<compile_context>
chip_gen: v7x
topology: tpu7x:2x2x1
jax: 0.10.0
libtpu: 0.0.40
codegen_flags: <defaults>
</compile_context>

<pallas_src>
import math

import jax
import jax.numpy as jnp
from jax.experimental import pallas as pl
from jax.experimental.pallas import tpu as pltpu

HIDDEN = 32                       # hidden_dim
NUM_HEADS = 8
HEAD_DIM = HIDDEN // NUM_HEADS    # 4
NUM_EXPERTS = 4
TOP_K = 2                         # kernel hard-codes the 2-step top-k below
SEQ = 8                           # sequence length per attention block
EPS = 1e-5                        # PyTorch LayerNorm default
MOE_COLS = NUM_EXPERTS * HIDDEN + NUM_EXPERTS   # 132 = experts + gate logits
NEG_INF = -1e30
TILE_SEQS = 16                    # 16 sequences * 8 rows = 128 rows per grid step


def moe_block_kernel(x_ref, wqk_ref, wvo_ref, wmoe_ref, mask_ref,
                     expand_ref, sum_ref, vec_ref, o_ref):
    H, hd = HIDDEN, HEAD_DIM
    x = x_ref[...].astype(jnp.float32)                        # (N, 32)
    N = x.shape[0]

    # ---------------- attention projections: two wide MXU matmuls ----------------
    qk = jnp.dot(x, wqk_ref[...], preferred_element_type=jnp.float32) \
        + vec_ref[1:2, 0:2 * H]                               # (N, 64): [q*scale | k]
    vo = jnp.dot(x, wvo_ref[...], preferred_element_type=jnp.float32)   # (N, 256)

    mask = mask_ref[...]                                      # (N, N) additive 0 / -1e30
    kT = qk[:, H:2 * H].T                                     # (32, N): one transpose

    # ---------------- per-head attention, accumulated into one (N,32) buffer ------
    attn = jnp.zeros((N, H), jnp.float32)
    for h in range(NUM_HEADS):
        qh = qk[:, h * hd:(h + 1) * hd]                       # (N, 4), scale pre-folded
        s = jnp.dot(qh, kT[h * hd:(h + 1) * hd, :],
                    preferred_element_type=jnp.float32) + mask            # (N, N)
        mrow = jnp.max(s, axis=-1, keepdims=True)
        p = jnp.exp(s - mrow)                                 # unnormalized probs
        l = jnp.sum(p, axis=-1, keepdims=True)
        ctx = jnp.dot(p, vo[:, h * H:(h + 1) * H],
                      preferred_element_type=jnp.float32)     # (N, 32), already @Wo
        attn = attn + ctx * pl.reciprocal(l)                  # deferred normalization
    attn = attn + vec_ref[2:3, 0:H]                           # out-proj bias + folded V bias

    # ---------------- residual + LayerNorm 1 ----------------
    y = x + attn
    mu = jnp.mean(y, axis=-1, keepdims=True)
    var = jnp.mean((y - mu) ** 2, axis=-1, keepdims=True)
    z = (y - mu) * jax.lax.rsqrt(var + EPS) * vec_ref[3:4, 0:H] + vec_ref[4:5, 0:H]

    # ---------------- MoE: experts + gate in one lane-dense matmul ----------------
    t = jnp.dot(z, wmoe_ref[...], preferred_element_type=jnp.float32) \
        + vec_ref[0:1, :]                                     # (N, 132)
    eh = NUM_EXPERTS * H
    expert_pre = t[:, 0:eh]                                   # (N, 128) all expert outs
    logits = t[:, eh:eh + NUM_EXPERTS]                        # (N, 4)   gate logits

    lm = jnp.max(logits, axis=-1, keepdims=True)
    le = jnp.exp(logits - lm)
    gates = le * pl.reciprocal(jnp.sum(le, axis=-1, keepdims=True))      # softmax

    # top-2 selection via masked arg-max twice (ties -> lower index, == torch.topk)
    e_iota = jax.lax.broadcasted_iota(jnp.int32, gates.shape, 1)
    m1 = jnp.max(gates, axis=-1, keepdims=True)
    idx1 = jnp.min(jnp.where(gates == m1, e_iota, NUM_EXPERTS), axis=-1, keepdims=True)
    oh1 = e_iota == idx1
    masked = jnp.where(oh1, -1.0, gates)
    m2 = jnp.max(masked, axis=-1, keepdims=True)
    idx2 = jnp.min(jnp.where(masked == m2, e_iota, NUM_EXPERTS), axis=-1, keepdims=True)
    oh2 = e_iota == idx2
    topk_gates = jnp.where(oh1 | oh2, gates, 0.0)             # (N, 4)

    # apply top-2 gates with precomputed mixing matmuls (no lane shuffles)
    gate_exp = jnp.dot(topk_gates, expand_ref[...],
                       preferred_element_type=jnp.float32)    # (N, 128)
    moe = jnp.dot(expert_pre * gate_exp, sum_ref[...],
                  preferred_element_type=jnp.float32)         # (N, 32)

    # ---------------- residual + LayerNorm 2 ----------------
    y2 = z + moe
    mu2 = jnp.mean(y2, axis=-1, keepdims=True)
    var2 = jnp.mean((y2 - mu2) ** 2, axis=-1, keepdims=True)
    out = (y2 - mu2) * jax.lax.rsqrt(var2 + EPS) * vec_ref[5:6, 0:H] + vec_ref[6:7, 0:H]

    o_ref[...] = out.astype(o_ref.dtype)


def moe_transformer_block(x, params, tile_seqs=TILE_SEQS):
    """x: (B, S, H) batch of independent sequences."""
    B, S, H = x.shape
    assert H == HIDDEN and S == SEQ
    # Pad B up to a multiple of tile_seqs (never fall back to tile_seqs=B: the
    # (N, N) score intermediates grow quadratically and would blow VMEM).
    n_pad = (-B) % tile_seqs
    if n_pad:
        x = jnp.concatenate([x, jnp.zeros((n_pad, S, H), x.dtype)], axis=0)
    b_pad = B + n_pad
    n_tile = tile_seqs * S                                    # 128 rows per grid step
    x2 = x.reshape(b_pad * S, H)

    # block-diagonal additive mask; identical for every grid step (constant index_map)
    rid = jnp.arange(n_tile, dtype=jnp.int32) // S
    mask = jnp.where(rid[:, None] == rid[None, :], 0.0, NEG_INF).astype(jnp.float32)

    out = pl.pallas_call(
        moe_block_kernel,
        out_shape=jax.ShapeDtypeStruct((b_pad * S, H), x.dtype),
        grid=(b_pad // tile_seqs,),
        in_specs=[
            pl.BlockSpec((n_tile, H), lambda i: (i, 0)),                        # x rows
            pl.BlockSpec((HIDDEN, 2 * HIDDEN), lambda i: (0, 0)),               # [Wq*scale | Wk]
            pl.BlockSpec((HIDDEN, NUM_HEADS * HIDDEN), lambda i: (0, 0)),       # lane-packed Wv@Wo
            pl.BlockSpec((HIDDEN, MOE_COLS), lambda i: (0, 0)),                 # experts | gate
            pl.BlockSpec((n_tile, n_tile), lambda i: (0, 0)),                   # additive seq mask
            pl.BlockSpec((NUM_EXPERTS, NUM_EXPERTS * HIDDEN), lambda i: (0, 0)),  # gate expand
            pl.BlockSpec((NUM_EXPERTS * HIDDEN, HIDDEN), lambda i: (0, 0)),     # chunk sum
            pl.BlockSpec((8, MOE_COLS), lambda i: (0, 0)),                      # packed vectors
        ],
        out_specs=pl.BlockSpec((n_tile, H), lambda i: (i, 0)),
        compiler_params=pltpu.CompilerParams(dimension_semantics=("parallel",)),
    )(x2, params["wqk"], params["wvo"], params["w_moe"], mask,
      params["expand_m"], params["sum_m"], params["vecs"])
    return out.reshape(b_pad, S, H)[:B]


# ----------------------------- parameters -----------------------------

def init_raw_params(key):
    """PyTorch-convention raw parameters."""
    H, E = HIDDEN, NUM_EXPERTS
    ks = jax.random.split(key, 12)

    def u(k, shape, fan_in):
        bound = 1.0 / math.sqrt(fan_in)
        return jax.random.uniform(k, shape, jnp.float32, -bound, bound)

    return {
        "in_proj_w": u(ks[0], (3 * H, H), H),
        "in_proj_b": u(ks[1], (3 * H,), H),
        "out_proj_w": u(ks[2], (H, H), H),
        "out_proj_b": u(ks[3], (H,), H),
        "gate_w": u(ks[4], (E, H), H),
        "gate_b": u(ks[5], (E,), H),
        "expert_w": u(ks[6], (E, H, H), H),
        "expert_b": u(ks[7], (E, H), H),
        "n1w": 1.0 + 0.1 * jax.random.normal(ks[8], (H,), jnp.float32),
        "n1b": 0.1 * jax.random.normal(ks[9], (H,), jnp.float32),
        "n2w": 1.0 + 0.1 * jax.random.normal(ks[10], (H,), jnp.float32),
        "n2b": 0.1 * jax.random.normal(ks[11], (H,), jnp.float32),
    }


def pack_params(raw):
    """Pre-pack weights into the kernel's fused layouts (glue, not hot path)."""
    H, E, hd = HIDDEN, NUM_EXPERTS, HEAD_DIM
    scale = 1.0 / math.sqrt(hd)

    wq_t = raw["in_proj_w"][0:H].T * scale         # fold attention scale into Q
    wk_t = raw["in_proj_w"][H:2 * H].T
    wv_t = raw["in_proj_w"][2 * H:3 * H].T
    bq = raw["in_proj_b"][0:H] * scale
    bk = raw["in_proj_b"][H:2 * H]
    bv = raw["in_proj_b"][2 * H:3 * H]
    wo_t = raw["out_proj_w"].T

    wqk = jnp.concatenate([wq_t, wk_t], axis=1)                         # (32, 64)
    bqk = jnp.concatenate([bq, bk])                                     # (64,)
    wvo = jnp.concatenate(
        [wv_t[:, h * hd:(h + 1) * hd] @ wo_t[h * hd:(h + 1) * hd, :]
         for h in range(NUM_HEADS)], axis=1)                            # (32, 256)
    # out-proj bias + (V bias folded through Wo): softmax rows sum to 1.
    b_attn = raw["out_proj_b"] + bv @ wo_t                              # (32,)

    # packed MoE RHS: [ W_0^T | W_1^T | W_2^T | W_3^T | Wg^T ] -> (32, 132)
    w_experts = jnp.concatenate([raw["expert_w"][e].T for e in range(E)], axis=1)
    w_moe = jnp.concatenate([w_experts, raw["gate_w"].T], axis=1)
    b_moe = jnp.concatenate([raw["expert_b"].reshape(-1), raw["gate_b"]])  # (132,)

    vecs = jnp.zeros((8, MOE_COLS), jnp.float32)
    vecs = vecs.at[0, :].set(b_moe)
    vecs = vecs.at[1, :2 * H].set(bqk)
    vecs = vecs.at[2, :H].set(b_attn)
    vecs = vecs.at[3, :H].set(raw["n1w"])
    vecs = vecs.at[4, :H].set(raw["n1b"])
    vecs = vecs.at[5, :H].set(raw["n2w"])
    vecs = vecs.at[6, :H].set(raw["n2b"])

    # constant MoE mixing matrices (gate expand + chunk sum), built host-side
    eh = E * H
    expand_m = (jnp.arange(E)[:, None] == (jnp.arange(eh)[None, :] // H)
                ).astype(jnp.float32)                                   # (4, 128)
    sum_m = ((jnp.arange(eh)[:, None] % H) == jnp.arange(H)[None, :]
             ).astype(jnp.float32)                                      # (128, 32)

    return {"wqk": wqk, "wvo": wvo, "w_moe": w_moe, "vecs": vecs,
            "expand_m": expand_m, "sum_m": sum_m}


# ----------------------------- pure-JAX reference -----------------------------

def _layernorm(y, w, b):
    mu = jnp.mean(y, axis=-1, keepdims=True)
    var = jnp.mean((y - mu) ** 2, axis=-1, keepdims=True)
    return (y - mu) * jax.lax.rsqrt(var + EPS) * w + b


def reference_one(x, raw):
    """Mirror of MoETransformerBlock.forward for one (S, H) sequence."""
    H, hd = HIDDEN, HEAD_DIM
    qkv = x @ raw["in_proj_w"].T + raw["in_proj_b"]
    q, k, v = qkv[:, :H], qkv[:, H:2 * H], qkv[:, 2 * H:]
    heads = []
    for h in range(NUM_HEADS):
        sl = slice(h * hd, (h + 1) * hd)
        s = (q[:, sl] @ k[:, sl].T) / math.sqrt(hd)
        heads.append(jax.nn.softmax(s, axis=-1) @ v[:, sl])
    attn = jnp.concatenate(heads, axis=-1) @ raw["out_proj_w"].T + raw["out_proj_b"]
    z = _layernorm(x + attn, raw["n1w"], raw["n1b"])

    gates = jax.nn.softmax(z @ raw["gate_w"].T + raw["gate_b"], axis=-1)
    topv, topi = jax.lax.top_k(gates, TOP_K)                 # == torch.topk
    moe = jnp.zeros_like(z)
    for e in range(NUM_EXPERTS):
        ye = z @ raw["expert_w"][e].T + raw["expert_b"][e]
        ge = jnp.sum(jnp.where(topi == e, topv, 0.0), axis=-1, keepdims=True)
        moe = moe + ge * ye
    return _layernorm(z + moe, raw["n2w"], raw["n2b"])


if __name__ == "__main__":
    key = jax.random.PRNGKey(0)
    kx, kp = jax.random.split(key)
    B = 32                                            # 32 independent sequences
    x = jax.random.normal(kx, (B, SEQ, HIDDEN), jnp.float32)
    raw = init_raw_params(kp)
    params = pack_params(raw)

    out = jax.block_until_ready(moe_transformer_block(x, params))
    ref = jax.vmap(lambda xi: reference_one(xi, raw))(x)

    assert out.shape == (B, SEQ, HIDDEN)
    if not bool(jnp.allclose(out, ref, atol=1e-4, rtol=1e-4)):
        err = float(jnp.max(jnp.abs(out - ref)))
        raise AssertionError(f"Pallas kernel output mismatch vs JAX reference (max err {err})")
    print("KERNEL_OK")
</pallas_src>

<mosaic_0001>
module attributes {stable_mosaic.version = 11 : i64} {
  func.func @moe_block_kernel(%arg0: i32, %arg1: memref<128x32xf32, #tpu.memory_space<vmem>>, %arg2: memref<32x64xf32, #tpu.memory_space<vmem>>, %arg3: memref<32x256xf32, #tpu.memory_space<vmem>>, %arg4: memref<32x132xf32, #tpu.memory_space<vmem>>, %arg5: memref<128x128xf32, #tpu.memory_space<vmem>>, %arg6: memref<4x128xf32, #tpu.memory_space<vmem>>, %arg7: memref<128x32xf32, #tpu.memory_space<vmem>>, %arg8: memref<8x132xf32, #tpu.memory_space<vmem>>, %arg9: memref<128x32xf32, #tpu.memory_space<vmem>>) attributes {dimension_semantics = [#tpu.dimension_semantics<parallel>], iteration_bounds = array<i64: 2>, scalar_prefetch = 0 : i64, scratch_operands = 0 : i64, tpu.core_type = #tpu.core_type<tc>, window_params = [{transform_indices = @transform_0, window_bounds = array<i64: 128, 32>}, {pipeline_mode = #tpu.pipeline_mode<synchronous>, transform_indices = @transform_1, window_bounds = array<i64: 32, 64>}, {pipeline_mode = #tpu.pipeline_mode<synchronous>, transform_indices = @transform_2, window_bounds = array<i64: 32, 256>}, {pipeline_mode = #tpu.pipeline_mode<synchronous>, transform_indices = @transform_3, window_bounds = array<i64: 32, 132>}, {pipeline_mode = #tpu.pipeline_mode<synchronous>, transform_indices = @transform_4, window_bounds = array<i64: 128, 128>}, {pipeline_mode = #tpu.pipeline_mode<synchronous>, transform_indices = @transform_5, window_bounds = array<i64: 4, 128>}, {pipeline_mode = #tpu.pipeline_mode<synchronous>, transform_indices = @transform_6, window_bounds = array<i64: 128, 32>}, {pipeline_mode = #tpu.pipeline_mode<synchronous>, transform_indices = @transform_7, window_bounds = array<i64: 8, 132>}, {transform_indices = @transform_8, window_bounds = array<i64: 128, 32>}]} {
    %c0 = arith.constant 0 : index
    %c0_0 = arith.constant 0 : index
    %0 = vector.load %arg1[%c0, %c0_0] : memref<128x32xf32, #tpu.memory_space<vmem>>, vector<128x32xf32>
    %c0_1 = arith.constant 0 : index
    %c0_2 = arith.constant 0 : index
    %1 = vector.load %arg2[%c0_1, %c0_2] : memref<32x64xf32, #tpu.memory_space<vmem>>, vector<32x64xf32>
    %cst = arith.constant dense<0.000000e+00> : vector<128x64xf32>
    %2 = tpu.matmul %0, %1, %cst {dimension_numbers = #tpu.dot_dimension_numbers<[1], [0], [0], [1], [0, 0, 1, 1], [], []>} : vector<128x32xf32>, vector<32x64xf32>, vector<128x64xf32> -> vector<128x64xf32>
    %c1 = arith.constant 1 : index
    %c0_3 = arith.constant 0 : index
    %3 = vector.load %arg8[%c1, %c0_3] : memref<8x132xf32, #tpu.memory_space<vmem>>, vector<1x64xf32>
    %4 = vector.broadcast %3 : vector<1x64xf32> to vector<128x64xf32>
    %5 = arith.addf %2, %4 : vector<128x64xf32>
    %c0_4 = arith.constant 0 : index
    %c0_5 = arith.constant 0 : index
    %6 = vector.load %arg3[%c0_4, %c0_5] : memref<32x256xf32, #tpu.memory_space<vmem>>, vector<32x256xf32>
    %cst_6 = arith.constant dense<0.000000e+00> : vector<128x256xf32>
    %7 = tpu.matmul %0, %6, %cst_6 {dimension_numbers = #tpu.dot_dimension_numbers<[1], [0], [0], [1], [0, 0, 1, 1], [], []>} : vector<128x32xf32>, vector<32x256xf32>, vector<128x256xf32> -> vector<128x256xf32>
    %c0_7 = arith.constant 0 : index
    %c0_8 = arith.constant 0 : index
    %8 = vector.load %arg5[%c0_7, %c0_8] : memref<128x128xf32, #tpu.memory_space<vmem>>, vector<128x128xf32>
    %9 = vector.extract_strided_slice %5 {offsets = [0, 32], sizes = [128, 32], strides = [1, 1]} : vector<128x64xf32> to vector<128x32xf32>
    %10 = tpu.transpose %9, [1, 0] : vector<128x32xf32> -> vector<32x128xf32>
    %cst_9 = arith.constant 0.000000e+00 : f32
    %11 = vector.broadcast %cst_9 : f32 to vector<128x32xf32>
    %12 = vector.extract_strided_slice %5 {offsets = [0, 0], sizes = [128, 4], strides = [1, 1]} : vector<128x64xf32> to vector<128x4xf32>
    %13 = vector.extract_strided_slice %10 {offsets = [0, 0], sizes = [4, 128], strides = [1, 1]} : vector<32x128xf32> to vector<4x128xf32>
    %cst_10 = arith.constant dense<0.000000e+00> : vector<128x128xf32>
    %14 = tpu.matmul %12, %13, %cst_10 {dimension_numbers = #tpu.dot_dimension_numbers<[1], [0], [0], [1], [0, 0, 1, 1], [], []>} : vector<128x4xf32>, vector<4x128xf32>, vector<128x128xf32> -> vector<128x128xf32>
    %15 = arith.addf %14, %8 : vector<128x128xf32>
    %cst_11 = arith.constant dense<0xFF800000> : vector<128xf32>
    %16 = vector.multi_reduction <maximumf>, %15, %cst_11 [1] : vector<128x128xf32> to vector<128xf32>
    %17 = vector.shape_cast %16 : vector<128xf32> to vector<128x1xf32>
    %18 = vector.broadcast %17 : vector<128x1xf32> to vector<128x128xf32>
    %19 = arith.subf %15, %18 : vector<128x128xf32>
    %20 = math.exp %19 : vector<128x128xf32>
    %cst_12 = arith.constant dense<0.000000e+00> : vector<128xf32>
    %21 = vector.multi_reduction <add>, %20, %cst_12 [1] : vector<128x128xf32> to vector<128xf32>
    %22 = vector.shape_cast %21 : vector<128xf32> to vector<128x1xf32>
    %23 = vector.extract_strided_slice %7 {offsets = [0, 0], sizes = [128, 32], strides = [1, 1]} : vector<128x256xf32> to vector<128x32xf32>
    %cst_13 = arith.constant dense<0.000000e+00> : vector<128x32xf32>
    %24 = tpu.matmul %20, %23, %cst_13 {dimension_numbers = #tpu.dot_dimension_numbers<[1], [0], [0], [1], [0, 0, 1, 1], [], []>} : vector<128x128xf32>, vector<128x32xf32>, vector<128x32xf32> -> vector<128x32xf32>
    %25 = tpu.reciprocal %22 : vector<128x1xf32> -> vector<128x1xf32>
    %26 = vector.broadcast %25 : vector<128x1xf32> to vector<128x32xf32>
    %27 = arith.mulf %24, %26 : vector<128x32xf32>
    %28 = arith.addf %11, %27 : vector<128x32xf32>
    %29 = vector.extract_strided_slice %5 {offsets = [0, 4], sizes = [128, 4], strides = [1, 1]} : vector<128x64xf32> to vector<128x4xf32>
    %30 = vector.extract_strided_slice %10 {offsets = [4, 0], sizes = [4, 128], strides = [1, 1]} : vector<32x128xf32> to vector<4x128xf32>
    %cst_14 = arith.constant dense<0.000000e+00> : vector<128x128xf32>
    %31 = tpu.matmul %29, %30, %cst_14 {dimension_numbers = #tpu.dot_dimension_numbers<[1], [0], [0], [1], [0, 0, 1, 1], [], []>} : vector<128x4xf32>, vector<4x128xf32>, vector<128x128xf32> -> vector<128x128xf32>
    %32 = arith.addf %31, %8 : vector<128x128xf32>
    %cst_15 = arith.constant dense<0xFF800000> : vector<128xf32>
    %33 = vector.multi_reduction <maximumf>, %32, %cst_15 [1] : vector<128x128xf32> to vector<128xf32>
    %34 = vector.shape_cast %33 : vector<128xf32> to vector<128x1xf32>
    %35 = vector.broadcast %34 : vector<128x1xf32> to vector<128x128xf32>
    %36 = arith.subf %32, %35 : vector<128x128xf32>
    %37 = math.exp %36 : vector<128x128xf32>
    %cst_16 = arith.constant dense<0.000000e+00> : vector<128xf32>
    %38 = vector.multi_reduction <add>, %37, %cst_16 [1] : vector<128x128xf32> to vector<128xf32>
    %39 = vector.shape_cast %38 : vector<128xf32> to vector<128x1xf32>
    %40 = vector.extract_strided_slice %7 {offsets = [0, 32], sizes = [128, 32], strides = [1, 1]} : vector<128x256xf32> to vector<128x32xf32>
    %cst_17 = arith.constant dense<0.000000e+00> : vector<128x32xf32>
    %41 = tpu.matmul %37, %40, %cst_17 {dimension_numbers = #tpu.dot_dimension_numbers<[1], [0], [0], [1], [0, 0, 1, 1], [], []>} : vector<128x128xf32>, vector<128x32xf32>, vector<128x32xf32> -> vector<128x32xf32>
    %42 = tpu.reciprocal %39 : vector<128x1xf32> -> vector<128x1xf32>
    %43 = vector.broadcast %42 : vector<128x1xf32> to vector<128x32xf32>
    %44 = arith.mulf %41, %43 : vector<128x32xf32>
    %45 = arith.addf %28, %44 : vector<128x32xf32>
    %46 = vector.extract_strided_slice %5 {offsets = [0, 8], sizes = [128, 4], strides = [1, 1]} : vector<128x64xf32> to vector<128x4xf32>
    %47 = vector.extract_strided_slice %10 {offsets = [8, 0], sizes = [4, 128], strides = [1, 1]} : vector<32x128xf32> to vector<4x128xf32>
    %cst_18 = arith.constant dense<0.000000e+00> : vector<128x128xf32>
    %48 = tpu.matmul %46, %47, %cst_18 {dimension_numbers = #tpu.dot_dimension_numbers<[1], [0], [0], [1], [0, 0, 1, 1], [], []>} : vector<128x4xf32>, vector<4x128xf32>, vector<128x128xf32> -> vector<128x128xf32>
    %49 = arith.addf %48, %8 : vector<128x128xf32>
    %cst_19 = arith.constant dense<0xFF800000> : vector<128xf32>
    %50 = vector.multi_reduction <maximumf>, %49, %cst_19 [1] : vector<128x128xf32> to vector<128xf32>
    %51 = vector.shape_cast %50 : vector<128xf32> to vector<128x1xf32>
    %52 = vector.broadcast %51 : vector<128x1xf32> to vector<128x128xf32>
    %53 = arith.subf %49, %52 : vector<128x128xf32>
    %54 = math.exp %53 : vector<128x128xf32>
    %cst_20 = arith.constant dense<0.000000e+00> : vector<128xf32>
    %55 = vector.multi_reduction <add>, %54, %cst_20 [1] : vector<128x128xf32> to vector<128xf32>
    %56 = vector.shape_cast %55 : vector<128xf32> to vector<128x1xf32>
    %57 = vector.extract_strided_slice %7 {offsets = [0, 64], sizes = [128, 32], strides = [1, 1]} : vector<128x256xf32> to vector<128x32xf32>
    %cst_21 = arith.constant dense<0.000000e+00> : vector<128x32xf32>
    %58 = tpu.matmul %54, %57, %cst_21 {dimension_numbers = #tpu.dot_dimension_numbers<[1], [0], [0], [1], [0, 0, 1, 1], [], []>} : vector<128x128xf32>, vector<128x32xf32>, vector<128x32xf32> -> vector<128x32xf32>
    %59 = tpu.reciprocal %56 : vector<128x1xf32> -> vector<128x1xf32>
    %60 = vector.broadcast %59 : vector<128x1xf32> to vector<128x32xf32>
    %61 = arith.mulf %58, %60 : vector<128x32xf32>
    %62 = arith.addf %45, %61 : vector<128x32xf32>
    %63 = vector.extract_strided_slice %5 {offsets = [0, 12], sizes = [128, 4], strides = [1, 1]} : vector<128x64xf32> to vector<128x4xf32>
    %64 = vector.extract_strided_slice %10 {offsets = [12, 0], sizes = [4, 128], strides = [1, 1]} : vector<32x128xf32> to vector<4x128xf32>
    %cst_22 = arith.constant dense<0.000000e+00> : vector<128x128xf32>
    %65 = tpu.matmul %63, %64, %cst_22 {dimension_numbers = #tpu.dot_dimension_numbers<[1], [0], [0], [1], [0, 0, 1, 1], [], []>} : vector<128x4xf32>, vector<4x128xf32>, vector<128x128xf32> -> vector<128x128xf32>
    %66 = arith.addf %65, %8 : vector<128x128xf32>
    %cst_23 = arith.constant dense<0xFF800000> : vector<128xf32>
    %67 = vector.multi_reduction <maximumf>, %66, %cst_23 [1] : vector<128x128xf32> to vector<128xf32>
    %68 = vector.shape_cast %67 : vector<128xf32> to vector<128x1xf32>
    %69 = vector.broadcast %68 : vector<128x1xf32> to vector<128x128xf32>
    %70 = arith.subf %66, %69 : vector<128x128xf32>
    %71 = math.exp %70 : vector<128x128xf32>
    %cst_24 = arith.constant dense<0.000000e+00> : vector<128xf32>
    %72 = vector.multi_reduction <add>, %71, %cst_24 [1] : vector<128x128xf32> to vector<128xf32>
    %73 = vector.shape_cast %72 : vector<128xf32> to vector<128x1xf32>
    %74 = vector.extract_strided_slice %7 {offsets = [0, 96], sizes = [128, 32], strides = [1, 1]} : vector<128x256xf32> to vector<128x32xf32>
    %cst_25 = arith.constant dense<0.000000e+00> : vector<128x32xf32>
    %75 = tpu.matmul %71, %74, %cst_25 {dimension_numbers = #tpu.dot_dimension_numbers<[1], [0], [0], [1], [0, 0, 1, 1], [], []>} : vector<128x128xf32>, vector<128x32xf32>, vector<128x32xf32> -> vector<128x32xf32>
    %76 = tpu.reciprocal %73 : vector<128x1xf32> -> vector<128x1xf32>
    %77 = vector.broadcast %76 : vector<128x1xf32> to vector<128x32xf32>
    %78 = arith.mulf %75, %77 : vector<128x32xf32>
    %79 = arith.addf %62, %78 : vector<128x32xf32>
    %80 = vector.extract_strided_slice %5 {offsets = [0, 16], sizes = [128, 4], strides = [1, 1]} : vector<128x64xf32> to vector<128x4xf32>
    %81 = vector.extract_strided_slice %10 {offsets = [16, 0], sizes = [4, 128], strides = [1, 1]} : vector<32x128xf32> to vector<4x128xf32>
    %cst_26 = arith.constant dense<0.000000e+00> : vector<128x128xf32>
    %82 = tpu.matmul %80, %81, %cst_26 {dimension_numbers = #tpu.dot_dimension_numbers<[1], [0], [0], [1], [0, 0, 1, 1], [], []>} : vector<128x4xf32>, vector<4x128xf32>, vector<128x128xf32> -> vector<128x128xf32>
    %83 = arith.addf %82, %8 : vector<128x128xf32>
    %cst_27 = arith.constant dense<0xFF800000> : vector<128xf32>
    %84 = vector.multi_reduction <maximumf>, %83, %cst_27 [1] : vector<128x128xf32> to vector<128xf32>
    %85 = vector.shape_cast %84 : vector<128xf32> to vector<128x1xf32>
    %86 = vector.broadcast %85 : vector<128x1xf32> to vector<128x128xf32>
    %87 = arith.subf %83, %86 : vector<128x128xf32>
    %88 = math.exp %87 : vector<128x128xf32>
    %cst_28 = arith.constant dense<0.000000e+00> : vector<128xf32>
    %89 = vector.multi_reduction <add>, %88, %cst_28 [1] : vector<128x128xf32> to vector<128xf32>
    %90 = vector.shape_cast %89 : vector<128xf32> to vector<128x1xf32>
    %91 = vector.extract_strided_slice %7 {offsets = [0, 128], sizes = [128, 32], strides = [1, 1]} : vector<128x256xf32> to vector<128x32xf32>
    %cst_29 = arith.constant dense<0.000000e+00> : vector<128x32xf32>
    %92 = tpu.matmul %88, %91, %cst_29 {dimension_numbers = #tpu.dot_dimension_numbers<[1], [0], [0], [1], [0, 0, 1, 1], [], []>} : vector<128x128xf32>, vector<128x32xf32>, vector<128x32xf32> -> vector<128x32xf32>
    %93 = tpu.reciprocal %90 : vector<128x1xf32> -> vector<128x1xf32>
    %94 = vector.broadcast %93 : vector<128x1xf32> to vector<128x32xf32>
    %95 = arith.mulf %92, %94 : vector<128x32xf32>
    %96 = arith.addf %79, %95 : vector<128x32xf32>
    %97 = vector.extract_strided_slice %5 {offsets = [0, 20], sizes = [128, 4], strides = [1, 1]} : vector<128x64xf32> to vector<128x4xf32>
    %98 = vector.extract_strided_slice %10 {offsets = [20, 0], sizes = [4, 128], strides = [1, 1]} : vector<32x128xf32> to vector<4x128xf32>
    %cst_30 = arith.constant dense<0.000000e+00> : vector<128x128xf32>
    %99 = tpu.matmul %97, %98, %cst_30 {dimension_numbers = #tpu.dot_dimension_numbers<[1], [0], [0], [1], [0, 0, 1, 1], [], []>} : vector<128x4xf32>, vector<4x128xf32>, vector<128x128xf32> -> vector<128x128xf32>
    %100 = arith.addf %99, %8 : vector<128x128xf32>
    %cst_31 = arith.constant dense<0xFF800000> : vector<128xf32>
    %101 = vector.multi_reduction <maximumf>, %100, %cst_31 [1] : vector<128x128xf32> to vector<128xf32>
    %102 = vector.shape_cast %101 : vector<128xf32> to vector<128x1xf32>
    %103 = vector.broadcast %102 : vector<128x1xf32> to vector<128x128xf32>
    %104 = arith.subf %100, %103 : vector<128x128xf32>
    %105 = math.exp %104 : vector<128x128xf32>
    %cst_32 = arith.constant dense<0.000000e+00> : vector<128xf32>
    %106 = vector.multi_reduction <add>, %105, %cst_32 [1] : vector<128x128xf32> to vector<128xf32>
    %107 = vector.shape_cast %106 : vector<128xf32> to vector<128x1xf32>
    %108 = vector.extract_strided_slice %7 {offsets = [0, 160], sizes = [128, 32], strides = [1, 1]} : vector<128x256xf32> to vector<128x32xf32>
    %cst_33 = arith.constant dense<0.000000e+00> : vector<128x32xf32>
    %109 = tpu.matmul %105, %108, %cst_33 {dimension_numbers = #tpu.dot_dimension_numbers<[1], [0], [0], [1], [0, 0, 1, 1], [], []>} : vector<128x128xf32>, vector<128x32xf32>, vector<128x32xf32> -> vector<128x32xf32>
    %110 = tpu.reciprocal %107 : vector<128x1xf32> -> vector<128x1xf32>
    %111 = vector.broadcast %110 : vector<128x1xf32> to vector<128x32xf32>
    %112 = arith.mulf %109, %111 : vector<128x32xf32>
    %113 = arith.addf %96, %112 : vector<128x32xf32>
    %114 = vector.extract_strided_slice %5 {offsets = [0, 24], sizes = [128, 4], strides = [1, 1]} : vector<128x64xf32> to vector<128x4xf32>
    %115 = vector.extract_strided_slice %10 {offsets = [24, 0], sizes = [4, 128], strides = [1, 1]} : vector<32x128xf32> to vector<4x128xf32>
    %cst_34 = arith.constant dense<0.000000e+00> : vector<128x128xf32>
    %116 = tpu.matmul %114, %115, %cst_34 {dimension_numbers = #tpu.dot_dimension_numbers<[1], [0], [0], [1], [0, 0, 1, 1], [], []>} : vector<128x4xf32>, vector<4x128xf32>, vector<128x128xf32> -> vector<128x128xf32>
    %117 = arith.addf %116, %8 : vector<128x128xf32>
    %cst_35 = arith.constant dense<0xFF800000> : vector<128xf32>
    %118 = vector.multi_reduction <maximumf>, %117, %cst_35 [1] : vector<128x128xf32> to vector<128xf32>
    %119 = vector.shape_cast %118 : vector<128xf32> to vector<128x1xf32>
    %120 = vector.broadcast %119 : vector<128x1xf32> to vector<128x128xf32>
    %121 = arith.subf %117, %120 : vector<128x128xf32>
    %122 = math.exp %121 : vector<128x128xf32>
    %cst_36 = arith.constant dense<0.000000e+00> : vector<128xf32>
    %123 = vector.multi_reduction <add>, %122, %cst_36 [1] : vector<128x128xf32> to vector<128xf32>
    %124 = vector.shape_cast %123 : vector<128xf32> to vector<128x1xf32>
    %125 = vector.extract_strided_slice %7 {offsets = [0, 192], sizes = [128, 32], strides = [1, 1]} : vector<128x256xf32> to vector<128x32xf32>
    %cst_37 = arith.constant dense<0.000000e+00> : vector<128x32xf32>
    %126 = tpu.matmul %122, %125, %cst_37 {dimension_numbers = #tpu.dot_dimension_numbers<[1], [0], [0], [1], [0, 0, 1, 1], [], []>} : vector<128x128xf32>, vector<128x32xf32>, vector<128x32xf32> -> vector<128x32xf32>
    %127 = tpu.reciprocal %124 : vector<128x1xf32> -> vector<128x1xf32>
    %128 = vector.broadcast %127 : vector<128x1xf32> to vector<128x32xf32>
    %129 = arith.mulf %126, %128 : vector<128x32xf32>
    %130 = arith.addf %113, %129 : vector<128x32xf32>
    %131 = vector.extract_strided_slice %5 {offsets = [0, 28], sizes = [128, 4], strides = [1, 1]} : vector<128x64xf32> to vector<128x4xf32>
    %132 = vector.extract_strided_slice %10 {offsets = [28, 0], sizes = [4, 128], strides = [1, 1]} : vector<32x128xf32> to vector<4x128xf32>
    %cst_38 = arith.constant dense<0.000000e+00> : vector<128x128xf32>
    %133 = tpu.matmul %131, %132, %cst_38 {dimension_numbers = #tpu.dot_dimension_numbers<[1], [0], [0], [1], [0, 0, 1, 1], [], []>} : vector<128x4xf32>, vector<4x128xf32>, vector<128x128xf32> -> vector<128x128xf32>
    %134 = arith.addf %133, %8 : vector<128x128xf32>
    %cst_39 = arith.constant dense<0xFF800000> : vector<128xf32>
    %135 = vector.multi_reduction <maximumf>, %134, %cst_39 [1] : vector<128x128xf32> to vector<128xf32>
    %136 = vector.shape_cast %135 : vector<128xf32> to vector<128x1xf32>
    %137 = vector.broadcast %136 : vector<128x1xf32> to vector<128x128xf32>
    %138 = arith.subf %134, %137 : vector<128x128xf32>
    %139 = math.exp %138 : vector<128x128xf32>
    %cst_40 = arith.constant dense<0.000000e+00> : vector<128xf32>
    %140 = vector.multi_reduction <add>, %139, %cst_40 [1] : vector<128x128xf32> to vector<128xf32>
    %141 = vector.shape_cast %140 : vector<128xf32> to vector<128x1xf32>
    %142 = vector.extract_strided_slice %7 {offsets = [0, 224], sizes = [128, 32], strides = [1, 1]} : vector<128x256xf32> to vector<128x32xf32>
    %cst_41 = arith.constant dense<0.000000e+00> : vector<128x32xf32>
    %143 = tpu.matmul %139, %142, %cst_41 {dimension_numbers = #tpu.dot_dimension_numbers<[1], [0], [0], [1], [0, 0, 1, 1], [], []>} : vector<128x128xf32>, vector<128x32xf32>, vector<128x32xf32> -> vector<128x32xf32>
    %144 = tpu.reciprocal %141 : vector<128x1xf32> -> vector<128x1xf32>
    %145 = vector.broadcast %144 : vector<128x1xf32> to vector<128x32xf32>
    %146 = arith.mulf %143, %145 : vector<128x32xf32>
    %147 = arith.addf %130, %146 : vector<128x32xf32>
    %c2 = arith.constant 2 : index
    %c0_42 = arith.constant 0 : index
    %148 = vector.load %arg8[%c2, %c0_42] : memref<8x132xf32, #tpu.memory_space<vmem>>, vector<1x32xf32>
    %149 = vector.broadcast %148 : vector<1x32xf32> to vector<128x32xf32>
    %150 = arith.addf %147, %149 : vector<128x32xf32>
    %151 = arith.addf %0, %150 : vector<128x32xf32>
    %cst_43 = arith.constant dense<0.000000e+00> : vector<128xf32>
    %152 = vector.multi_reduction <add>, %151, %cst_43 [1] : vector<128x32xf32> to vector<128xf32>
    %153 = vector.shape_cast %152 : vector<128xf32> to vector<128x1xf32>
    %cst_44 = arith.constant 3.200000e+01 : f32
    %154 = vector.broadcast %cst_44 : f32 to vector<128x1xf32>
    %155 = arith.divf %153, %154 : vector<128x1xf32>
    %156 = vector.broadcast %155 : vector<128x1xf32> to vector<128x32xf32>
    %157 = arith.subf %151, %156 : vector<128x32xf32>
    %158 = arith.mulf %157, %157 : vector<128x32xf32>
    %cst_45 = arith.constant dense<0.000000e+00> : vector<128xf32>
    %159 = vector.multi_reduction <add>, %158, %cst_45 [1] : vector<128x32xf32> to vector<128xf32>
    %160 = vector.shape_cast %159 : vector<128xf32> to vector<128x1xf32>
    %cst_46 = arith.constant 3.200000e+01 : f32
    %161 = vector.broadcast %cst_46 : f32 to vector<128x1xf32>
    %162 = arith.divf %160, %161 : vector<128x1xf32>
    %163 = vector.broadcast %155 : vector<128x1xf32> to vector<128x32xf32>
    %164 = arith.subf %151, %163 : vector<128x32xf32>
    %cst_47 = arith.constant 9.99999974E-6 : f32
    %165 = vector.broadcast %cst_47 : f32 to vector<128x1xf32>
    %166 = arith.addf %162, %165 : vector<128x1xf32>
    %167 = math.rsqrt %166 : vector<128x1xf32>
    %168 = vector.broadcast %167 : vector<128x1xf32> to vector<128x32xf32>
    %169 = arith.mulf %164, %168 : vector<128x32xf32>
    %c3 = arith.constant 3 : index
    %c0_48 = arith.constant 0 : index
    %170 = vector.load %arg8[%c3, %c0_48] : memref<8x132xf32, #tpu.memory_space<vmem>>, vector<1x32xf32>
    %171 = vector.broadcast %170 : vector<1x32xf32> to vector<128x32xf32>
    %172 = arith.mulf %169, %171 : vector<128x32xf32>
    %c4 = arith.constant 4 : index
    %c0_49 = arith.constant 0 : index
    %173 = vector.load %arg8[%c4, %c0_49] : memref<8x132xf32, #tpu.memory_space<vmem>>, vector<1x32xf32>
    %174 = vector.broadcast %173 : vector<1x32xf32> to vector<128x32xf32>
    %175 = arith.addf %172, %174 : vector<128x32xf32>
    %c0_50 = arith.constant 0 : index
    %c0_51 = arith.constant 0 : index
    %176 = vector.load %arg4[%c0_50, %c0_51] : memref<32x132xf32, #tpu.memory_space<vmem>>, vector<32x132xf32>
    %cst_52 = arith.constant dense<0.000000e+00> : vector<128x132xf32>
    %177 = tpu.matmul %175, %176, %cst_52 {dimension_numbers = #tpu.dot_dimension_numbers<[1], [0], [0], [1], [0, 0, 1, 1], [], []>} : vector<128x32xf32>, vector<32x132xf32>, vector<128x132xf32> -> vector<128x132xf32>
    %c0_53 = arith.constant 0 : index
    %c0_54 = arith.constant 0 : index
    %178 = vector.load %arg8[%c0_53, %c0_54] : memref<8x132xf32, #tpu.memory_space<vmem>>, vector<1x132xf32>
    %179 = vector.broadcast %178 : vector<1x132xf32> to vector<128x132xf32>
    %180 = arith.addf %177, %179 : vector<128x132xf32>
    %181 = vector.extract_strided_slice %180 {offsets = [0, 0], sizes = [128, 128], strides = [1, 1]} : vector<128x132xf32> to vector<128x128xf32>
    %182 = vector.extract_strided_slice %180 {offsets = [0, 128], sizes = [128, 4], strides = [1, 1]} : vector<128x132xf32> to vector<128x4xf32>
    %cst_55 = arith.constant dense<0xFF800000> : vector<128xf32>
    %183 = vector.multi_reduction <maximumf>, %182, %cst_55 [1] : vector<128x4xf32> to vector<128xf32>
    %184 = vector.shape_cast %183 : vector<128xf32> to vector<128x1xf32>
    %185 = vector.broadcast %184 : vector<128x1xf32> to vector<128x4xf32>
    %186 = arith.subf %182, %185 : vector<128x4xf32>
    %187 = math.exp %186 : vector<128x4xf32>
    %cst_56 = arith.constant dense<0.000000e+00> : vector<128xf32>
    %188 = vector.multi_reduction <add>, %187, %cst_56 [1] : vector<128x4xf32> to vector<128xf32>
    %189 = vector.shape_cast %188 : vector<128xf32> to vector<128x1xf32>
    %190 = tpu.reciprocal %189 : vector<128x1xf32> -> vector<128x1xf32>
    %191 = vector.broadcast %190 : vector<128x1xf32> to vector<128x4xf32>
    %192 = arith.mulf %187, %191 : vector<128x4xf32>
    %193 = tpu.iota {dimensions = array<i32: 1>} : vector<128x4xi32>
    %cst_57 = arith.constant dense<0xFF800000> : vector<128xf32>
    %194 = vector.multi_reduction <maximumf>, %192, %cst_57 [1] : vector<128x4xf32> to vector<128xf32>
    %195 = vector.shape_cast %194 : vector<128xf32> to vector<128x1xf32>
    %196 = vector.broadcast %195 : vector<128x1xf32> to vector<128x4xf32>
    %197 = arith.cmpf oeq, %192, %196 : vector<128x4xf32>
    %c4_i32 = arith.constant 4 : i32
    %198 = vector.broadcast %c4_i32 : i32 to vector<128x4xi32>
    %199 = arith.select %197, %193, %198 : vector<128x4xi1>, vector<128x4xi32>
    %cst_58 = arith.constant dense<2147483647> : vector<128xi32>
    %200 = vector.multi_reduction <minsi>, %199, %cst_58 [1] : vector<128x4xi32> to vector<128xi32>
    %201 = vector.shape_cast %200 : vector<128xi32> to vector<128x1xi32>
    %202 = vector.broadcast %201 : vector<128x1xi32> to vector<128x4xi32>
    %203 = arith.cmpi eq, %193, %202 : vector<128x4xi32>
    %cst_59 = arith.constant -1.000000e+00 : f32
    %204 = vector.broadcast %cst_59 : f32 to vector<128x4xf32>
    %205 = arith.select %203, %204, %192 : vector<128x4xi1>, vector<128x4xf32>
    %cst_60 = arith.constant dense<0xFF800000> : vector<128xf32>
    %206 = vector.multi_reduction <maximumf>, %205, %cst_60 [1] : vector<128x4xf32> to vector<128xf32>
    %207 = vector.shape_cast %206 : vector<128xf32> to vector<128x1xf32>
    %208 = vector.broadcast %207 : vector<128x1xf32> to vector<128x4xf32>
    %209 = arith.cmpf oeq, %205, %208 : vector<128x4xf32>
    %c4_i32_61 = arith.constant 4 : i32
    %210 = vector.broadcast %c4_i32_61 : i32 to vector<128x4xi32>
    %211 = arith.select %209, %193, %210 : vector<128x4xi1>, vector<128x4xi32>
    %cst_62 = arith.constant dense<2147483647> : vector<128xi32>
    %212 = vector.multi_reduction <minsi>, %211, %cst_62 [1] : vector<128x4xi32> to vector<128xi32>
    %213 = vector.shape_cast %212 : vector<128xi32> to vector<128x1xi32>
    %214 = vector.broadcast %213 : vector<128x1xi32> to vector<128x4xi32>
    %215 = arith.cmpi eq, %193, %214 : vector<128x4xi32>
    %216 = arith.ori %203, %215 : vector<128x4xi1>
    %cst_63 = arith.constant 0.000000e+00 : f32
    %217 = vector.broadcast %cst_63 : f32 to vector<128x4xf32>
    %218 = arith.select %216, %192, %217 : vector<128x4xi1>, vector<128x4xf32>
    %c0_64 = arith.constant 0 : index
    %c0_65 = arith.constant 0 : index
    %219 = vector.load %arg6[%c0_64, %c0_65] : memref<4x128xf32, #tpu.memory_space<vmem>>, vector<4x128xf32>
    %cst_66 = arith.constant dense<0.000000e+00> : vector<128x128xf32>
    %220 = tpu.matmul %218, %219, %cst_66 {dimension_numbers = #tpu.dot_dimension_numbers<[1], [0], [0], [1], [0, 0, 1, 1], [], []>} : vector<128x4xf32>, vector<4x128xf32>, vector<128x128xf32> -> vector<128x128xf32>
    %221 = arith.mulf %181, %220 : vector<128x128xf32>
    %c0_67 = arith.constant 0 : index
    %c0_68 = arith.constant 0 : index
    %222 = vector.load %arg7[%c0_67, %c0_68] : memref<128x32xf32, #tpu.memory_space<vmem>>, vector<128x32xf32>
    %cst_69 = arith.constant dense<0.000000e+00> : vector<128x32xf32>
    %223 = tpu.matmul %221, %222, %cst_69 {dimension_numbers = #tpu.dot_dimension_numbers<[1], [0], [0], [1], [0, 0, 1, 1], [], []>} : vector<128x128xf32>, vector<128x32xf32>, vector<128x32xf32> -> vector<128x32xf32>
    %224 = arith.addf %175, %223 : vector<128x32xf32>
    %cst_70 = arith.constant dense<0.000000e+00> : vector<128xf32>
    %225 = vector.multi_reduction <add>, %224, %cst_70 [1] : vector<128x32xf32> to vector<128xf32>
    %226 = vector.shape_cast %225 : vector<128xf32> to vector<128x1xf32>
    %cst_71 = arith.constant 3.200000e+01 : f32
    %227 = vector.broadcast %cst_71 : f32 to vector<128x1xf32>
    %228 = arith.divf %226, %227 : vector<128x1xf32>
    %229 = vector.broadcast %228 : vector<128x1xf32> to vector<128x32xf32>
    %230 = arith.subf %224, %229 : vector<128x32xf32>
    %231 = arith.mulf %230, %230 : vector<128x32xf32>
    %cst_72 = arith.constant dense<0.000000e+00> : vector<128xf32>
    %232 = vector.multi_reduction <add>, %231, %cst_72 [1] : vector<128x32xf32> to vector<128xf32>
    %233 = vector.shape_cast %232 : vector<128xf32> to vector<128x1xf32>
    %cst_73 = arith.constant 3.200000e+01 : f32
    %234 = vector.broadcast %cst_73 : f32 to vector<128x1xf32>
    %235 = arith.divf %233, %234 : vector<128x1xf32>
    %236 = vector.broadcast %228 : vector<128x1xf32> to vector<128x32xf32>
    %237 = arith.subf %224, %236 : vector<128x32xf32>
    %cst_74 = arith.constant 9.99999974E-6 : f32
    %238 = vector.broadcast %cst_74 : f32 to vector<128x1xf32>
    %239 = arith.addf %235, %238 : vector<128x1xf32>
    %240 = math.rsqrt %239 : vector<128x1xf32>
    %241 = vector.broadcast %240 : vector<128x1xf32> to vector<128x32xf32>
    %242 = arith.mulf %237, %241 : vector<128x32xf32>
    %c5 = arith.constant 5 : index
    %c0_75 = arith.constant 0 : index
    %243 = vector.load %arg8[%c5, %c0_75] : memref<8x132xf32, #tpu.memory_space<vmem>>, vector<1x32xf32>
    %244 = vector.broadcast %243 : vector<1x32xf32> to vector<128x32xf32>
    %245 = arith.mulf %242, %244 : vector<128x32xf32>
    %c6 = arith.constant 6 : index
    %c0_76 = arith.constant 0 : index
    %246 = vector.load %arg8[%c6, %c0_76] : memref<8x132xf32, #tpu.memory_space<vmem>>, vector<1x32xf32>
    %247 = vector.broadcast %246 : vector<1x32xf32> to vector<128x32xf32>
    %248 = arith.addf %245, %247 : vector<128x32xf32>
    %c0_77 = arith.constant 0 : index
    %c0_78 = arith.constant 0 : index
    %249 = vector.load %arg9[%c0_77, %c0_78] : memref<128x32xf32, #tpu.memory_space<vmem>>, vector<128x32xf32>
    tpu.vector_store %arg9[%c0_77, %c0_78], %248 {strides = array<i32>} : memref<128x32xf32, #tpu.memory_space<vmem>>, vector<128x32xf32>,
    return
  }
  func.func @transform_0(%arg0: i32) -> (i32, i32) {
    %c0_i32 = arith.constant 0 : i32
    %c0_i32_0 = arith.constant 0 : i32
    return %arg0, %c0_i32 : i32, i32
  }
  func.func @transform_1(%arg0: i32) -> (i32, i32) {
    %c0_i32 = arith.constant 0 : i32
    %c0_i32_0 = arith.constant 0 : i32
    %c0_i32_1 = arith.constant 0 : i32
    return %c0_i32, %c0_i32_0 : i32, i32
  }
  func.func @transform_2(%arg0: i32) -> (i32, i32) {
    %c0_i32 = arith.constant 0 : i32
    %c0_i32_0 = arith.constant 0 : i32
    %c0_i32_1 = arith.constant 0 : i32
    return %c0_i32, %c0_i32_0 : i32, i32
  }
  func.func @transform_3(%arg0: i32) -> (i32, i32) {
    %c0_i32 = arith.constant 0 : i32
    %c0_i32_0 = arith.constant 0 : i32
    %c0_i32_1 = arith.constant 0 : i32
    return %c0_i32, %c0_i32_0 : i32, i32
  }
  func.func @transform_4(%arg0: i32) -> (i32, i32) {
    %c0_i32 = arith.constant 0 : i32
    %c0_i32_0 = arith.constant 0 : i32
    %c0_i32_1 = arith.constant 0 : i32
    return %c0_i32, %c0_i32_0 : i32, i32
  }
  func.func @transform_5(%arg0: i32) -> (i32, i32) {
    %c0_i32 = arith.constant 0 : i32
    %c0_i32_0 = arith.constant 0 : i32
    %c0_i32_1 = arith.constant 0 : i32
    return %c0_i32, %c0_i32_0 : i32, i32
  }
  func.func @transform_6(%arg0: i32) -> (i32, i32) {
    %c0_i32 = arith.constant 0 : i32
    %c0_i32_0 = arith.constant 0 : i32
    %c0_i32_1 = arith.constant 0 : i32
    return %c0_i32, %c0_i32_0 : i32, i32
  }
  func.func @transform_7(%arg0: i32) -> (i32, i32) {
    %c0_i32 = arith.constant 0 : i32
    %c0_i32_0 = arith.constant 0 : i32
    %c0_i32_1 = arith.constant 0 : i32
    return %c0_i32, %c0_i32_0 : i32, i32
  }
  func.func @transform_8(%arg0: i32) -> (i32, i32) {
    %c0_i32 = arith.constant 0 : i32
    %c0_i32_0 = arith.constant 0 : i32
    return %arg0, %c0_i32 : i32, i32
  }
}

</mosaic_0001>

<bundles_post_ra>
// kernel: tpu_custom_call.1
= control target key start
LH: loop header
LB: loop body
LE: loop exit
PB: predicated region body
PF: predicated region fallthrough
CT: control target
= control target key end

     0   :  { %s11743_s27 = smov 0   ;;  %s16638_s0 = inlined_call_operand.vmem [shape: f32[256,32], index: 0, kind: input, shape index: {}]   ;;  %s16639_s1 = inlined_call_operand.vmem [shape: f32[32,64], index: 1, kind: input, shape index: {}]   ;;  %s16640_s2 = inlined_call_operand.vmem [shape: f32[32,256], index: 2, kind: input, shape index: {}]   ;;  %s16641_s3 = inlined_call_operand.vmem [shape: f32[32,132], index: 3, kind: input, shape index: {}]   ;;  %s16642_s4 = inlined_call_operand.vmem [shape: f32[128,128], index: 4, kind: input, shape index: {}]   ;;  %s16643_s5 = inlined_call_operand.vmem [shape: f32[4,128], index: 5, kind: input, shape index: {}]   ;;  %s16644_s6 = inlined_call_operand.vmem [shape: f32[128,32], index: 6, kind: input, shape index: {}]   ;;  %s16645_s7 = inlined_call_operand.vmem [shape: f32[8,132], index: 7, kind: input, shape index: {}]   ;;  %s16646_s8 = inlined_call_operand.vmem [shape: f32[256,32], index: 8, kind: output, shape index: {}]  }
   0x1 LB: > { %s7746_s28 = sadd.s32 4294967295, %s11678_s27   ;;  %p7750_p0 = scmp.ge.s32.totalorder %s11678_s27, 1  ;;  %s11678_s27 = sphi %s11743_s27, %s18_s27  }
   0x2   : > { %p263_p1 = scmp.lt.s32.totalorder %s11678_s27, 3 }
   0x4   : > { %p264_p2 = pnand %p7750_p0, %p263_p1 }
   0x6   : > { %267 = sbr.rel (%p264_p2) target bundleno = 6381 (0x18ed), region = 52 }
   0xd   : > { %v325_v0 = vld [vmem:[%s16639_s1] sm:$0xff]  ;;  %v326_v1 = vld [vmem:[%s16639_s1 + $0x8] sm:$0xff]  ;;  %v327_v2 = vld [vmem:[%s16639_s1 + $0x10] sm:$0xff]  ;;  %s7751_s13 = sshll.u32 %s7746_s28, 4  ;;  %v16647_v7 = vmov 0.0   ;;  %vm16841_vm0 = vcmask 261120  }
   0xe   : > { %v9669_v3 = vpack.c.bf16 %v326_v1, %v325_v0  ;;  %v328_v4 = vld [vmem:[%s16639_s1 + $0x18] sm:$0xff]  ;;  %p298_p3 = scmp.lt.s32.totalorder %s7751_s13, 31  ;;  %v525_v5 = vld [vmem:[%s16640_s2 + $0x8] sm:$0xff]  ;;  %596 = vmatprep.mubr.f32.mxu1 %v16647_v7  ;;  %v524_v10 = vld [vmem:[%s16640_s2] sm:$0xff]  ;;  %vm757_vm1 = vcmask 31744   ;;  %s11681_s18 = smov 96  }
   0xf   : > { %v527_v6 = vld [vmem:[%s16640_s2 + $0x18] sm:$0xff]  ;;  %v9673_v8 = vpack.c.bf16 %v328_v4, %v327_v2  ;;  %v526_v11 = vld [vmem:[%s16640_s2 + $0x10] sm:$0xff]  ;;  %v529_v12 = vld [vmem:[%s16640_s2 + $0x28] sm:$0xff]  ;;  %s11682_s19 = smov 92   ;;  %s11683_s20 = smov 124  }
  0x10   : > { %v9677_v9 = vpack.c.bf16 %v527_v6, %v525_v5  ;;  %9670 = vmatprep.subr.bf16.mxu0 %v9669_v3  ;;  %s17493_s13 = smov (!%p298_p3, %s7751_s13), 31  ;;  %v9679_v13 = vpack.c.bf16 %v526_v11, %v524_v10  ;;  %v531_v14 = vld [vmem:[%s16640_s2 + $0x38] sm:$0xff]  ;;  %v528_v15 = vld [vmem:[%s16640_s2 + $0x20] sm:$0xff]  ;;  %v530_v16 = vld [vmem:[%s16640_s2 + $0x30] sm:$0xff]  ;;  %s11684_s21 = smov 88  }
  0x11   : > { %9672 = vmatpush3.bf16.msra.mxu0 %v9669_v3  ;;  %v9681_v17 = vpack.c.bf16 %v531_v14, %v529_v12  ;;  %s7752_s11 = sshll.u32 %s17493_s13, 3  ;;  %v9683_v18 = vpack.c.bf16 %v530_v16, %v528_v15  ;;  %v11864_v35 = vld [vmem:[%s16645_s7 + $0x1] ss:$0 sm:$0xff]  ;;  %vm12066_vm2 = vmpackc.low %vm757_vm1, %vm757_vm1  ;;  %s11685_s22 = smov 120  }
  0x12   : > { %9678 = vmatprep.subr.bf16.mxu1 %v9677_v9  ;;  %9674 = vmatprep.subr.bf16.mxu0 %v9673_v8  ;;  %s11796_s15 = scalar_lea.vmem %s16638_s0, %s7752_s11  ;;  %s11687_s23 = smov 84  }
  0x13   : > { %9680 = vmatpush1.bf16.msra.mxu1 %v9679_v13  ;;  %v309_v19 = vld [vmem:[%s11796_s15] sm:$0xff]  ;;  %v310_v20 = vld [vmem:[%s11796_s15 + $0x8] sm:$0xff]  ;;  %v311_v21 = vld [vmem:[%s11796_s15 + $0x10] sm:$0xff]  ;;  %s11688_s26 = smov 116   ;;  %s11690_s28 = smov 80  }
  0x14   : > { %9682 = vmatprep.subr.bf16.mxu1 %v9681_v17  ;;  %8667 = vmatprep.mubr.msk.f32.mxu0 %vm16841_vm0, %v309_v19  ;;  %v312_v22 = vld [vmem:[%s11796_s15 + $0x18] sm:$0xff]  ;;  %v313_v23 = vld [vmem:[%s11796_s15 + $0x20] sm:$0xff]  ;;  %v314_v24 = vld [vmem:[%s11796_s15 + $0x28] sm:$0xff]  ;;  %s11691_s29 = smov 112   ;;  %s11692_s30 = smov 76  }
  0x15   : > { %9676 = vmatpush3.bf16.msra.mxu0 %v9673_v8  ;;  %v315_v25 = vld [vmem:[%s11796_s15 + $0x30] sm:$0xff]  ;;  %v316_v26 = vld [vmem:[%s11796_s15 + $0x38] sm:$0xff]  ;;  %v317_v27 = vld [vmem:[%s11796_s15 + $0x40] sm:$0xff]  ;;  %s11693_s16 = smov 108   ;;  %s11696_s17 = smov 68  }
  0x16   : > { %v318_v28 = vld [vmem:[%s11796_s15 + $0x48] sm:$0xff]  ;;  %v319_v29 = vld [vmem:[%s11796_s15 + $0x50] sm:$0xff]  ;;  %v320_v30 = vld [vmem:[%s11796_s15 + $0x58] sm:$0xff] }
  0x17   : > { %9684 = vmatpush1.bf16.msra.mxu1 %v9683_v18  ;;  %v321_v31 = vld [vmem:[%s11796_s15 + $0x60] sm:$0xff]  ;;  %v322_v32 = vld [vmem:[%s11796_s15 + $0x68] sm:$0xff]  ;;  %v323_v33 = vld [vmem:[%s11796_s15 + $0x70] sm:$0xff] }
  0x18   : > { %8668 = vmatmul.mubr.msk.f32.vlgmr.msra.gmra.mrb[0].mxu0 %vm16841_vm0, %v310_v20  ;;  %v324_v34 = vld [vmem:[%s11796_s15 + $0x78] sm:$0xff] }
  0x19   : > { %8670 = vmatprep.mubr.msk.f32.mxu0 %vm16841_vm0, %v311_v21 }
  0x1a   : > { %7771 = vmatmul.mubr.msk.f32.vlgmr.msra.gmra.mrb[0].mxu1 %vm16841_vm0, %v309_v19 }
  0x1b   : > { %602 = vmatprep.mubr.f32.mxu1 %v16647_v7 }
  0x1c   : > { %8671 = vmatmul.mubr.msk.f32.gmra.mrb[2].mxu0 %vm16841_vm0, %v312_v22 }
  0x1d   : > { %8673 = vmatprep.mubr.msk.f32.mxu0 %vm16841_vm0, %v313_v23 }
  0x1e   : > { %7772 = vmatmul.mubr.msk.f32.gmra.mrb[2].mxu1 %vm16841_vm0, %v310_v20 }
  0x1f   : > { %608 = vmatprep.mubr.f32.mxu1 %v16647_v7 }
  0x20   : > { %8674 = vmatmul.mubr.msk.f32.gmra.mrb[4].mxu0 %vm16841_vm0, %v314_v24 }
  0x21   : > { %8676 = vmatprep.mubr.msk.f32.mxu0 %vm16841_vm0, %v315_v25 }
  0x22   : > { %7773 = vmatmul.mubr.msk.f32.gmra.mrb[4].mxu1 %vm16841_vm0, %v311_v21 }
  0x23   : > { %614 = vmatprep.mubr.f32.mxu1 %v16647_v7 }
  0x24   : > { %8677 = vmatmul.mubr.msk.f32.gmra.mrb[6].mxu0 %vm16841_vm0, %v316_v26 }
  0x25   : > { %8679 = vmatprep.mubr.msk.f32.mxu0 %vm16841_vm0, %v317_v27 }
  0x26   : > { %7774 = vmatmul.mubr.msk.f32.gmra.mrb[6].mxu1 %vm16841_vm0, %v312_v22 }
  0x27   : > { %620 = vmatprep.mubr.f32.mxu1 %v16647_v7 }
  0x28   : > { %8680 = vmatmul.mubr.msk.f32.gmra.mrb[8].mxu0 %vm16841_vm0, %v318_v28 }
  0x29   : > { %8682 = vmatprep.mubr.msk.f32.mxu0 %vm16841_vm0, %v319_v29 }
  0x2a   : > { %7775 = vmatmul.mubr.msk.f32.gmra.mrb[8].mxu1 %vm16841_vm0, %v313_v23 }
  0x2b   : > { %626 = vmatprep.mubr.f32.mxu1 %v16647_v7 }
  0x2c   : > { %8683 = vmatmul.mubr.msk.f32.gmra.mrb[10].mxu0 %vm16841_vm0, %v320_v30 }
  0x2d   : > { %8685 = vmatprep.mubr.msk.f32.mxu0 %vm16841_vm0, %v321_v31 }
  0x2e   : > { %7776 = vmatmul.mubr.msk.f32.gmra.mrb[10].mxu1 %vm16841_vm0, %v314_v24 }
  0x2f   : > { %632 = vmatprep.mubr.f32.mxu1 %v16647_v7 }
  0x30   : > { %8686 = vmatmul.mubr.msk.f32.gmra.mrb[12].mxu0 %vm16841_vm0, %v322_v32 }
  0x31   : > { %8688 = vmatprep.mubr.msk.f32.mxu0 %vm16841_vm0, %v323_v33 }
  0x32   : > { %7777 = vmatmul.mubr.msk.f32.gmra.mrb[12].mxu1 %vm16841_vm0, %v315_v25 }
  0x33   : > { %638 = vmatprep.mubr.f32.mxu1 %v16647_v7 }
  0x34   : > { %8689 = vmatmul.mubr.msk.f32.gmra.mrb[14].mxu0 %vm16841_vm0, %v324_v34 }
  0x36   : > { %7778 = vmatmul.mubr.msk.f32.gmra.mrb[14].mxu1 %vm16841_vm0, %v316_v26 }
  0x37   : > { %644 = vmatprep.mubr.f32.mxu1 %v16647_v7 }
  0x3a   : > { %7779 = vmatmul.mubr.msk.f32.gmra.mrb[16].mxu1 %vm16841_vm0, %v317_v27 }
  0x3b   : > { %650 = vmatprep.mubr.f32.mxu1 %v16647_v7 }
  0x3e   : > { %7780 = vmatmul.mubr.msk.f32.gmra.mrb[18].mxu1 %vm16841_vm0, %v318_v28 }
  0x3f   : > { %656 = vmatprep.mubr.f32.mxu1 %v16647_v7 }
  0x42   : > { %7781 = vmatmul.mubr.msk.f32.gmra.mrb[20].mxu1 %vm16841_vm0, %v319_v29 }
  0x43   : > { %662 = vmatprep.mubr.f32.mxu1 %v16647_v7 }
  0x46   : > { %7782 = vmatmul.mubr.msk.f32.gmra.mrb[22].mxu1 %vm16841_vm0, %v320_v30 }
  0x47   : > { %668 = vmatprep.mubr.f32.mxu1 %v16647_v7 }
  0x4a   : > { %7783 = vmatmul.mubr.msk.f32.gmra.mrb[24].mxu1 %vm16841_vm0, %v321_v31 }
  0x4b   : > { %674 = vmatprep.mubr.f32.mxu1 %v16647_v7 }
  0x4e   : > { %7784 = vmatmul.mubr.msk.f32.gmra.mrb[26].mxu1 %vm16841_vm0, %v322_v32 }
  0x4f   : > { %680 = vmatprep.mubr.f32.mxu1 %v16647_v7 }
  0x52   : > { %7785 = vmatmul.mubr.msk.f32.gmra.mrb[28].mxu1 %vm16841_vm0, %v323_v33 }
  0x53   : > { %686 = vmatprep.mubr.f32.mxu1 %v16647_v7 }
  0x56   : > { %7786 = vmatmul.mubr.msk.f32.gmra.mrb[30].mxu1 %vm16841_vm0, %v324_v34 }
  0xeb   : > { %v8669_v36 = vpop.f32.mrb[0].mxu0 }
  0xec   : > { %v11867_v37 = vadd.f32 %v8669_v36, %v11864_v35  ;;  %v445_v38 = vpop.f32.mrb[1].mxu0 }
  0xed   : > { %v11869_v39 = vpop.f32.mrb[0].mxu1  ;;  %v11872_v40 = vadd.f32 %v445_v38, %v11864_v35 }
  0xee   : > { %16858 = vst [vmem:[#allocation2_spill] sm:$0xff] %v11867_v37  ;;  %v11874_v41 = vpop.f32.mrb[1].mxu1 }
  0xef   : > { %8723 = vmatprep.mubr.msk.f32.mxu0 %vm757_vm1, %v11872_v40  ;;  %v11880_v42 = vpack.i.bf16 %v11867_v37, %v11872_v40  ;;  %v8672_v43 = vpop.f32.mrb[2].mxu0 }
  0xf0   : > { %v11883_v44 = vadd.f32 %v8672_v43, %v11864_v35  ;;  %v455_v45 = vpop.f32.mrb[3].mxu0  ;;  %v16885_v43 = vmov 0 }
  0xf1   : > { %16859 = vst [vmem:[#allocation3_spill] sm:$0xff] %v11880_v42  ;;  %v11885_v46 = vpop.f32.mrb[2].mxu1  ;;  %10408 = vrot.lane.b32.xlu0 %v11880_v42, %s11681_s18  ;;  %v11890_v47 = vadd.f32 %v455_v45, %v11864_v35  ;;  %v16886_v43 = vsel %vm12066_vm2, 4294967295, %v16885_v43 }
  0xf2   : > { %16860 = vst [vmem:[#allocation4_spill] sm:$0xff] %v11883_v44  ;;  %v11894_v48 = vpack.i.bf16 %v11885_v46, %v11869_v39  ;;  %v11896_v49 = vpop.f32.mrb[3].mxu1  ;;  %16887 = vst [vmem:[#allocation29_spill] sm:$0xff] %v16886_v43 }
  0xf3   : > { %v11900_v50 = vpack.i.bf16 %v11896_v49, %v11874_v41  ;;  %v11904_v51 = vpack.i.bf16 %v11883_v44, %v11890_v47  ;;  %v8675_v52 = vpop.f32.mrb[4].mxu0 }
  0xf4   : > { %16861 = vst [vmem:[#allocation5_spill] sm:$0xff] %v11894_v48  ;;  %v11907_v53 = vadd.f32 %v8675_v52, %v11864_v35  ;;  %v465_v54 = vpop.f32.mrb[5].mxu0 }
  0xf5   : > { %16862 = vst [vmem:[#allocation6_spill] sm:$0xff] %v11900_v50  ;;  %16863 = vst [vmem:[#allocation7_spill] sm:$0xff] %v11904_v51  ;;  %v11909_v55 = vpop.f32.mrb[4].mxu1  ;;  %10413 = vrot.lane.b32.xlu0 %v11904_v51, %s11681_s18  ;;  %v11914_v56 = vadd.f32 %v465_v54, %v11864_v35 }
  0xf6   : > { %16864 = vst [vmem:[#allocation8_spill] sm:$0xff] %v11907_v53  ;;  %v11916_v57 = vpop.f32.mrb[5].mxu1 }
  0xf7   : > { %v8678_v58 = vpop.f32.mrb[6].mxu0  ;;  %v11920_v59 = vpack.i.bf16 %v11907_v53, %v11914_v56 }
  0xf8   : > { %v11923_v60 = vadd.f32 %v8678_v58, %v11864_v35  ;;  %v475_v61 = vpop.f32.mrb[7].mxu0 }
  0xf9   : > { %16865 = vst [vmem:[#allocation9_spill] sm:$0xff] %v11920_v59  ;;  %v11925_v62 = vpop.f32.mrb[6].mxu1  ;;  %v11928_v63 = vadd.f32 %v475_v61, %v11864_v35  ;;  %10418 = vrot.lane.b32.xlu1 %v11920_v59, %s11681_s18 }
  0xfa   : > { %16866 = vst [vmem:[#allocation10_spill] sm:$0xff] %v11923_v60  ;;  %v11934_v0 = vpack.i.bf16 %v11925_v62, %v11909_v55  ;;  %v11936_v1 = vpop.f32.mrb[7].mxu1 }
  0xfb   : > { %16867 = vst [vmem:[#allocation11_spill] sm:$0xff] %v11928_v63  ;;  %v11940_v2 = vpack.i.bf16 %v11936_v1, %v11916_v57  ;;  %v8681_v3 = vpop.f32.mrb[8].mxu0  ;;  %v11944_v4 = vpack.i.bf16 %v11923_v60, %v11928_v63 }
  0xfc   : > { %v11947_v5 = vadd.f32 %v8681_v3, %v11864_v35  ;;  %v485_v6 = vpop.f32.mrb[9].mxu0 }
  0xfd   : > { %16868 = vst [vmem:[#allocation12_spill] sm:$0xff] %v11940_v2  ;;  %16869 = vst [vmem:[#allocation13_spill] sm:$0xff] %v11944_v4  ;;  %v11949_v8 = vpop.f32.mrb[8].mxu1  ;;  %v11952_v9 = vadd.f32 %v485_v6, %v11864_v35  ;;  %10423 = vrot.lane.b32.xlu1 %v11944_v4, %s11681_s18  ;;  %v702_v2 = vld [vmem:[%s16642_s4 + $0x48] sm:$0xff] }
  0xfe   : > { %16870 = vst [vmem:[#allocation14_spill] sm:$0xff] %v11947_v5  ;;  %v11956_v10 = vpop.f32.mrb[9].mxu1 }
  0xff   : > { %16871 = vst [vmem:[#allocation15_spill] sm:$0xff] %v11952_v9  ;;  %v8684_v11 = vpop.f32.mrb[10].mxu0  ;;  %v11960_v12 = vpack.i.bf16 %v11947_v5, %v11952_v9 }
 0x100   : > { %v11963_v13 = vadd.f32 %v8684_v11, %v11864_v35  ;;  %v495_v14 = vpop.f32.mrb[11].mxu0 }
 0x101   : > { %16872 = vst [vmem:[#allocation16_spill] sm:$0xff] %v11960_v12  ;;  %v11965_v15 = vpop.f32.mrb[10].mxu1  ;;  %v11968_v16 = vadd.f32 %v495_v14, %v11864_v35  ;;  %10428 = vrot.lane.b32.xlu0 %v11960_v12, %s11681_s18 }
 0x102   : > { %16873 = vst [vmem:[#allocation17_spill] sm:$0xff] %v11963_v13  ;;  %v11974_v17 = vpack.i.bf16 %v11965_v15, %v11949_v8  ;;  %v11976_v18 = vpop.f32.mrb[11].mxu1 }
 0x103   : > { %16874 = vst [vmem:[#allocation18_spill] sm:$0xff] %v11968_v16  ;;  %v11980_v19 = vpack.i.bf16 %v11976_v18, %v11956_v10  ;;  %v8687_v20 = vpop.f32.mrb[12].mxu0  ;;  %v11984_v21 = vpack.i.bf16 %v11963_v13, %v11968_v16 }
 0x104   : > { %16875 = vst [vmem:[#allocation19_spill] sm:$0xff] %v11974_v17  ;;  %v11987_v22 = vadd.f32 %v8687_v20, %v11864_v35  ;;  %v505_v23 = vpop.f32.mrb[13].mxu0 }
 0x105   : > { %16876 = vst [vmem:[#allocation20_spill] sm:$0xff] %v11980_v19  ;;  %16877 = vst [vmem:[#allocation21_spill] sm:$0xff] %v11984_v21  ;;  %v11989_v24 = vpop.f32.mrb[12].mxu1  ;;  %v11992_v25 = vadd.f32 %v505_v23, %v11864_v35  ;;  %10433 = vrot.lane.b32.xlu1 %v11984_v21, %s11681_s18 }
 0x106   : > { %16878 = vst [vmem:[#allocation22_spill] sm:$0xff] %v11987_v22  ;;  %v11996_v26 = vpop.f32.mrb[13].mxu1 }
 0x107   : > { %16879 = vst [vmem:[#allocation23_spill] sm:$0xff] %v11992_v25  ;;  %v8690_v27 = vpop.f32.mrb[14].mxu0  ;;  %v12000_v28 = vpack.i.bf16 %v11987_v22, %v11992_v25 }
 0x108   : > { %v12003_v29 = vadd.f32 %v8690_v27, %v11864_v35  ;;  %v515_v30 = vpop.f32.mrb[15].mxu0 }
 0x109   : > { %16880 = vst [vmem:[#allocation24_spill] sm:$0xff] %v12000_v28  ;;  %v12005_v31 = vpop.f32.mrb[14].mxu1  ;;  %v12008_v32 = vadd.f32 %v515_v30, %v11864_v35  ;;  %10438 = vrot.lane.b32.xlu0 %v12000_v28, %s11681_s18 }
 0x10a   : > { %16881 = vst [vmem:[#allocation25_spill] sm:$0xff] %v12003_v29  ;;  %v12014_v33 = vpack.i.bf16 %v12005_v31, %v11989_v24 }
 0x10b   : > { %16882 = vst [vmem:[#allocation26_spill] sm:$0xff] %v12008_v32  ;;  %v12018_v34 = vpack.i.bf16 %v12003_v29, %v12008_v32 }
 0x10c   : > { %16883 = vst [vmem:[#allocation27_spill] sm:$0xff] %v12014_v33 }
 0x10d   : > { %16884 = vst [vmem:[#allocation28_spill] sm:$0xff] %v12018_v34  ;;  %10443 = vrot.lane.b32.xlu1 %v12018_v34, %s11681_s18  ;;  %10448 = vrot.lane.b32.xlu0 %v11880_v42, %s11682_s19 }
 0x111   : > { %10453 = vrot.lane.b32.xlu1 %v11904_v51, %s11682_s19  ;;  %10458 = vrot.lane.b32.xlu0 %v11920_v59, %s11682_s19 }
 0x115   : > { %10463 = vrot.lane.b32.xlu1 %v11944_v4, %s11682_s19  ;;  %10468 = vrot.lane.b32.xlu0 %v11960_v12, %s11682_s19 }
 0x119   : > { %10473 = vrot.lane.b32.xlu1 %v11984_v21, %s11682_s19  ;;  %10478 = vrot.lane.b32.xlu0 %v12000_v28, %s11682_s19 }
 0x11d   : > { %10483 = vrot.lane.b32.xlu1 %v12018_v34, %s11682_s19  ;;  %1272 = vrot.lane.b32.xlu0 %v11872_v40, %s11683_s20 }
 0x121   : > { %1274 = vrot.lane.b32.xlu1 %v11867_v37, %s11683_s20  ;;  %1276 = vrot.lane.b32.xlu0 %v11890_v47, %s11683_s20 }
 0x125   : > { %1278 = vrot.lane.b32.xlu1 %v11883_v44, %s11683_s20  ;;  %1280 = vrot.lane.b32.xlu0 %v11914_v56, %s11683_s20 }
 0x129   : > { %1282 = vrot.lane.b32.xlu1 %v11907_v53, %s11683_s20  ;;  %1284 = vrot.lane.b32.xlu0 %v11928_v63, %s11683_s20 }
 0x12d   : > { %1286 = vrot.lane.b32.xlu1 %v11923_v60, %s11683_s20  ;;  %1288 = vrot.lane.b32.xlu0 %v11952_v9, %s11683_s20 }
 0x131   : > { %1290 = vrot.lane.b32.xlu1 %v11947_v5, %s11683_s20  ;;  %1292 = vrot.lane.b32.xlu0 %v11968_v16, %s11683_s20 }
 0x135   : > { %1294 = vrot.lane.b32.xlu1 %v11963_v13, %s11683_s20  ;;  %1296 = vrot.lane.b32.xlu0 %v11992_v25, %s11683_s20 }
 0x139   : > { %1298 = vrot.lane.b32.xlu1 %v11987_v22, %s11683_s20  ;;  %1300 = vrot.lane.b32.xlu0 %v12008_v32, %s11683_s20 }
 0x13d   : > { %1302 = vrot.lane.b32.xlu1 %v12003_v29, %s11683_s20  ;;  %10493 = vrot.lane.b32.xlu0 %v11934_v0, %s11681_s18 }
 0x141   : > { %10488 = vrot.lane.b32.xlu1 %v11894_v48, %s11681_s18  ;;  %10513 = vrot.lane.b32.xlu0 %v11904_v51, %s11684_s21  ;;  %v705_v51 = vld [vmem:[%s16642_s4 + $0x60] sm:$0xff] }
 0x145   : > { %10498 = vrot.lane.b32.xlu1 %v11974_v17, %s11681_s18  ;;  %10518 = vrot.lane.b32.xlu0 %v11920_v59, %s11684_s21 }
 0x149   : > { %10503 = vrot.lane.b32.xlu1 %v12014_v33, %s11681_s18  ;;  %10528 = vrot.lane.b32.xlu0 %v11960_v12, %s11684_s21 }
 0x14d   : > { %10508 = vrot.lane.b32.xlu1 %v11880_v42, %s11684_s21 }
 0x151   : > { %10523 = vrot.lane.b32.xlu1 %v11944_v4, %s11684_s21 }
 0x163   : > { %v10409_v35 = vpop.permute.xlu0 %10408 }
 0x164   : > { %v10411_v36 = vunpack.i.h.bf16 %v10409_v35  ;;  %v10410_v38 = vunpack.i.l.bf16 %v10409_v35 }
 0x166   : > { %v9685_v45 = vpack.c.bf16 %v10411_v36, %v10410_v38 }
 0x167   : > { %v10414_v52 = vpop.permute.xlu0 %10413 }
 0x168   : > { %9687 = vmatprep.subr.msk.bf16.mxu0 %vm12066_vm2, %v9685_v45  ;;  %v10416_v54 = vunpack.i.h.bf16 %v10414_v52  ;;  %v10415_v58 = vunpack.i.l.bf16 %v10414_v52 }
 0x169   : > { %9690 = vmatpush3.bf16.xpose.msk.msra.mxu0 %vm12066_vm2, %v9685_v45 }
 0x16a   : > { %v9691_v61 = vpack.c.bf16 %v10416_v54, %v10415_v58 }
 0x16b   : > { %v10419_v3 = vpop.permute.xlu1 %10418 }
 0x16c   : > { %9693 = vmatprep.subr.msk.bf16.mxu0 %vm12066_vm2, %v9691_v61  ;;  %v10421_v6 = vunpack.i.h.bf16 %v10419_v3  ;;  %v10420_v11 = vunpack.i.l.bf16 %v10419_v3  ;;  %v9733_v3 = vpack.c.bf16 %v11885_v46, %v11869_v39 }
 0x16e   : > { %v9697_v14 = vpack.c.bf16 %v10421_v6, %v10420_v11  ;;  %9734 = vmatprep.subr.bf16.mxu1 %v9733_v3 }
 0x16f   : > { %v10424_v20 = vpop.permute.xlu1 %10423  ;;  %9736 = vmatpush3.bf16.msra.mxu1 %v9733_v3 }
 0x170   : > { %v10426_v23 = vunpack.i.h.bf16 %v10424_v20  ;;  %v10425_v27 = vunpack.i.l.bf16 %v10424_v20 }
 0x171   : > { %9696 = vmatpush3.bf16.xpose.msk.msra.mxu0 %vm12066_vm2, %v9691_v61  ;;  %v12088_v61 = vpop.f32.mrb[15].mxu1 }
 0x172   : > { %9699 = vmatprep.subr.msk.bf16.mxu0 %vm12066_vm2, %v9697_v14  ;;  %v9703_v30 = vpack.c.bf16 %v10426_v23, %v10425_v27  ;;  %v12094_v6 = vpack.i.bf16 %v12088_v61, %v11996_v26  ;;  %v646_v11 = vpop.f32.mrb[16].mxu1  ;;  %v9737_v23 = vpack.c.bf16 %v11925_v62, %v11909_v55  ;;  %v9741_v27 = vpack.c.bf16 %v11965_v15, %v11949_v8 }
 0x173   : > { %v10429_v35 = vpop.permute.xlu0 %10428  ;;  %v12096_v20 = vpop.f32.mrb[17].mxu1 }
 0x174   : > { %v10431_v36 = vunpack.i.h.bf16 %v10429_v35  ;;  %v10430_v38 = vunpack.i.l.bf16 %v10429_v35  ;;  %16888 = vst [vmem:[#allocation30_spill] sm:$0xff] %v12094_v6  ;;  %v652_v39 = vpop.f32.mrb[18].mxu1  ;;  %9738 = vmatprep.subr.bf16.mxu1 %v9737_v23 }
 0x175   : > { %v12106_v35 = vpack.i.bf16 %v652_v39, %v646_v11  ;;  %v9749_v15 = vpack.c.bf16 %v652_v39, %v646_v11  ;;  %9740 = vmatpush3.bf16.msra.mxu1 %v9737_v23 }
 0x176   : > { %v9709_v45 = vpack.c.bf16 %v10431_v36, %v10430_v38  ;;  %v12108_v36 = vpop.f32.mrb[19].mxu1  ;;  %9742 = vmatprep.subr.bf16.mxu1 %v9741_v27 }
 0x177   : > { %v10434_v52 = vpop.permute.xlu1 %10433  ;;  %v12114_v62 = vpack.i.bf16 %v12108_v36, %v12096_v20  ;;  %v658_v8 = vpop.f32.mrb[20].mxu1  ;;  %10533 = vrot.lane.b32.xlu0 %v12106_v35, %s11681_s18 }
 0x178   : > { %v10436_v54 = vunpack.i.h.bf16 %v10434_v52  ;;  %v10435_v58 = vunpack.i.l.bf16 %v10434_v52 }
 0x179   : > { %9702 = vmatpush3.bf16.xpose.msk.msra.mxu0 %vm12066_vm2, %v9697_v14  ;;  %16889 = vst [vmem:[#allocation31_spill] sm:$0xff] %v12114_v62  ;;  %9744 = vmatpush3.bf16.msra.mxu1 %v9741_v27 }
 0x17a   : > { %9705 = vmatprep.subr.msk.bf16.mxu0 %vm12066_vm2, %v9703_v30  ;;  %v9715_v14 = vpack.c.bf16 %v10436_v54, %v10435_v58 }
 0x17b   : > { %v10439_v46 = vpop.permute.xlu0 %10438 }
 0x17c   : > { %v10441_v38 = vunpack.i.h.bf16 %v10439_v46  ;;  %v10440_v55 = vunpack.i.l.bf16 %v10439_v46 }
 0x17f   : > { %v10444_v7 = vpop.permute.xlu1 %10443 }
 0x180   : > { %v10446_v23 = vunpack.i.h.bf16 %v10444_v7  ;;  %v10445_v39 = vunpack.i.l.bf16 %v10444_v7 }
 0x181   : > { %9708 = vmatpush3.bf16.xpose.msk.msra.mxu0 %vm12066_vm2, %v9703_v30  ;;  %v9745_v30 = vpack.c.bf16 %v12005_v31, %v11989_v24  ;;  %v12118_v24 = vpop.f32.mrb[21].mxu1 }
 0x182   : > { %9711 = vmatprep.subr.msk.bf16.mxu0 %vm12066_vm2, %v9709_v45  ;;  %v664_v31 = vpop.f32.mrb[22].mxu1  ;;  %v9727_v7 = vpack.c.bf16 %v10446_v23, %v10445_v39 }
 0x183   : > { %v12120_v52 = vpack.i.bf16 %v664_v31, %v658_v8  ;;  %v12122_v54 = vpop.f32.mrb[23].mxu1  ;;  %v9753_v46 = vpack.c.bf16 %v664_v31, %v658_v8  ;;  %9746 = vmatprep.subr.bf16.mxu1 %v9745_v30 }
 0x184   : > { %v12126_v58 = vpack.i.bf16 %v12122_v54, %v12118_v24  ;;  %v670_v3 = vpop.f32.mrb[24].mxu1  ;;  %9748 = vmatpush3.bf16.msra.mxu1 %v9745_v30 }
 0x185   : > { %v12130_v11 = vpop.f32.mrb[25].mxu1  ;;  %10538 = vrot.lane.b32.xlu1 %v12120_v52, %s11681_s18  ;;  %9750 = vmatprep.subr.bf16.mxu1 %v9749_v15 }
 0x186   : > { %16890 = vst [vmem:[#allocation32_spill] sm:$0xff] %v12126_v58 }
 0x188   : > { %9752 = vmatpush3.bf16.msra.mxu1 %v9749_v15 }
 0x189   : > { %9714 = vmatpush3.bf16.xpose.msk.msra.mxu0 %vm12066_vm2, %v9709_v45  ;;  %v9721_v45 = vpack.c.bf16 %v10441_v38, %v10440_v55  ;;  %v676_v38 = vpop.f32.mrb[26].mxu1  ;;  %9754 = vmatprep.subr.bf16.mxu1 %v9753_v46 }
 0x18a   : > { %9717 = vmatprep.subr.msk.bf16.mxu0 %vm12066_vm2, %v9715_v14  ;;  %v12136_v55 = vpack.i.bf16 %v676_v38, %v670_v3  ;;  %v9757_v27 = vpack.c.bf16 %v676_v38, %v670_v3  ;;  %v12138_v8 = vpop.f32.mrb[27].mxu1  ;;  %v10449_v3 = vpop.permute.xlu0 %10448 }
 0x18b   : > { %v12144_v31 = vpop.f32.mrb[28].mxu1  ;;  %v10451_v15 = vunpack.i.h.bf16 %v10449_v3  ;;  %v10450_v39 = vunpack.i.l.bf16 %v10449_v3 }
 0x18c   : > { %16891 = vst [vmem:[#allocation33_spill] sm:$0xff] %v12136_v55  ;;  %10543 = vrot.lane.b32.xlu1 %v12136_v55, %s11681_s18  ;;  %v12148_v6 = vpop.f32.mrb[29].mxu1  ;;  %9756 = vmatpush3.bf16.msra.mxu1 %v9753_v46  ;;  %v708_v55 = vld [vmem:[%s16642_s4 + $0x78] sm:$0xff] }
 0x18d   : > { %v12150_v58 = vpop.f32.mrb[30].mxu1  ;;  %9758 = vmatprep.subr.bf16.mxu1 %v9757_v27 }
 0x18e   : > { %v12156_v30 = vpack.i.bf16 %v12150_v58, %v12144_v31  ;;  %v12158_v38 = vpop.f32.mrb[31].mxu1 }
 0x18f   : > { %v12164_v23 = vpack.i.bf16 %v12158_v38, %v12148_v6 }
 0x190   : > { %10548 = vrot.lane.b32.xlu1 %v12156_v30, %s11681_s18  ;;  %9760 = vmatpush3.bf16.msra.mxu1 %v9757_v27 }
 0x191   : > { %9720 = vmatpush3.bf16.xpose.msk.msra.mxu0 %vm12066_vm2, %v9715_v14  ;;  %v12142_v14 = vpack.i.bf16 %v12138_v8, %v12130_v11  ;;  %16893 = vst [vmem:[#allocation35_spill] sm:$0xff] %v12164_v23  ;;  %v10459_v23 = vpop.permute.xlu0 %10458 }
 0x192   : > { %9723 = vmatprep.subr.msk.bf16.mxu0 %vm12066_vm2, %v9721_v45  ;;  %v10461_v46 = vunpack.i.h.bf16 %v10459_v23  ;;  %v10460_v27 = vunpack.i.l.bf16 %v10459_v23 }
 0x193   : > { %16892 = vst [vmem:[#allocation34_spill] sm:$0xff] %v12142_v14  ;;  %v10454_v14 = vpop.permute.xlu1 %10453 }
 0x194   : > { %v10456_v19 = vunpack.i.h.bf16 %v10454_v14  ;;  %v10455_v62 = vunpack.i.l.bf16 %v10454_v14 }
 0x195   : > { %v10469_v23 = vpop.permute.xlu0 %10468 }
 0x196   : > { %v9771_v50 = vpack.c.bf16 %v10456_v19, %v10455_v62  ;;  %v9777_v19 = vpack.c.bf16 %v10461_v46, %v10460_v27 }
 0x197   : > { %v10464_v62 = vpop.permute.xlu1 %10463 }
 0x198   : > { %v10466_v14 = vunpack.i.h.bf16 %v10464_v62 }
 0x199   : > { %9726 = vmatpush3.bf16.xpose.msk.msra.mxu0 %vm12066_vm2, %v9721_v45  ;;  %v9765_v45 = vpack.c.bf16 %v10451_v15, %v10450_v39  ;;  %v10470_v15 = vunpack.i.l.bf16 %v10469_v23  ;;  %v10479_v39 = vpop.permute.xlu0 %10478 }
 0x19a   : > { %9729 = vmatprep.subr.msk.bf16.mxu0 %vm12066_vm2, %v9727_v7 }
 0x19b   : > { %v10474_v46 = vpop.permute.xlu1 %10473 }
 0x19c   : > { %v10476_v27 = vunpack.i.h.bf16 %v10474_v46 }
 0x1a1   : > { %9732 = vmatpush3.bf16.xpose.msk.msra.mxu0 %vm12066_vm2, %v9727_v7  ;;  %v10465_v7 = vunpack.i.l.bf16 %v10464_v62  ;;  %v1273_v62 = vpop.permute.xlu0 %1272 }
 0x1a2   : > { %9767 = vmatprep.subr.msk.bf16.mxu0 %vm12066_vm2, %v9765_v45 }
 0x1a3   : > { %v9783_v3 = vpack.c.bf16 %v10466_v14, %v10465_v7  ;;  %v12221_v14 = vpack.c.bf16 %v11896_v49, %v11874_v41  ;;  %v10484_v41 = vpop.permute.xlu1 %10483 }
 0x1a4   : > { %v10486_v49 = vunpack.i.h.bf16 %v10484_v41 }
 0x1a5   : > { %16894 = vst [vmem:[#allocation36_spill] sm:$0xff] %v12221_v14 }
 0x1a8   : > { %8724 = vmatmul.mubr.msk.f32.vlgmr.msra.gmra.mrb[16].mxu0 %vm757_vm1, %v11867_v37 }
 0x1a9   : > { %8726 = vmatprep.mubr.msk.f32.mxu0 %vm757_vm1, %v11890_v47  ;;  %9770 = vmatpush3.bf16.xpose.msk.msra.mxu0 %vm12066_vm2, %v9765_v45 }
 0x1aa   : > { %9773 = vmatprep.subr.msk.bf16.mxu0 %vm12066_vm2, %v9771_v50 }
 0x1ac   : > { %8727 = vmatmul.mubr.msk.f32.gmra.mrb[18].mxu0 %vm757_vm1, %v11883_v44 }
 0x1ad   : > { %8729 = vmatprep.mubr.msk.f32.mxu0 %vm757_vm1, %v11914_v56 }
 0x1b0   : > { %8730 = vmatmul.mubr.msk.f32.gmra.mrb[20].mxu0 %vm757_vm1, %v11907_v53 }
 0x1b1   : > { %8732 = vmatprep.mubr.msk.f32.mxu0 %vm757_vm1, %v11928_v63  ;;  %9776 = vmatpush3.bf16.xpose.msk.msra.mxu0 %vm12066_vm2, %v9771_v50  ;;  %v10471_v50 = vunpack.i.h.bf16 %v10469_v23  ;;  %v10480_v23 = vunpack.i.l.bf16 %v10479_v39 }
 0x1b2   : > { %9779 = vmatprep.subr.msk.bf16.mxu0 %vm12066_vm2, %v9777_v19 }
 0x1b3   : > { %v9789_v45 = vpack.c.bf16 %v10471_v50, %v10470_v15  ;;  %v12229_v50 = vpack.c.bf16 %v11936_v1, %v11916_v57  ;;  %v1277_v57 = vpop.permute.xlu0 %1276  ;;  %v12245_v1 = vpack.c.bf16 %v12088_v61, %v11996_v26  ;;  %v12259_v26 = vpack.c.bf16 %v12122_v54, %v12118_v24 }
 0x1b4   : > { %8733 = vmatmul.mubr.msk.f32.gmra.mrb[22].mxu0 %vm757_vm1, %v11923_v60  ;;  %v9761_v54 = vpack.c.bf16 %v12150_v58, %v12144_v31 }
 0x1b5   : > { %8735 = vmatprep.mubr.msk.f32.mxu0 %vm757_vm1, %v11952_v9  ;;  %16895 = vst [vmem:[#allocation37_spill] sm:$0xff] %v12229_v50  ;;  %16897 = vst [vmem:[#allocation39_spill] sm:$0xff] %v12245_v1 }
 0x1b6   : > { %16899 = vst [vmem:[#allocation41_spill] sm:$0xff] %v12259_v26  ;;  %9762 = vmatprep.subr.bf16.mxu1 %v9761_v54 }
 0x1b7   : > { %9764 = vmatpush3.bf16.msra.mxu1 %v9761_v54 }
 0x1b8   : > { %8736 = vmatmul.mubr.msk.f32.gmra.mrb[24].mxu0 %vm757_vm1, %v11947_v5 }
 0x1b9   : > { %8738 = vmatprep.mubr.msk.f32.mxu0 %vm757_vm1, %v11968_v16  ;;  %9782 = vmatpush3.bf16.xpose.msk.msra.mxu0 %vm12066_vm2, %v9777_v19  ;;  %v10475_v19 = vunpack.i.l.bf16 %v10474_v46  ;;  %v10485_v46 = vunpack.i.l.bf16 %v10484_v41 }
 0x1ba   : > { %9785 = vmatprep.subr.msk.bf16.mxu0 %vm12066_vm2, %v9783_v3 }
 0x1bb   : > { %v9795_v7 = vpack.c.bf16 %v10476_v27, %v10475_v19  ;;  %v9807_v27 = vpack.c.bf16 %v10486_v49, %v10485_v46 }
 0x1bc   : > { %8739 = vmatmul.mubr.msk.f32.gmra.mrb[26].mxu0 %vm757_vm1, %v11963_v13 }
 0x1bd   : > { %8741 = vmatprep.mubr.msk.f32.mxu0 %vm757_vm1, %v11992_v25 }
 0x1c0   : > { %8742 = vmatmul.mubr.msk.f32.gmra.mrb[28].mxu0 %vm757_vm1, %v11987_v22 }
 0x1c1   : > { %8744 = vmatprep.mubr.msk.f32.mxu0 %vm757_vm1, %v12008_v32  ;;  %9788 = vmatpush3.bf16.xpose.msk.msra.mxu0 %vm12066_vm2, %v9783_v3  ;;  %v10481_v3 = vunpack.i.h.bf16 %v10479_v39  ;;  %v1275_v39 = vpop.permute.xlu1 %1274 }
 0x1c2   : > { %9791 = vmatprep.subr.msk.bf16.mxu0 %vm12066_vm2, %v9789_v45 }
 0x1c3   : > { %v9801_v15 = vpack.c.bf16 %v10481_v3, %v10480_v23 }
 0x1c4   : > { %8745 = vmatmul.mubr.msk.f32.gmra.mrb[30].mxu0 %vm757_vm1, %v12003_v29 }
 0x1c5   : > { %8835 = vmatprep.mubr.msk.f32.mxu0 %vm757_vm1, %v1273_v62  ;;  %v1279_v19 = vpop.permute.xlu1 %1278  ;;  %v1281_v62 = vpop.permute.xlu0 %1280 }
 0x1c9   : > { %9794 = vmatpush3.bf16.xpose.msk.msra.mxu0 %vm12066_vm2, %v9789_v45  ;;  %v12237_v45 = vpack.c.bf16 %v11976_v18, %v11956_v10  ;;  %v1283_v10 = vpop.permute.xlu1 %1282  ;;  %v12251_v18 = vpack.c.bf16 %v12108_v36, %v12096_v20  ;;  %v12267_v36 = vpack.c.bf16 %v12138_v8, %v12130_v11  ;;  %v12277_v11 = vpack.c.bf16 %v12158_v38, %v12148_v6  ;;  %v12288_v6 = vld [vmem:[%s16642_s4 + $0x8] sm:$0xff]  ;;  %v12293_v38 = vld [vmem:[%s16642_s4] sm:$0xff] }
 0x1ca   : > { %9797 = vmatprep.subr.msk.bf16.mxu0 %vm12066_vm2, %v9795_v7 }
 0x1cb   : > { %16896 = vst [vmem:[#allocation38_spill] sm:$0xff] %v12237_v45  ;;  %16898 = vst [vmem:[#allocation40_spill] sm:$0xff] %v12251_v18 }
 0x1cc   : > { %16900 = vst [vmem:[#allocation42_spill] sm:$0xff] %v12267_v36  ;;  %16901 = vst [vmem:[#allocation43_spill] sm:$0xff] %v12277_v11  ;;  %v703_v11 = vld [vmem:[%s16642_s4 + $0x50] sm:$0xff] }
 0x1cd   : > { %v1287_v3 = vpop.permute.xlu1 %1286 }
 0x1d1   : > { %9800 = vmatpush3.bf16.xpose.msk.msra.mxu0 %vm12066_vm2, %v9795_v7  ;;  %v1285_v7 = vpop.permute.xlu0 %1284  ;;  %v1291_v23 = vpop.permute.xlu1 %1290 }
 0x1d2   : > { %9803 = vmatprep.subr.msk.bf16.mxu0 %vm12066_vm2, %v9801_v15 }
 0x1d5   : > { %v1289_v61 = vpop.permute.xlu0 %1288 }
 0x1d9   : > { %9806 = vmatpush3.bf16.xpose.msk.msra.mxu0 %vm12066_vm2, %v9801_v15  ;;  %v1293_v20 = vpop.permute.xlu0 %1292  ;;  %v1295_v15 = vpop.permute.xlu1 %1294 }
 0x1da   : > { %9809 = vmatprep.subr.msk.bf16.mxu0 %vm12066_vm2, %v9807_v27 }
 0x1dd   : > { %v1297_v24 = vpop.permute.xlu0 %1296  ;;  %v1299_v41 = vpop.permute.xlu1 %1298 }
 0x1e1   : > { %9812 = vmatpush3.bf16.xpose.msk.msra.mxu0 %vm12066_vm2, %v9807_v27  ;;  %v1301_v8 = vpop.permute.xlu0 %1300  ;;  %v1303_v49 = vpop.permute.xlu1 %1302 }
 0x1e5   : > { %v10489_v58 = vpop.permute.xlu1 %10488 }
 0x1e6   : > { %v10491_v31 = vunpack.i.h.bf16 %v10489_v58  ;;  %v10490_v46 = vunpack.i.l.bf16 %v10489_v58 }
 0x1e8   : > { %8836 = vmatmul.mubr.msk.f32.vlgmr.msra.gmra.mrb[32].mxu0 %vm757_vm1, %v1275_v39  ;;  %v12282_v27 = vpack.c.bf16 %v10491_v31, %v10490_v46 }
 0x1e9   : > { %8838 = vmatprep.mubr.msk.f32.mxu0 %vm757_vm1, %v1277_v57 }
 0x1ea   : > { %9814 = vmatprep.subr.bf16.mxu1 %v12282_v27 }
 0x1ec   : > { %8839 = vmatmul.mubr.msk.f32.gmra.mrb[34].mxu0 %vm757_vm1, %v1279_v19 }
 0x1ed   : > { %8841 = vmatprep.mubr.msk.f32.mxu0 %vm757_vm1, %v1281_v62 }
 0x1f0   : > { %8842 = vmatmul.mubr.msk.f32.gmra.mrb[36].mxu0 %vm757_vm1, %v1283_v10  ;;  %v12304_v10 = vld [vmem:[%s16642_s4 + $0x18] sm:$0xff] }
 0x1f1   : > { %8844 = vmatprep.mubr.msk.f32.mxu0 %vm757_vm1, %v1285_v7 }
 0x1f4   : > { %8845 = vmatmul.mubr.msk.f32.gmra.mrb[38].mxu0 %vm757_vm1, %v1287_v3 }
 0x1f5   : > { %8847 = vmatprep.mubr.msk.f32.mxu0 %vm757_vm1, %v1289_v61 }
 0x1f8   : > { %8848 = vmatmul.mubr.msk.f32.gmra.mrb[40].mxu0 %vm757_vm1, %v1291_v23  ;;  %v12314_v23 = vld [vmem:[%s16642_s4 + $0x10] sm:$0xff] }
 0x1f9   : > { %8850 = vmatprep.mubr.msk.f32.mxu0 %vm757_vm1, %v1293_v20  ;;  %v12319_v20 = vld [vmem:[%s16642_s4 + $0x20] sm:$0xff] }
 0x1fc   : > { %8851 = vmatmul.mubr.msk.f32.gmra.mrb[42].mxu0 %vm757_vm1, %v1295_v15 }
 0x1fd   : > { %8853 = vmatprep.mubr.msk.f32.mxu0 %vm757_vm1, %v1297_v24 }
 0x200   : > { %8854 = vmatmul.mubr.msk.f32.gmra.mrb[44].mxu0 %vm757_vm1, %v1299_v41 }
 0x201   : > { %8856 = vmatprep.mubr.msk.f32.mxu0 %vm757_vm1, %v1301_v8  ;;  %v12331_v8 = vld [vmem:[%s16642_s4 + $0x28] sm:$0xff] }
 0x204   : > { %8857 = vmatmul.mubr.msk.f32.gmra.mrb[46].mxu0 %vm757_vm1, %v1303_v49  ;;  %v12336_v49 = vld [vmem:[%s16642_s4 + $0x30] sm:$0xff] }
 0x27b   : > { %v8725_v39 = vpop.f32.mrb[16].mxu0 }
 0x27c   : > { %v12296_v57 = vadd.f32 %v8725_v39, %v12288_v6  ;;  %v888_v19 = vpop.f32.mrb[17].mxu0 }
 0x27d   : > { %v12299_v62 = vadd.f32 %v888_v19, %v12293_v38  ;;  %v700_v19 = vld [vmem:[%s16642_s4 + $0x38] sm:$0xff] }
 0x27e   : > { %969 = vmax.xlane.f32.xlu1 %v12296_v57 }
 0x27f   : > { %v8728_v7 = vpop.f32.mrb[18].mxu0  ;;  %967 = vmax.xlane.f32.xlu0 %v12299_v62 }
 0x280   : > { %v12309_v3 = vadd.f32 %v8728_v7, %v12304_v10  ;;  %v898_v61 = vpop.f32.mrb[19].mxu0  ;;  %v12352_v7 = vld [vmem:[%s16642_s4 + $0x40] sm:$0xff] }
 0x281   : > { %v12323_v54 = vadd.f32 %v898_v61, %v12314_v23 }
 0x283   : > { %v8731_v15 = vpop.f32.mrb[20].mxu0  ;;  %973 = vmax.xlane.f32.xlu0 %v12309_v3 }
 0x284   : > { %v908_v24 = vpop.f32.mrb[21].mxu0  ;;  %v12341_v46 = vadd.f32 %v8731_v15, %v12331_v8 }
 0x285   : > { %v12326_v41 = vadd.f32 %v908_v24, %v12319_v20 }
 0x287   : > { %v8734_v58 = vpop.f32.mrb[22].mxu0  ;;  %975 = vmax.xlane.f32.xlu1 %v12326_v41  ;;  %971 = vmax.xlane.f32.xlu0 %v12323_v54 }
 0x288   : > { %v918_v31 = vpop.f32.mrb[23].mxu0  ;;  %v12356_v15 = vadd.f32 %v8734_v58, %v700_v19 }
 0x289   : > { %v12344_v39 = vadd.f32 %v918_v31, %v12336_v49 }
 0x28b   : > { %v8737_v61 = vpop.f32.mrb[24].mxu0  ;;  %979 = vmax.xlane.f32.xlu1 %v12344_v39  ;;  %977 = vmax.xlane.f32.xlu0 %v12341_v46 }
 0x28c   : > { %v928_v24 = vpop.f32.mrb[25].mxu0  ;;  %v12369_v18 = vadd.f32 %v8737_v61, %v702_v2  ;;  %v12386_v61 = vld [vmem:[%s16642_s4 + $0x68] sm:$0xff] }
 0x28d   : > { %v12359_v31 = vadd.f32 %v928_v24, %v12352_v7  ;;  %v12376_v24 = vld [vmem:[%s16642_s4 + $0x58] sm:$0xff] }
 0x28f   : > { %v8740_v36 = vpop.f32.mrb[26].mxu0  ;;  %983 = vmax.xlane.f32.xlu1 %v12359_v31  ;;  %981 = vmax.xlane.f32.xlu0 %v12356_v15 }
 0x290   : > { %v938_v26 = vpop.f32.mrb[27].mxu0  ;;  %v12381_v50 = vadd.f32 %v8740_v36, %v12376_v24 }
 0x291   : > { %v12371_v58 = vadd.f32 %v938_v26, %v703_v11  ;;  %v12391_v26 = vld [vmem:[%s16642_s4 + $0x70] sm:$0xff] }
 0x293   : > { %v8743_v1 = vpop.f32.mrb[28].mxu0  ;;  %987 = vmax.xlane.f32.xlu1 %v12371_v58  ;;  %985 = vmax.xlane.f32.xlu0 %v12369_v18 }
 0x294   : > { %v948_v45 = vpop.f32.mrb[29].mxu0  ;;  %v12395_v59 = vadd.f32 %v8743_v1, %v12386_v61 }
 0x295   : > { %v12405_v42 = vadd.f32 %v948_v45, %v705_v51 }
 0x297   : > { %v8746_v14 = vpop.f32.mrb[30].mxu0  ;;  %989 = vmax.xlane.f32.xlu0 %v12381_v50 }
 0x298   : > { %v958_v12 = vpop.f32.mrb[31].mxu0  ;;  %v12411_v1 = vadd.f32 %v8746_v14, %v708_v55 }
 0x299   : > { %v12398_v36 = vadd.f32 %v958_v12, %v12391_v26 }
 0x29a   : > { %16902 = vst [vmem:[#allocation44_spill] sm:$0xff] %v12411_v1 }
 0x29b   : > { %995 = vmax.xlane.f32.xlu1 %v12398_v36  ;;  %993 = vmax.xlane.f32.xlu0 %v12395_v59 }
 0x29f   : > { %991 = vmax.xlane.f32.xlu0 %v12405_v42 }
 0x2a3   : > { %997 = vmax.xlane.f32.xlu0 %v12411_v1 }
 0x2ac   : > { %10553 = vrot.lane.b32.xlu1 %v11984_v21, %s11684_s21 }
 0x2bb   : > { %v8837_v12 = vpop.f32.mrb[32].mxu0 }
 0x2bc   : > { %v12417_v33 = vadd.f32 %v8837_v12, %v12288_v6  ;;  %v1466_v17 = vpop.f32.mrb[33].mxu0 }
 0x2bd   : > { %v12421_v48 = vadd.f32 %v1466_v17, %v12293_v38 }
 0x2be   : > { %16903 = vst [vmem:[#allocation45_spill] sm:$0xff] %v12417_v33  ;;  %1547 = vmax.xlane.f32.xlu0 %v12417_v33 }
 0x2bf   : > { %v8840_v45 = vpop.f32.mrb[34].mxu0  ;;  %16904 = vst [vmem:[#allocation46_spill] sm:$0xff] %v12421_v48 }
 0x2c0   : > { %v1476_v32 = vpop.f32.mrb[35].mxu0 }
 0x2c1   : > { %v12425_v4 = vadd.f32 %v1476_v32, %v12314_v23 }
 0x2c2   : > { %1545 = vmax.xlane.f32.xlu0 %v12421_v48 }
 0x2c3   : > { %v8843_v14 = vpop.f32.mrb[36].mxu0 }
 0x2c4   : > { %v1486_v43 = vpop.f32.mrb[37].mxu0 }
 0x2c5   : > { %v12429_v33 = vadd.f32 %v1486_v43, %v12319_v20  ;;  %v12451_v20 = vpop.permute.xlu1 %10498 }
 0x2c7   : > { %v8846_v25 = vpop.f32.mrb[38].mxu0 }
 0x2c8   : > { %v1496_v16 = vpop.f32.mrb[39].mxu0  ;;  %v12432_v48 = vadd.f32 %v8846_v25, %v700_v19 }
 0x2c9   : > { %v12438_v32 = vadd.f32 %v1496_v16, %v12336_v49 }
 0x2cb   : > { %v8849_v9 = vpop.f32.mrb[40].mxu0 }
 0x2cc   : > { %v1506_v21 = vpop.f32.mrb[41].mxu0  ;;  %v12441_v43 = vadd.f32 %v8849_v9, %v702_v2  ;;  %v12458_v2 = vpop.permute.xlu1 %10503 }
 0x2cd   : > { %v12445_v23 = vadd.f32 %v1506_v21, %v12352_v7  ;;  %v12461_v9 = vpop.permute.xlu0 %10493 }
 0x2cf   : > { %v8852_v6 = vpop.f32.mrb[42].mxu0 }
 0x2d0   : > { %v1516_v12 = vpop.f32.mrb[43].mxu0  ;;  %1549 = vmax.xlane.f32.xlu1 %v12425_v4  ;;  %v12463_v21 = vpop.permute.xlu1 %10508  ;;  %v12478_v7 = vadd.f32 %v8852_v6, %v12376_v24 }
 0x2d1   : > { %v12448_v25 = vadd.f32 %v1516_v12, %v703_v11  ;;  %v12466_v11 = vadd.f32 %v8840_v45, %v12304_v10  ;;  %v12469_v49 = vpop.permute.xlu0 %10513 }
 0x2d3   : > { %v8855_v17 = vpop.f32.mrb[44].mxu0 }
 0x2d4   : > { %v1526_v38 = vpop.f32.mrb[45].mxu0  ;;  %1553 = vmax.xlane.f32.xlu1 %v12429_v33  ;;  %v12486_v10 = vadd.f32 %v8855_v17, %v12386_v61 }
 0x2d5   : > { %v12453_v19 = vadd.f32 %v1526_v38, %v705_v51  ;;  %v12472_v51 = vadd.f32 %v8843_v14, %v12331_v8 }
 0x2d7   : > { %v8858_v1 = vpop.f32.mrb[46].mxu0 }
 0x2d8   : > { %v1536_v63 = vpop.f32.mrb[47].mxu0  ;;  %1559 = vmax.xlane.f32.xlu1 %v12432_v48  ;;  %10558 = vrot.lane.b32.xlu0 %v12000_v28, %s11684_s21  ;;  %v12456_v16 = vadd.f32 %v8858_v1, %v708_v55  ;;  %v12474_v55 = vpop.permute.xlu1 %10523 }
 0x2d9   : > { %v12480_v1 = vpop.permute.xlu0 %10518  ;;  %v12496_v24 = vadd.f32 %v1536_v63, %v12391_v26 }
 0x2da   : > { %16905 = vst [vmem:[#allocation47_spill] sm:$0xff] %v12456_v16 }
 0x2dc   : > { %1557 = vmax.xlane.f32.xlu1 %v12438_v32  ;;  %v12482_v12 = vpop.permute.xlu1 %10538 }
 0x2dd   : > { %v12493_v45 = vpop.permute.xlu0 %10528 }
 0x2e0   : > { %1563 = vmax.xlane.f32.xlu1 %v12441_v43  ;;  %v12490_v8 = vpop.permute.xlu1 %10543 }
 0x2e1   : > { %v12503_v61 = vpop.permute.xlu0 %10533 }
 0x2e4   : > { %1561 = vmax.xlane.f32.xlu1 %v12445_v23  ;;  %v12500_v14 = vpop.permute.xlu1 %10548 }
 0x2e8   : > { %1565 = vmax.xlane.f32.xlu1 %v12448_v25 }
 0x2ec   : > { %1569 = vmax.xlane.f32.xlu1 %v12453_v19 }
 0x2f0   : > { %1575 = vmax.xlane.f32.xlu1 %v12456_v16 }
 0x2f7   : > { %1551 = vmax.xlane.f32.xlu0 %v12466_v11 }
 0x2fb   : > { %1555 = vmax.xlane.f32.xlu0 %v12472_v51 }
 0x2ff   : > { %1567 = vmax.xlane.f32.xlu0 %v12478_v7 }
 0x301   : > { %1916 = vrot.lane.b32.xlu1 %v11867_v37, %s11685_s22 }
 0x303   : > { %1571 = vmax.xlane.f32.xlu0 %v12486_v10 }
 0x305   : > { %1920 = vrot.lane.b32.xlu1 %v11883_v44, %s11685_s22 }
 0x307   : > { %1573 = vmax.xlane.f32.xlu0 %v12496_v24 }
 0x309   : > { %1924 = vrot.lane.b32.xlu1 %v11907_v53, %s11685_s22 }
 0x30b   : > { %v970_v6 = vpop.xlane.xlu1 %969 }
 0x30c   : > { %v1000_v17 = vsub.f32 %v12296_v57, %v970_v6  ;;  %v968_v38 = vpop.xlane.xlu0 %967 }
 0x30d   : > { %v999_v37 = vsub.f32 %v12299_v62, %v968_v38  ;;  %1928 = vrot.lane.b32.xlu1 %v11923_v60, %s11685_s22 }
 0x30e   : > { %v1017_v63 = vmul.f32 1.442695, %v1000_v17 }
 0x30f   : > { %v1015_v26 = vmul.f32 1.442695, %v999_v37 }
 0x310   : > { %v974_v44 = vpop.xlane.xlu0 %973 }
 0x311   : > { %10967 = vpow2.f32 %v1015_v26  ;;  %1932 = vrot.lane.b32.xlu1 %v11947_v5, %s11685_s22  ;;  %v1002_v28 = vsub.f32 %v12309_v3, %v974_v44  ;;  %v10496_v44 = vunpack.i.h.bf16 %v12461_v9 }
 0x312   : > { %10969 = vpow2.f32 %v1017_v63 }
 0x313   : > { %v1021_v62 = vmul.f32 1.442695, %v1002_v28 }
 0x314   : > { %v976_v53 = vpop.xlane.xlu1 %975  ;;  %v972_v16 = vpop.xlane.xlu0 %971 }
 0x315   : > { %v1003_v57 = vsub.f32 %v12326_v41, %v976_v53  ;;  %v1001_v6 = vsub.f32 %v12323_v54, %v972_v16  ;;  %1936 = vrot.lane.b32.xlu1 %v11963_v13, %s11685_s22  ;;  %v10495_v53 = vunpack.i.l.bf16 %v12461_v9  ;;  %v10501_v9 = vunpack.i.h.bf16 %v12451_v20 }
 0x317   : > { %v1019_v17 = vmul.f32 1.442695, %v1001_v6  ;;  %v1023_v37 = vmul.f32 1.442695, %v1003_v57  ;;  %v9817_v6 = vpack.c.bf16 %v10496_v44, %v10495_v53 }
 0x318   : > { %v980_v38 = vpop.xlane.xlu1 %979  ;;  %v978_v26 = vpop.xlane.xlu0 %977 }
 0x319   : > { %v1005_v60 = vsub.f32 %v12344_v39, %v980_v38  ;;  %v1004_v63 = vsub.f32 %v12341_v46, %v978_v26  ;;  %1940 = vrot.lane.b32.xlu1 %v11987_v22, %s11685_s22  ;;  %10971 = vpow2.f32 %v1019_v17 }
 0x31a   : > { %10973 = vpow2.f32 %v1021_v62 }
 0x31b   : > { %v12524_v3 = vpop.eup %10967  ;;  %v1025_v28 = vmul.f32 1.442695, %v1004_v63  ;;  %10975 = vpow2.f32 %v1023_v37  ;;  %v1027_v54 = vmul.f32 1.442695, %v1005_v60  ;;  %v10500_v60 = vunpack.i.l.bf16 %v12451_v20 }
 0x31c   : > { %16906 = vst [vmem:[#allocation48_spill] sm:$0xff] %v12524_v3  ;;  %v984_v41 = vpop.xlane.xlu1 %983  ;;  %8779 = vmatprep.mubr.f32.mxu1 %v12524_v3  ;;  %v982_v39 = vpop.xlane.xlu0 %981  ;;  %v10506_v20 = vunpack.i.h.bf16 %v12458_v2  ;;  %v12982_v3 = vld [vmem:[%s16642_s4 + $0x78] sm:$0xff] }
 0x31d   : > { %v12527_v16 = vpop.eup %10969  ;;  %v1007_v46 = vsub.f32 %v12359_v31, %v984_v41  ;;  %v1006_v57 = vsub.f32 %v12356_v15, %v982_v39  ;;  %1944 = vrot.lane.b32.xlu1 %v12003_v29, %s11685_s22  ;;  %10563 = vrot.lane.b32.xlu0 %v12018_v34, %s11684_s21  ;;  %10977 = vpow2.f32 %v1025_v28  ;;  %s11686_s21 = smov 64   ;;  %v9821_v26 = vpack.c.bf16 %v10501_v9, %v10500_v60 }
 0x31e   : > { %16907 = vst [vmem:[#allocation49_spill] sm:$0xff] %v12527_v16  ;;  %8780 = vmatmul.mubr.f32.vlgmr.msra.gmra.mrb[32].mxu1 %v12527_v16  ;;  %10979 = vpow2.f32 %v1027_v54  ;;  %v10536_v54 = vunpack.i.h.bf16 %v12503_v61  ;;  %v10535_v41 = vunpack.i.l.bf16 %v12503_v61  ;;  %v10541_v60 = vunpack.i.h.bf16 %v12482_v12 }
 0x31f   : > { %v1029_v62 = vmul.f32 1.442695, %v1006_v57  ;;  %9816 = vmatpush3.bf16.msra.mxu1 %v12282_v27  ;;  %v1031_v31 = vmul.f32 1.442695, %v1007_v46  ;;  %v10505_v27 = vunpack.i.l.bf16 %v12458_v2 }
 0x320   : > { %9818 = vmatprep.subr.bf16.mxu1 %v9817_v6  ;;  %v988_v15 = vpop.xlane.xlu1 %987  ;;  %v986_v17 = vpop.xlane.xlu0 %985 }
 0x321   : > { %v1009_v37 = vsub.f32 %v12371_v58, %v988_v15  ;;  %v1008_v38 = vsub.f32 %v12369_v18, %v986_v17  ;;  %10573 = vrot.lane.b32.xlu1 %v11934_v0, %s11686_s21  ;;  %1914 = vrot.lane.b32.xlu0 %v11872_v40, %s11685_s22  ;;  %10981 = vpow2.f32 %v1029_v62  ;;  %v9825_v39 = vpack.c.bf16 %v10506_v20, %v10505_v27 }
 0x322   : > { %10983 = vpow2.f32 %v1031_v31  ;;  %v9829_v31 = vpack.c.bf16 %v10536_v54, %v10535_v41  ;;  %v10545_v20 = vunpack.i.l.bf16 %v12490_v8 }
 0x323   : > { %v1033_v63 = vmul.f32 1.442695, %v1008_v38  ;;  %9820 = vmatpush3.bf16.msra.mxu1 %v9817_v6  ;;  %v12547_v44 = vpop.eup %10971  ;;  %v1035_v58 = vmul.f32 1.442695, %v1009_v37  ;;  %v10540_v6 = vunpack.i.l.bf16 %v12482_v12  ;;  %v10546_v12 = vunpack.i.h.bf16 %v12490_v8  ;;  %v16918_v8 = vld [vmem:[#allocation13_spill] sm:$0xff] }
 0x324   : > { %16908 = vst [vmem:[#allocation50_spill] sm:$0xff] %v12547_v44  ;;  %9822 = vmatprep.subr.bf16.mxu1 %v9821_v26  ;;  %v990_v18 = vpop.xlane.xlu0 %989  ;;  %v12549_v53 = vpop.eup %10973  ;;  %8782 = vmatprep.mubr.f32.mxu1 %v12547_v44 }
 0x325   : > { %16909 = vst [vmem:[#allocation51_spill] sm:$0xff] %v12549_v53  ;;  %v1010_v28 = vsub.f32 %v12381_v50, %v990_v18  ;;  %10588 = vrot.lane.b32.xlu1 %v12106_v35, %s11686_s21  ;;  %v12555_v2 = vpop.eup %10975  ;;  %10985 = vpow2.f32 %v1033_v63  ;;  %1918 = vrot.lane.b32.xlu0 %v11890_v47, %s11685_s22 }
 0x326   : > { %16910 = vst [vmem:[#allocation52_spill] sm:$0xff] %v12555_v2  ;;  %8783 = vmatmul.mubr.f32.gmra.mrb[34].mxu1 %v12549_v53  ;;  %10987 = vpow2.f32 %v1035_v58 }
 0x327   : > { %v1037_v46 = vmul.f32 1.442695, %v1010_v28  ;;  %9824 = vmatpush3.bf16.msra.mxu1 %v9821_v26  ;;  %8785 = vmatprep.mubr.f32.mxu1 %v12555_v2  ;;  %v12563_v50 = vpop.eup %10977  ;;  %v9833_v26 = vpack.c.bf16 %v10541_v60, %v10540_v6  ;;  %v16917_v28 = vld [vmem:[#allocation44_spill] sm:$0xff] }
 0x328   : > { %16911 = vst [vmem:[#allocation53_spill] sm:$0xff] %v12563_v50  ;;  %9826 = vmatprep.subr.bf16.mxu1 %v9825_v39  ;;  %v996_v57 = vpop.xlane.xlu1 %995  ;;  %v994_v9 = vpop.xlane.xlu0 %993 }
 0x329   : > { %10989 = vpow2.f32 %v1037_v46  ;;  %10593 = vrot.lane.b32.xlu1 %v12120_v52, %s11686_s21  ;;  %v12567_v61 = vpop.eup %10979  ;;  %v1012_v62 = vsub.f32 %v12395_v59, %v994_v9  ;;  %1922 = vrot.lane.b32.xlu0 %v11914_v56, %s11685_s22  ;;  %v1013_v15 = vsub.f32 %v12398_v36, %v996_v57  ;;  %v16915_v36 = vld [vmem:[#allocation11_spill] sm:$0xff]  ;;  %v10550_v46 = vunpack.i.l.bf16 %v12500_v14 }
 0x32a   : > { %16912 = vst [vmem:[#allocation54_spill] sm:$0xff] %v12567_v61  ;;  %8786 = vmatmul.mubr.f32.gmra.mrb[36].mxu1 %v12563_v50  ;;  %v16920_v57 = vld [vmem:[#allocation15_spill] sm:$0xff]  ;;  %v9837_v9 = vpack.c.bf16 %v10546_v12, %v10545_v20 }
 0x32b   : > { %9828 = vmatpush3.bf16.msra.mxu1 %v9825_v39  ;;  %8788 = vmatprep.mubr.f32.mxu1 %v12567_v61  ;;  %v12577_v17 = vpop.eup %10981  ;;  %v1041_v27 = vmul.f32 1.442695, %v1012_v62  ;;  %v1043_v63 = vmul.f32 1.442695, %v1013_v15  ;;  %v10551_v39 = vunpack.i.h.bf16 %v12500_v14  ;;  %v10511_v62 = vunpack.i.h.bf16 %v12463_v21 }
 0x32c   : > { %16913 = vst [vmem:[#allocation55_spill] sm:$0xff] %v12577_v17  ;;  %9830 = vmatprep.subr.bf16.mxu1 %v9829_v31  ;;  %v992_v37 = vpop.xlane.xlu0 %991  ;;  %v12582_v59 = vpop.eup %10983  ;;  %v10510_v14 = vunpack.i.l.bf16 %v12463_v21 }
 0x32d   : > { %v1011_v38 = vsub.f32 %v12405_v42, %v992_v37  ;;  %10603 = vrot.lane.b32.xlu1 %v12156_v30, %s11686_s21  ;;  %16914 = vst [vmem:[#allocation56_spill] sm:$0xff] %v12582_v59  ;;  %1926 = vrot.lane.b32.xlu0 %v16915_v36, %s11685_s22  ;;  %v9841_v15 = vpack.c.bf16 %v10551_v39, %v10550_v46  ;;  %v16933_v39 = vld [vmem:[#allocation45_spill] sm:$0xff] }
 0x32e   : > { %8789 = vmatmul.mubr.f32.gmra.mrb[38].mxu1 %v12577_v17  ;;  %v9845_v37 = vpack.c.bf16 %v10511_v62, %v10510_v14  ;;  %v16935_v62 = vld [vmem:[#allocation46_spill] sm:$0xff] }
 0x32f   : > { %v1039_v58 = vmul.f32 1.442695, %v1011_v38  ;;  %9832 = vmatpush3.bf16.msra.mxu1 %v9829_v31  ;;  %8791 = vmatprep.mubr.f32.mxu1 %v12582_v59  ;;  %v12590_v42 = vpop.eup %10985  ;;  %v16922_v31 = vld [vmem:[#allocation18_spill] sm:$0xff]  ;;  %v16923_v38 = vld [vmem:[#allocation23_spill] sm:$0xff] }
 0x330   : > { %16916 = vst [vmem:[#allocation11_spill] sm:$0xff] %v12590_v42  ;;  %9834 = vmatprep.subr.bf16.mxu1 %v9833_v26  ;;  %v998_v18 = vpop.xlane.xlu0 %997  ;;  %v12595_v41 = vpop.eup %10987 }
 0x331   : > { %10991 = vpow2.f32 %v1039_v58  ;;  %v1014_v54 = vsub.f32 %v16917_v28, %v998_v18  ;;  %10623 = vrot.lane.b32.xlu1 %v16918_v8, %s11687_s23  ;;  %16919 = vst [vmem:[#allocation44_spill] sm:$0xff] %v12595_v41  ;;  %1930 = vrot.lane.b32.xlu0 %v16920_v57, %s11685_s22  ;;  %v16930_v58 = vld [vmem:[#allocation5_spill] sm:$0xff]  ;;  %v16931_v18 = vld [vmem:[#allocation19_spill] sm:$0xff] }
 0x332   : > { %10993 = vpow2.f32 %v1041_v27  ;;  %8792 = vmatmul.mubr.f32.gmra.mrb[40].mxu1 %v12590_v42  ;;  %v16932_v28 = vld [vmem:[#allocation27_spill] sm:$0xff] }
 0x333   : > { %v12602_v60 = vpop.eup %10989  ;;  %10995 = vpow2.f32 %v1043_v63  ;;  %v1045_v6 = vmul.f32 1.442695, %v1014_v54  ;;  %9836 = vmatpush3.bf16.msra.mxu1 %v9833_v26  ;;  %8794 = vmatprep.mubr.f32.mxu1 %v12595_v41  ;;  %v16928_v26 = vld [vmem:[#allocation26_spill] sm:$0xff] }
 0x334   : > { %16921 = vst [vmem:[#allocation15_spill] sm:$0xff] %v12602_v60  ;;  %9838 = vmatprep.subr.bf16.mxu1 %v9837_v9 }
 0x335   : > { %10997 = vpow2.f32 %v1045_v6  ;;  %1934 = vrot.lane.b32.xlu0 %v16922_v31, %s11685_s22 }
 0x336   : > { %8795 = vmatmul.mubr.f32.gmra.mrb[42].mxu1 %v12602_v60  ;;  %v16938_v60 = vld [vmem:[#allocation9_spill] sm:$0xff] }
 0x337   : > { %9840 = vmatpush3.bf16.msra.mxu1 %v9837_v9  ;;  %v16934_v9 = vld [vmem:[#allocation33_spill] sm:$0xff] }
 0x338   : > { %9842 = vmatprep.subr.bf16.mxu1 %v9841_v15 }
 0x339   : > { %1938 = vrot.lane.b32.xlu0 %v16923_v38, %s11685_s22 }
 0x33b   : > { %v12612_v12 = vpop.eup %10991  ;;  %9844 = vmatpush3.bf16.msra.mxu1 %v9841_v15 }
 0x33c   : > { %16924 = vst [vmem:[#allocation57_spill] sm:$0xff] %v12612_v12  ;;  %v12614_v20 = vpop.eup %10993  ;;  %9847 = vmatprep.subr.msk.bf16.mxu1 %vm12066_vm2, %v9845_v37  ;;  %8797 = vmatprep.mubr.f32.mxu1 %v12612_v12  ;;  %v10554_v12 = vpop.permute.xlu1 %10553 }
 0x33d   : > { %16925 = vst [vmem:[#allocation58_spill] sm:$0xff] %v12614_v20  ;;  %v12619_v21 = vpop.eup %10995  ;;  %8798 = vmatmul.mubr.f32.gmra.mrb[44].mxu1 %v12614_v20  ;;  %1942 = vrot.lane.b32.xlu0 %v16928_v26, %s11685_s22  ;;  %v16937_v20 = vld [vmem:[#allocation7_spill] sm:$0xff] }
 0x33e   : > { %16927 = vst [vmem:[#allocation29_spill] sm:$0xff] %v12619_v21  ;;  %8800 = vmatprep.mubr.f32.mxu1 %v12619_v21  ;;  %v16936_v21 = vld [vmem:[#allocation3_spill] sm:$0xff] }
 0x33f   : > { %v12625_v63 = vpop.eup %10997 }
 0x340   : > { %16929 = vst [vmem:[#allocation59_spill] sm:$0xff] %v12625_v63 }
 0x341   : > { %8801 = vmatmul.mubr.f32.gmra.mrb[46].mxu1 %v12625_v63  ;;  %10568 = vrot.lane.b32.xlu0 %v16930_v58, %s11686_s21 }
 0x345   : > { %10578 = vrot.lane.b32.xlu0 %v16931_v18, %s11686_s21 }
 0x349   : > { %10583 = vrot.lane.b32.xlu0 %v16932_v28, %s11686_s21 }
 0x34b   : > { %v1548_v54 = vpop.xlane.xlu0 %1547 }
 0x34c   : > { %v1578_v46 = vsub.f32 %v16933_v39, %v1548_v54  ;;  %v10516_v54 = vunpack.i.h.bf16 %v12469_v49  ;;  %v10515_v39 = vunpack.i.l.bf16 %v12469_v49 }
 0x34d   : > { %10598 = vrot.lane.b32.xlu0 %v16934_v9, %s11686_s21 }
 0x34e   : > { %v1595_v15 = vmul.f32 1.442695, %v1578_v46 }
 0x34f   : > { %v1546_v6 = vpop.xlane.xlu0 %1545 }
 0x350   : > { %v1577_v14 = vsub.f32 %v16935_v62, %v1546_v6  ;;  %v16940_v62 = vld [vmem:[#allocation16_spill] sm:$0xff] }
 0x351   : > { %10608 = vrot.lane.b32.xlu0 %v16936_v21, %s11687_s23 }
 0x352   : > { %v1593_v63 = vmul.f32 1.442695, %v1577_v14  ;;  %v9851_v14 = vpack.c.bf16 %v10516_v54, %v10515_v39 }
 0x353   : > { %v10559_v50 = vpop.permute.xlu0 %10558 }
 0x354   : > { %10999 = vpow2.f32 %v1593_v63 }
 0x355   : > { %11001 = vpow2.f32 %v1595_v15  ;;  %10613 = vrot.lane.b32.xlu0 %v16937_v20, %s11687_s23 }
 0x359   : > { %10618 = vrot.lane.b32.xlu0 %v16938_v60, %s11687_s23 }
 0x35d   : > { %v1550_v41 = vpop.xlane.xlu1 %1549  ;;  %10628 = vrot.lane.b32.xlu0 %v16940_v62, %s11687_s23 }
 0x35e   : > { %v12646_v6 = vpop.eup %10999  ;;  %v1579_v46 = vsub.f32 %v12425_v4, %v1550_v41  ;;  %v10521_v4 = vunpack.i.h.bf16 %v12480_v1  ;;  %v10520_v41 = vunpack.i.l.bf16 %v12480_v1 }
 0x35f   : > { %16939 = vst [vmem:[#allocation5_spill] sm:$0xff] %v12646_v6  ;;  %v12651_v63 = vpop.eup %11001  ;;  %8891 = vmatprep.mubr.f32.mxu1 %v12646_v6  ;;  %v12973_v6 = vld [vmem:[%s16642_s4 + $0x60] sm:$0xff] }
 0x360   : > { %16941 = vst [vmem:[#allocation19_spill] sm:$0xff] %v12651_v63  ;;  %v1597_v15 = vmul.f32 1.442695, %v1579_v46  ;;  %8892 = vmatmul.mubr.f32.vlgmr.msra.gmra.mrb[48].mxu1 %v12651_v63  ;;  %v9857_v59 = vpack.c.bf16 %v10521_v4, %v10520_v41  ;;  %v10525_v46 = vunpack.i.l.bf16 %v12474_v55  ;;  %v10530_v4 = vunpack.i.l.bf16 %v12493_v45  ;;  %v12964_v63 = vld [vmem:[%s16642_s4 + $0x50] sm:$0xff] }
 0x361   : > { %9850 = vmatpush3.bf16.xpose.msk.msra.mxu1 %vm12066_vm2, %v9845_v37  ;;  %v1554_v49 = vpop.xlane.xlu1 %1553  ;;  %v10526_v37 = vunpack.i.h.bf16 %v12474_v55  ;;  %v10556_v55 = vunpack.i.h.bf16 %v10554_v12 }
 0x362   : > { %11003 = vpow2.f32 %v1597_v15  ;;  %9853 = vmatprep.subr.msk.bf16.mxu1 %vm12066_vm2, %v9851_v14  ;;  %v1581_v2 = vsub.f32 %v12429_v33, %v1554_v49 }
 0x363   : > { %v9863_v17 = vpack.c.bf16 %v10526_v37, %v10525_v46  ;;  %v10555_v37 = vunpack.i.l.bf16 %v10554_v12 }
 0x365   : > { %v1560_v42 = vpop.xlane.xlu1 %1559 }
 0x369   : > { %9856 = vmatpush3.bf16.xpose.msk.msra.mxu1 %vm12066_vm2, %v9851_v14  ;;  %v1558_v54 = vpop.xlane.xlu1 %1557  ;;  %v10531_v14 = vunpack.i.h.bf16 %v12493_v45  ;;  %v10561_v45 = vunpack.i.h.bf16 %v10559_v50 }
 0x36a   : > { %9859 = vmatprep.subr.msk.bf16.mxu1 %vm12066_vm2, %v9857_v59  ;;  %v1583_v12 = vsub.f32 %v12438_v32, %v1558_v54 }
 0x36b   : > { %v9869_v41 = vpack.c.bf16 %v10531_v14, %v10530_v4  ;;  %v10560_v14 = vunpack.i.l.bf16 %v10559_v50 }
 0x36c   : > { %v12665_v39 = vpop.eup %11003  ;;  %v1605_v50 = vmul.f32 1.442695, %v1583_v12 }
 0x36d   : > { %16942 = vst [vmem:[#allocation27_spill] sm:$0xff] %v12665_v39  ;;  %v1564_v15 = vpop.xlane.xlu1 %1563  ;;  %8894 = vmatprep.mubr.f32.mxu1 %v12665_v39  ;;  %v1601_v39 = vmul.f32 1.442695, %v1581_v2 }
 0x371   : > { %9862 = vmatpush3.bf16.xpose.msk.msra.mxu1 %vm12066_vm2, %v9857_v59  ;;  %v1562_v1 = vpop.xlane.xlu1 %1561  ;;  %v9875_v59 = vpack.c.bf16 %v10556_v55, %v10555_v37  ;;  %v9881_v37 = vpack.c.bf16 %v10561_v45, %v10560_v14 }
 0x372   : > { %9865 = vmatprep.subr.msk.bf16.mxu1 %vm12066_vm2, %v9863_v17  ;;  %v1585_v49 = vsub.f32 %v12445_v23, %v1562_v1 }
 0x374   : > { %v1609_v2 = vmul.f32 1.442695, %v1585_v49 }
 0x375   : > { %v1566_v61 = vpop.xlane.xlu1 %1565 }
 0x379   : > { %9868 = vmatpush3.bf16.xpose.msk.msra.mxu1 %vm12066_vm2, %v9863_v17  ;;  %v1570_v46 = vpop.xlane.xlu1 %1569 }
 0x37a   : > { %9871 = vmatprep.subr.msk.bf16.mxu1 %vm12066_vm2, %v9869_v41  ;;  %v1589_v1 = vsub.f32 %v12453_v19, %v1570_v46  ;;  %v16947_v46 = vld [vmem:[#allocation47_spill] sm:$0xff] }
 0x37d   : > { %v12685_v4 = vpop.xlane.xlu1 %1575 }
 0x37e   : > { %v1592_v12 = vsub.f32 %v16947_v46, %v12685_v4 }
 0x381   : > { %9874 = vmatpush3.bf16.xpose.msk.msra.mxu1 %vm12066_vm2, %v9869_v41  ;;  %v1584_v41 = vsub.f32 %v12432_v48, %v1560_v42  ;;  %v12694_v44 = vpop.permute.xlu1 %1916  ;;  %v1586_v48 = vsub.f32 %v12441_v43, %v1564_v15  ;;  %v1587_v42 = vsub.f32 %v12448_v25, %v1566_v61 }
 0x382   : > { %9877 = vmatprep.subr.msk.bf16.mxu1 %vm12066_vm2, %v9875_v59 }
 0x383   : > { %v1611_v23 = vmul.f32 1.442695, %v1586_v48 }
 0x384   : > { %v1552_v17 = vpop.xlane.xlu0 %1551 }
 0x385   : > { %v1580_v53 = vsub.f32 %v12466_v11, %v1552_v17 }
 0x387   : > { %v1599_v55 = vmul.f32 1.442695, %v1580_v53  ;;  %v1607_v53 = vmul.f32 1.442695, %v1584_v41 }
 0x388   : > { %v1556_v16 = vpop.xlane.xlu0 %1555 }
 0x389   : > { %11005 = vpow2.f32 %v1599_v55  ;;  %9880 = vmatpush3.bf16.xpose.msk.msra.mxu1 %vm12066_vm2, %v9875_v59  ;;  %v1582_v33 = vsub.f32 %v12472_v51, %v1556_v16  ;;  %v12700_v51 = vpop.permute.xlu1 %1920 }
 0x38a   : > { %11007 = vpow2.f32 %v1601_v39  ;;  %9883 = vmatprep.subr.msk.bf16.mxu1 %vm12066_vm2, %v9881_v37  ;;  %v1613_v39 = vmul.f32 1.442695, %v1587_v42 }
 0x38b   : > { %v1603_v32 = vmul.f32 1.442695, %v1582_v33 }
 0x38c   : > { %v1568_v11 = vpop.xlane.xlu0 %1567 }
 0x38d   : > { %11009 = vpow2.f32 %v1603_v32  ;;  %v1588_v54 = vsub.f32 %v12478_v7, %v1568_v11  ;;  %v1617_v7 = vmul.f32 1.442695, %v1589_v1  ;;  %v1925_v45 = vpop.permute.xlu1 %1924  ;;  %v1623_v11 = vmul.f32 1.442695, %v1592_v12 }
 0x38e   : > { %11011 = vpow2.f32 %v1605_v50 }
 0x38f   : > { %11013 = vpow2.f32 %v1607_v53  ;;  %v1615_v61 = vmul.f32 1.442695, %v1588_v54 }
 0x390   : > { %v1572_v16 = vpop.xlane.xlu0 %1571  ;;  %11015 = vpow2.f32 %v1609_v2 }
 0x391   : > { %9886 = vmatpush3.bf16.xpose.msk.msra.mxu1 %vm12066_vm2, %v9881_v37  ;;  %11017 = vpow2.f32 %v1611_v23  ;;  %v1590_v59 = vsub.f32 %v12486_v10, %v1572_v16  ;;  %v1929_v32 = vpop.permute.xlu1 %1928 }
 0x392   : > { %11019 = vpow2.f32 %v1613_v39 }
 0x393   : > { %v12706_v43 = vpop.eup %11005  ;;  %11021 = vpow2.f32 %v1615_v61  ;;  %v1619_v37 = vmul.f32 1.442695, %v1590_v59 }
 0x394   : > { %16943 = vst [vmem:[#allocation45_spill] sm:$0xff] %v12706_v43  ;;  %v12708_v15 = vpop.eup %11007  ;;  %8895 = vmatmul.mubr.f32.gmra.mrb[50].mxu1 %v12706_v43  ;;  %v1574_v25 = vpop.xlane.xlu0 %1573  ;;  %11023 = vpow2.f32 %v1617_v7  ;;  %v12955_v43 = vld [vmem:[%s16642_s4 + $0x40] sm:$0xff] }
 0x395   : > { %16944 = vst [vmem:[#allocation33_spill] sm:$0xff] %v12708_v15  ;;  %8897 = vmatprep.mubr.f32.mxu1 %v12708_v15  ;;  %v1591_v14 = vsub.f32 %v12496_v24, %v1574_v25  ;;  %11025 = vpow2.f32 %v1619_v37  ;;  %v1933_v42 = vpop.permute.xlu1 %1932  ;;  %v12945_v15 = vld [vmem:[%s16642_s4 + $0x48] sm:$0xff] }
 0x397   : > { %v12714_v17 = vpop.eup %11009  ;;  %v1621_v33 = vmul.f32 1.442695, %v1591_v14 }
 0x398   : > { %16945 = vst [vmem:[#allocation46_spill] sm:$0xff] %v12714_v17  ;;  %v12716_v19 = vpop.eup %11011  ;;  %8898 = vmatmul.mubr.f32.gmra.mrb[52].mxu1 %v12714_v17  ;;  %v10564_v55 = vpop.permute.xlu0 %10563  ;;  %v12937_v17 = vld [vmem:[%s16642_s4 + $0x70] sm:$0xff] }
 0x399   : > { %16946 = vst [vmem:[#allocation3_spill] sm:$0xff] %v12716_v19  ;;  %v10566_v10 = vunpack.i.h.bf16 %v10564_v55  ;;  %v10565_v41 = vunpack.i.l.bf16 %v10564_v55  ;;  %8900 = vmatprep.mubr.f32.mxu1 %v12716_v19  ;;  %v12722_v50 = vpop.eup %11013  ;;  %11027 = vpow2.f32 %v1621_v33  ;;  %v1937_v25 = vpop.permute.xlu1 %1936  ;;  %v12927_v19 = vld [vmem:[%s16642_s4 + $0x30] sm:$0xff] }
 0x39a   : > { %16948 = vst [vmem:[#allocation7_spill] sm:$0xff] %v12722_v50  ;;  %v12724_v49 = vpop.eup %11015  ;;  %11029 = vpow2.f32 %v1623_v11 }
 0x39b   : > { %v9887_v24 = vpack.c.bf16 %v10566_v10, %v10565_v41  ;;  %16949 = vst [vmem:[#allocation9_spill] sm:$0xff] %v12724_v49  ;;  %v12732_v53 = vpop.eup %11017 }
 0x39c   : > { %8901 = vmatmul.mubr.f32.gmra.mrb[54].mxu1 %v12722_v50  ;;  %v1915_v4 = vpop.permute.xlu0 %1914  ;;  %16950 = vst [vmem:[#allocation47_spill] sm:$0xff] %v12732_v53  ;;  %v12734_v48 = vpop.eup %11019  ;;  %v12919_v50 = vld [vmem:[%s16642_s4 + $0x68] sm:$0xff] }
 0x39d   : > { %8903 = vmatprep.mubr.f32.mxu1 %v12724_v49  ;;  %9889 = vmatprep.subr.msk.bf16.mxu1 %vm12066_vm2, %v9887_v24  ;;  %16951 = vst [vmem:[#allocation60_spill] sm:$0xff] %v12734_v48  ;;  %v12738_v16 = vpop.eup %11021  ;;  %v1941_v14 = vpop.permute.xlu1 %1940  ;;  %v12909_v49 = vld [vmem:[%s16642_s4 + $0x38] sm:$0xff] }
 0x39e   : > { %9892 = vmatpush3.bf16.xpose.msk.msra.mxu1 %vm12066_vm2, %v9887_v24  ;;  %16952 = vst [vmem:[#allocation61_spill] sm:$0xff] %v12738_v16  ;;  %v12740_v23 = vpop.eup %11023 }
 0x39f   : > { %16953 = vst [vmem:[#allocation62_spill] sm:$0xff] %v12740_v23  ;;  %v12744_v39 = vpop.eup %11025 }
 0x3a0   : > { %8904 = vmatmul.mubr.f32.gmra.mrb[56].mxu1 %v12732_v53  ;;  %v1919_v2 = vpop.permute.xlu0 %1918  ;;  %16954 = vst [vmem:[#allocation63_spill] sm:$0xff] %v12744_v39  ;;  %v12901_v53 = vld [vmem:[%s16642_s4 + $0x58] sm:$0xff] }
 0x3a1   : > { %8906 = vmatprep.mubr.f32.mxu1 %v12734_v48  ;;  %v1945_v12 = vpop.permute.xlu1 %1944 }
 0x3a3   : > { %v12746_v1 = vpop.eup %11027 }
 0x3a4   : > { %8907 = vmatmul.mubr.f32.gmra.mrb[58].mxu1 %v12738_v16  ;;  %v1923_v54 = vpop.permute.xlu0 %1922  ;;  %16955 = vst [vmem:[#allocation64_spill] sm:$0xff] %v12746_v1  ;;  %v12750_v59 = vpop.eup %11029 }
 0x3a5   : > { %8909 = vmatprep.mubr.f32.mxu1 %v12740_v23  ;;  %16956 = vst [vmem:[#allocation65_spill] sm:$0xff] %v12750_v59  ;;  %v10574_v10 = vpop.permute.xlu1 %10573 }
 0x3a6   : > { %v10576_v33 = vunpack.i.h.bf16 %v10574_v10 }
 0x3a8   : > { %8910 = vmatmul.mubr.f32.gmra.mrb[60].mxu1 %v12744_v39  ;;  %v1927_v61 = vpop.permute.xlu0 %1926 }
 0x3a9   : > { %8912 = vmatprep.mubr.f32.mxu1 %v12746_v1 }
 0x3ac   : > { %8913 = vmatmul.mubr.f32.gmra.mrb[62].mxu1 %v12750_v59  ;;  %v1931_v7 = vpop.permute.xlu0 %1930 }
 0x3ad   : > { %8947 = vmatprep.mubr.msk.f32.mxu1 %vm757_vm1, %v1915_v4 }
 0x3b0   : > { %v1935_v46 = vpop.permute.xlu0 %1934  ;;  %8948 = vmatmul.mubr.msk.f32.vlgmr.msra.gmra.mrb[64].mxu1 %vm757_vm1, %v12694_v44  ;;  %v10575_v44 = vunpack.i.l.bf16 %v10574_v10 }
 0x3b1   : > { %8950 = vmatprep.mubr.msk.f32.mxu1 %vm757_vm1, %v1919_v2 }
 0x3b4   : > { %v1939_v55 = vpop.permute.xlu0 %1938  ;;  %8951 = vmatmul.mubr.msk.f32.gmra.mrb[66].mxu1 %vm757_vm1, %v12700_v51 }
 0x3b5   : > { %8953 = vmatprep.mubr.msk.f32.mxu1 %vm757_vm1, %v1923_v54 }
 0x3b8   : > { %v1943_v37 = vpop.permute.xlu0 %1942  ;;  %8954 = vmatmul.mubr.msk.f32.gmra.mrb[68].mxu1 %vm757_vm1, %v1925_v45  ;;  %v9897_v45 = vpack.c.bf16 %v10576_v33, %v10575_v44 }
 0x3b9   : > { %8956 = vmatprep.mubr.msk.f32.mxu1 %vm757_vm1, %v1927_v61  ;;  %v10589_v61 = vpop.permute.xlu1 %10588 }
 0x3bc   : > { %v10569_v41 = vpop.permute.xlu0 %10568  ;;  %8957 = vmatmul.mubr.msk.f32.gmra.mrb[70].mxu1 %vm757_vm1, %v1929_v32 }
 0x3bd   : > { %v10571_v24 = vunpack.i.h.bf16 %v10569_v41  ;;  %v10570_v4 = vunpack.i.l.bf16 %v10569_v41  ;;  %8959 = vmatprep.mubr.msk.f32.mxu1 %vm757_vm1, %v1931_v7  ;;  %v10594_v33 = vpop.permute.xlu1 %10593 }
 0x3be   : > { %v10595_v44 = vunpack.i.l.bf16 %v10594_v33 }
 0x3bf   : > { %v9893_v11 = vpack.c.bf16 %v10571_v24, %v10570_v4  ;;  %v10590_v24 = vunpack.i.l.bf16 %v10589_v61 }
 0x3c0   : > { %v10579_v2 = vpop.permute.xlu0 %10578  ;;  %8960 = vmatmul.mubr.msk.f32.gmra.mrb[72].mxu1 %vm757_vm1, %v1933_v42  ;;  %v10591_v42 = vunpack.i.h.bf16 %v10589_v61 }
 0x3c1   : > { %v10581_v51 = vunpack.i.h.bf16 %v10579_v2  ;;  %v10580_v54 = vunpack.i.l.bf16 %v10579_v2  ;;  %8962 = vmatprep.mubr.msk.f32.mxu1 %vm757_vm1, %v1935_v46  ;;  %9894 = vmatprep.subr.bf16.mxu0 %v9893_v11 }
 0x3c2   : > { %9896 = vmatpush3.bf16.msra.mxu0 %v9893_v11  ;;  %v9909_v4 = vpack.c.bf16 %v10591_v42, %v10590_v24 }
 0x3c3   : > { %9898 = vmatprep.subr.bf16.mxu0 %v9897_v45  ;;  %v9901_v7 = vpack.c.bf16 %v10581_v51, %v10580_v54 }
 0x3c4   : > { %v10584_v32 = vpop.permute.xlu0 %10583  ;;  %8963 = vmatmul.mubr.msk.f32.gmra.mrb[74].mxu1 %vm757_vm1, %v1937_v25  ;;  %v10596_v25 = vunpack.i.h.bf16 %v10594_v33 }
 0x3c5   : > { %v10586_v10 = vunpack.i.h.bf16 %v10584_v32  ;;  %v10585_v41 = vunpack.i.l.bf16 %v10584_v32  ;;  %8965 = vmatprep.mubr.msk.f32.mxu1 %vm757_vm1, %v1939_v55 }
 0x3c6   : > { %9900 = vmatpush3.bf16.msra.mxu0 %v9897_v45  ;;  %v9913_v51 = vpack.c.bf16 %v10596_v25, %v10595_v44 }
 0x3c7   : > { %9902 = vmatprep.subr.bf16.mxu0 %v9901_v7  ;;  %v9905_v46 = vpack.c.bf16 %v10586_v10, %v10585_v41 }
 0x3c8   : > { %8966 = vmatmul.mubr.msk.f32.gmra.mrb[76].mxu1 %vm757_vm1, %v1941_v14  ;;  %v10599_v11 = vpop.permute.xlu0 %10598  ;;  %v10604_v14 = vpop.permute.xlu1 %10603 }
 0x3c9   : > { %8968 = vmatprep.mubr.msk.f32.mxu1 %vm757_vm1, %v1943_v37  ;;  %v10601_v55 = vunpack.i.h.bf16 %v10599_v11  ;;  %v10600_v2 = vunpack.i.l.bf16 %v10599_v11  ;;  %v10606_v54 = vunpack.i.h.bf16 %v10604_v14  ;;  %v10605_v37 = vunpack.i.l.bf16 %v10604_v14 }
 0x3ca   : > { %9904 = vmatpush3.bf16.msra.mxu0 %v9901_v7 }
 0x3cb   : > { %9906 = vmatprep.subr.bf16.mxu0 %v9905_v46  ;;  %v9917_v45 = vpack.c.bf16 %v10601_v55, %v10600_v2  ;;  %v9921_v10 = vpack.c.bf16 %v10606_v54, %v10605_v37 }
 0x3cc   : > { %8969 = vmatmul.mubr.msk.f32.gmra.mrb[78].mxu1 %vm757_vm1, %v1945_v12  ;;  %v10609_v61 = vpop.permute.xlu0 %10608 }
 0x3cd   : > { %v10611_v32 = vunpack.i.h.bf16 %v10609_v61  ;;  %v10610_v12 = vunpack.i.l.bf16 %v10609_v61 }
 0x3ce   : > { %9908 = vmatpush3.bf16.msra.mxu0 %v9905_v46 }
 0x3cf   : > { %9910 = vmatprep.subr.bf16.mxu0 %v9909_v4  ;;  %v12771_v41 = vpack.c.bf16 %v10611_v32, %v10610_v12 }
 0x3d2   : > { %9912 = vmatpush3.bf16.msra.mxu0 %v9909_v4 }
 0x3d3   : > { %9914 = vmatprep.subr.bf16.mxu0 %v9913_v51 }
 0x3d6   : > { %9916 = vmatpush3.bf16.msra.mxu0 %v9913_v51 }
 0x3d7   : > { %9918 = vmatprep.subr.bf16.mxu0 %v9917_v45 }
 0x3da   : > { %9920 = vmatpush3.bf16.msra.mxu0 %v9917_v45 }
 0x3db   : > { %9922 = vmatprep.subr.bf16.mxu0 %v9921_v10 }
 0x3de   : > { %9924 = vmatpush3.bf16.msra.mxu0 %v9921_v10 }
 0x3df   : > { %9927 = vmatprep.subr.msk.bf16.mxu0 %vm12066_vm2, %v12771_v41 }
 0x3f1   : > { %v12776_v7 = vpop.f32.mrb[32].mxu1 }
 0x3f2   : > { %16957 = vst [vmem:[#allocation66_spill] sm:$0xff] %v12776_v7  ;;  %v12778_v42 = vpop.f32.mrb[33].mxu1  ;;  %v12865_v7 = vld [vmem:[%s16642_s4 + $0x18] sm:$0xff] }
 0x3f3   : > { %16958 = vst [vmem:[#allocation67_spill] sm:$0xff] %v12778_v42  ;;  %v12891_v42 = vld [vmem:[%s16642_s4 + $0x20] sm:$0xff] }
 0x3f9   : > { %v12780_v24 = vpop.f32.mrb[34].mxu1 }
 0x3fa   : > { %16959 = vst [vmem:[#allocation68_spill] sm:$0xff] %v12780_v24  ;;  %v12782_v46 = vpop.f32.mrb[35].mxu1 }
 0x3fb   : > { %16960 = vst [vmem:[#allocation69_spill] sm:$0xff] %v12782_v46  ;;  %v12873_v46 = vld [vmem:[%s16642_s4 + $0x10] sm:$0xff] }
 0x3fd   : > { %v12784_v33 = vpop.f32.mrb[36].mxu1 }
 0x3fe   : > { %16961 = vst [vmem:[#allocation70_spill] sm:$0xff] %v12784_v33  ;;  %v12786_v25 = vpop.f32.mrb[37].mxu1 }
 0x3ff   : > { %16962 = vst [vmem:[#allocation71_spill] sm:$0xff] %v12786_v25 }
 0x401   : > { %v12788_v44 = vpop.f32.mrb[38].mxu1 }
 0x402   : > { %16963 = vst [vmem:[#allocation72_spill] sm:$0xff] %v12788_v44  ;;  %v12790_v4 = vpop.f32.mrb[39].mxu1 }
 0x403   : > { %16964 = vst [vmem:[#allocation73_spill] sm:$0xff] %v12790_v4 }
 0x405   : > { %v12792_v11 = vpop.f32.mrb[40].mxu1 }
 0x406   : > { %16965 = vst [vmem:[#allocation74_spill] sm:$0xff] %v12792_v11  ;;  %v12794_v55 = vpop.f32.mrb[41].mxu1 }
 0x407   : > { %16966 = vst [vmem:[#allocation75_spill] sm:$0xff] %v12794_v55 }
 0x409   : > { %v12796_v2 = vpop.f32.mrb[42].mxu1 }
 0x40a   : > { %16967 = vst [vmem:[#allocation76_spill] sm:$0xff] %v12796_v2  ;;  %v12798_v51 = vpop.f32.mrb[43].mxu1 }
 0x40b   : > { %16968 = vst [vmem:[#allocation77_spill] sm:$0xff] %v12798_v51 }
 0x410   : > { %v12800_v14 = vpop.f32.mrb[44].mxu1 }
 0x411   : > { %16969 = vst [vmem:[#allocation78_spill] sm:$0xff] %v12800_v14  ;;  %v12802_v54 = vpop.f32.mrb[45].mxu1 }
 0x412   : > { %16970 = vst [vmem:[#allocation79_spill] sm:$0xff] %v12802_v54 }
 0x414   : > { %v12804_v37 = vpop.f32.mrb[46].mxu1 }
 0x415   : > { %16971 = vst [vmem:[#allocation80_spill] sm:$0xff] %v12804_v37  ;;  %v12806_v45 = vpop.f32.mrb[47].mxu1 }
 0x416   : > { %16972 = vst [vmem:[#allocation81_spill] sm:$0xff] %v12806_v45 }
 0x433   : > { %v12808_v61 = vpop.f32.mrb[48].mxu1 }
 0x434   : > { %16973 = vst [vmem:[#allocation82_spill] sm:$0xff] %v12808_v61  ;;  %v12810_v32 = vpop.f32.mrb[49].mxu1 }
 0x435   : > { %16974 = vst [vmem:[#allocation83_spill] sm:$0xff] %v12810_v32  ;;  %v12883_v32 = vld [vmem:[%s16642_s4 + $0x28] sm:$0xff] }
 0x467   : > { %v12812_v12 = vpop.f32.mrb[50].mxu1 }
 0x468   : > { %16975 = vst [vmem:[#allocation84_spill] sm:$0xff] %v12812_v12  ;;  %v12814_v10 = vpop.f32.mrb[51].mxu1  ;;  %v16989_v12 = vld [vmem:[#allocation21_spill] sm:$0xff] }
 0x469   : > { %16976 = vst [vmem:[#allocation85_spill] sm:$0xff] %v12814_v10  ;;  %16991 = vst [vmem:[#allocation21_spill] sm:$0xff] %v12973_v6 }
 0x46b   : > { %v12816_v11 = vpop.f32.mrb[52].mxu1 }
 0x46c   : > { %16977 = vst [vmem:[#allocation86_spill] sm:$0xff] %v12816_v11  ;;  %v12818_v2 = vpop.f32.mrb[53].mxu1 }
 0x46d   : > { %16978 = vst [vmem:[#allocation87_spill] sm:$0xff] %v12818_v2 }
 0x46f   : > { %v12820_v51 = vpop.f32.mrb[54].mxu1 }
 0x470   : > { %16979 = vst [vmem:[#allocation88_spill] sm:$0xff] %v12820_v51  ;;  %v12822_v14 = vpop.f32.mrb[55].mxu1  ;;  %v12843_v51 = vld [vmem:[%s16642_s4 + $0x8] sm:$0xff] }
 0x471   : > { %16980 = vst [vmem:[#allocation89_spill] sm:$0xff] %v12822_v14 }
 0x473   : > { %v12824_v54 = vpop.f32.mrb[56].mxu1 }
 0x474   : > { %16981 = vst [vmem:[#allocation90_spill] sm:$0xff] %v12824_v54  ;;  %v12826_v37 = vpop.f32.mrb[57].mxu1 }
 0x475   : > { %16982 = vst [vmem:[#allocation91_spill] sm:$0xff] %v12826_v37 }
 0x477   : > { %v12828_v45 = vpop.f32.mrb[58].mxu1 }
 0x478   : > { %16983 = vst [vmem:[#allocation92_spill] sm:$0xff] %v12828_v45  ;;  %v12830_v55 = vpop.f32.mrb[59].mxu1 }
 0x479   : > { %16984 = vst [vmem:[#allocation93_spill] sm:$0xff] %v12830_v55 }
 0x47b   : > { %v12832_v44 = vpop.f32.mrb[60].mxu1 }
 0x47c   : > { %16985 = vst [vmem:[#allocation94_spill] sm:$0xff] %v12832_v44  ;;  %v12834_v4 = vpop.f32.mrb[61].mxu1  ;;  %v12851_v44 = vld [vmem:[%s16642_s4] sm:$0xff] }
 0x47d   : > { %16986 = vst [vmem:[#allocation95_spill] sm:$0xff] %v12834_v4 }
 0x47f   : > { %v12836_v59 = vpop.f32.mrb[62].mxu1 }
 0x480   : > { %16987 = vst [vmem:[#allocation96_spill] sm:$0xff] %v12836_v59  ;;  %v12838_v11 = vpop.f32.mrb[63].mxu1 }
 0x481   : > { %16988 = vst [vmem:[#allocation97_spill] sm:$0xff] %v12838_v11 }
 0x483   : > { %v8949_v1 = vpop.f32.mrb[64].mxu1 }
 0x484   : > { %v12846_v54 = vadd.f32 %v12843_v51, %v8949_v1  ;;  %v2108_v45 = vpop.f32.mrb[65].mxu1 }
 0x485   : > { %v12854_v4 = vadd.f32 %v12851_v44, %v2108_v45  ;;  %v16990_v45 = vld [vmem:[#allocation24_spill] sm:$0xff] }
 0x486   : > { %2189 = vmax.xlane.f32.xlu0 %v12846_v54 }
 0x487   : > { %v8952_v59 = vpop.f32.mrb[66].mxu1  ;;  %2187 = vmax.xlane.f32.xlu1 %v12854_v4 }
 0x488   : > { %v2118_v11 = vpop.f32.mrb[67].mxu1  ;;  %v12868_v48 = vadd.f32 %v12865_v7, %v8952_v59 }
 0x489   : > { %v12876_v61 = vadd.f32 %v12873_v46, %v2118_v11 }
 0x48b   : > { %v8955_v55 = vpop.f32.mrb[68].mxu1 }
 0x48c   : > { %v2128_v37 = vpop.f32.mrb[69].mxu1  ;;  %v12886_v59 = vadd.f32 %v12883_v32, %v8955_v55 }
 0x48d   : > { %v12894_v11 = vadd.f32 %v12891_v42, %v2128_v37 }
 0x48f   : > { %v8958_v14 = vpop.f32.mrb[70].mxu1 }
 0x490   : > { %v2138_v1 = vpop.f32.mrb[71].mxu1  ;;  %v12912_v37 = vadd.f32 %v12909_v49, %v8958_v14 }
 0x491   : > { %v12930_v14 = vadd.f32 %v12927_v19, %v2138_v1 }
 0x493   : > { %v8961_v33 = vpop.f32.mrb[72].mxu1 }
 0x494   : > { %v2148_v2 = vpop.f32.mrb[73].mxu1  ;;  %v12948_v1 = vadd.f32 %v12945_v15, %v8961_v33 }
 0x497   : > { %v8964_v39 = vpop.f32.mrb[74].mxu1 }
 0x498   : > { %v2158_v25 = vpop.f32.mrb[75].mxu1  ;;  %10633 = vrot.lane.b32.xlu1 %v16989_v12, %s11687_s23  ;;  %v12904_v55 = vadd.f32 %v12901_v53, %v8964_v39 }
 0x499   : > { %v12967_v33 = vadd.f32 %v12964_v63, %v2158_v25 }
 0x49b   : > { %v8967_v24 = vpop.f32.mrb[76].mxu1 }
 0x49c   : > { %10638 = vrot.lane.b32.xlu0 %v16990_v45, %s11687_s23  ;;  %v2168_v23 = vpop.f32.mrb[77].mxu1  ;;  %v12922_v39 = vadd.f32 %v12919_v50, %v8967_v24 }
 0x49f   : > { %v8970_v16 = vpop.f32.mrb[78].mxu1 }
 0x4a0   : > { %v2178_v10 = vpop.f32.mrb[79].mxu1  ;;  %v12985_v25 = vadd.f32 %v12982_v3, %v8970_v16  ;;  %v16994_v16 = vld [vmem:[#allocation8_spill] sm:$0xff] }
 0x4a1   : > { %v12940_v24 = vadd.f32 %v12937_v17, %v2178_v10  ;;  %v12958_v10 = vadd.f32 %v12955_v43, %v2148_v2  ;;  %v12976_v2 = vadd.f32 %v12973_v6, %v2168_v23  ;;  %v16992_v23 = vld [vmem:[#allocation2_spill] sm:$0xff]  ;;  %v16993_v6 = vld [vmem:[#allocation4_spill] sm:$0xff] }
 0x4bb   : > { %2193 = vmax.xlane.f32.xlu0 %v12868_v48 }
 0x4bc   : > { %2191 = vmax.xlane.f32.xlu1 %v12876_v61 }
 0x4bf   : > { %2197 = vmax.xlane.f32.xlu0 %v12886_v59 }
 0x4c0   : > { %2195 = vmax.xlane.f32.xlu1 %v12894_v11 }
 0x4c3   : > { %2209 = vmax.xlane.f32.xlu0 %v12904_v55 }
 0x4c4   : > { %2201 = vmax.xlane.f32.xlu1 %v12912_v37 }
 0x4c7   : > { %2213 = vmax.xlane.f32.xlu0 %v12922_v39 }
 0x4c8   : > { %2199 = vmax.xlane.f32.xlu1 %v12930_v14 }
 0x4cb   : > { %2215 = vmax.xlane.f32.xlu0 %v12940_v24 }
 0x4cc   : > { %2205 = vmax.xlane.f32.xlu1 %v12948_v1 }
 0x4d0   : > { %2203 = vmax.xlane.f32.xlu1 %v12958_v10 }
 0x4d4   : > { %2207 = vmax.xlane.f32.xlu1 %v12967_v33 }
 0x4d8   : > { %2211 = vmax.xlane.f32.xlu1 %v12976_v2 }
 0x4dc   : > { %2217 = vmax.xlane.f32.xlu1 %v12985_v25 }
 0x4e1   : > { %10643 = vrot.lane.b32.xlu0 %v12018_v34, %s11687_s23  ;;  %v16995_v34 = vld [vmem:[#allocation10_spill] sm:$0xff]  ;;  %s11689_s23 = smov 32  }
 0x4e5   : > { %2540 = vrot.lane.b32.xlu0 %v11872_v40, %s11688_s26 }
 0x4e9   : > { %2544 = vrot.lane.b32.xlu0 %v11890_v47, %s11688_s26 }
 0x4ed   : > { %2548 = vrot.lane.b32.xlu0 %v11914_v56, %s11688_s26  ;;  %2542 = vrot.lane.b32.xlu1 %v16992_v23, %s11688_s26  ;;  %v10614_v23 = vpop.permute.xlu0 %10613 }
 0x4f1   : > { %2552 = vrot.lane.b32.xlu0 %v16915_v36, %s11688_s26  ;;  %2546 = vrot.lane.b32.xlu1 %v16993_v6, %s11688_s26 }
 0x4f5   : > { %2556 = vrot.lane.b32.xlu0 %v16920_v57, %s11688_s26  ;;  %2550 = vrot.lane.b32.xlu1 %v16994_v16, %s11688_s26  ;;  %v10619_v16 = vpop.permute.xlu0 %10618 }
 0x4f9   : > { %2560 = vrot.lane.b32.xlu0 %v16922_v31, %s11688_s26  ;;  %2554 = vrot.lane.b32.xlu1 %v16995_v34, %s11688_s26 }
 0x4fd   : > { %2564 = vrot.lane.b32.xlu0 %v16923_v38, %s11688_s26  ;;  %2558 = vrot.lane.b32.xlu1 %v11947_v5, %s11688_s26 }
 0x501   : > { %2568 = vrot.lane.b32.xlu0 %v16928_v26, %s11688_s26  ;;  %2562 = vrot.lane.b32.xlu1 %v11963_v13, %s11688_s26  ;;  %v10629_v13 = vpop.permute.xlu0 %10628  ;;  %v10624_v26 = vpop.permute.xlu1 %10623 }
 0x505   : > { %10648 = vrot.lane.b32.xlu0 %v16930_v58, %s11689_s23  ;;  %2566 = vrot.lane.b32.xlu1 %v11987_v22, %s11688_s26 }
 0x509   : > { %10658 = vrot.lane.b32.xlu0 %v16931_v18, %s11689_s23  ;;  %2570 = vrot.lane.b32.xlu1 %v12003_v29, %s11688_s26 }
 0x50d   : > { %10663 = vrot.lane.b32.xlu0 %v16932_v28, %s11689_s23  ;;  %10653 = vrot.lane.b32.xlu1 %v11934_v0, %s11689_s23 }
 0x511   : > { %10678 = vrot.lane.b32.xlu0 %v16934_v9, %s11689_s23  ;;  %10668 = vrot.lane.b32.xlu1 %v12106_v35, %s11689_s23  ;;  %v10616_v35 = vunpack.i.h.bf16 %v10614_v23  ;;  %v10615_v9 = vunpack.i.l.bf16 %v10614_v23  ;;  %v10626_v23 = vunpack.i.h.bf16 %v10624_v26 }
 0x513   : > { %v2190_v58 = vpop.xlane.xlu0 %2189 }
 0x514   : > { %v2220_v22 = vsub.f32 %v12846_v54, %v2190_v58  ;;  %v2188_v18 = vpop.xlane.xlu1 %2187  ;;  %v10625_v58 = vunpack.i.l.bf16 %v10624_v26 }
 0x515   : > { %v2219_v29 = vsub.f32 %v12854_v4, %v2188_v18  ;;  %10688 = vrot.lane.b32.xlu0 %v16936_v21, %s11690_s28  ;;  %10673 = vrot.lane.b32.xlu1 %v12120_v52, %s11689_s23  ;;  %v9931_v52 = vpack.c.bf16 %v10616_v35, %v10615_v9  ;;  %v10620_v4 = vunpack.i.l.bf16 %v10619_v16 }
 0x516   : > { %v2237_v0 = vmul.f32 1.442695, %v2220_v22  ;;  %v9943_v18 = vpack.c.bf16 %v10626_v23, %v10625_v58 }
 0x517   : > { %v2235_v28 = vmul.f32 1.442695, %v2219_v29  ;;  %v10639_v26 = vpop.permute.xlu0 %10638 }
 0x519   : > { %11031 = vpow2.f32 %v2235_v28  ;;  %10693 = vrot.lane.b32.xlu0 %v16937_v20, %s11690_s28  ;;  %10683 = vrot.lane.b32.xlu1 %v12156_v30, %s11689_s23  ;;  %v10621_v30 = vunpack.i.h.bf16 %v10619_v16  ;;  %v10634_v16 = vpop.permute.xlu1 %10633 }
 0x51a   : > { %11033 = vpow2.f32 %v2237_v0  ;;  %v10630_v0 = vunpack.i.l.bf16 %v10629_v13  ;;  %v10636_v35 = vunpack.i.h.bf16 %v10634_v16  ;;  %v10635_v9 = vunpack.i.l.bf16 %v10634_v16 }
 0x51b   : > { %v9937_v54 = vpack.c.bf16 %v10621_v30, %v10620_v4  ;;  %v10640_v4 = vunpack.i.l.bf16 %v10639_v26 }
 0x51d   : > { %10698 = vrot.lane.b32.xlu0 %v16938_v60, %s11690_s28  ;;  %10703 = vrot.lane.b32.xlu1 %v16918_v8, %s11690_s28 }
 0x521   : > { %10708 = vrot.lane.b32.xlu0 %v16940_v62, %s11690_s28 }
 0x523   : > { %v13034_v22 = vpop.eup %11031 }
 0x524   : > { %16996 = vst [vmem:[#allocation24_spill] sm:$0xff] %v13034_v22  ;;  %v13036_v29 = vpop.eup %11033  ;;  %9003 = vmatprep.mubr.f32.mxu0 %v13034_v22  ;;  %v17079_v22 = vld [vmem:[#allocation20_spill] sm:$0xff] }
 0x525   : > { %16997 = vst [vmem:[#allocation4_spill] sm:$0xff] %v13036_v29  ;;  %9004 = vmatmul.mubr.f32.vlgmr.msra.gmra.mrb[48].mxu0 %v13036_v29  ;;  %v17078_v29 = vld [vmem:[#allocation31_spill] sm:$0xff] }
 0x526   : > { %9930 = vmatpush3.bf16.xpose.msk.msra.mxu0 %vm12066_vm2, %v12771_v41  ;;  %v10631_v41 = vunpack.i.h.bf16 %v10629_v13  ;;  %v10641_v13 = vunpack.i.h.bf16 %v10639_v26 }
 0x527   : > { %9933 = vmatprep.subr.msk.bf16.mxu0 %vm12066_vm2, %v9931_v52 }
 0x528   : > { %v9949_v28 = vpack.c.bf16 %v10631_v41, %v10630_v0  ;;  %v9961_v16 = vpack.c.bf16 %v10641_v13, %v10640_v4 }
 0x52e   : > { %9936 = vmatpush3.bf16.xpose.msk.msra.mxu0 %vm12066_vm2, %v9931_v52  ;;  %v9955_v52 = vpack.c.bf16 %v10636_v35, %v10635_v9 }
 0x52f   : > { %9939 = vmatprep.subr.msk.bf16.mxu0 %vm12066_vm2, %v9937_v54 }
 0x536   : > { %9942 = vmatpush3.bf16.xpose.msk.msra.mxu0 %vm12066_vm2, %v9937_v54 }
 0x537   : > { %9945 = vmatprep.subr.msk.bf16.mxu0 %vm12066_vm2, %v9943_v18 }
 0x53e   : > { %9948 = vmatpush3.bf16.xpose.msk.msra.mxu0 %vm12066_vm2, %v9943_v18 }
 0x53f   : > { %9951 = vmatprep.subr.msk.bf16.mxu0 %vm12066_vm2, %v9949_v28 }
 0x546   : > { %9954 = vmatpush3.bf16.xpose.msk.msra.mxu0 %vm12066_vm2, %v9949_v28 }
 0x547   : > { %9957 = vmatprep.subr.msk.bf16.mxu0 %vm12066_vm2, %v9955_v52 }
 0x548   : > { %v2194_v30 = vpop.xlane.xlu0 %2193 }
 0x549   : > { %v2222_v54 = vsub.f32 %v12868_v48, %v2194_v30  ;;  %v2192_v23 = vpop.xlane.xlu1 %2191 }
 0x54a   : > { %v2221_v58 = vsub.f32 %v12876_v61, %v2192_v23 }
 0x54b   : > { %v2241_v18 = vmul.f32 1.442695, %v2222_v54 }
 0x54c   : > { %v2239_v41 = vmul.f32 1.442695, %v2221_v58  ;;  %v2198_v0 = vpop.xlane.xlu0 %2197 }
 0x54d   : > { %v2224_v35 = vsub.f32 %v12886_v59, %v2198_v0  ;;  %v2196_v9 = vpop.xlane.xlu1 %2195 }
 0x54e   : > { %11035 = vpow2.f32 %v2239_v41  ;;  %v2223_v28 = vsub.f32 %v12894_v11, %v2196_v9  ;;  %9960 = vmatpush3.bf16.xpose.msk.msra.mxu0 %vm12066_vm2, %v9955_v52 }
 0x54f   : > { %11037 = vpow2.f32 %v2241_v18  ;;  %v2245_v26 = vmul.f32 1.442695, %v2224_v35  ;;  %9963 = vmatprep.subr.msk.bf16.mxu0 %vm12066_vm2, %v9961_v16 }
 0x550   : > { %v2243_v48 = vmul.f32 1.442695, %v2223_v28  ;;  %v2210_v61 = vpop.xlane.xlu0 %2209 }
 0x551   : > { %v2202_v30 = vpop.xlane.xlu1 %2201 }
 0x552   : > { %11039 = vpow2.f32 %v2243_v48  ;;  %v2226_v13 = vsub.f32 %v12912_v37, %v2202_v30  ;;  %v2230_v48 = vsub.f32 %v12904_v55, %v2210_v61 }
 0x553   : > { %11041 = vpow2.f32 %v2245_v26 }
 0x554   : > { %v2214_v59 = vpop.xlane.xlu0 %2213  ;;  %v2249_v11 = vmul.f32 1.442695, %v2226_v13 }
 0x555   : > { %v2200_v4 = vpop.xlane.xlu1 %2199 }
 0x556   : > { %v2225_v54 = vsub.f32 %v12930_v14, %v2200_v4  ;;  %9966 = vmatpush3.bf16.xpose.msk.msra.mxu0 %vm12066_vm2, %v9961_v16 }
 0x558   : > { %v13073_v52 = vpop.eup %11035  ;;  %v2247_v23 = vmul.f32 1.442695, %v2225_v54  ;;  %v2216_v58 = vpop.xlane.xlu0 %2215 }
 0x559   : > { %16998 = vst [vmem:[#allocation98_spill] sm:$0xff] %v13073_v52  ;;  %v13075_v18 = vpop.eup %11037  ;;  %9006 = vmatprep.mubr.f32.mxu0 %v13073_v52  ;;  %v2206_v41 = vpop.xlane.xlu1 %2205  ;;  %v2233_v61 = vsub.f32 %v12940_v24, %v2216_v58 }
 0x55a   : > { %16999 = vst [vmem:[#allocation99_spill] sm:$0xff] %v13075_v18  ;;  %11043 = vpow2.f32 %v2247_v23  ;;  %9007 = vmatmul.mubr.f32.gmra.mrb[50].mxu0 %v13075_v18  ;;  %v2228_v37 = vsub.f32 %v12948_v1, %v2206_v41  ;;  %v2257_v23 = vmul.f32 1.442695, %v2230_v48  ;;  %v17002_v41 = vld [vmem:[#allocation36_spill] sm:$0xff] }
 0x55b   : > { %11045 = vpow2.f32 %v2249_v11  ;;  %v13563_v18 = vld [vmem:[%s16642_s4 + $0x70] sm:$0xff] }
 0x55c   : > { %v13080_v14 = vpop.eup %11039  ;;  %v10644_v0 = vpop.permute.xlu0 %10643  ;;  %v2253_v30 = vmul.f32 1.442695, %v2228_v37 }
 0x55d   : > { %17000 = vst [vmem:[#allocation100_spill] sm:$0xff] %v13080_v14  ;;  %v13082_v16 = vpop.eup %11041  ;;  %v10646_v35 = vunpack.i.h.bf16 %v10644_v0  ;;  %v10645_v9 = vunpack.i.l.bf16 %v10644_v0  ;;  %9009 = vmatprep.mubr.f32.mxu0 %v13080_v14  ;;  %v2204_v28 = vpop.xlane.xlu1 %2203  ;;  %v13537_v14 = vld [vmem:[%s16642_s4 + $0x40] sm:$0xff] }
 0x55e   : > { %17001 = vst [vmem:[#allocation101_spill] sm:$0xff] %v13082_v16  ;;  %v2227_v26 = vsub.f32 %v12958_v10, %v2204_v28  ;;  %9010 = vmatmul.mubr.f32.gmra.mrb[52].mxu0 %v13082_v16  ;;  %v2232_v10 = vsub.f32 %v12922_v39, %v2214_v59  ;;  %v2263_v59 = vmul.f32 1.442695, %v2233_v61  ;;  %v13519_v16 = vld [vmem:[%s16642_s4 + $0x48] sm:$0xff] }
 0x55f   : > { %v9967_v13 = vpack.c.bf16 %v10646_v35, %v10645_v9 }
 0x560   : > { %v2251_v4 = vmul.f32 1.442695, %v2227_v26  ;;  %v2541_v1 = vpop.permute.xlu0 %2540  ;;  %v2261_v39 = vmul.f32 1.442695, %v2232_v10 }
 0x561   : > { %v2208_v54 = vpop.xlane.xlu1 %2207  ;;  %9969 = vmatprep.subr.msk.bf16.mxu0 %vm12066_vm2, %v9967_v13 }
 0x562   : > { %11047 = vpow2.f32 %v2251_v4  ;;  %v2229_v11 = vsub.f32 %v12967_v33, %v2208_v54  ;;  %9972 = vmatpush3.bf16.xpose.msk.msra.mxu0 %vm12066_vm2, %v9967_v13 }
 0x563   : > { %11049 = vpow2.f32 %v2253_v30  ;;  %10054 = vmatprep.subr.bf16.mxu0 %v17002_v41 }
 0x564   : > { %v13095_v55 = vpop.eup %11043  ;;  %v2255_v37 = vmul.f32 1.442695, %v2229_v11  ;;  %v2545_v0 = vpop.permute.xlu0 %2544 }
 0x565   : > { %17003 = vst [vmem:[#allocation36_spill] sm:$0xff] %v13095_v55  ;;  %v13098_v35 = vpop.eup %11045  ;;  %9012 = vmatprep.mubr.f32.mxu0 %v13095_v55  ;;  %v2212_v33 = vpop.xlane.xlu1 %2211  ;;  %v13501_v55 = vld [vmem:[%s16642_s4 + $0x38] sm:$0xff] }
 0x566   : > { %17004 = vst [vmem:[#allocation102_spill] sm:$0xff] %v13098_v35  ;;  %11051 = vpow2.f32 %v2255_v37  ;;  %v2231_v9 = vsub.f32 %v12976_v2, %v2212_v33  ;;  %9013 = vmatmul.mubr.f32.gmra.mrb[54].mxu0 %v13098_v35 }
 0x567   : > { %11053 = vpow2.f32 %v2257_v23 }
 0x568   : > { %v2259_v28 = vmul.f32 1.442695, %v2231_v9  ;;  %v2549_v26 = vpop.permute.xlu0 %2548 }
 0x569   : > { %v2218_v48 = vpop.xlane.xlu1 %2217 }
 0x56a   : > { %11055 = vpow2.f32 %v2259_v28  ;;  %v2234_v24 = vsub.f32 %v12985_v25, %v2218_v48 }
 0x56b   : > { %11057 = vpow2.f32 %v2261_v39 }
 0x56c   : > { %v13104_v58 = vpop.eup %11047  ;;  %11059 = vpow2.f32 %v2263_v59  ;;  %v2265_v30 = vmul.f32 1.442695, %v2234_v24  ;;  %v2553_v13 = vpop.permute.xlu0 %2552 }
 0x56d   : > { %17005 = vst [vmem:[#allocation103_spill] sm:$0xff] %v13104_v58  ;;  %v13106_v4 = vpop.eup %11049  ;;  %9015 = vmatprep.mubr.f32.mxu0 %v13104_v58  ;;  %v2543_v2 = vpop.permute.xlu1 %2542 }
 0x56e   : > { %17006 = vst [vmem:[#allocation104_spill] sm:$0xff] %v13106_v4  ;;  %11061 = vpow2.f32 %v2265_v30  ;;  %9016 = vmatmul.mubr.f32.gmra.mrb[56].mxu0 %v13106_v4  ;;  %v17013_v30 = vld [vmem:[#allocation37_spill] sm:$0xff] }
 0x570   : > { %v13110_v54 = vpop.eup %11051  ;;  %v2557_v11 = vpop.permute.xlu0 %2556 }
 0x571   : > { %17007 = vst [vmem:[#allocation105_spill] sm:$0xff] %v13110_v54  ;;  %v13112_v23 = vpop.eup %11053  ;;  %9018 = vmatprep.mubr.f32.mxu0 %v13110_v54  ;;  %v2547_v25 = vpop.permute.xlu1 %2546 }
 0x572   : > { %17008 = vst [vmem:[#allocation106_spill] sm:$0xff] %v13112_v23  ;;  %9019 = vmatmul.mubr.f32.gmra.mrb[58].mxu0 %v13112_v23 }
 0x574   : > { %v13116_v10 = vpop.eup %11055  ;;  %v2561_v61 = vpop.permute.xlu0 %2560 }
 0x575   : > { %17009 = vst [vmem:[#allocation107_spill] sm:$0xff] %v13116_v10  ;;  %v13118_v37 = vpop.eup %11057  ;;  %9021 = vmatprep.mubr.f32.mxu0 %v13116_v10  ;;  %v2551_v33 = vpop.permute.xlu1 %2550 }
 0x576   : > { %17010 = vst [vmem:[#allocation108_spill] sm:$0xff] %v13118_v37  ;;  %v13121_v9 = vpop.eup %11059  ;;  %9022 = vmatmul.mubr.f32.gmra.mrb[60].mxu0 %v13118_v37 }
 0x577   : > { %17011 = vst [vmem:[#allocation109_spill] sm:$0xff] %v13121_v9  ;;  %9024 = vmatprep.mubr.f32.mxu0 %v13121_v9 }
 0x578   : > { %v13125_v39 = vpop.eup %11061  ;;  %v2565_v59 = vpop.permute.xlu0 %2564 }
 0x579   : > { %17012 = vst [vmem:[#allocation110_spill] sm:$0xff] %v13125_v39  ;;  %v2555_v28 = vpop.permute.xlu1 %2554 }
 0x57a   : > { %9025 = vmatmul.mubr.f32.gmra.mrb[62].mxu0 %v13125_v39  ;;  %v17014_v39 = vld [vmem:[#allocation38_spill] sm:$0xff] }
 0x57b   : > { %9059 = vmatprep.mubr.msk.f32.mxu0 %vm757_vm1, %v2541_v1 }
 0x57c   : > { %v2569_v48 = vpop.permute.xlu0 %2568 }
 0x57d   : > { %v2559_v24 = vpop.permute.xlu1 %2558 }
 0x57e   : > { %9060 = vmatmul.mubr.msk.f32.vlgmr.msra.gmra.mrb[64].mxu0 %vm757_vm1, %v2543_v2 }
 0x57f   : > { %10056 = vmatpush3.bf16.msra.mxu0 %v17002_v41  ;;  %9062 = vmatprep.mubr.msk.f32.mxu0 %vm757_vm1, %v2545_v0  ;;  %v17015_v41 = vld [vmem:[#allocation39_spill] sm:$0xff] }
 0x580   : > { %10058 = vmatprep.subr.bf16.mxu0 %v17013_v30  ;;  %v10649_v37 = vpop.permute.xlu0 %10648 }
 0x581   : > { %v10651_v9 = vunpack.i.h.bf16 %v10649_v37  ;;  %v10650_v10 = vunpack.i.l.bf16 %v10649_v37  ;;  %v2563_v23 = vpop.permute.xlu1 %2562 }
 0x582   : > { %9063 = vmatmul.mubr.msk.f32.gmra.mrb[66].mxu0 %vm757_vm1, %v2547_v25 }
 0x583   : > { %10060 = vmatpush3.bf16.msra.mxu0 %v17013_v30  ;;  %9065 = vmatprep.mubr.msk.f32.mxu0 %vm757_vm1, %v2549_v26  ;;  %v9973_v1 = vpack.c.bf16 %v10651_v9, %v10650_v10  ;;  %v17016_v26 = vld [vmem:[#allocation40_spill] sm:$0xff]  ;;  %v17017_v30 = vld [vmem:[#allocation41_spill] sm:$0xff] }
 0x584   : > { %10062 = vmatprep.subr.bf16.mxu0 %v17014_v39  ;;  %v10659_v25 = vpop.permute.xlu0 %10658 }
 0x585   : > { %9974 = vmatprep.subr.bf16.mxu1 %v9973_v1  ;;  %v2567_v2 = vpop.permute.xlu1 %2566  ;;  %v10661_v9 = vunpack.i.h.bf16 %v10659_v25 }
 0x586   : > { %9066 = vmatmul.mubr.msk.f32.gmra.mrb[68].mxu0 %vm757_vm1, %v2551_v33  ;;  %9976 = vmatpush3.bf16.msra.mxu1 %v9973_v1 }
 0x587   : > { %10064 = vmatpush3.bf16.msra.mxu0 %v17014_v39  ;;  %9068 = vmatprep.mubr.msk.f32.mxu0 %vm757_vm1, %v2553_v13  ;;  %v10660_v39 = vunpack.i.l.bf16 %v10659_v25  ;;  %v17018_v25 = vld [vmem:[#allocation42_spill] sm:$0xff] }
 0x588   : > { %10066 = vmatprep.subr.bf16.mxu0 %v17015_v41  ;;  %v10664_v13 = vpop.permute.xlu0 %10663 }
 0x589   : > { %v2571_v0 = vpop.permute.xlu1 %2570 }
 0x58a   : > { %9069 = vmatmul.mubr.msk.f32.gmra.mrb[70].mxu0 %vm757_vm1, %v2555_v28 }
 0x58b   : > { %10068 = vmatpush3.bf16.msra.mxu0 %v17015_v41  ;;  %9071 = vmatprep.mubr.msk.f32.mxu0 %vm757_vm1, %v2557_v11  ;;  %v10666_v11 = vunpack.i.h.bf16 %v10664_v13  ;;  %v10665_v41 = vunpack.i.l.bf16 %v10664_v13 }
 0x58c   : > { %10070 = vmatprep.subr.bf16.mxu0 %v17016_v26 }
 0x58d   : > { %v10654_v10 = vpop.permute.xlu1 %10653 }
 0x58e   : > { %v10656_v37 = vunpack.i.h.bf16 %v10654_v10  ;;  %v10655_v33 = vunpack.i.l.bf16 %v10654_v10  ;;  %9072 = vmatmul.mubr.msk.f32.gmra.mrb[72].mxu0 %vm757_vm1, %v2559_v24  ;;  %v9981_v24 = vpack.c.bf16 %v10661_v9, %v10660_v39 }
 0x58f   : > { %10072 = vmatpush3.bf16.msra.mxu0 %v17016_v26  ;;  %9074 = vmatprep.mubr.msk.f32.mxu0 %vm757_vm1, %v2561_v61 }
 0x590   : > { %10074 = vmatprep.subr.bf16.mxu0 %v17017_v30  ;;  %v9977_v28 = vpack.c.bf16 %v10656_v37, %v10655_v33  ;;  %v17019_v37 = vld [vmem:[#allocation43_spill] sm:$0xff] }
 0x591   : > { %v10669_v1 = vpop.permute.xlu1 %10668 }
 0x592   : > { %9075 = vmatmul.mubr.msk.f32.gmra.mrb[74].mxu0 %vm757_vm1, %v2563_v23  ;;  %9978 = vmatprep.subr.bf16.mxu1 %v9977_v28  ;;  %v10671_v61 = vunpack.i.h.bf16 %v10669_v1  ;;  %v10670_v26 = vunpack.i.l.bf16 %v10669_v1  ;;  %v9985_v23 = vpack.c.bf16 %v10666_v11, %v10665_v41 }
 0x593   : > { %10076 = vmatpush3.bf16.msra.mxu0 %v17017_v30  ;;  %9077 = vmatprep.mubr.msk.f32.mxu0 %vm757_vm1, %v2565_v59 }
 0x594   : > { %9980 = vmatpush3.bf16.msra.mxu1 %v9977_v28  ;;  %10078 = vmatprep.subr.bf16.mxu0 %v17018_v25  ;;  %v9989_v9 = vpack.c.bf16 %v10671_v61, %v10670_v26 }
 0x595   : > { %9982 = vmatprep.subr.bf16.mxu1 %v9981_v24  ;;  %v10674_v10 = vpop.permute.xlu1 %10673 }
 0x596   : > { %9078 = vmatmul.mubr.msk.f32.gmra.mrb[76].mxu0 %vm757_vm1, %v2567_v2  ;;  %v10676_v59 = vunpack.i.h.bf16 %v10674_v10  ;;  %v10675_v33 = vunpack.i.l.bf16 %v10674_v10  ;;  %v10679_v2 = vpop.permute.xlu0 %10678 }
 0x597   : > { %10080 = vmatpush3.bf16.msra.mxu0 %v17018_v25  ;;  %9080 = vmatprep.mubr.msk.f32.mxu0 %vm757_vm1, %v2569_v48  ;;  %v10681_v39 = vunpack.i.h.bf16 %v10679_v2  ;;  %v10680_v13 = vunpack.i.l.bf16 %v10679_v2 }
 0x598   : > { %9984 = vmatpush3.bf16.msra.mxu1 %v9981_v24  ;;  %10082 = vmatprep.subr.bf16.mxu0 %v17019_v37  ;;  %v9993_v30 = vpack.c.bf16 %v10676_v59, %v10675_v33 }
 0x599   : > { %9986 = vmatprep.subr.bf16.mxu1 %v9985_v23  ;;  %v10684_v48 = vpop.permute.xlu1 %10683  ;;  %v9997_v11 = vpack.c.bf16 %v10681_v39, %v10680_v13 }
 0x59a   : > { %9081 = vmatmul.mubr.msk.f32.gmra.mrb[78].mxu0 %vm757_vm1, %v2571_v0  ;;  %v10686_v28 = vunpack.i.h.bf16 %v10684_v48  ;;  %v10685_v1 = vunpack.i.l.bf16 %v10684_v48  ;;  %v10689_v41 = vpop.permute.xlu0 %10688 }
 0x59b   : > { %10084 = vmatpush3.bf16.msra.mxu0 %v17019_v37  ;;  %v10691_v0 = vunpack.i.h.bf16 %v10689_v41  ;;  %v10690_v24 = vunpack.i.l.bf16 %v10689_v41 }
 0x59c   : > { %9988 = vmatpush3.bf16.msra.mxu1 %v9985_v23  ;;  %v10001_v25 = vpack.c.bf16 %v10686_v28, %v10685_v1 }
 0x59d   : > { %9990 = vmatprep.subr.bf16.mxu1 %v9989_v9  ;;  %v13159_v61 = vpack.c.bf16 %v10691_v0, %v10690_v24 }
 0x5a0   : > { %9992 = vmatpush3.bf16.msra.mxu1 %v9989_v9 }
 0x5a1   : > { %9994 = vmatprep.subr.bf16.mxu1 %v9993_v30 }
 0x5a4   : > { %9996 = vmatpush3.bf16.msra.mxu1 %v9993_v30 }
 0x5a5   : > { %9998 = vmatprep.subr.bf16.mxu1 %v9997_v11 }
 0x5a8   : > { %10000 = vmatpush3.bf16.msra.mxu1 %v9997_v11 }
 0x5a9   : > { %10002 = vmatprep.subr.bf16.mxu1 %v10001_v25 }
 0x5ac   : > { %10004 = vmatpush3.bf16.msra.mxu1 %v10001_v25 }
 0x5ad   : > { %10007 = vmatprep.subr.msk.bf16.mxu1 %vm12066_vm2, %v13159_v61 }
 0x5f8   : > { %v13164_v26 = vpop.f32.mrb[48].mxu0 }
 0x5f9   : > { %17020 = vst [vmem:[#allocation37_spill] sm:$0xff] %v13164_v26  ;;  %v13166_v23 = vpop.f32.mrb[49].mxu0 }
 0x5fa   : > { %17021 = vst [vmem:[#allocation38_spill] sm:$0xff] %v13166_v23 }
 0x62d   : > { %v13168_v10 = vpop.f32.mrb[50].mxu0 }
 0x62e   : > { %17022 = vst [vmem:[#allocation39_spill] sm:$0xff] %v13168_v10  ;;  %v13170_v37 = vpop.f32.mrb[51].mxu0 }
 0x62f   : > { %17023 = vst [vmem:[#allocation40_spill] sm:$0xff] %v13170_v37 }
 0x631   : > { %v13172_v59 = vpop.f32.mrb[52].mxu0 }
 0x632   : > { %17024 = vst [vmem:[#allocation41_spill] sm:$0xff] %v13172_v59  ;;  %v13174_v33 = vpop.f32.mrb[53].mxu0 }
 0x633   : > { %17025 = vst [vmem:[#allocation42_spill] sm:$0xff] %v13174_v33 }
 0x639   : > { %v13176_v9 = vpop.f32.mrb[54].mxu0 }
 0x63a   : > { %17026 = vst [vmem:[#allocation43_spill] sm:$0xff] %v13176_v9  ;;  %v13178_v2 = vpop.f32.mrb[55].mxu0 }
 0x63b   : > { %17027 = vst [vmem:[#allocation111_spill] sm:$0xff] %v13178_v2 }
 0x641   : > { %v13180_v39 = vpop.f32.mrb[56].mxu0 }
 0x642   : > { %17028 = vst [vmem:[#allocation112_spill] sm:$0xff] %v13180_v39  ;;  %v13182_v13 = vpop.f32.mrb[57].mxu0 }
 0x643   : > { %17029 = vst [vmem:[#allocation113_spill] sm:$0xff] %v13182_v13 }
 0x645   : > { %v13184_v30 = vpop.f32.mrb[58].mxu0 }
 0x646   : > { %17030 = vst [vmem:[#allocation114_spill] sm:$0xff] %v13184_v30  ;;  %v13186_v48 = vpop.f32.mrb[59].mxu0 }
 0x647   : > { %17031 = vst [vmem:[#allocation115_spill] sm:$0xff] %v13186_v48 }
 0x649   : > { %v13188_v28 = vpop.f32.mrb[60].mxu0 }
 0x64a   : > { %17032 = vst [vmem:[#allocation116_spill] sm:$0xff] %v13188_v28  ;;  %v13190_v1 = vpop.f32.mrb[61].mxu0 }
 0x64b   : > { %17033 = vst [vmem:[#allocation117_spill] sm:$0xff] %v13190_v1 }
 0x64d   : > { %v13192_v11 = vpop.f32.mrb[62].mxu0 }
 0x64e   : > { %17034 = vst [vmem:[#allocation118_spill] sm:$0xff] %v13192_v11  ;;  %v13194_v41 = vpop.f32.mrb[63].mxu0 }
 0x64f   : > { %17035 = vst [vmem:[#allocation119_spill] sm:$0xff] %v13194_v41 }
 0x651   : > { %v9061_v0 = vpop.f32.mrb[64].mxu0 }
 0x652   : > { %v13197_v24 = vadd.f32 %v12843_v51, %v9061_v0  ;;  %v2734_v25 = vpop.f32.mrb[65].mxu0 }
 0x653   : > { %v13200_v39 = vadd.f32 %v12851_v44, %v2734_v25 }
 0x654   : > { %2815 = vmax.xlane.f32.xlu0 %v13197_v24 }
 0x655   : > { %v9064_v30 = vpop.f32.mrb[66].mxu0  ;;  %2813 = vmax.xlane.f32.xlu1 %v13200_v39 }
 0x656   : > { %v2744_v28 = vpop.f32.mrb[67].mxu0  ;;  %v13209_v33 = vadd.f32 %v12865_v7, %v9064_v30  ;;  %v17042_v30 = vld [vmem:[#allocation22_spill] sm:$0xff] }
 0x657   : > { %v13212_v10 = vadd.f32 %v12873_v46, %v2744_v28  ;;  %v17043_v28 = vld [vmem:[#allocation25_spill] sm:$0xff] }
 0x659   : > { %v9067_v48 = vpop.f32.mrb[68].mxu0 }
 0x65a   : > { %v2754_v1 = vpop.f32.mrb[69].mxu0  ;;  %v13217_v54 = vadd.f32 %v12883_v32, %v9067_v48 }
 0x65b   : > { %v13220_v37 = vadd.f32 %v12891_v42, %v2754_v1 }
 0x65d   : > { %v9070_v13 = vpop.f32.mrb[70].mxu0 }
 0x65e   : > { %v2764_v11 = vpop.f32.mrb[71].mxu0  ;;  %v13228_v46 = vadd.f32 %v12909_v49, %v9070_v13  ;;  %v10694_v13 = vpop.permute.xlu0 %10693 }
 0x65f   : > { %v13236_v42 = vadd.f32 %v12927_v19, %v2764_v11  ;;  %v10704_v11 = vpop.permute.xlu1 %10703  ;;  %v10696_v26 = vunpack.i.h.bf16 %v10694_v13  ;;  %v10695_v4 = vunpack.i.l.bf16 %v10694_v13 }
 0x660   : > { %v10706_v13 = vunpack.i.h.bf16 %v10704_v11 }
 0x661   : > { %v9073_v9 = vpop.f32.mrb[72].mxu0  ;;  %v10011_v35 = vpack.c.bf16 %v10696_v26, %v10695_v4  ;;  %v10705_v4 = vunpack.i.l.bf16 %v10704_v11 }
 0x662   : > { %v2774_v41 = vpop.f32.mrb[73].mxu0  ;;  %v13244_v49 = vadd.f32 %v12945_v15, %v9073_v9  ;;  %v17041_v9 = vld [vmem:[#allocation17_spill] sm:$0xff]  ;;  %v10699_v48 = vpop.permute.xlu0 %10698 }
 0x663   : > { %v10023_v26 = vpack.c.bf16 %v10706_v13, %v10705_v4 }
 0x665   : > { %v9076_v2 = vpop.f32.mrb[74].mxu0 }
 0x666   : > { %v2784_v59 = vpop.f32.mrb[75].mxu0  ;;  %10713 = vrot.lane.b32.xlu1 %v16989_v12, %s11690_s28  ;;  %v13225_v7 = vadd.f32 %v12901_v53, %v9076_v2  ;;  %v17036_v2 = vld [vmem:[#allocation21_spill] sm:$0xff]  ;;  %v10709_v1 = vpop.permute.xlu0 %10708 }
 0x667   : > { %v13253_v19 = vadd.f32 %v12964_v63, %v2784_v59  ;;  %v17038_v63 = vld [vmem:[#allocation2_spill] sm:$0xff] }
 0x668   : > { %v17040_v59 = vld [vmem:[#allocation26_spill] sm:$0xff] }
 0x669   : > { %v9079_v51 = vpop.f32.mrb[76].mxu0 }
 0x66a   : > { %10718 = vrot.lane.b32.xlu0 %v16990_v45, %s11690_s28  ;;  %v2794_v44 = vpop.f32.mrb[77].mxu0  ;;  %v13233_v32 = vadd.f32 %v12919_v50, %v9079_v51  ;;  %v13249_v50 = vadd.f32 %v12955_v43, %v2774_v41  ;;  %v17037_v43 = vld [vmem:[#allocation28_spill] sm:$0xff] }
 0x66d   : > { %v9082_v0 = vpop.f32.mrb[78].mxu0 }
 0x66e   : > { %v2804_v25 = vpop.f32.mrb[79].mxu0  ;;  %v13261_v15 = vadd.f32 %v12982_v3, %v9082_v0  ;;  %v17039_v3 = vld [vmem:[#allocation8_spill] sm:$0xff] }
 0x66f   : > { %v13241_v53 = vadd.f32 %v12937_v17, %v2804_v25  ;;  %v13257_v17 = vadd.f32 %v17036_v2, %v2794_v44 }
 0x689   : > { %2819 = vmax.xlane.f32.xlu0 %v13209_v33 }
 0x68a   : > { %2817 = vmax.xlane.f32.xlu1 %v13212_v10 }
 0x68d   : > { %2823 = vmax.xlane.f32.xlu0 %v13217_v54 }
 0x68e   : > { %2821 = vmax.xlane.f32.xlu1 %v13220_v37 }
 0x691   : > { %2835 = vmax.xlane.f32.xlu0 %v13225_v7 }
 0x692   : > { %2827 = vmax.xlane.f32.xlu1 %v13228_v46 }
 0x695   : > { %2839 = vmax.xlane.f32.xlu0 %v13233_v32 }
 0x696   : > { %2825 = vmax.xlane.f32.xlu1 %v13236_v42 }
 0x699   : > { %2841 = vmax.xlane.f32.xlu0 %v13241_v53 }
 0x69a   : > { %2831 = vmax.xlane.f32.xlu1 %v13244_v49 }
 0x69e   : > { %2829 = vmax.xlane.f32.xlu1 %v13249_v50 }
 0x6a2   : > { %2833 = vmax.xlane.f32.xlu1 %v13253_v19 }
 0x6a6   : > { %2837 = vmax.xlane.f32.xlu1 %v13257_v17 }
 0x6aa   : > { %2843 = vmax.xlane.f32.xlu1 %v13261_v15 }
 0x6af   : > { %10723 = vrot.lane.b32.xlu0 %v17037_v43, %s11690_s28  ;;  %s16556_s28 = scalar_lea.vmem %s16646_s8, %s7752_s11 }
 0x6b3   : > { %3166 = vrot.lane.b32.xlu0 %v11872_v40, %s11691_s29 }
 0x6b7   : > { %3170 = vrot.lane.b32.xlu0 %v11890_v47, %s11691_s29 }
 0x6bb   : > { %3174 = vrot.lane.b32.xlu0 %v11914_v56, %s11691_s29  ;;  %3168 = vrot.lane.b32.xlu1 %v17038_v63, %s11691_s29 }
 0x6bf   : > { %3178 = vrot.lane.b32.xlu0 %v16915_v36, %s11691_s29  ;;  %3172 = vrot.lane.b32.xlu1 %v16993_v6, %s11691_s29 }
 0x6c3   : > { %3182 = vrot.lane.b32.xlu0 %v16920_v57, %s11691_s29  ;;  %3176 = vrot.lane.b32.xlu1 %v17039_v3, %s11691_s29 }
 0x6c7   : > { %3186 = vrot.lane.b32.xlu0 %v16922_v31, %s11691_s29  ;;  %3180 = vrot.lane.b32.xlu1 %v16995_v34, %s11691_s29 }
 0x6cb   : > { %3190 = vrot.lane.b32.xlu0 %v16923_v38, %s11691_s29  ;;  %3184 = vrot.lane.b32.xlu1 %v11947_v5, %s11691_s29 }
 0x6cf   : > { %3194 = vrot.lane.b32.xlu0 %v17040_v59, %s11691_s29  ;;  %3188 = vrot.lane.b32.xlu1 %v17041_v9, %s11691_s29 }
 0x6d3   : > { %10728 = vrot.lane.b32.xlu0 %v16936_v21, %s11692_s30  ;;  %3192 = vrot.lane.b32.xlu1 %v17042_v30, %s11691_s29 }
 0x6d7   : > { %10738 = vrot.lane.b32.xlu0 %v16938_v60, %s11692_s30  ;;  %3196 = vrot.lane.b32.xlu1 %v17043_v28, %s11691_s29 }
 0x6db   : > { %10748 = vrot.lane.b32.xlu0 %v16940_v62, %s11692_s30  ;;  %10733 = vrot.lane.b32.xlu1 %v16937_v20, %s11692_s30 }
 0x6df   : > { %10743 = vrot.lane.b32.xlu1 %v16918_v8, %s11692_s30 }
 0x6e1   : > { %v2816_v41 = vpop.xlane.xlu0 %2815 }
 0x6e2   : > { %v2846_v51 = vsub.f32 %v13197_v24, %v2816_v41  ;;  %v2814_v44 = vpop.xlane.xlu1 %2813  ;;  %v10700_v24 = vunpack.i.l.bf16 %v10699_v48 }
 0x6e3   : > { %v2845_v0 = vsub.f32 %v13200_v39, %v2814_v44  ;;  %v10701_v39 = vunpack.i.h.bf16 %v10699_v48 }
 0x6e4   : > { %v2863_v25 = vmul.f32 1.442695, %v2846_v51  ;;  %v10710_v51 = vunpack.i.l.bf16 %v10709_v1 }
 0x6e5   : > { %v2861_v2 = vmul.f32 1.442695, %v2845_v0  ;;  %v10017_v41 = vpack.c.bf16 %v10701_v39, %v10700_v24  ;;  %v10719_v11 = vpop.permute.xlu0 %10718 }
 0x6e6   : > { %v10714_v48 = vpop.permute.xlu1 %10713  ;;  %v10720_v39 = vunpack.i.l.bf16 %v10719_v11 }
 0x6e7   : > { %11063 = vpow2.f32 %v2861_v2  ;;  %v10715_v0 = vunpack.i.l.bf16 %v10714_v48 }
 0x6e8   : > { %11065 = vpow2.f32 %v2863_v25 }
 0x6f1   : > { %v13294_v23 = vpop.eup %11063 }
 0x6f2   : > { %17044 = vst [vmem:[#allocation21_spill] sm:$0xff] %v13294_v23  ;;  %v13296_v58 = vpop.eup %11065  ;;  %9115 = vmatprep.mubr.f32.mxu1 %v13294_v23  ;;  %v13582_v23 = vld [vmem:[%s16642_s4 + $0x78] sm:$0xff] }
 0x6f3   : > { %17045 = vst [vmem:[#allocation28_spill] sm:$0xff] %v13296_v58  ;;  %9116 = vmatmul.mubr.f32.vlgmr.msra.gmra.mrb[80].mxu1 %v13296_v58  ;;  %v17077_v58 = vld [vmem:[#allocation6_spill] sm:$0xff] }
 0x6f4   : > { %10010 = vmatpush3.bf16.xpose.msk.msra.mxu1 %vm12066_vm2, %v13159_v61  ;;  %v10711_v61 = vunpack.i.h.bf16 %v10709_v1  ;;  %v10721_v1 = vunpack.i.h.bf16 %v10719_v11 }
 0x6f5   : > { %10013 = vmatprep.subr.msk.bf16.mxu1 %vm12066_vm2, %v10011_v35 }
 0x6f6   : > { %v10029_v44 = vpack.c.bf16 %v10711_v61, %v10710_v51  ;;  %v10041_v51 = vpack.c.bf16 %v10721_v1, %v10720_v39 }
 0x6fc   : > { %10016 = vmatpush3.bf16.xpose.msk.msra.mxu1 %vm12066_vm2, %v10011_v35  ;;  %v10716_v35 = vunpack.i.h.bf16 %v10714_v48 }
 0x6fd   : > { %10019 = vmatprep.subr.msk.bf16.mxu1 %vm12066_vm2, %v10017_v41 }
 0x6fe   : > { %v10035_v25 = vpack.c.bf16 %v10716_v35, %v10715_v0 }
 0x704   : > { %10022 = vmatpush3.bf16.xpose.msk.msra.mxu1 %vm12066_vm2, %v10017_v41 }
 0x705   : > { %10025 = vmatprep.subr.msk.bf16.mxu1 %vm12066_vm2, %v10023_v26 }
 0x70c   : > { %10028 = vmatpush3.bf16.xpose.msk.msra.mxu1 %vm12066_vm2, %v10023_v26 }
 0x70d   : > { %10031 = vmatprep.subr.msk.bf16.mxu1 %vm12066_vm2, %v10029_v44 }
 0x714   : > { %10034 = vmatpush3.bf16.xpose.msk.msra.mxu1 %vm12066_vm2, %v10029_v44 }
 0x715   : > { %10037 = vmatprep.subr.msk.bf16.mxu1 %vm12066_vm2, %v10035_v25 }
 0x716   : > { %v2820_v2 = vpop.xlane.xlu0 %2819 }
 0x717   : > { %v2848_v24 = vsub.f32 %v13209_v33, %v2820_v2  ;;  %v2818_v41 = vpop.xlane.xlu1 %2817 }
 0x718   : > { %v2847_v13 = vsub.f32 %v13212_v10, %v2818_v41 }
 0x719   : > { %v2867_v4 = vmul.f32 1.442695, %v2848_v24 }
 0x71a   : > { %v2865_v26 = vmul.f32 1.442695, %v2847_v13  ;;  %v2824_v61 = vpop.xlane.xlu0 %2823 }
 0x71b   : > { %v2850_v48 = vsub.f32 %v13217_v54, %v2824_v61  ;;  %v2822_v35 = vpop.xlane.xlu1 %2821 }
 0x71c   : > { %11067 = vpow2.f32 %v2865_v26  ;;  %v2849_v44 = vsub.f32 %v13220_v37, %v2822_v35  ;;  %10040 = vmatpush3.bf16.xpose.msk.msra.mxu1 %vm12066_vm2, %v10035_v25 }
 0x71d   : > { %11069 = vpow2.f32 %v2867_v4  ;;  %v2871_v0 = vmul.f32 1.442695, %v2850_v48  ;;  %10043 = vmatprep.subr.msk.bf16.mxu1 %vm12066_vm2, %v10041_v51 }
 0x71e   : > { %v2869_v33 = vmul.f32 1.442695, %v2849_v44  ;;  %v2836_v10 = vpop.xlane.xlu0 %2835 }
 0x71f   : > { %v2828_v11 = vpop.xlane.xlu1 %2827 }
 0x720   : > { %11071 = vpow2.f32 %v2869_v33  ;;  %v2852_v2 = vsub.f32 %v13228_v46, %v2828_v11 }
 0x721   : > { %11073 = vpow2.f32 %v2871_v0  ;;  %v2856_v0 = vsub.f32 %v13225_v7, %v2836_v10 }
 0x722   : > { %v2840_v54 = vpop.xlane.xlu0 %2839  ;;  %v2875_v37 = vmul.f32 1.442695, %v2852_v2 }
 0x723   : > { %v2826_v1 = vpop.xlane.xlu1 %2825 }
 0x724   : > { %v2851_v39 = vsub.f32 %v13236_v42, %v2826_v1  ;;  %10046 = vmatpush3.bf16.xpose.msk.msra.mxu1 %vm12066_vm2, %v10041_v51 }
 0x726   : > { %v13333_v25 = vpop.eup %11067  ;;  %v2873_v24 = vmul.f32 1.442695, %v2851_v39  ;;  %v2842_v41 = vpop.xlane.xlu0 %2841 }
 0x727   : > { %17046 = vst [vmem:[#allocation2_spill] sm:$0xff] %v13333_v25  ;;  %v13335_v13 = vpop.eup %11069  ;;  %9118 = vmatprep.mubr.f32.mxu1 %v13333_v25  ;;  %v2832_v4 = vpop.xlane.xlu1 %2831  ;;  %v2859_v7 = vsub.f32 %v13241_v53, %v2842_v41  ;;  %v13573_v25 = vld [vmem:[%s16642_s4 + $0x60] sm:$0xff] }
 0x728   : > { %17047 = vst [vmem:[#allocation8_spill] sm:$0xff] %v13335_v13  ;;  %11075 = vpow2.f32 %v2873_v24  ;;  %9119 = vmatmul.mubr.f32.gmra.mrb[82].mxu1 %v13335_v13  ;;  %v2854_v46 = vsub.f32 %v13244_v49, %v2832_v4  ;;  %v13555_v13 = vld [vmem:[%s16642_s4 + $0x50] sm:$0xff] }
 0x729   : > { %11077 = vpow2.f32 %v2875_v37  ;;  %v2883_v37 = vmul.f32 1.442695, %v2856_v0 }
 0x72a   : > { %v13340_v42 = vpop.eup %11071  ;;  %v10724_v26 = vpop.permute.xlu0 %10723  ;;  %v2879_v33 = vmul.f32 1.442695, %v2854_v46 }
 0x72b   : > { %17048 = vst [vmem:[#allocation120_spill] sm:$0xff] %v13340_v42  ;;  %v13342_v61 = vpop.eup %11073  ;;  %v10726_v51 = vunpack.i.h.bf16 %v10724_v26  ;;  %v10725_v48 = vunpack.i.l.bf16 %v10724_v26  ;;  %9121 = vmatprep.mubr.f32.mxu1 %v13340_v42  ;;  %v2830_v35 = vpop.xlane.xlu1 %2829  ;;  %v13545_v42 = vld [vmem:[%s16642_s4 + $0x68] sm:$0xff] }
 0x72c   : > { %17049 = vst [vmem:[#allocation121_spill] sm:$0xff] %v13342_v61  ;;  %v2853_v44 = vsub.f32 %v13249_v50, %v2830_v35  ;;  %9122 = vmatmul.mubr.f32.gmra.mrb[84].mxu1 %v13342_v61  ;;  %v2858_v50 = vsub.f32 %v13233_v32, %v2840_v54  ;;  %v2889_v32 = vmul.f32 1.442695, %v2859_v7  ;;  %v13527_v61 = vld [vmem:[%s16642_s4 + $0x58] sm:$0xff] }
 0x72d   : > { %v10047_v11 = vpack.c.bf16 %v10726_v51, %v10725_v48 }
 0x72e   : > { %v2877_v2 = vmul.f32 1.442695, %v2853_v44  ;;  %v3167_v49 = vpop.permute.xlu0 %3166  ;;  %v2887_v51 = vmul.f32 1.442695, %v2858_v50 }
 0x72f   : > { %v2834_v1 = vpop.xlane.xlu1 %2833  ;;  %10049 = vmatprep.subr.msk.bf16.mxu1 %vm12066_vm2, %v10047_v11 }
 0x730   : > { %11079 = vpow2.f32 %v2877_v2  ;;  %v2855_v39 = vsub.f32 %v13253_v19, %v2834_v1  ;;  %10052 = vmatpush3.bf16.xpose.msk.msra.mxu1 %vm12066_vm2, %v10047_v11 }
 0x731   : > { %11081 = vpow2.f32 %v2879_v33 }
 0x732   : > { %v13354_v24 = vpop.eup %11075  ;;  %v2881_v10 = vmul.f32 1.442695, %v2855_v39  ;;  %v3171_v4 = vpop.permute.xlu0 %3170 }
 0x733   : > { %17050 = vst [vmem:[#allocation122_spill] sm:$0xff] %v13354_v24  ;;  %v13357_v46 = vpop.eup %11077  ;;  %9124 = vmatprep.mubr.f32.mxu1 %v13354_v24  ;;  %v2838_v26 = vpop.xlane.xlu1 %2837  ;;  %v13509_v24 = vld [vmem:[%s16642_s4 + $0x30] sm:$0xff] }
 0x734   : > { %17051 = vst [vmem:[#allocation123_spill] sm:$0xff] %v13357_v46  ;;  %11083 = vpow2.f32 %v2881_v10  ;;  %v2857_v19 = vsub.f32 %v13257_v17, %v2838_v26  ;;  %9125 = vmatmul.mubr.f32.gmra.mrb[86].mxu1 %v13357_v46  ;;  %v13491_v46 = vld [vmem:[%s16642_s4 + $0x28] sm:$0xff] }
 0x735   : > { %11085 = vpow2.f32 %v2883_v37 }
 0x736   : > { %v2885_v54 = vmul.f32 1.442695, %v2857_v19  ;;  %v3175_v48 = vpop.permute.xlu0 %3174 }
 0x737   : > { %v2844_v35 = vpop.xlane.xlu1 %2843 }
 0x738   : > { %11087 = vpow2.f32 %v2885_v54  ;;  %v2860_v53 = vsub.f32 %v13261_v15, %v2844_v35 }
 0x739   : > { %11089 = vpow2.f32 %v2887_v51 }
 0x73a   : > { %v13363_v41 = vpop.eup %11079  ;;  %11091 = vpow2.f32 %v2889_v32  ;;  %v2891_v44 = vmul.f32 1.442695, %v2860_v53  ;;  %v3179_v0 = vpop.permute.xlu0 %3178 }
 0x73b   : > { %17052 = vst [vmem:[#allocation124_spill] sm:$0xff] %v13363_v41  ;;  %v13365_v33 = vpop.eup %11081  ;;  %9127 = vmatprep.mubr.f32.mxu1 %v13363_v41  ;;  %v3169_v17 = vpop.permute.xlu1 %3168  ;;  %v13483_v41 = vld [vmem:[%s16642_s4 + $0x20] sm:$0xff] }
 0x73c   : > { %17053 = vst [vmem:[#allocation125_spill] sm:$0xff] %v13365_v33  ;;  %11093 = vpow2.f32 %v2891_v44  ;;  %9128 = vmatmul.mubr.f32.gmra.mrb[88].mxu1 %v13365_v33 }
 0x73e   : > { %v13369_v11 = vpop.eup %11083  ;;  %v3183_v2 = vpop.permute.xlu0 %3182 }
 0x73f   : > { %17054 = vst [vmem:[#allocation126_spill] sm:$0xff] %v13369_v11  ;;  %v13371_v1 = vpop.eup %11085  ;;  %9130 = vmatprep.mubr.f32.mxu1 %v13369_v11  ;;  %v3173_v50 = vpop.permute.xlu1 %3172  ;;  %v13473_v11 = vld [vmem:[%s16642_s4 + $0x18] sm:$0xff] }
 0x740   : > { %17055 = vst [vmem:[#allocation127_spill] sm:$0xff] %v13371_v1  ;;  %9131 = vmatmul.mubr.f32.gmra.mrb[90].mxu1 %v13371_v1 }
 0x742   : > { %v13375_v15 = vpop.eup %11087  ;;  %v3187_v39 = vpop.permute.xlu0 %3186 }
 0x743   : > { %17056 = vst [vmem:[#allocation128_spill] sm:$0xff] %v13375_v15  ;;  %v13377_v37 = vpop.eup %11089  ;;  %9133 = vmatprep.mubr.f32.mxu1 %v13375_v15  ;;  %v3177_v19 = vpop.permute.xlu1 %3176 }
 0x744   : > { %17057 = vst [vmem:[#allocation129_spill] sm:$0xff] %v13377_v37  ;;  %v13380_v7 = vpop.eup %11091  ;;  %9134 = vmatmul.mubr.f32.gmra.mrb[92].mxu1 %v13377_v37 }
 0x745   : > { %17058 = vst [vmem:[#allocation130_spill] sm:$0xff] %v13380_v7  ;;  %9136 = vmatprep.mubr.f32.mxu1 %v13380_v7 }
 0x746   : > { %v13384_v10 = vpop.eup %11093  ;;  %v3191_v26 = vpop.permute.xlu0 %3190 }
 0x747   : > { %17059 = vst [vmem:[#allocation131_spill] sm:$0xff] %v13384_v10  ;;  %v3181_v54 = vpop.permute.xlu1 %3180 }
 0x748   : > { %9137 = vmatmul.mubr.f32.gmra.mrb[94].mxu1 %v13384_v10 }
 0x749   : > { %9171 = vmatprep.mubr.msk.f32.mxu1 %vm757_vm1, %v3167_v49 }
 0x74a   : > { %v3195_v51 = vpop.permute.xlu0 %3194 }
 0x74b   : > { %v3185_v49 = vpop.permute.xlu1 %3184 }
 0x74c   : > { %9172 = vmatmul.mubr.msk.f32.vlgmr.msra.gmra.mrb[96].mxu1 %vm757_vm1, %v3169_v17 }
 0x74d   : > { %9174 = vmatprep.mubr.msk.f32.mxu1 %vm757_vm1, %v3171_v4 }
 0x74e   : > { %v10729_v32 = vpop.permute.xlu0 %10728 }
 0x74f   : > { %v10731_v35 = vunpack.i.h.bf16 %v10729_v32  ;;  %v10730_v53 = vunpack.i.l.bf16 %v10729_v32  ;;  %v3189_v4 = vpop.permute.xlu1 %3188 }
 0x750   : > { %9175 = vmatmul.mubr.msk.f32.gmra.mrb[98].mxu1 %vm757_vm1, %v3173_v50 }
 0x751   : > { %v13391_v44 = vpack.c.bf16 %v10731_v35, %v10730_v53  ;;  %9177 = vmatprep.mubr.msk.f32.mxu1 %vm757_vm1, %v3175_v48 }
 0x752   : > { %v10739_v52 = vpop.permute.xlu0 %10738 }
 0x753   : > { %10087 = vmatprep.subr.msk.bf16.mxu0 %vm12066_vm2, %v13391_v44  ;;  %v3193_v48 = vpop.permute.xlu1 %3192 }
 0x754   : > { %9178 = vmatmul.mubr.msk.f32.gmra.mrb[100].mxu1 %vm757_vm1, %v3177_v19 }
 0x755   : > { %9180 = vmatprep.mubr.msk.f32.mxu1 %vm757_vm1, %v3179_v0 }
 0x757   : > { %v3197_v17 = vpop.permute.xlu1 %3196 }
 0x758   : > { %9181 = vmatmul.mubr.msk.f32.gmra.mrb[102].mxu1 %vm757_vm1, %v3181_v54 }
 0x759   : > { %9183 = vmatprep.mubr.msk.f32.mxu1 %vm757_vm1, %v3183_v2 }
 0x75c   : > { %9184 = vmatmul.mubr.msk.f32.gmra.mrb[104].mxu1 %vm757_vm1, %v3185_v49 }
 0x75d   : > { %9186 = vmatprep.mubr.msk.f32.mxu1 %vm757_vm1, %v3187_v39 }
 0x760   : > { %9187 = vmatmul.mubr.msk.f32.gmra.mrb[106].mxu1 %vm757_vm1, %v3189_v4 }
 0x761   : > { %9189 = vmatprep.mubr.msk.f32.mxu1 %vm757_vm1, %v3191_v26 }
 0x764   : > { %9190 = vmatmul.mubr.msk.f32.gmra.mrb[108].mxu1 %vm757_vm1, %v3193_v48 }
 0x765   : > { %9192 = vmatprep.mubr.msk.f32.mxu1 %vm757_vm1, %v3195_v51 }
 0x768   : > { %9193 = vmatmul.mubr.msk.f32.gmra.mrb[110].mxu1 %vm757_vm1, %v3197_v17 }
 0x7c6   : > { %v13408_v0 = vpop.f32.mrb[80].mxu1 }
 0x7c7   : > { %17060 = vst [vmem:[#allocation132_spill] sm:$0xff] %v13408_v0  ;;  %v13410_v2 = vpop.f32.mrb[81].mxu1  ;;  %v13465_v0 = vld [vmem:[%s16642_s4 + $0x10] sm:$0xff] }
 0x7c8   : > { %17061 = vst [vmem:[#allocation133_spill] sm:$0xff] %v13410_v2 }
 0x7fb   : > { %v13412_v50 = vpop.f32.mrb[82].mxu1 }
 0x7fc   : > { %17062 = vst [vmem:[#allocation134_spill] sm:$0xff] %v13412_v50  ;;  %v13414_v19 = vpop.f32.mrb[83].mxu1 }
 0x7fd   : > { %17063 = vst [vmem:[#allocation135_spill] sm:$0xff] %v13414_v19 }
 0x7ff   : > { %v13416_v39 = vpop.f32.mrb[84].mxu1 }
 0x800   : > { %17064 = vst [vmem:[#allocation136_spill] sm:$0xff] %v13416_v39  ;;  %v13418_v32 = vpop.f32.mrb[85].mxu1 }
 0x801   : > { %17065 = vst [vmem:[#allocation137_spill] sm:$0xff] %v13418_v32 }
 0x807   : > { %v13420_v26 = vpop.f32.mrb[86].mxu1 }
 0x808   : > { %17066 = vst [vmem:[#allocation138_spill] sm:$0xff] %v13420_v26  ;;  %v13422_v54 = vpop.f32.mrb[87].mxu1  ;;  %v13443_v26 = vld [vmem:[%s16642_s4 + $0x8] sm:$0xff] }
 0x809   : > { %17067 = vst [vmem:[#allocation139_spill] sm:$0xff] %v13422_v54 }
 0x80f   : > { %v13424_v51 = vpop.f32.mrb[88].mxu1 }
 0x810   : > { %17068 = vst [vmem:[#allocation140_spill] sm:$0xff] %v13424_v51  ;;  %v13426_v35 = vpop.f32.mrb[89].mxu1 }
 0x811   : > { %17069 = vst [vmem:[#allocation141_spill] sm:$0xff] %v13426_v35 }
 0x813   : > { %v13428_v53 = vpop.f32.mrb[90].mxu1 }
 0x814   : > { %17070 = vst [vmem:[#allocation142_spill] sm:$0xff] %v13428_v53  ;;  %v13430_v49 = vpop.f32.mrb[91].mxu1 }
 0x815   : > { %17071 = vst [vmem:[#allocation143_spill] sm:$0xff] %v13430_v49 }
 0x817   : > { %v13432_v4 = vpop.f32.mrb[92].mxu1 }
 0x818   : > { %17072 = vst [vmem:[#allocation144_spill] sm:$0xff] %v13432_v4  ;;  %v13434_v48 = vpop.f32.mrb[93].mxu1  ;;  %v13451_v4 = vld [vmem:[%s16642_s4] sm:$0xff] }
 0x819   : > { %17073 = vst [vmem:[#allocation145_spill] sm:$0xff] %v13434_v48 }
 0x81b   : > { %v13436_v17 = vpop.f32.mrb[94].mxu1 }
 0x81c   : > { %17074 = vst [vmem:[#allocation146_spill] sm:$0xff] %v13436_v17  ;;  %v13438_v39 = vpop.f32.mrb[95].mxu1 }
 0x81d   : > { %17075 = vst [vmem:[#allocation147_spill] sm:$0xff] %v13438_v39 }
 0x81f   : > { %v9173_v32 = vpop.f32.mrb[96].mxu1 }
 0x820   : > { %v13446_v51 = vadd.f32 %v13443_v26, %v9173_v32  ;;  %v3360_v53 = vpop.f32.mrb[97].mxu1 }
 0x821   : > { %v13454_v48 = vadd.f32 %v13451_v4, %v3360_v53 }
 0x822   : > { %3441 = vmax.xlane.f32.xlu1 %v13446_v51 }
 0x823   : > { %v9176_v17 = vpop.f32.mrb[98].mxu1  ;;  %3439 = vmax.xlane.f32.xlu0 %v13454_v48 }
 0x824   : > { %v3370_v39 = vpop.f32.mrb[99].mxu1  ;;  %v13476_v33 = vadd.f32 %v13473_v11, %v9176_v17 }
 0x825   : > { %v13468_v1 = vadd.f32 %v13465_v0, %v3370_v39 }
 0x827   : > { %v9179_v49 = vpop.f32.mrb[100].mxu1 }
 0x828   : > { %v3380_v35 = vpop.f32.mrb[101].mxu1  ;;  %v13494_v17 = vadd.f32 %v13491_v46, %v9179_v49 }
 0x829   : > { %v13486_v39 = vadd.f32 %v13483_v41, %v3380_v35 }
 0x82b   : > { %v9182_v54 = vpop.f32.mrb[102].mxu1 }
 0x82c   : > { %v3390_v32 = vpop.f32.mrb[103].mxu1  ;;  %v13504_v35 = vadd.f32 %v13501_v55, %v9182_v54 }
 0x82d   : > { %v13512_v49 = vadd.f32 %v13509_v24, %v3390_v32 }
 0x82f   : > { %v9185_v50 = vpop.f32.mrb[104].mxu1 }
 0x830   : > { %v3400_v19 = vpop.f32.mrb[105].mxu1  ;;  %v13522_v54 = vadd.f32 %v13519_v16, %v9185_v50 }
 0x831   : > { %v13540_v50 = vadd.f32 %v13537_v14, %v3400_v19 }
 0x833   : > { %10753 = vrot.lane.b32.xlu1 %v16989_v12, %s11692_s30  ;;  %v9188_v10 = vpop.f32.mrb[106].mxu1 }
 0x834   : > { %v3410_v7 = vpop.f32.mrb[107].mxu1  ;;  %v13530_v32 = vadd.f32 %v13527_v61, %v9188_v10 }
 0x835   : > { %v13558_v19 = vadd.f32 %v13555_v13, %v3410_v7 }
 0x837   : > { %v9191_v37 = vpop.f32.mrb[108].mxu1 }
 0x838   : > { %v3420_v53 = vpop.f32.mrb[109].mxu1  ;;  %v13548_v10 = vadd.f32 %v13545_v42, %v9191_v37 }
 0x839   : > { %10758 = vrot.lane.b32.xlu0 %v16990_v45, %s11692_s30  ;;  %v13576_v7 = vadd.f32 %v13573_v25, %v3420_v53  ;;  %v10734_v53 = vpop.permute.xlu1 %10733 }
 0x83b   : > { %v9194_v2 = vpop.f32.mrb[110].mxu1 }
 0x83c   : > { %v3430_v15 = vpop.f32.mrb[111].mxu1 }
 0x83d   : > { %v13566_v37 = vadd.f32 %v13563_v18, %v3430_v15  ;;  %v13585_v15 = vadd.f32 %v13582_v23, %v9194_v2  ;;  %v17076_v2 = vld [vmem:[#allocation12_spill] sm:$0xff] }
 0x857   : > { %3443 = vmax.xlane.f32.xlu1 %v13468_v1 }
 0x858   : > { %3445 = vmax.xlane.f32.xlu0 %v13476_v33 }
 0x85b   : > { %3447 = vmax.xlane.f32.xlu1 %v13486_v39 }
 0x85c   : > { %3449 = vmax.xlane.f32.xlu0 %v13494_v17 }
 0x85f   : > { %3453 = vmax.xlane.f32.xlu1 %v13504_v35 }
 0x860   : > { %3451 = vmax.xlane.f32.xlu0 %v13512_v49 }
 0x863   : > { %3457 = vmax.xlane.f32.xlu1 %v13522_v54 }
 0x864   : > { %3461 = vmax.xlane.f32.xlu0 %v13530_v32 }
 0x867   : > { %3455 = vmax.xlane.f32.xlu1 %v13540_v50 }
 0x868   : > { %3465 = vmax.xlane.f32.xlu0 %v13548_v10 }
 0x86b   : > { %3459 = vmax.xlane.f32.xlu1 %v13558_v19 }
 0x86c   : > { %3467 = vmax.xlane.f32.xlu0 %v13566_v37 }
 0x86f   : > { %3463 = vmax.xlane.f32.xlu1 %v13576_v7 }
 0x873   : > { %3469 = vmax.xlane.f32.xlu1 %v13585_v15 }
 0x882   : > { %10763 = vrot.lane.b32.xlu0 %v17037_v43, %s11692_s30  ;;  %s11694_s30 = smov 72  }
 0x884   : > { %3746 = vrot.lane.b32.xlu1 %v17038_v63, %s11693_s16 }
 0x886   : > { %3744 = vrot.lane.b32.xlu0 %v11872_v40, %s11693_s16 }
 0x888   : > { %3750 = vrot.lane.b32.xlu1 %v16993_v6, %s11693_s16 }
 0x88a   : > { %3748 = vrot.lane.b32.xlu0 %v11890_v47, %s11693_s16 }
 0x88c   : > { %3754 = vrot.lane.b32.xlu1 %v17039_v3, %s11693_s16 }
 0x88e   : > { %3752 = vrot.lane.b32.xlu0 %v11914_v56, %s11693_s16 }
 0x890   : > { %3758 = vrot.lane.b32.xlu1 %v16995_v34, %s11693_s16 }
 0x892   : > { %3756 = vrot.lane.b32.xlu0 %v16915_v36, %s11693_s16 }
 0x894   : > { %3762 = vrot.lane.b32.xlu1 %v11947_v5, %s11693_s16 }
 0x896   : > { %3760 = vrot.lane.b32.xlu0 %v16920_v57, %s11693_s16 }
 0x898   : > { %3766 = vrot.lane.b32.xlu1 %v17041_v9, %s11693_s16  ;;  %v10749_v9 = vpop.permute.xlu0 %10748 }
 0x89a   : > { %3764 = vrot.lane.b32.xlu0 %v16922_v31, %s11693_s16 }
 0x89c   : > { %3770 = vrot.lane.b32.xlu1 %v17042_v30, %s11693_s16  ;;  %v10744_v30 = vpop.permute.xlu1 %10743 }
 0x89e   : > { %3768 = vrot.lane.b32.xlu0 %v16923_v38, %s11693_s16  ;;  %v17082_v38 = vld [vmem:[#allocation35_spill] sm:$0xff] }
 0x8a0   : > { %3774 = vrot.lane.b32.xlu1 %v17043_v28, %s11693_s16  ;;  %v17080_v28 = vld [vmem:[#allocation32_spill] sm:$0xff] }
 0x8a2   : > { %3772 = vrot.lane.b32.xlu0 %v17040_v59, %s11693_s16  ;;  %v17081_v59 = vld [vmem:[#allocation30_spill] sm:$0xff] }
 0x8a4   : > { %10773 = vrot.lane.b32.xlu1 %v17076_v2, %s11681_s18 }
 0x8a6   : > { %10768 = vrot.lane.b32.xlu0 %v17077_v58, %s11681_s18 }
 0x8a8   : > { %10788 = vrot.lane.b32.xlu1 %v17078_v29, %s11681_s18 }
 0x8aa   : > { %10778 = vrot.lane.b32.xlu0 %v17079_v22, %s11681_s18  ;;  %v17083_v22 = vld [vmem:[#allocation34_spill] sm:$0xff] }
 0x8ac   : > { %10793 = vrot.lane.b32.xlu1 %v17080_v28, %s11681_s18 }
 0x8ae   : > { %10783 = vrot.lane.b32.xlu0 %v17081_v59, %s11681_s18 }
 0x8af   : > { %v3442_v2 = vpop.xlane.xlu1 %3441 }
 0x8b0   : > { %v3472_v5 = vsub.f32 %v13446_v51, %v3442_v2  ;;  %10803 = vrot.lane.b32.xlu1 %v17082_v38, %s11681_s18  ;;  %v3440_v58 = vpop.xlane.xlu0 %3439  ;;  %v10736_v51 = vunpack.i.h.bf16 %v10734_v53  ;;  %v10735_v2 = vunpack.i.l.bf16 %v10734_v53  ;;  %v10746_v53 = vunpack.i.h.bf16 %v10744_v30 }
 0x8b1   : > { %v3471_v29 = vsub.f32 %v13454_v48, %v3440_v58 }
 0x8b2   : > { %v3489_v34 = vmul.f32 1.442695, %v3472_v5  ;;  %10798 = vrot.lane.b32.xlu0 %v17083_v22, %s11681_s18  ;;  %v10091_v58 = vpack.c.bf16 %v10736_v51, %v10735_v2  ;;  %v10745_v51 = vunpack.i.l.bf16 %v10744_v30  ;;  %s11695_s18 = smov 104  }
 0x8b3   : > { %v3487_v31 = vmul.f32 1.442695, %v3471_v29 }
 0x8b4   : > { %10823 = vrot.lane.b32.xlu1 %v16918_v8, %s11694_s30  ;;  %v10103_v2 = vpack.c.bf16 %v10746_v53, %v10745_v51 }
 0x8b5   : > { %11095 = vpow2.f32 %v3487_v31  ;;  %v10740_v31 = vunpack.i.l.bf16 %v10739_v52 }
 0x8b6   : > { %11097 = vpow2.f32 %v3489_v34  ;;  %10808 = vrot.lane.b32.xlu0 %v16936_v21, %s11694_s30  ;;  %v10741_v34 = vunpack.i.h.bf16 %v10739_v52  ;;  %v10754_v52 = vpop.permute.xlu1 %10753 }
 0x8b8   : > { %v10097_v48 = vpack.c.bf16 %v10741_v34, %v10740_v31  ;;  %v10755_v34 = vunpack.i.l.bf16 %v10754_v52  ;;  %v10759_v31 = vpop.permute.xlu0 %10758 }
 0x8ba   : > { %10813 = vrot.lane.b32.xlu0 %v16937_v20, %s11694_s30 }
 0x8be   : > { %10818 = vrot.lane.b32.xlu0 %v16938_v60, %s11694_s30 }
 0x8bf   : > { %v13632_v5 = vpop.eup %11095 }
 0x8c0   : > { %17084 = vst [vmem:[#allocation32_spill] sm:$0xff] %v13632_v5  ;;  %v13634_v29 = vpop.eup %11097  ;;  %9227 = vmatprep.mubr.f32.mxu0 %v13632_v5 }
 0x8c1   : > { %17085 = vst [vmem:[#allocation30_spill] sm:$0xff] %v13634_v29  ;;  %9228 = vmatmul.mubr.f32.vlgmr.msra.gmra.mrb[80].mxu0 %v13634_v29  ;;  %v10750_v29 = vunpack.i.l.bf16 %v10749_v9 }
 0x8c2   : > { %10090 = vmatpush3.bf16.xpose.msk.msra.mxu0 %vm12066_vm2, %v13391_v44  ;;  %10828 = vrot.lane.b32.xlu0 %v16940_v62, %s11694_s30  ;;  %v10751_v44 = vunpack.i.h.bf16 %v10749_v9  ;;  %v10761_v9 = vunpack.i.h.bf16 %v10759_v31 }
 0x8c3   : > { %10093 = vmatprep.subr.msk.bf16.mxu0 %vm12066_vm2, %v10091_v58 }
 0x8c4   : > { %v10109_v5 = vpack.c.bf16 %v10751_v44, %v10750_v29  ;;  %v10760_v29 = vunpack.i.l.bf16 %v10759_v31 }
 0x8ca   : > { %10096 = vmatpush3.bf16.xpose.msk.msra.mxu0 %vm12066_vm2, %v10091_v58  ;;  %v10756_v58 = vunpack.i.h.bf16 %v10754_v52  ;;  %v10121_v52 = vpack.c.bf16 %v10761_v9, %v10760_v29 }
 0x8cb   : > { %10099 = vmatprep.subr.msk.bf16.mxu0 %vm12066_vm2, %v10097_v48 }
 0x8cc   : > { %v10115_v30 = vpack.c.bf16 %v10756_v58, %v10755_v34 }
 0x8d2   : > { %10102 = vmatpush3.bf16.xpose.msk.msra.mxu0 %vm12066_vm2, %v10097_v48 }
 0x8d3   : > { %10105 = vmatprep.subr.msk.bf16.mxu0 %vm12066_vm2, %v10103_v2 }
 0x8da   : > { %10108 = vmatpush3.bf16.xpose.msk.msra.mxu0 %vm12066_vm2, %v10103_v2 }
 0x8db   : > { %10111 = vmatprep.subr.msk.bf16.mxu0 %vm12066_vm2, %v10109_v5 }
 0x8e2   : > { %10114 = vmatpush3.bf16.xpose.msk.msra.mxu0 %vm12066_vm2, %v10109_v5 }
 0x8e3   : > { %10117 = vmatprep.subr.msk.bf16.mxu0 %vm12066_vm2, %v10115_v30 }
 0x8e4   : > { %v3444_v48 = vpop.xlane.xlu1 %3443 }
 0x8e5   : > { %v3473_v53 = vsub.f32 %v13468_v1, %v3444_v48  ;;  %v3446_v51 = vpop.xlane.xlu0 %3445 }
 0x8e6   : > { %v3474_v2 = vsub.f32 %v13476_v33, %v3446_v51 }
 0x8e7   : > { %v3491_v44 = vmul.f32 1.442695, %v3473_v53 }
 0x8e8   : > { %v3493_v62 = vmul.f32 1.442695, %v3474_v2  ;;  %v3448_v8 = vpop.xlane.xlu1 %3447 }
 0x8e9   : > { %11099 = vpow2.f32 %v3491_v44  ;;  %v3475_v58 = vsub.f32 %v13486_v39, %v3448_v8  ;;  %v3450_v34 = vpop.xlane.xlu0 %3449 }
 0x8ea   : > { %11101 = vpow2.f32 %v3493_v62  ;;  %10120 = vmatpush3.bf16.xpose.msk.msra.mxu0 %vm12066_vm2, %v10115_v30  ;;  %v3476_v5 = vsub.f32 %v13494_v17, %v3450_v34 }
 0x8eb   : > { %v3495_v31 = vmul.f32 1.442695, %v3475_v58  ;;  %10123 = vmatprep.subr.msk.bf16.mxu0 %vm12066_vm2, %v10121_v52 }
 0x8ec   : > { %v3497_v1 = vmul.f32 1.442695, %v3476_v5  ;;  %v3454_v33 = vpop.xlane.xlu1 %3453 }
 0x8ed   : > { %11103 = vpow2.f32 %v3495_v31  ;;  %v3478_v48 = vsub.f32 %v13504_v35, %v3454_v33  ;;  %v3452_v9 = vpop.xlane.xlu0 %3451 }
 0x8ee   : > { %11105 = vpow2.f32 %v3497_v1  ;;  %v3477_v8 = vsub.f32 %v13512_v49, %v3452_v9 }
 0x8ef   : > { %v3501_v39 = vmul.f32 1.442695, %v3478_v48 }
 0x8f0   : > { %v3499_v62 = vmul.f32 1.442695, %v3477_v8  ;;  %v3458_v29 = vpop.xlane.xlu1 %3457 }
 0x8f1   : > { %v3462_v53 = vpop.xlane.xlu0 %3461  ;;  %v3480_v17 = vsub.f32 %v13522_v54, %v3458_v29 }
 0x8f2   : > { %11107 = vpow2.f32 %v3499_v62  ;;  %10126 = vmatpush3.bf16.xpose.msk.msra.mxu0 %vm12066_vm2, %v10121_v52  ;;  %v3482_v58 = vsub.f32 %v13530_v32, %v3462_v53 }
 0x8f3   : > { %v13674_v30 = vpop.eup %11099  ;;  %11109 = vpow2.f32 %v3501_v39  ;;  %v3505_v44 = vmul.f32 1.442695, %v3480_v17 }
 0x8f4   : > { %v13676_v51 = vpop.eup %11101  ;;  %v3456_v35 = vpop.xlane.xlu1 %3455  ;;  %9230 = vmatprep.mubr.f32.mxu0 %v13674_v30  ;;  %v3509_v1 = vmul.f32 1.442695, %v3482_v58 }
 0x8f5   : > { %17086 = vst [vmem:[#allocation35_spill] sm:$0xff] %v13676_v51  ;;  %v3479_v49 = vsub.f32 %v13540_v50, %v3456_v35  ;;  %9231 = vmatmul.mubr.f32.gmra.mrb[82].mxu0 %v13676_v51  ;;  %v3466_v2 = vpop.xlane.xlu0 %3465  ;;  %v14182_v51 = vld [vmem:[%s16642_s4 + $0x78] sm:$0xff] }
 0x8f6   : > { %v3484_v33 = vsub.f32 %v13548_v10, %v3466_v2 }
 0x8f7   : > { %v13682_v54 = vpop.eup %11103  ;;  %v3503_v34 = vmul.f32 1.442695, %v3479_v49 }
 0x8f8   : > { %17087 = vst [vmem:[#allocation34_spill] sm:$0xff] %v13682_v54  ;;  %v13684_v52 = vpop.eup %11105  ;;  %v3460_v5 = vpop.xlane.xlu1 %3459  ;;  %9233 = vmatprep.mubr.f32.mxu0 %v13682_v54  ;;  %v3513_v29 = vmul.f32 1.442695, %v3484_v33  ;;  %v14164_v54 = vld [vmem:[%s16642_s4 + $0x50] sm:$0xff] }
 0x8f9   : > { %17088 = vst [vmem:[#allocation148_spill] sm:$0xff] %v13684_v52  ;;  %11111 = vpow2.f32 %v3503_v34  ;;  %v3481_v31 = vsub.f32 %v13558_v19, %v3460_v5  ;;  %9234 = vmatmul.mubr.f32.gmra.mrb[84].mxu0 %v13684_v52  ;;  %v3468_v50 = vpop.xlane.xlu0 %3467  ;;  %v14145_v52 = vld [vmem:[%s16642_s4 + $0x48] sm:$0xff] }
 0x8fa   : > { %11113 = vpow2.f32 %v3505_v44  ;;  %v3485_v32 = vsub.f32 %v13566_v37, %v3468_v50 }
 0x8fb   : > { %v3507_v48 = vmul.f32 1.442695, %v3481_v31 }
 0x8fc   : > { %v13691_v9 = vpop.eup %11107  ;;  %v3464_v8 = vpop.xlane.xlu1 %3463  ;;  %v3515_v10 = vmul.f32 1.442695, %v3485_v32 }
 0x8fd   : > { %17089 = vst [vmem:[#allocation149_spill] sm:$0xff] %v13691_v9  ;;  %v13693_v39 = vpop.eup %11109  ;;  %11115 = vpow2.f32 %v3507_v48  ;;  %v3483_v62 = vsub.f32 %v13576_v7, %v3464_v8  ;;  %9236 = vmatprep.mubr.f32.mxu0 %v13691_v9  ;;  %v10764_v19 = vpop.permute.xlu0 %10763  ;;  %v14137_v9 = vld [vmem:[%s16642_s4 + $0x70] sm:$0xff] }
 0x8fe   : > { %17090 = vst [vmem:[#allocation150_spill] sm:$0xff] %v13693_v39  ;;  %11117 = vpow2.f32 %v3509_v1  ;;  %v10766_v53 = vunpack.i.h.bf16 %v10764_v19  ;;  %v10765_v17 = vunpack.i.l.bf16 %v10764_v19  ;;  %9237 = vmatmul.mubr.f32.gmra.mrb[86].mxu0 %v13693_v39 }
 0x8ff   : > { %v3511_v35 = vmul.f32 1.442695, %v3483_v62 }
 0x900   : > { %v10127_v37 = vpack.c.bf16 %v10766_v53, %v10765_v17  ;;  %v3470_v49 = vpop.xlane.xlu1 %3469 }
 0x901   : > { %11119 = vpow2.f32 %v3511_v35  ;;  %v3486_v2 = vsub.f32 %v13585_v15, %v3470_v49  ;;  %v3745_v44 = vpop.permute.xlu0 %3744 }
 0x902   : > { %11121 = vpow2.f32 %v3513_v29  ;;  %10129 = vmatprep.subr.msk.bf16.mxu0 %vm12066_vm2, %v10127_v37 }
 0x903   : > { %v13701_v7 = vpop.eup %11111  ;;  %11123 = vpow2.f32 %v3515_v10  ;;  %v3517_v58 = vmul.f32 1.442695, %v3486_v2  ;;  %10132 = vmatpush3.bf16.xpose.msk.msra.mxu0 %vm12066_vm2, %v10127_v37 }
 0x904   : > { %17091 = vst [vmem:[#allocation151_spill] sm:$0xff] %v13701_v7  ;;  %v13705_v34 = vpop.eup %11113  ;;  %v3747_v5 = vpop.permute.xlu1 %3746  ;;  %9239 = vmatprep.mubr.f32.mxu0 %v13701_v7 }
 0x905   : > { %17092 = vst [vmem:[#allocation152_spill] sm:$0xff] %v13705_v34  ;;  %11125 = vpow2.f32 %v3517_v58  ;;  %9240 = vmatmul.mubr.f32.gmra.mrb[88].mxu0 %v13705_v34  ;;  %v3749_v15 = vpop.permute.xlu0 %3748 }
 0x907   : > { %v13709_v31 = vpop.eup %11115 }
 0x908   : > { %17093 = vst [vmem:[#allocation153_spill] sm:$0xff] %v13709_v31  ;;  %v13711_v50 = vpop.eup %11117  ;;  %v3751_v1 = vpop.permute.xlu1 %3750  ;;  %9242 = vmatprep.mubr.f32.mxu0 %v13709_v31 }
 0x909   : > { %17094 = vst [vmem:[#allocation154_spill] sm:$0xff] %v13711_v50  ;;  %9243 = vmatmul.mubr.f32.gmra.mrb[90].mxu0 %v13711_v50  ;;  %v3753_v33 = vpop.permute.xlu0 %3752 }
 0x90b   : > { %v13715_v48 = vpop.eup %11119 }
 0x90c   : > { %17095 = vst [vmem:[#allocation155_spill] sm:$0xff] %v13715_v48  ;;  %v13717_v32 = vpop.eup %11121  ;;  %v3755_v8 = vpop.permute.xlu1 %3754  ;;  %9245 = vmatprep.mubr.f32.mxu0 %v13715_v48 }
 0x90d   : > { %17096 = vst [vmem:[#allocation156_spill] sm:$0xff] %v13717_v32  ;;  %v13720_v62 = vpop.eup %11123  ;;  %9246 = vmatmul.mubr.f32.gmra.mrb[92].mxu0 %v13717_v32  ;;  %v3757_v19 = vpop.permute.xlu0 %3756 }
 0x90e   : > { %17097 = vst [vmem:[#allocation157_spill] sm:$0xff] %v13720_v62  ;;  %9248 = vmatprep.mubr.f32.mxu0 %v13720_v62 }
 0x90f   : > { %v13724_v29 = vpop.eup %11125 }
 0x910   : > { %17098 = vst [vmem:[#allocation158_spill] sm:$0xff] %v13724_v29  ;;  %v3759_v53 = vpop.permute.xlu1 %3758 }
 0x911   : > { %9249 = vmatmul.mubr.f32.gmra.mrb[94].mxu0 %v13724_v29  ;;  %v3761_v17 = vpop.permute.xlu0 %3760 }
 0x912   : > { %9283 = vmatprep.mubr.msk.f32.mxu0 %vm757_vm1, %v3745_v44 }
 0x914   : > { %v3763_v10 = vpop.permute.xlu1 %3762 }
 0x915   : > { %v3765_v35 = vpop.permute.xlu0 %3764  ;;  %9284 = vmatmul.mubr.msk.f32.vlgmr.msra.gmra.mrb[96].mxu0 %vm757_vm1, %v3747_v5 }
 0x916   : > { %9286 = vmatprep.mubr.msk.f32.mxu0 %vm757_vm1, %v3749_v15 }
 0x918   : > { %v3767_v37 = vpop.permute.xlu1 %3766 }
 0x919   : > { %v3769_v49 = vpop.permute.xlu0 %3768  ;;  %9287 = vmatmul.mubr.msk.f32.gmra.mrb[98].mxu0 %vm757_vm1, %v3751_v1 }
 0x91a   : > { %9289 = vmatprep.mubr.msk.f32.mxu0 %vm757_vm1, %v3753_v33 }
 0x91c   : > { %v3771_v2 = vpop.permute.xlu1 %3770 }
 0x91d   : > { %v3773_v58 = vpop.permute.xlu0 %3772  ;;  %9290 = vmatmul.mubr.msk.f32.gmra.mrb[100].mxu0 %vm757_vm1, %v3755_v8 }
 0x91e   : > { %9292 = vmatprep.mubr.msk.f32.mxu0 %vm757_vm1, %v3757_v19 }
 0x920   : > { %v3775_v29 = vpop.permute.xlu1 %3774 }
 0x921   : > { %v10769_v44 = vpop.permute.xlu0 %10768  ;;  %9293 = vmatmul.mubr.msk.f32.gmra.mrb[102].mxu0 %vm757_vm1, %v3759_v53 }
 0x922   : > { %v10771_v62 = vunpack.i.h.bf16 %v10769_v44  ;;  %v10770_v5 = vunpack.i.l.bf16 %v10769_v44  ;;  %9295 = vmatprep.mubr.msk.f32.mxu0 %vm757_vm1, %v3761_v17 }
 0x924   : > { %v10774_v15 = vpop.permute.xlu1 %10773  ;;  %v10133_v32 = vpack.c.bf16 %v10771_v62, %v10770_v5 }
 0x925   : > { %v10776_v48 = vunpack.i.h.bf16 %v10774_v15  ;;  %v10775_v1 = vunpack.i.l.bf16 %v10774_v15  ;;  %v10779_v50 = vpop.permute.xlu0 %10778  ;;  %9296 = vmatmul.mubr.msk.f32.gmra.mrb[104].mxu0 %vm757_vm1, %v3763_v10 }
 0x926   : > { %v10781_v33 = vunpack.i.h.bf16 %v10779_v50  ;;  %v10780_v31 = vunpack.i.l.bf16 %v10779_v50  ;;  %9298 = vmatprep.mubr.msk.f32.mxu0 %vm757_vm1, %v3765_v35  ;;  %10134 = vmatprep.subr.bf16.mxu1 %v10133_v32 }
 0x927   : > { %10136 = vmatpush3.bf16.msra.mxu1 %v10133_v32  ;;  %v10137_v8 = vpack.c.bf16 %v10776_v48, %v10775_v1 }
 0x928   : > { %v10789_v19 = vpop.permute.xlu1 %10788  ;;  %v10141_v62 = vpack.c.bf16 %v10781_v33, %v10780_v31 }
 0x929   : > { %v10784_v53 = vpop.permute.xlu0 %10783  ;;  %9299 = vmatmul.mubr.msk.f32.gmra.mrb[106].mxu0 %vm757_vm1, %v3767_v37  ;;  %10138 = vmatprep.subr.bf16.mxu1 %v10137_v8  ;;  %v10791_v50 = vunpack.i.h.bf16 %v10789_v19  ;;  %v10790_v10 = vunpack.i.l.bf16 %v10789_v19 }
 0x92a   : > { %v10786_v17 = vunpack.i.h.bf16 %v10784_v53  ;;  %v10785_v44 = vunpack.i.l.bf16 %v10784_v53  ;;  %9301 = vmatprep.mubr.msk.f32.mxu0 %vm757_vm1, %v3769_v49 }
 0x92b   : > { %10140 = vmatpush3.bf16.msra.mxu1 %v10137_v8  ;;  %v10149_v5 = vpack.c.bf16 %v10791_v50, %v10790_v10 }
 0x92c   : > { %10142 = vmatprep.subr.bf16.mxu1 %v10141_v62  ;;  %v10145_v32 = vpack.c.bf16 %v10786_v17, %v10785_v44  ;;  %v10794_v48 = vpop.permute.xlu1 %10793 }
 0x92d   : > { %9302 = vmatmul.mubr.msk.f32.gmra.mrb[108].mxu0 %vm757_vm1, %v3771_v2  ;;  %v10796_v35 = vunpack.i.h.bf16 %v10794_v48  ;;  %v10795_v37 = vunpack.i.l.bf16 %v10794_v48  ;;  %v10799_v15 = vpop.permute.xlu0 %10798 }
 0x92e   : > { %9304 = vmatprep.mubr.msk.f32.mxu0 %vm757_vm1, %v3773_v58  ;;  %v10801_v31 = vunpack.i.h.bf16 %v10799_v15  ;;  %v10800_v49 = vunpack.i.l.bf16 %v10799_v15 }
 0x92f   : > { %10144 = vmatpush3.bf16.msra.mxu1 %v10141_v62  ;;  %v10153_v1 = vpack.c.bf16 %v10796_v35, %v10795_v37 }
 0x930   : > { %10146 = vmatprep.subr.bf16.mxu1 %v10145_v32  ;;  %v10804_v2 = vpop.permute.xlu1 %10803  ;;  %v10157_v8 = vpack.c.bf16 %v10801_v31, %v10800_v49 }
 0x931   : > { %9305 = vmatmul.mubr.msk.f32.gmra.mrb[110].mxu0 %vm757_vm1, %v3775_v29  ;;  %v10806_v33 = vunpack.i.h.bf16 %v10804_v2  ;;  %v10805_v58 = vunpack.i.l.bf16 %v10804_v2  ;;  %v10809_v19 = vpop.permute.xlu0 %10808 }
 0x932   : > { %v10811_v53 = vunpack.i.h.bf16 %v10809_v19  ;;  %v10810_v29 = vunpack.i.l.bf16 %v10809_v19 }
 0x933   : > { %10148 = vmatpush3.bf16.msra.mxu1 %v10145_v32  ;;  %v10161_v17 = vpack.c.bf16 %v10806_v33, %v10805_v58 }
 0x934   : > { %10150 = vmatprep.subr.bf16.mxu1 %v10149_v5  ;;  %v13743_v44 = vpack.c.bf16 %v10811_v53, %v10810_v29 }
 0x937   : > { %10152 = vmatpush3.bf16.msra.mxu1 %v10149_v5 }
 0x938   : > { %10154 = vmatprep.subr.bf16.mxu1 %v10153_v1 }
 0x93b   : > { %10156 = vmatpush3.bf16.msra.mxu1 %v10153_v1 }
 0x93c   : > { %10158 = vmatprep.subr.bf16.mxu1 %v10157_v8 }
 0x93f   : > { %10160 = vmatpush3.bf16.msra.mxu1 %v10157_v8 }
 0x940   : > { %10162 = vmatprep.subr.bf16.mxu1 %v10161_v17 }
 0x943   : > { %10164 = vmatpush3.bf16.msra.mxu1 %v10161_v17 }
 0x944   : > { %10167 = vmatprep.subr.msk.bf16.mxu1 %vm12066_vm2, %v13743_v44 }
 0x994   : > { %v13748_v62 = vpop.f32.mrb[80].mxu0 }
 0x995   : > { %17099 = vst [vmem:[#allocation159_spill] sm:$0xff] %v13748_v62  ;;  %v13750_v50 = vpop.f32.mrb[81].mxu0 }
 0x996   : > { %17100 = vst [vmem:[#allocation160_spill] sm:$0xff] %v13750_v50 }
 0x9c8   : > { %v13752_v10 = vpop.f32.mrb[82].mxu0 }
 0x9c9   : > { %17101 = vst [vmem:[#allocation161_spill] sm:$0xff] %v13752_v10  ;;  %v13754_v32 = vpop.f32.mrb[83].mxu0 }
 0x9ca   : > { %17102 = vst [vmem:[#allocation162_spill] sm:$0xff] %v13754_v32 }
 0x9cc   : > { %v13756_v48 = vpop.f32.mrb[84].mxu0 }
 0x9cd   : > { %17103 = vst [vmem:[#allocation163_spill] sm:$0xff] %v13756_v48  ;;  %v13758_v35 = vpop.f32.mrb[85].mxu0 }
 0x9ce   : > { %17104 = vst [vmem:[#allocation164_spill] sm:$0xff] %v13758_v35 }
 0x9d1   : > { %v13760_v37 = vpop.f32.mrb[86].mxu0 }
 0x9d2   : > { %17105 = vst [vmem:[#allocation165_spill] sm:$0xff] %v13760_v37  ;;  %v13762_v5 = vpop.f32.mrb[87].mxu0 }
 0x9d3   : > { %17106 = vst [vmem:[#allocation166_spill] sm:$0xff] %v13762_v5 }
 0x9d8   : > { %v13764_v15 = vpop.f32.mrb[88].mxu0 }
 0x9d9   : > { %17107 = vst [vmem:[#allocation167_spill] sm:$0xff] %v13764_v15  ;;  %v13766_v31 = vpop.f32.mrb[89].mxu0 }
 0x9da   : > { %17108 = vst [vmem:[#allocation168_spill] sm:$0xff] %v13766_v31 }
 0x9dc   : > { %v13768_v49 = vpop.f32.mrb[90].mxu0 }
 0x9dd   : > { %17109 = vst [vmem:[#allocation169_spill] sm:$0xff] %v13768_v49  ;;  %v13770_v1 = vpop.f32.mrb[91].mxu0 }
 0x9de   : > { %17110 = vst [vmem:[#allocation170_spill] sm:$0xff] %v13770_v1 }
 0x9e0   : > { %v13772_v2 = vpop.f32.mrb[92].mxu0 }
 0x9e1   : > { %17111 = vst [vmem:[#allocation171_spill] sm:$0xff] %v13772_v2  ;;  %v13774_v33 = vpop.f32.mrb[93].mxu0 }
 0x9e2   : > { %17112 = vst [vmem:[#allocation172_spill] sm:$0xff] %v13774_v33 }
 0x9e4   : > { %v13776_v58 = vpop.f32.mrb[94].mxu0 }
 0x9e5   : > { %17113 = vst [vmem:[#allocation173_spill] sm:$0xff] %v13776_v58  ;;  %v13778_v8 = vpop.f32.mrb[95].mxu0 }
 0x9e6   : > { %17114 = vst [vmem:[#allocation174_spill] sm:$0xff] %v13778_v8 }
 0x9e8   : > { %v9285_v19 = vpop.f32.mrb[96].mxu0 }
 0x9e9   : > { %v13781_v53 = vadd.f32 %v13443_v26, %v9285_v19  ;;  %v3938_v29 = vpop.f32.mrb[97].mxu0 }
 0x9ea   : > { %v13784_v17 = vadd.f32 %v13451_v4, %v3938_v29 }
 0x9eb   : > { %4019 = vmax.xlane.f32.xlu0 %v13781_v53 }
 0x9ec   : > { %v9288_v49 = vpop.f32.mrb[98].mxu0  ;;  %4017 = vmax.xlane.f32.xlu1 %v13784_v17 }
 0x9ed   : > { %v3948_v2 = vpop.f32.mrb[99].mxu0  ;;  %v13793_v48 = vadd.f32 %v13473_v11, %v9288_v49  ;;  %v17122_v49 = vld [vmem:[#allocation22_spill] sm:$0xff] }
 0x9ee   : > { %v13796_v35 = vadd.f32 %v13465_v0, %v3948_v2  ;;  %v17123_v2 = vld [vmem:[#allocation20_spill] sm:$0xff] }
 0x9f0   : > { %v9291_v1 = vpop.f32.mrb[100].mxu0 }
 0x9f1   : > { %v3958_v33 = vpop.f32.mrb[101].mxu0  ;;  %v13801_v10 = vadd.f32 %v13491_v46, %v9291_v1 }
 0x9f2   : > { %v13804_v32 = vadd.f32 %v13483_v41, %v3958_v33  ;;  %v17124_v33 = vld [vmem:[#allocation25_spill] sm:$0xff] }
 0x9f4   : > { %v9294_v15 = vpop.f32.mrb[102].mxu0 }
 0x9f5   : > { %v3968_v58 = vpop.f32.mrb[103].mxu0  ;;  %v13812_v0 = vadd.f32 %v13501_v55, %v9294_v15  ;;  %v10814_v15 = vpop.permute.xlu0 %10813 }
 0x9f6   : > { %v13820_v41 = vadd.f32 %v13509_v24, %v3968_v58  ;;  %v17125_v58 = vld [vmem:[#allocation12_spill] sm:$0xff] }
 0x9f8   : > { %v9297_v31 = vpop.f32.mrb[104].mxu0 }
 0x9f9   : > { %v3978_v8 = vpop.f32.mrb[105].mxu0  ;;  %v13828_v55 = vadd.f32 %v13519_v16, %v9297_v31  ;;  %v17121_v31 = vld [vmem:[#allocation6_spill] sm:$0xff]  ;;  %v10819_v1 = vpop.permute.xlu0 %10818 }
 0x9fc   : > { %v9300_v37 = vpop.f32.mrb[106].mxu0 }
 0x9fd   : > { %v3988_v5 = vpop.f32.mrb[107].mxu0  ;;  %10833 = vrot.lane.b32.xlu1 %v16989_v12, %s11694_s30  ;;  %v13809_v11 = vadd.f32 %v13527_v61, %v9300_v37  ;;  %v17119_v37 = vld [vmem:[#allocation26_spill] sm:$0xff] }
 0x9fe   : > { %v13837_v24 = vadd.f32 %v13555_v13, %v3988_v5  ;;  %v17118_v13 = vld [vmem:[#allocation14_spill] sm:$0xff]  ;;  %v17120_v5 = vld [vmem:[#allocation17_spill] sm:$0xff] }
 0xa00   : > { %v9303_v26 = vpop.f32.mrb[108].mxu0 }
 0xa01   : > { %10838 = vrot.lane.b32.xlu0 %v16990_v45, %s11694_s30  ;;  %v3998_v4 = vpop.f32.mrb[109].mxu0  ;;  %v13817_v46 = vadd.f32 %v13545_v42, %v9303_v26  ;;  %v13833_v42 = vadd.f32 %v13537_v14, %v3978_v8  ;;  %v17115_v14 = vld [vmem:[#allocation18_spill] sm:$0xff]  ;;  %v10829_v8 = vpop.permute.xlu0 %10828 }
 0xa02   : > { %v10824_v26 = vpop.permute.xlu1 %10823 }
 0xa04   : > { %v9306_v19 = vpop.f32.mrb[110].mxu0 }
 0xa05   : > { %v4008_v29 = vpop.f32.mrb[111].mxu0  ;;  %v13845_v16 = vadd.f32 %v13582_v23, %v9306_v19  ;;  %v17116_v23 = vld [vmem:[#allocation10_spill] sm:$0xff] }
 0xa06   : > { %v13825_v61 = vadd.f32 %v13563_v18, %v4008_v29  ;;  %v13841_v18 = vadd.f32 %v13573_v25, %v3998_v4  ;;  %v17117_v25 = vld [vmem:[#allocation23_spill] sm:$0xff] }
 0xa07   : > { %v17126_v4 = vld [vmem:[#allocation31_spill] sm:$0xff] }
 0xa20   : > { %4023 = vmax.xlane.f32.xlu0 %v13793_v48 }
 0xa21   : > { %4021 = vmax.xlane.f32.xlu1 %v13796_v35 }
 0xa24   : > { %4027 = vmax.xlane.f32.xlu0 %v13801_v10 }
 0xa25   : > { %4025 = vmax.xlane.f32.xlu1 %v13804_v32 }
 0xa28   : > { %4039 = vmax.xlane.f32.xlu0 %v13809_v11 }
 0xa29   : > { %4031 = vmax.xlane.f32.xlu1 %v13812_v0 }
 0xa2c   : > { %4043 = vmax.xlane.f32.xlu0 %v13817_v46 }
 0xa2d   : > { %4029 = vmax.xlane.f32.xlu1 %v13820_v41 }
 0xa30   : > { %4045 = vmax.xlane.f32.xlu0 %v13825_v61 }
 0xa31   : > { %4035 = vmax.xlane.f32.xlu1 %v13828_v55 }
 0xa35   : > { %4033 = vmax.xlane.f32.xlu1 %v13833_v42 }
 0xa39   : > { %4037 = vmax.xlane.f32.xlu1 %v13837_v24 }
 0xa3d   : > { %4041 = vmax.xlane.f32.xlu1 %v13841_v18 }
 0xa41   : > { %4047 = vmax.xlane.f32.xlu1 %v13845_v16 }
 0xa46   : > { %10843 = vrot.lane.b32.xlu0 %v17037_v43, %s11694_s30 }
 0xa4a   : > { %4386 = vrot.lane.b32.xlu0 %v11872_v40, %s11695_s18 }
 0xa4e   : > { %4390 = vrot.lane.b32.xlu0 %v11890_v47, %s11695_s18 }
 0xa52   : > { %4394 = vrot.lane.b32.xlu0 %v11914_v56, %s11695_s18  ;;  %4388 = vrot.lane.b32.xlu1 %v17038_v63, %s11695_s18 }
 0xa56   : > { %4398 = vrot.lane.b32.xlu0 %v16915_v36, %s11695_s18  ;;  %4392 = vrot.lane.b32.xlu1 %v16993_v6, %s11695_s18 }
 0xa5a   : > { %4402 = vrot.lane.b32.xlu0 %v16920_v57, %s11695_s18  ;;  %4396 = vrot.lane.b32.xlu1 %v17039_v3, %s11695_s18 }
 0xa5e   : > { %4406 = vrot.lane.b32.xlu0 %v17115_v14, %s11695_s18  ;;  %4400 = vrot.lane.b32.xlu1 %v17116_v23, %s11695_s18 }
 0xa62   : > { %4410 = vrot.lane.b32.xlu0 %v17117_v25, %s11695_s18  ;;  %4404 = vrot.lane.b32.xlu1 %v17118_v13, %s11695_s18 }
 0xa66   : > { %4414 = vrot.lane.b32.xlu0 %v17119_v37, %s11695_s18  ;;  %4408 = vrot.lane.b32.xlu1 %v17120_v5, %s11695_s18 }
 0xa6a   : > { %10848 = vrot.lane.b32.xlu0 %v17121_v31, %s11686_s21  ;;  %4412 = vrot.lane.b32.xlu1 %v17122_v49, %s11695_s18 }
 0xa6e   : > { %10858 = vrot.lane.b32.xlu0 %v17123_v2, %s11686_s21  ;;  %4416 = vrot.lane.b32.xlu1 %v17124_v33, %s11695_s18 }
 0xa72   : > { %10863 = vrot.lane.b32.xlu0 %v17081_v59, %s11686_s21  ;;  %10853 = vrot.lane.b32.xlu1 %v17125_v58, %s11686_s21 }
 0xa76   : > { %10878 = vrot.lane.b32.xlu0 %v17083_v22, %s11686_s21  ;;  %10868 = vrot.lane.b32.xlu1 %v17126_v4, %s11686_s21 }
 0xa78   : > { %v4020_v19 = vpop.xlane.xlu0 %4019 }
 0xa79   : > { %v4050_v29 = vsub.f32 %v13781_v53, %v4020_v19  ;;  %v4018_v62 = vpop.xlane.xlu1 %4017  ;;  %v10815_v53 = vunpack.i.l.bf16 %v10814_v15  ;;  %v10826_v19 = vunpack.i.h.bf16 %v10824_v26 }
 0xa7a   : > { %v4049_v50 = vsub.f32 %v13784_v17, %v4018_v62  ;;  %10888 = vrot.lane.b32.xlu0 %v16936_v21, %s11696_s17  ;;  %10873 = vrot.lane.b32.xlu1 %v17080_v28, %s11686_s21  ;;  %v17127_v62 = vld [vmem:[#allocation13_spill] sm:$0xff]  ;;  %v10816_v21 = vunpack.i.h.bf16 %v10814_v15  ;;  %v17128_v17 = vld [vmem:[#allocation16_spill] sm:$0xff] }
 0xa7b   : > { %v4067_v34 = vmul.f32 1.442695, %v4050_v29  ;;  %v10825_v29 = vunpack.i.l.bf16 %v10824_v26 }
 0xa7c   : > { %v4065_v7 = vmul.f32 1.442695, %v4049_v50  ;;  %v10839_v26 = vpop.permute.xlu0 %10838 }
 0xa7e   : > { %11127 = vpow2.f32 %v4065_v7  ;;  %10893 = vrot.lane.b32.xlu0 %v16937_v20, %s11696_s17  ;;  %10883 = vrot.lane.b32.xlu1 %v17082_v38, %s11686_s21  ;;  %v10171_v20 = vpack.c.bf16 %v10816_v21, %v10815_v53  ;;  %v10830_v21 = vunpack.i.l.bf16 %v10829_v8  ;;  %s11697_s21 = smov 100  }
 0xa7f   : > { %11129 = vpow2.f32 %v4067_v34  ;;  %v10820_v34 = vunpack.i.l.bf16 %v10819_v1 }
 0xa82   : > { %10898 = vrot.lane.b32.xlu0 %v16938_v60, %s11696_s17  ;;  %10903 = vrot.lane.b32.xlu1 %v17127_v62, %s11696_s17  ;;  %v10821_v60 = vunpack.i.h.bf16 %v10819_v1  ;;  %v10183_v62 = vpack.c.bf16 %v10826_v19, %v10825_v29  ;;  %v10834_v1 = vpop.permute.xlu1 %10833 }
 0xa84   : > { %v10177_v15 = vpack.c.bf16 %v10821_v60, %v10820_v34 }
 0xa86   : > { %10908 = vrot.lane.b32.xlu0 %v17128_v17, %s11696_s17  ;;  %v10836_v17 = vunpack.i.h.bf16 %v10834_v1 }
 0xa88   : > { %v13894_v50 = vpop.eup %11127 }
 0xa89   : > { %v13896_v7 = vpop.eup %11129  ;;  %9339 = vmatprep.mubr.f32.mxu1 %v13894_v50 }
 0xa8a   : > { %9340 = vmatmul.mubr.f32.vlgmr.msra.gmra.mrb[112].mxu1 %v13896_v7 }
 0xa8b   : > { %10170 = vmatpush3.bf16.xpose.msk.msra.mxu1 %vm12066_vm2, %v13743_v44  ;;  %v10831_v44 = vunpack.i.h.bf16 %v10829_v8  ;;  %v10841_v8 = vunpack.i.h.bf16 %v10839_v26 }
 0xa8c   : > { %10173 = vmatprep.subr.msk.bf16.mxu1 %vm12066_vm2, %v10171_v20 }
 0xa8d   : > { %v10189_v53 = vpack.c.bf16 %v10831_v44, %v10830_v21 }
 0xa93   : > { %10176 = vmatpush3.bf16.xpose.msk.msra.mxu1 %vm12066_vm2, %v10171_v20  ;;  %v10835_v20 = vunpack.i.l.bf16 %v10834_v1 }
 0xa94   : > { %10179 = vmatprep.subr.msk.bf16.mxu1 %vm12066_vm2, %v10177_v15 }
 0xa95   : > { %v10195_v60 = vpack.c.bf16 %v10836_v17, %v10835_v20 }
 0xa9b   : > { %10182 = vmatpush3.bf16.xpose.msk.msra.mxu1 %vm12066_vm2, %v10177_v15  ;;  %v10840_v15 = vunpack.i.l.bf16 %v10839_v26 }
 0xa9c   : > { %10185 = vmatprep.subr.msk.bf16.mxu1 %vm12066_vm2, %v10183_v62 }
 0xa9d   : > { %v10201_v1 = vpack.c.bf16 %v10841_v8, %v10840_v15 }
 0xaa3   : > { %10188 = vmatpush3.bf16.xpose.msk.msra.mxu1 %vm12066_vm2, %v10183_v62 }
 0xaa4   : > { %10191 = vmatprep.subr.msk.bf16.mxu1 %vm12066_vm2, %v10189_v53 }
 0xaab   : > { %10194 = vmatpush3.bf16.xpose.msk.msra.mxu1 %vm12066_vm2, %v10189_v53 }
 0xaac   : > { %10197 = vmatprep.subr.msk.bf16.mxu1 %vm12066_vm2, %v10195_v60 }
 0xaad   : > { %v4024_v34 = vpop.xlane.xlu0 %4023 }
 0xaae   : > { %v4052_v19 = vsub.f32 %v13793_v48, %v4024_v34  ;;  %v4022_v29 = vpop.xlane.xlu1 %4021 }
 0xaaf   : > { %v4051_v62 = vsub.f32 %v13796_v35, %v4022_v29 }
 0xab0   : > { %v4071_v44 = vmul.f32 1.442695, %v4052_v19 }
 0xab1   : > { %v4069_v21 = vmul.f32 1.442695, %v4051_v62  ;;  %v4028_v39 = vpop.xlane.xlu0 %4027 }
 0xab2   : > { %v4054_v17 = vsub.f32 %v13801_v10, %v4028_v39  ;;  %v4026_v20 = vpop.xlane.xlu1 %4025 }
 0xab3   : > { %11131 = vpow2.f32 %v4069_v21  ;;  %v4053_v53 = vsub.f32 %v13804_v32, %v4026_v20  ;;  %10200 = vmatpush3.bf16.xpose.msk.msra.mxu1 %vm12066_vm2, %v10195_v60 }
 0xab4   : > { %11133 = vpow2.f32 %v4071_v44  ;;  %v4075_v26 = vmul.f32 1.442695, %v4054_v17  ;;  %10203 = vmatprep.subr.msk.bf16.mxu1 %vm12066_vm2, %v10201_v1 }
 0xab5   : > { %v4073_v48 = vmul.f32 1.442695, %v4053_v53  ;;  %v4040_v35 = vpop.xlane.xlu0 %4039 }
 0xab6   : > { %v4032_v34 = vpop.xlane.xlu1 %4031 }
 0xab7   : > { %11135 = vpow2.f32 %v4073_v48  ;;  %v4056_v8 = vsub.f32 %v13812_v0, %v4032_v34  ;;  %v4060_v48 = vsub.f32 %v13809_v11, %v4040_v35 }
 0xab8   : > { %11137 = vpow2.f32 %v4075_v26 }
 0xab9   : > { %v4044_v39 = vpop.xlane.xlu0 %4043  ;;  %v4079_v32 = vmul.f32 1.442695, %v4056_v8 }
 0xaba   : > { %v4030_v10 = vpop.xlane.xlu1 %4029 }
 0xabb   : > { %v4055_v15 = vsub.f32 %v13820_v41, %v4030_v10  ;;  %10206 = vmatpush3.bf16.xpose.msk.msra.mxu1 %vm12066_vm2, %v10201_v1 }
 0xabd   : > { %v13933_v60 = vpop.eup %11131  ;;  %v4077_v19 = vmul.f32 1.442695, %v4055_v15  ;;  %v4046_v29 = vpop.xlane.xlu0 %4045 }
 0xabe   : > { %17129 = vst [vmem:[#allocation18_spill] sm:$0xff] %v13933_v60  ;;  %v13935_v62 = vpop.eup %11133  ;;  %9342 = vmatprep.mubr.f32.mxu1 %v13933_v60  ;;  %v4036_v44 = vpop.xlane.xlu1 %4035  ;;  %v4063_v11 = vsub.f32 %v13825_v61, %v4046_v29  ;;  %v14173_v60 = vld [vmem:[%s16642_s4 + $0x60] sm:$0xff] }
 0xabf   : > { %17130 = vst [vmem:[#allocation10_spill] sm:$0xff] %v13935_v62  ;;  %11139 = vpow2.f32 %v4077_v19  ;;  %9343 = vmatmul.mubr.f32.gmra.mrb[114].mxu1 %v13935_v62  ;;  %v4058_v0 = vsub.f32 %v13828_v55, %v4036_v44  ;;  %v4087_v19 = vmul.f32 1.442695, %v4060_v48  ;;  %v14155_v62 = vld [vmem:[%s16642_s4 + $0x40] sm:$0xff] }
 0xac0   : > { %11141 = vpow2.f32 %v4079_v32 }
 0xac1   : > { %v13940_v41 = vpop.eup %11135  ;;  %v10844_v21 = vpop.permute.xlu0 %10843  ;;  %v4083_v34 = vmul.f32 1.442695, %v4058_v0 }
 0xac2   : > { %17131 = vst [vmem:[#allocation23_spill] sm:$0xff] %v13940_v41  ;;  %v13942_v1 = vpop.eup %11137  ;;  %v10846_v17 = vunpack.i.h.bf16 %v10844_v21  ;;  %v10845_v20 = vunpack.i.l.bf16 %v10844_v21  ;;  %9345 = vmatprep.mubr.f32.mxu1 %v13940_v41  ;;  %v4034_v53 = vpop.xlane.xlu1 %4033  ;;  %v14127_v41 = vld [vmem:[%s16642_s4 + $0x30] sm:$0xff] }
 0xac3   : > { %17132 = vst [vmem:[#allocation14_spill] sm:$0xff] %v13942_v1  ;;  %v4057_v26 = vsub.f32 %v13833_v42, %v4034_v53  ;;  %9346 = vmatmul.mubr.f32.gmra.mrb[116].mxu1 %v13942_v1  ;;  %v4062_v42 = vsub.f32 %v13817_v46, %v4044_v39  ;;  %v4093_v46 = vmul.f32 1.442695, %v4063_v11  ;;  %v14119_v1 = vld [vmem:[%s16642_s4 + $0x68] sm:$0xff] }
 0xac4   : > { %v10207_v8 = vpack.c.bf16 %v10846_v17, %v10845_v20 }
 0xac5   : > { %v4081_v10 = vmul.f32 1.442695, %v4057_v26  ;;  %v4387_v55 = vpop.permute.xlu0 %4386  ;;  %v4091_v20 = vmul.f32 1.442695, %v4062_v42 }
 0xac6   : > { %v4038_v15 = vpop.xlane.xlu1 %4037  ;;  %10209 = vmatprep.subr.msk.bf16.mxu1 %vm12066_vm2, %v10207_v8 }
 0xac7   : > { %11143 = vpow2.f32 %v4081_v10  ;;  %v4059_v32 = vsub.f32 %v13837_v24, %v4038_v15  ;;  %10212 = vmatpush3.bf16.xpose.msk.msra.mxu1 %vm12066_vm2, %v10207_v8 }
 0xac8   : > { %11145 = vpow2.f32 %v4083_v34 }
 0xac9   : > { %v13954_v44 = vpop.eup %11139  ;;  %v4085_v35 = vmul.f32 1.442695, %v4059_v32  ;;  %v4391_v0 = vpop.permute.xlu0 %4390 }
 0xaca   : > { %17133 = vst [vmem:[#allocation26_spill] sm:$0xff] %v13954_v44  ;;  %v13957_v21 = vpop.eup %11141  ;;  %9348 = vmatprep.mubr.f32.mxu1 %v13954_v44  ;;  %v4042_v17 = vpop.xlane.xlu1 %4041  ;;  %v14109_v44 = vld [vmem:[%s16642_s4 + $0x38] sm:$0xff] }
 0xacb   : > { %17134 = vst [vmem:[#allocation17_spill] sm:$0xff] %v13957_v21  ;;  %11147 = vpow2.f32 %v4085_v35  ;;  %v4061_v24 = vsub.f32 %v13841_v18, %v4042_v17  ;;  %9349 = vmatmul.mubr.f32.gmra.mrb[118].mxu1 %v13957_v21  ;;  %v14101_v21 = vld [vmem:[%s16642_s4 + $0x58] sm:$0xff] }
 0xacc   : > { %11149 = vpow2.f32 %v4087_v19 }
 0xacd   : > { %v4089_v39 = vmul.f32 1.442695, %v4061_v24  ;;  %v4395_v53 = vpop.permute.xlu0 %4394 }
 0xace   : > { %v4048_v26 = vpop.xlane.xlu1 %4047 }
 0xacf   : > { %11151 = vpow2.f32 %v4089_v39  ;;  %v4064_v61 = vsub.f32 %v13845_v16, %v4048_v26 }
 0xad0   : > { %11153 = vpow2.f32 %v4091_v20 }
 0xad1   : > { %v13963_v29 = vpop.eup %11143  ;;  %11155 = vpow2.f32 %v4093_v46  ;;  %v4095_v48 = vmul.f32 1.442695, %v4064_v61  ;;  %v4399_v34 = vpop.permute.xlu0 %4398 }
 0xad2   : > { %17135 = vst [vmem:[#allocation6_spill] sm:$0xff] %v13963_v29  ;;  %v13965_v8 = vpop.eup %11145  ;;  %9351 = vmatprep.mubr.f32.mxu1 %v13963_v29  ;;  %v4389_v18 = vpop.permute.xlu1 %4388  ;;  %v14091_v29 = vld [vmem:[%s16642_s4 + $0x20] sm:$0xff] }
 0xad3   : > { %17136 = vst [vmem:[#allocation22_spill] sm:$0xff] %v13965_v8  ;;  %11157 = vpow2.f32 %v4095_v48  ;;  %9352 = vmatmul.mubr.f32.gmra.mrb[120].mxu1 %v13965_v8  ;;  %v14073_v8 = vld [vmem:[%s16642_s4 + $0x10] sm:$0xff] }
 0xad5   : > { %v13969_v10 = vpop.eup %11147  ;;  %v4403_v15 = vpop.permute.xlu0 %4402 }
 0xad6   : > { %17137 = vst [vmem:[#allocation20_spill] sm:$0xff] %v13969_v10  ;;  %v13971_v32 = vpop.eup %11149  ;;  %9354 = vmatprep.mubr.f32.mxu1 %v13969_v10  ;;  %v4393_v16 = vpop.permute.xlu1 %4392 }
 0xad7   : > { %17138 = vst [vmem:[#allocation25_spill] sm:$0xff] %v13971_v32  ;;  %9355 = vmatmul.mubr.f32.gmra.mrb[122].mxu1 %v13971_v32 }
 0xad9   : > { %v13975_v19 = vpop.eup %11151  ;;  %v4407_v42 = vpop.permute.xlu0 %4406 }
 0xada   : > { %17139 = vst [vmem:[#allocation12_spill] sm:$0xff] %v13975_v19  ;;  %v13977_v11 = vpop.eup %11153  ;;  %9357 = vmatprep.mubr.f32.mxu1 %v13975_v19  ;;  %v4397_v35 = vpop.permute.xlu1 %4396 }
 0xadb   : > { %17140 = vst [vmem:[#allocation31_spill] sm:$0xff] %v13977_v11  ;;  %v13980_v17 = vpop.eup %11155  ;;  %9358 = vmatmul.mubr.f32.gmra.mrb[124].mxu1 %v13977_v11 }
 0xadc   : > { %17141 = vst [vmem:[#allocation13_spill] sm:$0xff] %v13980_v17  ;;  %9360 = vmatprep.mubr.f32.mxu1 %v13980_v17 }
 0xadd   : > { %v13984_v24 = vpop.eup %11157  ;;  %v4411_v20 = vpop.permute.xlu0 %4410 }
 0xade   : > { %17142 = vst [vmem:[#allocation16_spill] sm:$0xff] %v13984_v24  ;;  %v4401_v46 = vpop.permute.xlu1 %4400 }
 0xadf   : > { %9361 = vmatmul.mubr.f32.gmra.mrb[126].mxu1 %v13984_v24 }
 0xae0   : > { %9395 = vmatprep.mubr.msk.f32.mxu1 %vm757_vm1, %v4387_v55 }
 0xae1   : > { %v4415_v39 = vpop.permute.xlu0 %4414 }
 0xae2   : > { %v4405_v26 = vpop.permute.xlu1 %4404 }
 0xae3   : > { %9396 = vmatmul.mubr.msk.f32.vlgmr.msra.gmra.mrb[128].mxu1 %vm757_vm1, %v4389_v18 }
 0xae4   : > { %9398 = vmatprep.mubr.msk.f32.mxu1 %vm757_vm1, %v4391_v0 }
 0xae5   : > { %v10849_v61 = vpop.permute.xlu0 %10848 }
 0xae6   : > { %v10851_v48 = vunpack.i.h.bf16 %v10849_v61  ;;  %v10850_v19 = vunpack.i.l.bf16 %v10849_v61  ;;  %v4409_v11 = vpop.permute.xlu1 %4408 }
 0xae7   : > { %9399 = vmatmul.mubr.msk.f32.gmra.mrb[130].mxu1 %vm757_vm1, %v4393_v16 }
 0xae8   : > { %9401 = vmatprep.mubr.msk.f32.mxu1 %vm757_vm1, %v4395_v53  ;;  %v10213_v17 = vpack.c.bf16 %v10851_v48, %v10850_v19 }
 0xae9   : > { %v10859_v55 = vpop.permute.xlu0 %10858 }
 0xaea   : > { %10214 = vmatprep.subr.bf16.mxu0 %v10213_v17  ;;  %v4413_v32 = vpop.permute.xlu1 %4412  ;;  %v10861_v61 = vunpack.i.h.bf16 %v10859_v55  ;;  %v10860_v24 = vunpack.i.l.bf16 %v10859_v55 }
 0xaeb   : > { %9402 = vmatmul.mubr.msk.f32.gmra.mrb[132].mxu1 %vm757_vm1, %v4397_v35  ;;  %10216 = vmatpush3.bf16.msra.mxu0 %v10213_v17 }
 0xaec   : > { %9404 = vmatprep.mubr.msk.f32.mxu1 %vm757_vm1, %v4399_v34 }
 0xaed   : > { %v10864_v53 = vpop.permute.xlu0 %10863 }
 0xaee   : > { %v4417_v18 = vpop.permute.xlu1 %4416  ;;  %v10866_v17 = vunpack.i.h.bf16 %v10864_v53  ;;  %v10865_v34 = vunpack.i.l.bf16 %v10864_v53 }
 0xaef   : > { %9405 = vmatmul.mubr.msk.f32.gmra.mrb[134].mxu1 %vm757_vm1, %v4401_v46  ;;  %v10221_v46 = vpack.c.bf16 %v10861_v61, %v10860_v24 }
 0xaf0   : > { %9407 = vmatprep.mubr.msk.f32.mxu1 %vm757_vm1, %v4403_v15 }
 0xaf1   : > { %v10879_v24 = vpop.permute.xlu0 %10878 }
 0xaf2   : > { %v10854_v0 = vpop.permute.xlu1 %10853 }
 0xaf3   : > { %v10856_v16 = vunpack.i.h.bf16 %v10854_v0  ;;  %v10855_v10 = vunpack.i.l.bf16 %v10854_v0  ;;  %9408 = vmatmul.mubr.msk.f32.gmra.mrb[136].mxu1 %vm757_vm1, %v4405_v26  ;;  %v10225_v26 = vpack.c.bf16 %v10866_v17, %v10865_v34  ;;  %v10880_v0 = vunpack.i.l.bf16 %v10879_v24 }
 0xaf4   : > { %9410 = vmatprep.mubr.msk.f32.mxu1 %vm757_vm1, %v4407_v42 }
 0xaf5   : > { %v10217_v19 = vpack.c.bf16 %v10856_v16, %v10855_v10 }
 0xaf6   : > { %v10869_v35 = vpop.permute.xlu1 %10868 }
 0xaf7   : > { %9411 = vmatmul.mubr.msk.f32.gmra.mrb[138].mxu1 %vm757_vm1, %v4409_v11  ;;  %10218 = vmatprep.subr.bf16.mxu0 %v10217_v19  ;;  %v10871_v15 = vunpack.i.h.bf16 %v10869_v35  ;;  %v10870_v48 = vunpack.i.l.bf16 %v10869_v35 }
 0xaf8   : > { %9413 = vmatprep.mubr.msk.f32.mxu1 %vm757_vm1, %v4411_v20  ;;  %10220 = vmatpush3.bf16.msra.mxu0 %v10217_v19  ;;  %v10881_v20 = vunpack.i.h.bf16 %v10879_v24 }
 0xaf9   : > { %10222 = vmatprep.subr.bf16.mxu0 %v10221_v46  ;;  %v10229_v11 = vpack.c.bf16 %v10871_v15, %v10870_v48 }
 0xafa   : > { %v10874_v55 = vpop.permute.xlu1 %10873  ;;  %v10237_v19 = vpack.c.bf16 %v10881_v20, %v10880_v0 }
 0xafb   : > { %9414 = vmatmul.mubr.msk.f32.gmra.mrb[140].mxu1 %vm757_vm1, %v4413_v32  ;;  %v10876_v10 = vunpack.i.h.bf16 %v10874_v55  ;;  %v10875_v42 = vunpack.i.l.bf16 %v10874_v55 }
 0xafc   : > { %9416 = vmatprep.mubr.msk.f32.mxu1 %vm757_vm1, %v4415_v39  ;;  %10224 = vmatpush3.bf16.msra.mxu0 %v10221_v46  ;;  %v10889_v39 = vpop.permute.xlu0 %10888 }
 0xafd   : > { %10226 = vmatprep.subr.bf16.mxu0 %v10225_v26  ;;  %v10233_v61 = vpack.c.bf16 %v10876_v10, %v10875_v42  ;;  %v10891_v35 = vunpack.i.h.bf16 %v10889_v39  ;;  %v10890_v17 = vunpack.i.l.bf16 %v10889_v39 }
 0xafe   : > { %v10884_v16 = vpop.permute.xlu1 %10883 }
 0xaff   : > { %9417 = vmatmul.mubr.msk.f32.gmra.mrb[142].mxu1 %vm757_vm1, %v4417_v18  ;;  %v10886_v32 = vunpack.i.h.bf16 %v10884_v16  ;;  %v10885_v53 = vunpack.i.l.bf16 %v10884_v16  ;;  %v14003_v18 = vpack.c.bf16 %v10891_v35, %v10890_v17  ;;  %v14043_v35 = vld [vmem:[%s16642_s4 + $0x8] sm:$0xff] }
 0xb00   : > { %10228 = vmatpush3.bf16.msra.mxu0 %v10225_v26 }
 0xb01   : > { %10230 = vmatprep.subr.bf16.mxu0 %v10229_v11  ;;  %v10241_v34 = vpack.c.bf16 %v10886_v32, %v10885_v53 }
 0xb04   : > { %10232 = vmatpush3.bf16.msra.mxu0 %v10229_v11 }
 0xb05   : > { %10234 = vmatprep.subr.bf16.mxu0 %v10233_v61 }
 0xb08   : > { %10236 = vmatpush3.bf16.msra.mxu0 %v10233_v61 }
 0xb09   : > { %10238 = vmatprep.subr.bf16.mxu0 %v10237_v19 }
 0xb0c   : > { %10240 = vmatpush3.bf16.msra.mxu0 %v10237_v19 }
 0xb0d   : > { %10242 = vmatprep.subr.bf16.mxu0 %v10241_v34 }
 0xb10   : > { %10244 = vmatpush3.bf16.msra.mxu0 %v10241_v34 }
 0xb11   : > { %10247 = vmatprep.subr.msk.bf16.mxu0 %vm12066_vm2, %v14003_v18 }
 0xb5d   : > { %v14008_v46 = vpop.f32.mrb[112].mxu1 }
 0xb5e   : > { %17143 = vst [vmem:[#allocation175_spill] sm:$0xff] %v14008_v46  ;;  %v14010_v15 = vpop.f32.mrb[113].mxu1  ;;  %v14065_v46 = vld [vmem:[%s16642_s4 + $0x18] sm:$0xff] }
 0xb5f   : > { %17144 = vst [vmem:[#allocation176_spill] sm:$0xff] %v14010_v15 }
 0xb92   : > { %v14012_v48 = vpop.f32.mrb[114].mxu1 }
 0xb93   : > { %17145 = vst [vmem:[#allocation177_spill] sm:$0xff] %v14012_v48  ;;  %v14014_v26 = vpop.f32.mrb[115].mxu1 }
 0xb94   : > { %17146 = vst [vmem:[#allocation178_spill] sm:$0xff] %v14014_v26 }
 0xb96   : > { %v14016_v55 = vpop.f32.mrb[116].mxu1 }
 0xb97   : > { %17147 = vst [vmem:[#allocation179_spill] sm:$0xff] %v14016_v55  ;;  %v14018_v10 = vpop.f32.mrb[117].mxu1 }
 0xb98   : > { %17148 = vst [vmem:[#allocation180_spill] sm:$0xff] %v14018_v10 }
 0xb9e   : > { %v14020_v42 = vpop.f32.mrb[118].mxu1 }
 0xb9f   : > { %17149 = vst [vmem:[#allocation181_spill] sm:$0xff] %v14020_v42  ;;  %v14022_v11 = vpop.f32.mrb[119].mxu1 }
 0xba0   : > { %17150 = vst [vmem:[#allocation182_spill] sm:$0xff] %v14022_v11 }
 0xba6   : > { %v14024_v24 = vpop.f32.mrb[120].mxu1 }
 0xba7   : > { %17151 = vst [vmem:[#allocation183_spill] sm:$0xff] %v14024_v24  ;;  %v14026_v20 = vpop.f32.mrb[121].mxu1 }
 0xba8   : > { %17152 = vst [vmem:[#allocation184_spill] sm:$0xff] %v14026_v20 }
 0xbaa   : > { %v14028_v0 = vpop.f32.mrb[122].mxu1 }
 0xbab   : > { %17153 = vst [vmem:[#allocation185_spill] sm:$0xff] %v14028_v0  ;;  %v14030_v61 = vpop.f32.mrb[123].mxu1 }
 0xbac   : > { %17154 = vst [vmem:[#allocation186_spill] sm:$0xff] %v14030_v61 }
 0xbae   : > { %v14032_v16 = vpop.f32.mrb[124].mxu1 }
 0xbaf   : > { %17155 = vst [vmem:[#allocation187_spill] sm:$0xff] %v14032_v16  ;;  %v14034_v32 = vpop.f32.mrb[125].mxu1  ;;  %v14051_v16 = vld [vmem:[%s16642_s4] sm:$0xff] }
 0xbb0   : > { %17156 = vst [vmem:[#allocation188_spill] sm:$0xff] %v14034_v32 }
 0xbb2   : > { %v14036_v53 = vpop.f32.mrb[126].mxu1 }
 0xbb3   : > { %17157 = vst [vmem:[#allocation189_spill] sm:$0xff] %v14036_v53  ;;  %v14038_v19 = vpop.f32.mrb[127].mxu1 }
 0xbb4   : > { %17158 = vst [vmem:[#allocation190_spill] sm:$0xff] %v14038_v19 }
 0xbb6   : > { %v9397_v39 = vpop.f32.mrb[128].mxu1 }
 0xbb7   : > { %v14046_v17 = vadd.f32 %v14043_v35, %v9397_v39  ;;  %v4580_v34 = vpop.f32.mrb[129].mxu1 }
 0xbb8   : > { %v14054_v32 = vadd.f32 %v14051_v16, %v4580_v34 }
 0xbb9   : > { %4661 = vmax.xlane.f32.xlu0 %v14046_v17 }
 0xbba   : > { %v9400_v53 = vpop.f32.mrb[130].mxu1  ;;  %4659 = vmax.xlane.f32.xlu1 %v14054_v32 }
 0xbbb   : > { %v4590_v19 = vpop.f32.mrb[131].mxu1  ;;  %v14068_v15 = vadd.f32 %v14065_v46, %v9400_v53 }
 0xbbe   : > { %v9403_v0 = vpop.f32.mrb[132].mxu1 }
 0xbbf   : > { %v4600_v61 = vpop.f32.mrb[133].mxu1 }
 0xbc2   : > { %v9406_v24 = vpop.f32.mrb[134].mxu1 }
 0xbc3   : > { %v4610_v39 = vpop.f32.mrb[135].mxu1 }
 0xbc6   : > { %v9409_v20 = vpop.f32.mrb[136].mxu1 }
 0xbc7   : > { %v4620_v42 = vpop.f32.mrb[137].mxu1 }
 0xbca   : > { %v9412_v11 = vpop.f32.mrb[138].mxu1 }
 0xbcb   : > { %v4630_v55 = vpop.f32.mrb[139].mxu1  ;;  %10913 = vrot.lane.b32.xlu1 %v16989_v12, %s11696_s17  ;;  %v14076_v12 = vadd.f32 %v14073_v8, %v4590_v19  ;;  %v14094_v19 = vadd.f32 %v14091_v29, %v4600_v61  ;;  %v14112_v61 = vadd.f32 %v14109_v44, %v9406_v24  ;;  %v14130_v24 = vadd.f32 %v14127_v41, %v4610_v39 }
 0xbcc   : > { %v14148_v39 = vadd.f32 %v14145_v52, %v9409_v20  ;;  %v14167_v20 = vadd.f32 %v14164_v54, %v4630_v55 }
 0xbce   : > { %v9415_v10 = vpop.f32.mrb[140].mxu1 }
 0xbcf   : > { %10918 = vrot.lane.b32.xlu0 %v16990_v45, %s11696_s17  ;;  %v4640_v34 = vpop.f32.mrb[141].mxu1  ;;  %v14083_v45 = vld [vmem:[%s16642_s4 + $0x28] sm:$0xff] }
 0xbd0   : > { %v14086_v53 = vadd.f32 %v14083_v45, %v9403_v0  ;;  %v14104_v0 = vadd.f32 %v14101_v21, %v9412_v11  ;;  %v14122_v11 = vadd.f32 %v14119_v1, %v9415_v10 }
 0xbd2   : > { %v9418_v48 = vpop.f32.mrb[142].mxu1 }
 0xbd3   : > { %v4650_v26 = vpop.f32.mrb[143].mxu1  ;;  %v14185_v55 = vadd.f32 %v14182_v51, %v9418_v48 }
 0xbd4   : > { %v14140_v10 = vadd.f32 %v14137_v9, %v4650_v26  ;;  %v14158_v26 = vadd.f32 %v14155_v62, %v4620_v42  ;;  %v14176_v42 = vadd.f32 %v14173_v60, %v4640_v34 }
 0xbee   : > { %4665 = vmax.xlane.f32.xlu0 %v14068_v15 }
 0xbef   : > { %4663 = vmax.xlane.f32.xlu1 %v14076_v12 }
 0xbf2   : > { %4669 = vmax.xlane.f32.xlu0 %v14086_v53 }
 0xbf3   : > { %4667 = vmax.xlane.f32.xlu1 %v14094_v19 }
 0xbf6   : > { %4681 = vmax.xlane.f32.xlu0 %v14104_v0 }
 0xbf7   : > { %4673 = vmax.xlane.f32.xlu1 %v14112_v61 }
 0xbfa   : > { %4685 = vmax.xlane.f32.xlu0 %v14122_v11 }
 0xbfb   : > { %4671 = vmax.xlane.f32.xlu1 %v14130_v24 }
 0xbfe   : > { %4687 = vmax.xlane.f32.xlu0 %v14140_v10 }
 0xbff   : > { %4677 = vmax.xlane.f32.xlu1 %v14148_v39 }
 0xc03   : > { %4675 = vmax.xlane.f32.xlu1 %v14158_v26 }
 0xc07   : > { %4679 = vmax.xlane.f32.xlu1 %v14167_v20 }
 0xc0b   : > { %4683 = vmax.xlane.f32.xlu1 %v14176_v42 }
 0xc0f   : > { %4689 = vmax.xlane.f32.xlu1 %v14185_v55 }
 0xc14   : > { %10923 = vrot.lane.b32.xlu0 %v17037_v43, %s11696_s17 }
 0xc18   : > { %5012 = vrot.lane.b32.xlu0 %v11872_v40, %s11697_s21  ;;  %v10894_v40 = vpop.permute.xlu0 %10893 }
 0xc1c   : > { %5016 = vrot.lane.b32.xlu0 %v11890_v47, %s11697_s21  ;;  %v10899_v47 = vpop.permute.xlu0 %10898 }
 0xc20   : > { %5020 = vrot.lane.b32.xlu0 %v11914_v56, %s11697_s21  ;;  %5014 = vrot.lane.b32.xlu1 %v17038_v63, %s11697_s21  ;;  %v10909_v56 = vpop.permute.xlu0 %10908 }
 0xc24   : > { %5024 = vrot.lane.b32.xlu0 %v16915_v36, %s11697_s21  ;;  %5018 = vrot.lane.b32.xlu1 %v16993_v6, %s11697_s21  ;;  %v10904_v36 = vpop.permute.xlu1 %10903 }
 0xc28   : > { %5028 = vrot.lane.b32.xlu0 %v16920_v57, %s11697_s21  ;;  %5022 = vrot.lane.b32.xlu1 %v17039_v3, %s11697_s21 }
 0xc2c   : > { %5032 = vrot.lane.b32.xlu0 %v17115_v14, %s11697_s21  ;;  %5026 = vrot.lane.b32.xlu1 %v17116_v23, %s11697_s21  ;;  %v10896_v14 = vunpack.i.h.bf16 %v10894_v40  ;;  %v10895_v23 = vunpack.i.l.bf16 %v10894_v40 }
 0xc30   : > { %5036 = vrot.lane.b32.xlu0 %v17117_v25, %s11697_s21  ;;  %5030 = vrot.lane.b32.xlu1 %v17118_v13, %s11697_s21  ;;  %v10251_v13 = vpack.c.bf16 %v10896_v14, %v10895_v23 }
 0xc34   : > { %5040 = vrot.lane.b32.xlu0 %v17119_v37, %s11697_s21  ;;  %5034 = vrot.lane.b32.xlu1 %v17120_v5, %s11697_s21  ;;  %v10906_v5 = vunpack.i.h.bf16 %v10904_v36 }
 0xc38   : > { %10928 = vrot.lane.b32.xlu0 %v17121_v31, %s11689_s23  ;;  %5038 = vrot.lane.b32.xlu1 %v17122_v49, %s11697_s21  ;;  %v10905_v31 = vunpack.i.l.bf16 %v10904_v36 }
 0xc3a   : > { %v10263_v49 = vpack.c.bf16 %v10906_v5, %v10905_v31 }
 0xc3c   : > { %10933 = vrot.lane.b32.xlu0 %v17125_v58, %s11689_s23  ;;  %5042 = vrot.lane.b32.xlu1 %v17124_v33, %s11697_s21  ;;  %v10911_v33 = vunpack.i.h.bf16 %v10909_v56  ;;  %v10910_v58 = vunpack.i.l.bf16 %v10909_v56 }
 0xc40   : > { %10943 = vrot.lane.b32.xlu0 %v17081_v59, %s11689_s23  ;;  %10938 = vrot.lane.b32.xlu1 %v17123_v2, %s11689_s23  ;;  %v17159_v2 = vld [vmem:[#allocation48_spill] sm:$0xff] }
 0xc44   : > { %10948 = vrot.lane.b32.xlu0 %v17126_v4, %s11689_s23  ;;  %10953 = vrot.lane.b32.xlu1 %v17080_v28, %s11689_s23  ;;  %v17160_v4 = vld [vmem:[#allocation24_spill] sm:$0xff] }
 0xc46   : > { %v4662_v57 = vpop.xlane.xlu0 %4661 }
 0xc47   : > { %v4692_v6 = vsub.f32 %v14046_v17, %v4662_v57  ;;  %v4660_v43 = vpop.xlane.xlu1 %4659 }
 0xc48   : > { %v4691_v63 = vsub.f32 %v14054_v32, %v4660_v43  ;;  %10958 = vrot.lane.b32.xlu0 %v17083_v22, %s11689_s23  ;;  %v10900_v22 = vunpack.i.l.bf16 %v10899_v47 }
 0xc49   : > { %v4709_v3 = vmul.f32 1.442695, %v4692_v6 }
 0xc4a   : > { %v4707_v59 = vmul.f32 1.442695, %v4691_v63  ;;  %v10919_v34 = vpop.permute.xlu0 %10918 }
 0xc4b   : > { %v10914_v48 = vpop.permute.xlu1 %10913  ;;  %v10921_v56 = vunpack.i.h.bf16 %v10919_v34  ;;  %v10920_v36 = vunpack.i.l.bf16 %v10919_v34 }
 0xc4c   : > { %11159 = vpow2.f32 %v4707_v59  ;;  %10963 = vrot.lane.b32.xlu0 %v17082_v38, %s11689_s23  ;;  %v10901_v38 = vunpack.i.h.bf16 %v10899_v47  ;;  %v10916_v32 = vunpack.i.h.bf16 %v10914_v48  ;;  %v10915_v17 = vunpack.i.l.bf16 %v10914_v48 }
 0xc4d   : > { %11161 = vpow2.f32 %v4709_v3  ;;  %v10281_v14 = vpack.c.bf16 %v10921_v56, %v10920_v36 }
 0xc4e   : > { %v10257_v37 = vpack.c.bf16 %v10901_v38, %v10900_v22  ;;  %v10275_v40 = vpack.c.bf16 %v10916_v32, %v10915_v17 }
 0xc56   : > { %v14224_v25 = vpop.eup %11159 }
 0xc57   : > { %v14226_v28 = vpop.eup %11161  ;;  %9451 = vmatprep.mubr.f32.mxu0 %v14224_v25 }
 0xc58   : > { %9452 = vmatmul.mubr.f32.vlgmr.msra.gmra.mrb[112].mxu0 %v14226_v28 }
 0xc59   : > { %10250 = vmatpush3.bf16.xpose.msk.msra.mxu0 %vm12066_vm2, %v14003_v18  ;;  %v10269_v18 = vpack.c.bf16 %v10911_v33, %v10910_v58 }
 0xc5a   : > { %10253 = vmatprep.subr.msk.bf16.mxu0 %vm12066_vm2, %v10251_v13 }
 0xc61   : > { %10256 = vmatpush3.bf16.xpose.msk.msra.mxu0 %vm12066_vm2, %v10251_v13 }
 0xc62   : > { %10259 = vmatprep.subr.msk.bf16.mxu0 %vm12066_vm2, %v10257_v37 }
 0xc68   : > { %1047 = vadd.xlane.f32.xlu1 %v17159_v2 }
 0xc69   : > { %10262 = vmatpush3.bf16.xpose.msk.msra.mxu0 %vm12066_vm2, %v10257_v37 }
 0xc6a   : > { %10265 = vmatprep.subr.msk.bf16.mxu0 %vm12066_vm2, %v10263_v49 }
 0xc6c   : > { %2267 = vadd.xlane.f32.xlu1 %v17160_v4 }
 0xc71   : > { %10268 = vmatpush3.bf16.xpose.msk.msra.mxu0 %vm12066_vm2, %v10263_v49 }
 0xc72   : > { %10271 = vmatprep.subr.msk.bf16.mxu0 %vm12066_vm2, %v10269_v18 }
 0xc79   : > { %10274 = vmatpush3.bf16.xpose.msk.msra.mxu0 %vm12066_vm2, %v10269_v18 }
 0xc7a   : > { %10277 = vmatprep.subr.msk.bf16.mxu0 %vm12066_vm2, %v10275_v40 }
 0xc7b   : > { %v4666_v47 = vpop.xlane.xlu0 %4665 }
 0xc7c   : > { %v4694_v57 = vsub.f32 %v14068_v15, %v4666_v47  ;;  %v4664_v6 = vpop.xlane.xlu1 %4663 }
 0xc7d   : > { %v4693_v43 = vsub.f32 %v14076_v12, %v4664_v6 }
 0xc7e   : > { %v4713_v63 = vmul.f32 1.442695, %v4694_v57 }
 0xc7f   : > { %v4711_v3 = vmul.f32 1.442695, %v4693_v43  ;;  %v4670_v59 = vpop.xlane.xlu0 %4669 }
 0xc80   : > { %v4696_v23 = vsub.f32 %v14086_v53, %v4670_v59  ;;  %v4668_v13 = vpop.xlane.xlu1 %4667 }
 0xc81   : > { %11163 = vpow2.f32 %v4711_v3  ;;  %v4695_v38 = vsub.f32 %v14094_v19, %v4668_v13  ;;  %10280 = vmatpush3.bf16.xpose.msk.msra.mxu0 %vm12066_vm2, %v10275_v40 }
 0xc82   : > { %11165 = vpow2.f32 %v4713_v63  ;;  %v4717_v22 = vmul.f32 1.442695, %v4696_v23  ;;  %10283 = vmatprep.subr.msk.bf16.mxu0 %vm12066_vm2, %v10281_v14 }
 0xc83   : > { %v4715_v15 = vmul.f32 1.442695, %v4695_v38  ;;  %v4682_v12 = vpop.xlane.xlu0 %4681 }
 0xc84   : > { %v4674_v37 = vpop.xlane.xlu1 %4673  ;;  %v4702_v56 = vsub.f32 %v14104_v0, %v4682_v12 }
 0xc85   : > { %11167 = vpow2.f32 %v4715_v15  ;;  %v4698_v5 = vsub.f32 %v14112_v61, %v4674_v37 }
 0xc86   : > { %11169 = vpow2.f32 %v4717_v22  ;;  %v4729_v3 = vmul.f32 1.442695, %v4702_v56 }
 0xc87   : > { %v4686_v53 = vpop.xlane.xlu0 %4685  ;;  %v4721_v19 = vmul.f32 1.442695, %v4698_v5 }
 0xc88   : > { %v4672_v31 = vpop.xlane.xlu1 %4671 }
 0xc89   : > { %v4697_v49 = vsub.f32 %v14130_v24, %v4672_v31  ;;  %10286 = vmatpush3.bf16.xpose.msk.msra.mxu0 %vm12066_vm2, %v10281_v14 }
 0xc8b   : > { %v14265_v2 = vpop.eup %11163  ;;  %v4719_v33 = vmul.f32 1.442695, %v4697_v49  ;;  %v4688_v58 = vpop.xlane.xlu0 %4687 }
 0xc8c   : > { %v14267_v4 = vpop.eup %11165  ;;  %9454 = vmatprep.mubr.f32.mxu0 %v14265_v2  ;;  %v4678_v18 = vpop.xlane.xlu1 %4677  ;;  %v4705_v0 = vsub.f32 %v14140_v10, %v4688_v58 }
 0xc8d   : > { %11171 = vpow2.f32 %v4719_v33  ;;  %9455 = vmatmul.mubr.f32.gmra.mrb[114].mxu0 %v14267_v4  ;;  %v4700_v61 = vsub.f32 %v14148_v39, %v4678_v18 }
 0xc8e   : > { %11173 = vpow2.f32 %v4721_v19 }
 0xc8f   : > { %v14272_v24 = vpop.eup %11167  ;;  %v10924_v48 = vpop.permute.xlu0 %10923  ;;  %v4725_v36 = vmul.f32 1.442695, %v4700_v61 }
 0xc90   : > { %v14274_v32 = vpop.eup %11169  ;;  %v10926_v17 = vunpack.i.h.bf16 %v10924_v48  ;;  %v10925_v34 = vunpack.i.l.bf16 %v10924_v48  ;;  %9457 = vmatprep.mubr.f32.mxu0 %v14272_v24  ;;  %v4676_v40 = vpop.xlane.xlu1 %4675 }
 0xc91   : > { %v4699_v47 = vsub.f32 %v14158_v26, %v4676_v40  ;;  %9458 = vmatmul.mubr.f32.gmra.mrb[116].mxu0 %v14274_v32  ;;  %v4704_v26 = vsub.f32 %v14122_v11, %v4686_v53  ;;  %v4735_v11 = vmul.f32 1.442695, %v4705_v0 }
 0xc92   : > { %v10287_v57 = vpack.c.bf16 %v10926_v17, %v10925_v34 }
 0xc93   : > { %v4723_v6 = vmul.f32 1.442695, %v4699_v47  ;;  %v5013_v39 = vpop.permute.xlu0 %5012  ;;  %v4733_v27 = vmul.f32 1.442695, %v4704_v26 }
 0xc94   : > { %v4680_v43 = vpop.xlane.xlu1 %4679  ;;  %10289 = vmatprep.subr.msk.bf16.mxu0 %vm12066_vm2, %v10287_v57 }
 0xc95   : > { %11175 = vpow2.f32 %v4723_v6  ;;  %v4701_v63 = vsub.f32 %v14167_v20, %v4680_v43  ;;  %10292 = vmatpush3.bf16.xpose.msk.msra.mxu0 %vm12066_vm2, %v10287_v57 }
 0xc96   : > { %11177 = vpow2.f32 %v4725_v36 }
 0xc97   : > { %v14286_v59 = vpop.eup %11171  ;;  %v4727_v14 = vmul.f32 1.442695, %v4701_v63  ;;  %v5017_v23 = vpop.permute.xlu0 %5016 }
 0xc98   : > { %v14289_v13 = vpop.eup %11173  ;;  %9460 = vmatprep.mubr.f32.mxu0 %v14286_v59  ;;  %v4684_v38 = vpop.xlane.xlu1 %4683 }
 0xc99   : > { %11179 = vpow2.f32 %v4727_v14  ;;  %v4703_v20 = vsub.f32 %v14176_v42, %v4684_v38  ;;  %9461 = vmatmul.mubr.f32.gmra.mrb[118].mxu0 %v14289_v13 }
 0xc9a   : > { %11181 = vpow2.f32 %v4729_v3 }
 0xc9b   : > { %v4731_v22 = vmul.f32 1.442695, %v4703_v20  ;;  %v5021_v15 = vpop.permute.xlu0 %5020 }
 0xc9c   : > { %v4690_v12 = vpop.xlane.xlu1 %4689 }
 0xc9d   : > { %11183 = vpow2.f32 %v4731_v22  ;;  %v4706_v10 = vsub.f32 %v14185_v55, %v4690_v12 }
 0xc9e   : > { %11185 = vpow2.f32 %v4733_v27 }
 0xc9f   : > { %v14295_v37 = vpop.eup %11175  ;;  %11187 = vpow2.f32 %v4735_v11  ;;  %v4737_v5 = vmul.f32 1.442695, %v4706_v10  ;;  %v5025_v53 = vpop.permute.xlu0 %5024 }
 0xca0   : > { %v14297_v31 = vpop.eup %11177  ;;  %9463 = vmatprep.mubr.f32.mxu0 %v14295_v37  ;;  %v5015_v42 = vpop.permute.xlu1 %5014 }
 0xca1   : > { %11189 = vpow2.f32 %v4737_v5  ;;  %9464 = vmatmul.mubr.f32.gmra.mrb[120].mxu0 %v14297_v31 }
 0xca3   : > { %v14301_v49 = vpop.eup %11179  ;;  %v5029_v19 = vpop.permute.xlu0 %5028 }
 0xca4   : > { %v14303_v33 = vpop.eup %11181  ;;  %9466 = vmatprep.mubr.f32.mxu0 %v14301_v49  ;;  %v5019_v55 = vpop.permute.xlu1 %5018 }
 0xca5   : > { %9467 = vmatmul.mubr.f32.gmra.mrb[122].mxu0 %v14303_v33 }
 0xca7   : > { %v14307_v58 = vpop.eup %11183  ;;  %v5033_v18 = vpop.permute.xlu0 %5032 }
 0xca8   : > { %v14309_v61 = vpop.eup %11185  ;;  %9469 = vmatprep.mubr.f32.mxu0 %v14307_v58  ;;  %v5023_v48 = vpop.permute.xlu1 %5022 }
 0xca9   : > { %v14312_v17 = vpop.eup %11187  ;;  %9470 = vmatmul.mubr.f32.gmra.mrb[124].mxu0 %v14309_v61 }
 0xcaa   : > { %9472 = vmatprep.mubr.f32.mxu0 %v14312_v17 }
 0xcab   : > { %v14316_v34 = vpop.eup %11189  ;;  %v5037_v40 = vpop.permute.xlu0 %5036 }
 0xcac   : > { %v5027_v47 = vpop.permute.xlu1 %5026 }
 0xcad   : > { %9473 = vmatmul.mubr.f32.gmra.mrb[126].mxu0 %v14316_v34 }
 0xcae   : > { %9507 = vmatprep.mubr.msk.f32.mxu0 %vm757_vm1, %v5013_v39 }
 0xcaf   : > { %v5041_v56 = vpop.permute.xlu0 %5040 }
 0xcb0   : > { %v5031_v36 = vpop.permute.xlu1 %5030 }
 0xcb1   : > { %9508 = vmatmul.mubr.msk.f32.vlgmr.msra.gmra.mrb[128].mxu0 %vm757_vm1, %v5015_v42 }
 0xcb2   : > { %9510 = vmatprep.mubr.msk.f32.mxu0 %vm757_vm1, %v5017_v23 }
 0xcb3   : > { %v10929_v57 = vpop.permute.xlu0 %10928 }
 0xcb4   : > { %v10931_v6 = vunpack.i.h.bf16 %v10929_v57  ;;  %v10930_v43 = vunpack.i.l.bf16 %v10929_v57  ;;  %v5035_v63 = vpop.permute.xlu1 %5034 }
 0xcb5   : > { %9511 = vmatmul.mubr.msk.f32.gmra.mrb[130].mxu0 %vm757_vm1, %v5019_v55 }
 0xcb6   : > { %9513 = vmatprep.mubr.msk.f32.mxu0 %vm757_vm1, %v5021_v15  ;;  %v10293_v3 = vpack.c.bf16 %v10931_v6, %v10930_v43 }
 0xcb7   : > { %v10934_v26 = vpop.permute.xlu0 %10933 }
 0xcb8   : > { %v10936_v0 = vunpack.i.h.bf16 %v10934_v26  ;;  %v10935_v14 = vunpack.i.l.bf16 %v10934_v26  ;;  %10294 = vmatprep.subr.bf16.mxu1 %v10293_v3  ;;  %v5039_v39 = vpop.permute.xlu1 %5038 }
 0xcb9   : > { %9514 = vmatmul.mubr.msk.f32.gmra.mrb[132].mxu0 %vm757_vm1, %v5023_v48  ;;  %10296 = vmatpush3.bf16.msra.mxu1 %v10293_v3 }
 0xcba   : > { %9516 = vmatprep.mubr.msk.f32.mxu0 %vm757_vm1, %v5025_v53  ;;  %v10297_v23 = vpack.c.bf16 %v10936_v0, %v10935_v14 }
 0xcbb   : > { %v10944_v38 = vpop.permute.xlu0 %10943 }
 0xcbc   : > { %10298 = vmatprep.subr.bf16.mxu1 %v10297_v23  ;;  %v5043_v20 = vpop.permute.xlu1 %5042  ;;  %v10946_v11 = vunpack.i.h.bf16 %v10944_v38  ;;  %v10945_v22 = vunpack.i.l.bf16 %v10944_v38 }
 0xcbd   : > { %9517 = vmatmul.mubr.msk.f32.gmra.mrb[134].mxu0 %vm757_vm1, %v5027_v47  ;;  %10300 = vmatpush3.bf16.msra.mxu1 %v10297_v23 }
 0xcbe   : > { %9519 = vmatprep.mubr.msk.f32.mxu0 %vm757_vm1, %v5029_v19  ;;  %v10305_v55 = vpack.c.bf16 %v10946_v11, %v10945_v22 }
 0xcbf   : > { %v10949_v10 = vpop.permute.xlu0 %10948 }
 0xcc0   : > { %v10939_v27 = vpop.permute.xlu1 %10938  ;;  %v10951_v53 = vunpack.i.h.bf16 %v10949_v10  ;;  %v10950_v42 = vunpack.i.l.bf16 %v10949_v10 }
 0xcc1   : > { %v10941_v15 = vunpack.i.h.bf16 %v10939_v27  ;;  %v10940_v12 = vunpack.i.l.bf16 %v10939_v27  ;;  %9520 = vmatmul.mubr.msk.f32.gmra.mrb[136].mxu0 %vm757_vm1, %v5031_v36 }
 0xcc2   : > { %9522 = vmatprep.mubr.msk.f32.mxu0 %vm757_vm1, %v5033_v18  ;;  %v10309_v36 = vpack.c.bf16 %v10951_v53, %v10950_v42 }
 0xcc3   : > { %v10301_v5 = vpack.c.bf16 %v10941_v15, %v10940_v12  ;;  %v10959_v19 = vpop.permute.xlu0 %10958 }
 0xcc4   : > { %v10954_v48 = vpop.permute.xlu1 %10953  ;;  %v10961_v18 = vunpack.i.h.bf16 %v10959_v19  ;;  %v10960_v6 = vunpack.i.l.bf16 %v10959_v19 }
 0xcc5   : > { %9523 = vmatmul.mubr.msk.f32.gmra.mrb[138].mxu0 %vm757_vm1, %v5035_v63  ;;  %10302 = vmatprep.subr.bf16.mxu1 %v10301_v5  ;;  %v10956_v47 = vunpack.i.h.bf16 %v10954_v48  ;;  %v10955_v57 = vunpack.i.l.bf16 %v10954_v48 }
 0xcc6   : > { %9525 = vmatprep.mubr.msk.f32.mxu0 %vm757_vm1, %v5037_v40  ;;  %10304 = vmatpush3.bf16.msra.mxu1 %v10301_v5  ;;  %v10317_v26 = vpack.c.bf16 %v10961_v18, %v10960_v6 }
 0xcc7   : > { %10306 = vmatprep.subr.bf16.mxu1 %v10305_v55  ;;  %v10313_v43 = vpack.c.bf16 %v10956_v47, %v10955_v57  ;;  %v10964_v63 = vpop.permute.xlu0 %10963 }
 0xcc8   : > { %v10966_v40 = vunpack.i.h.bf16 %v10964_v63  ;;  %v10965_v3 = vunpack.i.l.bf16 %v10964_v63 }
 0xcc9   : > { %9526 = vmatmul.mubr.msk.f32.gmra.mrb[140].mxu0 %vm757_vm1, %v5039_v39 }
 0xcca   : > { %9528 = vmatprep.mubr.msk.f32.mxu0 %vm757_vm1, %v5041_v56  ;;  %10308 = vmatpush3.bf16.msra.mxu1 %v10305_v55  ;;  %v10321_v0 = vpack.c.bf16 %v10966_v40, %v10965_v3  ;;  %v17165_v3 = vld [vmem:[#allocation19_spill] sm:$0xff] }
 0xccb   : > { %10310 = vmatprep.subr.bf16.mxu1 %v10309_v36 }
 0xccd   : > { %9529 = vmatmul.mubr.msk.f32.gmra.mrb[142].mxu0 %vm757_vm1, %v5043_v20 }
 0xcce   : > { %10312 = vmatpush3.bf16.msra.mxu1 %v10309_v36 }
 0xccf   : > { %10314 = vmatprep.subr.bf16.mxu1 %v10313_v43 }
 0xcd2   : > { %10316 = vmatpush3.bf16.msra.mxu1 %v10313_v43  ;;  %v17164_v43 = vld [vmem:[#allocation5_spill] sm:$0xff] }
 0xcd3   : > { %10318 = vmatprep.subr.bf16.mxu1 %v10317_v26 }
 0xcd6   : > { %10320 = vmatpush3.bf16.msra.mxu1 %v10317_v26 }
 0xcd7   : > { %10322 = vmatprep.subr.bf16.mxu1 %v10321_v0 }
 0xcda   : > { %10324 = vmatpush3.bf16.msra.mxu1 %v10321_v0 }
 0xd2b   : > { %v14335_v56 = vpop.f32.mrb[112].mxu0 }
 0xd2c   : > { %v14337_v14 = vpop.f32.mrb[113].mxu0 }
 0xd60   : > { %v14339_v39 = vpop.f32.mrb[114].mxu0 }
 0xd61   : > { %v14341_v23 = vpop.f32.mrb[115].mxu0 }
 0xd64   : > { %v14343_v38 = vpop.f32.mrb[116].mxu0 }
 0xd65   : > { %v14345_v20 = vpop.f32.mrb[117].mxu0 }
 0xd6c   : > { %v14347_v27 = vpop.f32.mrb[118].mxu0 }
 0xd6d   : > { %v14349_v11 = vpop.f32.mrb[119].mxu0 }
 0xd74   : > { %v14351_v22 = vpop.f32.mrb[120].mxu0 }
 0xd75   : > { %v14353_v15 = vpop.f32.mrb[121].mxu0 }
 0xd78   : > { %v14355_v12 = vpop.f32.mrb[122].mxu0 }
 0xd79   : > { %v14357_v10 = vpop.f32.mrb[123].mxu0 }
 0xd7c   : > { %v14359_v5 = vpop.f32.mrb[124].mxu0 }
 0xd7d   : > { %17161 = vst [vmem:[#allocation48_spill] sm:$0xff] %v14359_v5  ;;  %v14361_v53 = vpop.f32.mrb[125].mxu0 }
 0xd80   : > { %v14363_v42 = vpop.f32.mrb[126].mxu0 }
 0xd81   : > { %17162 = vst [vmem:[#allocation24_spill] sm:$0xff] %v14363_v42  ;;  %v14365_v55 = vpop.f32.mrb[127].mxu0 }
 0xd82   : > { %17163 = vst [vmem:[#allocation191_spill] sm:$0xff] %v14365_v55 }
 0xd84   : > { %v9509_v48 = vpop.f32.mrb[128].mxu0 }
 0xd85   : > { %v14368_v19 = vadd.f32 %v14043_v35, %v9509_v48  ;;  %v5206_v47 = vpop.f32.mrb[129].mxu0  ;;  %v17166_v48 = vld [vmem:[#allocation4_spill] sm:$0xff] }
 0xd86   : > { %v14371_v57 = vadd.f32 %v14051_v16, %v5206_v47 }
 0xd87   : > { %5287 = vmax.xlane.f32.xlu0 %v14368_v19 }
 0xd88   : > { %v9512_v36 = vpop.f32.mrb[130].mxu0  ;;  %5285 = vmax.xlane.f32.xlu1 %v14371_v57 }
 0xd89   : > { %v14376_v18 = vadd.f32 %v14065_v46, %v9512_v36  ;;  %v5216_v6 = vpop.f32.mrb[131].mxu0 }
 0xd8a   : > { %v14381_v35 = vadd.f32 %v14073_v8, %v5216_v6  ;;  %v17167_v6 = vld [vmem:[#allocation50_spill] sm:$0xff] }
 0xd8b   : > { %1625 = vadd.xlane.f32.xlu0 %v17164_v43 }
 0xd8c   : > { %v9515_v63 = vpop.f32.mrb[132].mxu0  ;;  %5291 = vmax.xlane.f32.xlu1 %v14376_v18 }
 0xd8d   : > { %v5226_v40 = vpop.f32.mrb[133].mxu0  ;;  %v14386_v26 = vadd.f32 %v14083_v45, %v9515_v63  ;;  %v17169_v63 = vld [vmem:[#allocation28_spill] sm:$0xff] }
 0xd8e   : > { %v14391_v47 = vadd.f32 %v14091_v29, %v5226_v40  ;;  %v17170_v40 = vld [vmem:[#allocation98_spill] sm:$0xff] }
 0xd8f   : > { %5289 = vmax.xlane.f32.xlu0 %v14381_v35 }
 0xd90   : > { %v9518_v16 = vpop.f32.mrb[134].mxu0  ;;  %1627 = vadd.xlane.f32.xlu1 %v17165_v3  ;;  %v17168_v3 = vld [vmem:[#allocation49_spill] sm:$0xff] }
 0xd91   : > { %v5236_v46 = vpop.f32.mrb[135].mxu0  ;;  %v14398_v42 = vadd.f32 %v14109_v44, %v9518_v16  ;;  %v17173_v16 = vld [vmem:[#allocation27_spill] sm:$0xff] }
 0xd92   : > { %v14403_v5 = vadd.f32 %v14127_v41, %v5236_v46  ;;  %v17174_v46 = vld [vmem:[#allocation30_spill] sm:$0xff] }
 0xd93   : > { %5295 = vmax.xlane.f32.xlu0 %v14386_v26 }
 0xd94   : > { %v9521_v0 = vpop.f32.mrb[136].mxu0  ;;  %2269 = vadd.xlane.f32.xlu1 %v17166_v48 }
 0xd95   : > { %v5246_v8 = vpop.f32.mrb[137].mxu0 }
 0xd96   : > { %v14413_v44 = vadd.f32 %v14155_v62, %v5246_v8  ;;  %v17177_v8 = vld [vmem:[#allocation2_spill] sm:$0xff] }
 0xd97   : > { %5293 = vmax.xlane.f32.xlu0 %v14391_v47 }
 0xd98   : > { %v9524_v36 = vpop.f32.mrb[138].mxu0  ;;  %1051 = vadd.xlane.f32.xlu1 %v17167_v6  ;;  %v17171_v6 = vld [vmem:[#allocation21_spill] sm:$0xff] }
 0xd99   : > { %v5256_v43 = vpop.f32.mrb[139].mxu0  ;;  %v14418_v41 = vadd.f32 %v14101_v21, %v9524_v36  ;;  %v17183_v36 = vld [vmem:[#allocation53_spill] sm:$0xff] }
 0xd9b   : > { %1049 = vadd.xlane.f32.xlu0 %v17168_v3  ;;  %v14408_v3 = vadd.f32 %v14145_v52, %v9521_v0  ;;  %v14423_v52 = vadd.f32 %v14164_v54, %v5256_v43  ;;  %v17176_v0 = vld [vmem:[#allocation45_spill] sm:$0xff]  ;;  %v17184_v43 = vld [vmem:[#allocation18_spill] sm:$0xff] }
 0xd9c   : > { %v9527_v45 = vpop.f32.mrb[140].mxu0  ;;  %2895 = vadd.xlane.f32.xlu1 %v17169_v63  ;;  %v17172_v63 = vld [vmem:[#allocation32_spill] sm:$0xff] }
 0xd9d   : > { %v5266_v55 = vpop.f32.mrb[141].mxu0  ;;  %v14428_v62 = vadd.f32 %v14119_v1, %v9527_v45  ;;  %v17185_v45 = vld [vmem:[#allocation120_spill] sm:$0xff] }
 0xd9e   : > { %v14433_v21 = vadd.f32 %v14173_v60, %v5266_v55  ;;  %v17178_v60 = vld [vmem:[#allocation52_spill] sm:$0xff]  ;;  %v17181_v55 = vld [vmem:[#allocation35_spill] sm:$0xff] }
 0xd9f   : > { %5299 = vmax.xlane.f32.xlu0 %v14398_v42 }
 0xda0   : > { %v9530_v29 = vpop.f32.mrb[142].mxu0  ;;  %2271 = vadd.xlane.f32.xlu1 %v17170_v40  ;;  %v17189_v40 = vld [vmem:[#allocation46_spill] sm:$0xff] }
 0xda1   : > { %v5276_v48 = vpop.f32.mrb[143].mxu0  ;;  %v14438_v54 = vadd.f32 %v14182_v51, %v9530_v29  ;;  %v17180_v51 = vld [vmem:[#allocation8_spill] sm:$0xff]  ;;  %v17188_v29 = vld [vmem:[#allocation54_spill] sm:$0xff] }
 0xda2   : > { %v14443_v1 = vadd.f32 %v14137_v9, %v5276_v48  ;;  %v17182_v9 = vld [vmem:[#allocation33_spill] sm:$0xff]  ;;  %v17191_v48 = vld [vmem:[#allocation10_spill] sm:$0xff] }
 0xda3   : > { %2893 = vadd.xlane.f32.xlu0 %v17171_v6  ;;  %v17192_v6 = vld [vmem:[#allocation148_spill] sm:$0xff] }
 0xda4   : > { %5297 = vmax.xlane.f32.xlu1 %v14403_v5 }
 0xda7   : > { %3519 = vadd.xlane.f32.xlu0 %v17172_v63  ;;  %v17193_v63 = vld [vmem:[#allocation101_spill] sm:$0xff] }
 0xda8   : > { %5303 = vmax.xlane.f32.xlu1 %v14408_v3 }
 0xdab   : > { %1629 = vadd.xlane.f32.xlu0 %v17173_v16  ;;  %v17194_v16 = vld [vmem:[#allocation55_spill] sm:$0xff] }
 0xdac   : > { %5301 = vmax.xlane.f32.xlu1 %v14413_v44 }
 0xdaf   : > { %4097 = vadd.xlane.f32.xlu0 %v13894_v50  ;;  %v17175_v50 = vld [vmem:[#allocation51_spill] sm:$0xff] }
 0xdb0   : > { %5307 = vmax.xlane.f32.xlu1 %v14418_v41 }
 0xdb3   : > { %3521 = vadd.xlane.f32.xlu0 %v17174_v46  ;;  %v17195_v46 = vld [vmem:[#allocation122_spill] sm:$0xff] }
 0xdb4   : > { %5305 = vmax.xlane.f32.xlu1 %v14423_v52 }
 0xdb7   : > { %5311 = vmax.xlane.f32.xlu0 %v14428_v62 }
 0xdb8   : > { %4739 = vadd.xlane.f32.xlu1 %v14224_v25  ;;  %v17179_v25 = vld [vmem:[#allocation99_spill] sm:$0xff] }
 0xdbb   : > { %1053 = vadd.xlane.f32.xlu0 %v17175_v50  ;;  %v17196_v50 = vld [vmem:[#allocation3_spill] sm:$0xff] }
 0xdbc   : > { %5309 = vmax.xlane.f32.xlu1 %v14433_v21 }
 0xdbf   : > { %5315 = vmax.xlane.f32.xlu0 %v14438_v54 }
 0xdc0   : > { %1631 = vadd.xlane.f32.xlu1 %v17176_v0  ;;  %v17198_v0 = vld [vmem:[#allocation23_spill] sm:$0xff] }
 0xdc3   : > { %2897 = vadd.xlane.f32.xlu0 %v17177_v8  ;;  %v17199_v8 = vld [vmem:[#allocation56_spill] sm:$0xff] }
 0xdc4   : > { %5313 = vmax.xlane.f32.xlu1 %v14443_v1 }
 0xdc7   : > { %3523 = vadd.xlane.f32.xlu0 %v13674_v30  ;;  %v17186_v30 = vld [vmem:[#allocation100_spill] sm:$0xff] }
 0xdc8   : > { %4099 = vadd.xlane.f32.xlu1 %v13896_v7  ;;  %v17187_v7 = vld [vmem:[#allocation34_spill] sm:$0xff] }
 0xdcb   : > { %1055 = vadd.xlane.f32.xlu0 %v17178_v60  ;;  %v17200_v60 = vld [vmem:[#allocation36_spill] sm:$0xff] }
 0xdcc   : > { %2273 = vadd.xlane.f32.xlu1 %v17179_v25  ;;  %v17201_v25 = vld [vmem:[#allocation123_spill] sm:$0xff] }
 0xdcf   : > { %2899 = vadd.xlane.f32.xlu0 %v17180_v51  ;;  %v17202_v51 = vld [vmem:[#allocation150_spill] sm:$0xff] }
 0xdd0   : > { %4741 = vadd.xlane.f32.xlu1 %v14226_v28  ;;  %v17190_v28 = vld [vmem:[#allocation121_spill] sm:$0xff] }
 0xdd3   : > { %3525 = vadd.xlane.f32.xlu0 %v17181_v55  ;;  %v17203_v55 = vld [vmem:[#allocation7_spill] sm:$0xff] }
 0xdd4   : > { %1633 = vadd.xlane.f32.xlu1 %v17182_v9  ;;  %v17205_v9 = vld [vmem:[#allocation14_spill] sm:$0xff] }
 0xdd7   : > { %1057 = vadd.xlane.f32.xlu0 %v17183_v36  ;;  %v1048_v36 = vpop.xlane.xlu1 %1047 }
 0xdd8   : > { %4101 = vadd.xlane.f32.xlu1 %v17184_v43  ;;  %v17206_v43 = vld [vmem:[#allocation124_spill] sm:$0xff]  ;;  %11191 = vrcp.f32 %v1048_v36 }
 0xddb   : > { %2901 = vadd.xlane.f32.xlu0 %v17185_v45  ;;  %v17207_v45 = vld [vmem:[#allocation102_spill] sm:$0xff] }
 0xddc   : > { %2275 = vadd.xlane.f32.xlu1 %v17186_v30  ;;  %v17208_v30 = vld [vmem:[#allocation151_spill] sm:$0xff] }
 0xddf   : > { %3527 = vadd.xlane.f32.xlu0 %v17187_v7  ;;  %v2268_v7 = vpop.xlane.xlu1 %2267 }
 0xde0   : > { %4743 = vadd.xlane.f32.xlu1 %v14265_v2  ;;  %v17197_v2 = vld [vmem:[#allocation149_spill] sm:$0xff]  ;;  %11193 = vrcp.f32 %v2268_v7  ;;  %v17216_v7 = vld [vmem:[#allocation126_spill] sm:$0xff] }
 0xde2   : > { %v11192_v36 = vpop.eup %11191 }
 0xde3   : > { %1059 = vadd.xlane.f32.xlu0 %v17188_v29  ;;  %v17209_v29 = vld [vmem:[#allocation44_spill] sm:$0xff] }
 0xde4   : > { %1635 = vadd.xlane.f32.xlu1 %v17189_v40  ;;  %v17210_v40 = vld [vmem:[#allocation9_spill] sm:$0xff] }
 0xde7   : > { %2903 = vadd.xlane.f32.xlu0 %v17190_v28 }
 0xde8   : > { %4103 = vadd.xlane.f32.xlu1 %v17191_v48 }
 0xdeb   : > { %3529 = vadd.xlane.f32.xlu0 %v17192_v6 }
 0xdec   : > { %2277 = vadd.xlane.f32.xlu1 %v17193_v63 }
 0xdef   : > { %1061 = vadd.xlane.f32.xlu0 %v17194_v16  ;;  %v17211_v16 = vld [vmem:[#allocation125_spill] sm:$0xff] }
 0xdf0   : > { %4745 = vadd.xlane.f32.xlu1 %v14267_v4  ;;  %v17204_v4 = vld [vmem:[#allocation11_spill] sm:$0xff] }
 0xdf3   : > { %2905 = vadd.xlane.f32.xlu0 %v17195_v46 }
 0xdf4   : > { %1637 = vadd.xlane.f32.xlu1 %v17196_v50 }
 0xdf7   : > { %3531 = vadd.xlane.f32.xlu0 %v17197_v2  ;;  %v17212_v2 = vld [vmem:[#allocation26_spill] sm:$0xff] }
 0xdf8   : > { %4105 = vadd.xlane.f32.xlu1 %v17198_v0 }
 0xdfb   : > { %1063 = vadd.xlane.f32.xlu0 %v17199_v8  ;;  %v17213_v8 = vld [vmem:[#allocation152_spill] sm:$0xff] }
 0xdfc   : > { %2279 = vadd.xlane.f32.xlu1 %v17200_v60 }
 0xdff   : > { %2907 = vadd.xlane.f32.xlu0 %v17201_v25 }
 0xe00   : > { %4747 = vadd.xlane.f32.xlu1 %v14272_v24 }
 0xe03   : > { %3533 = vadd.xlane.f32.xlu0 %v17202_v51 }
 0xe04   : > { %1639 = vadd.xlane.f32.xlu1 %v17203_v55 }
 0xe07   : > { %1065 = vadd.xlane.f32.xlu0 %v17204_v4  ;;  %v17215_v4 = vld [vmem:[#allocation15_spill] sm:$0xff] }
 0xe08   : > { %4107 = vadd.xlane.f32.xlu1 %v17205_v9 }
 0xe0b   : > { %2909 = vadd.xlane.f32.xlu0 %v17206_v43 }
 0xe0c   : > { %2281 = vadd.xlane.f32.xlu1 %v17207_v45  ;;  %v11194_v45 = vpop.eup %11193 }
 0xe0f   : > { %3535 = vadd.xlane.f32.xlu0 %v17208_v30 }
 0xe10   : > { %4749 = vadd.xlane.f32.xlu1 %v14274_v32 }
 0xe13   : > { %1067 = vadd.xlane.f32.xlu0 %v17209_v29 }
 0xe14   : > { %v5288_v24 = vpop.xlane.xlu0 %5287  ;;  %1641 = vadd.xlane.f32.xlu1 %v17210_v40  ;;  %v17217_v40 = vld [vmem:[#allocation47_spill] sm:$0xff] }
 0xe15   : > { %v5318_v28 = vsub.f32 %v14368_v19, %v5288_v24  ;;  %v5286_v48 = vpop.xlane.xlu1 %5285 }
 0xe16   : > { %v5317_v6 = vsub.f32 %v14371_v57, %v5286_v48  ;;  %v17214_v57 = vld [vmem:[#allocation103_spill] sm:$0xff] }
 0xe17   : > { %v5335_v63 = vmul.f32 1.442695, %v5318_v28  ;;  %2911 = vadd.xlane.f32.xlu0 %v17211_v16 }
 0xe18   : > { %v5333_v46 = vmul.f32 1.442695, %v5317_v6  ;;  %v1626_v50 = vpop.xlane.xlu0 %1625  ;;  %4109 = vadd.xlane.f32.xlu1 %v17212_v2  ;;  %v17221_v2 = vld [vmem:[#allocation38_spill] sm:$0xff] }
 0xe19   : > { %11195 = vpow2.f32 %v5335_v63  ;;  %v5292_v32 = vpop.xlane.xlu1 %5291  ;;  %v17219_v63 = vld [vmem:[#allocation83_spill] sm:$0xff] }
 0xe1a   : > { %11197 = vpow2.f32 %v5333_v46  ;;  %v5320_v0 = vsub.f32 %v14376_v18, %v5292_v32  ;;  %v2508_v32 = vmul.f32 %v11194_v45, %v17221_v2  ;;  %v17226_v45 = vld [vmem:[#allocation37_spill] sm:$0xff]  ;;  %v17229_v2 = vld [vmem:[#allocation154_spill] sm:$0xff] }
 0xe1b   : > { %11199 = vrcp.f32 %v1626_v50  ;;  %3537 = vadd.xlane.f32.xlu0 %v17213_v8  ;;  %v17220_v50 = vld [vmem:[#allocation153_spill] sm:$0xff] }
 0xe1c   : > { %v5339_v19 = vmul.f32 1.442695, %v5320_v0  ;;  %v5290_v60 = vpop.xlane.xlu0 %5289  ;;  %2283 = vadd.xlane.f32.xlu1 %v17214_v57  ;;  %v17222_v8 = vld [vmem:[#allocation17_spill] sm:$0xff] }
 0xe1d   : > { %v5319_v25 = vsub.f32 %v14381_v35, %v5290_v60  ;;  %v1628_v51 = vpop.xlane.xlu1 %1627 }
 0xe1e   : > { %11201 = vrcp.f32 %v1628_v51 }
 0xe1f   : > { %v5337_v55 = vmul.f32 1.442695, %v5319_v25  ;;  %1069 = vadd.xlane.f32.xlu0 %v17215_v4  ;;  %11203 = vpow2.f32 %v5339_v19  ;;  %v17223_v25 = vld [vmem:[#allocation82_spill] sm:$0xff] }
 0xe20   : > { %v5296_v9 = vpop.xlane.xlu0 %5295  ;;  %4751 = vadd.xlane.f32.xlu1 %v14286_v59 }
 0xe21   : > { %11205 = vpow2.f32 %v5337_v55  ;;  %v5322_v18 = vsub.f32 %v14386_v26, %v5296_v9  ;;  %v2270_v43 = vpop.xlane.xlu1 %2269  ;;  %v17218_v26 = vld [vmem:[#allocation67_spill] sm:$0xff]  ;;  %v17224_v9 = vld [vmem:[#allocation57_spill] sm:$0xff] }
 0xe22   : > { %11207 = vrcp.f32 %v2270_v43  ;;  %v1240_v6 = vmul.f32 %v11192_v36, %v17218_v26  ;;  %v17225_v43 = vld [vmem:[#allocation104_spill] sm:$0xff] }
 0xe23   : > { %v14498_v30 = vpop.eup %11195  ;;  %2913 = vadd.xlane.f32.xlu0 %v17216_v7  ;;  %v5343_v29 = vmul.f32 1.442695, %v5322_v18 }
 0xe24   : > { %v14501_v35 = vpop.eup %11197  ;;  %v5294_v24 = vpop.xlane.xlu0 %5293  ;;  %1643 = vadd.xlane.f32.xlu1 %v17217_v40  ;;  %v17227_v40 = vld [vmem:[#allocation127_spill] sm:$0xff] }
 0xe25   : > { %v11200_v28 = vpop.eup %11199  ;;  %v5321_v59 = vsub.f32 %v14391_v47, %v5294_v24  ;;  %9563 = vmatprep.mubr.f32.mxu1 %v14501_v35  ;;  %v1052_v48 = vpop.xlane.xlu1 %1051 }
 0xe26   : > { %v1882_v16 = vmul.f32 %v11200_v28, %v17219_v63  ;;  %11209 = vrcp.f32 %v1052_v48  ;;  %9564 = vmatmul.mubr.f32.vlgmr.msra.gmra.mrb[144].mxu1 %v14498_v30  ;;  %v17228_v48 = vld [vmem:[#allocation69_spill] sm:$0xff] }
 0xe27   : > { %v5341_v46 = vmul.f32 1.442695, %v5321_v59  ;;  %3539 = vadd.xlane.f32.xlu0 %v17220_v50  ;;  %11211 = vpow2.f32 %v5343_v29 }
 0xe28   : > { %v1050_v0 = vpop.xlane.xlu0 %1049  ;;  %4111 = vadd.xlane.f32.xlu1 %v17222_v8  ;;  %v1898_v47 = vadd.f32 %v1882_v16, %v1240_v6  ;;  %v11202_v19 = vpop.eup %11201  ;;  %v17230_v8 = vld [vmem:[#allocation60_spill] sm:$0xff] }
 0xe29   : > { %11213 = vpow2.f32 %v5341_v46  ;;  %v2896_v60 = vpop.xlane.xlu1 %2895  ;;  %v14512_v57 = vpop.eup %11203  ;;  %v1883_v51 = vmul.f32 %v11202_v19, %v17223_v25 }
 0xe2a   : > { %11215 = vrcp.f32 %v1050_v0  ;;  %v14515_v55 = vadd.f32 %v2508_v32, %v1898_v47  ;;  %v17231_v47 = vld [vmem:[#allocation66_spill] sm:$0xff] }
 0xe2b   : > { %v14517_v4 = vpop.eup %11205  ;;  %11217 = vrcp.f32 %v2896_v60  ;;  %1071 = vadd.xlane.f32.xlu0 %v17224_v9 }
 0xe2c   : > { %v11208_v36 = vpop.eup %11207  ;;  %v5300_v18 = vpop.xlane.xlu0 %5299  ;;  %2285 = vadd.xlane.f32.xlu1 %v17225_v43  ;;  %9566 = vmatprep.mubr.f32.mxu1 %v14517_v4 }
 0xe2d   : > { %v2509_v7 = vmul.f32 %v11208_v36, %v17226_v45  ;;  %9567 = vmatmul.mubr.f32.gmra.mrb[146].mxu1 %v14512_v57  ;;  %v2272_v29 = vpop.xlane.xlu1 %2271  ;;  %v5324_v24 = vsub.f32 %v14398_v42, %v5300_v18  ;;  %v17233_v36 = vld [vmem:[#allocation58_spill] sm:$0xff] }
 0xe2e   : > { %11219 = vrcp.f32 %v2272_v29  ;;  %v17234_v29 = vld [vmem:[#allocation6_spill] sm:$0xff] }
 0xe2f   : > { %2915 = vadd.xlane.f32.xlu0 %v17227_v40  ;;  %v5347_v50 = vmul.f32 1.442695, %v5324_v24  ;;  %v17235_v24 = vld [vmem:[#allocation40_spill] sm:$0xff] }
 0xe30   : > { %v11210_v28 = vpop.eup %11209  ;;  %v2894_v59 = vpop.xlane.xlu0 %2893  ;;  %4753 = vadd.xlane.f32.xlu1 %v14289_v13 }
 0xe31   : > { %v14528_v26 = vmul.f32 %v11210_v28, %v17228_v48  ;;  %v5298_v6 = vpop.xlane.xlu1 %5297  ;;  %v14530_v63 = vpop.eup %11211  ;;  %11221 = vrcp.f32 %v2894_v59 }
 0xe32   : > { %v5323_v16 = vsub.f32 %v14403_v5, %v5298_v6  ;;  %v17232_v5 = vld [vmem:[#allocation132_spill] sm:$0xff] }
 0xe33   : > { %v14533_v46 = vpop.eup %11213  ;;  %3541 = vadd.xlane.f32.xlu0 %v17229_v2 }
 0xe34   : > { %v11216_v42 = vpop.eup %11215  ;;  %v5345_v32 = vmul.f32 1.442695, %v5323_v16  ;;  %v3520_v0 = vpop.xlane.xlu0 %3519  ;;  %1645 = vadd.xlane.f32.xlu1 %v17230_v8  ;;  %9569 = vmatprep.mubr.f32.mxu1 %v14533_v46  ;;  %v17236_v16 = vld [vmem:[#allocation128_spill] sm:$0xff] }
 0xe35   : > { %v11218_v13 = vpop.eup %11217  ;;  %v1241_v19 = vmul.f32 %v11216_v42, %v17231_v47  ;;  %11223 = vrcp.f32 %v3520_v0  ;;  %9570 = vmatmul.mubr.f32.gmra.mrb[148].mxu1 %v14530_v63  ;;  %v5304_v60 = vpop.xlane.xlu1 %5303  ;;  %v17238_v0 = vld [vmem:[#allocation133_spill] sm:$0xff] }
 0xe36   : > { %11225 = vpow2.f32 %v5345_v32  ;;  %v3135_v25 = vmul.f32 %v11218_v13, %v17232_v5  ;;  %v5326_v9 = vsub.f32 %v14408_v3, %v5304_v60  ;;  %v17240_v5 = vld [vmem:[#allocation160_spill] sm:$0xff] }
 0xe37   : > { %11227 = vpow2.f32 %v5347_v50  ;;  %1073 = vadd.xlane.f32.xlu0 %v17233_v36  ;;  %v1899_v18 = vadd.f32 %v1883_v51, %v1241_v19  ;;  %v17237_v51 = vld [vmem:[#allocation105_spill] sm:$0xff] }
 0xe38   : > { %v11220_v43 = vpop.eup %11219  ;;  %v1630_v45 = vpop.xlane.xlu0 %1629  ;;  %4113 = vadd.xlane.f32.xlu1 %v17234_v29  ;;  %v5351_v6 = vmul.f32 1.442695, %v5326_v9  ;;  %v17242_v29 = vld [vmem:[#allocation85_spill] sm:$0xff] }
 0xe39   : > { %v2510_v40 = vmul.f32 %v11220_v43, %v17235_v24  ;;  %11229 = vrcp.f32 %v1630_v45  ;;  %v5302_v28 = vpop.xlane.xlu1 %5301  ;;  %v2525_v59 = vadd.f32 %v2509_v7, %v1899_v18  ;;  %v17241_v45 = vld [vmem:[#allocation29_spill] sm:$0xff] }
 0xe3a   : > { %v5325_v48 = vsub.f32 %v14413_v44, %v5302_v28  ;;  %v17239_v44 = vld [vmem:[#allocation155_spill] sm:$0xff] }
 0xe3b   : > { %2917 = vadd.xlane.f32.xlu0 %v17236_v16  ;;  %v14547_v50 = vadd.f32 %v3135_v25, %v2525_v59  ;;  %v11222_v3 = vpop.eup %11221  ;;  %v17243_v59 = vld [vmem:[#allocation61_spill] sm:$0xff] }
 0xe3c   : > { %v5349_v2 = vmul.f32 1.442695, %v5325_v48  ;;  %v4098_v42 = vpop.xlane.xlu0 %4097  ;;  %2287 = vadd.xlane.f32.xlu1 %v17237_v51  ;;  %v3134_v8 = vmul.f32 %v11222_v3, %v17238_v0  ;;  %v17244_v3 = vld [vmem:[#allocation129_spill] sm:$0xff]  ;;  %v17245_v51 = vld [vmem:[#allocation22_spill] sm:$0xff] }
 0xe3d   : > { %11231 = vrcp.f32 %v4098_v42  ;;  %v5308_v32 = vpop.xlane.xlu1 %5307 }
 0xe3e   : > { %11233 = vpow2.f32 %v5349_v2  ;;  %v5328_v13 = vsub.f32 %v14418_v41, %v5308_v32  ;;  %v3150_v47 = vadd.f32 %v3134_v8, %v14515_v55  ;;  %v17246_v32 = vld [vmem:[#allocation176_spill] sm:$0xff] }
 0xe3f   : > { %v11224_v7 = vpop.eup %11223  ;;  %11235 = vpow2.f32 %v5351_v6  ;;  %3543 = vadd.xlane.f32.xlu0 %v17239_v44 }
 0xe40   : > { %v14554_v19 = vpop.eup %11225  ;;  %v3522_v60 = vpop.xlane.xlu0 %3521  ;;  %4755 = vadd.xlane.f32.xlu1 %v14295_v37  ;;  %v3712_v25 = vmul.f32 %v11224_v7, %v17240_v5  ;;  %v5355_v36 = vmul.f32 1.442695, %v5328_v13 }
 0xe41   : > { %v14558_v9 = vpop.eup %11227  ;;  %11237 = vrcp.f32 %v3522_v60  ;;  %9572 = vmatprep.mubr.f32.mxu1 %v14554_v19  ;;  %v5306_v41 = vpop.xlane.xlu1 %5305  ;;  %v17247_v60 = vld [vmem:[#allocation156_spill] sm:$0xff] }
 0xe42   : > { %v5327_v18 = vsub.f32 %v14423_v52, %v5306_v41  ;;  %9573 = vmatmul.mubr.f32.gmra.mrb[150].mxu1 %v14558_v9  ;;  %v3728_v43 = vadd.f32 %v3712_v25, %v3150_v47  ;;  %11239 = vpow2.f32 %v5355_v36  ;;  %v17248_v36 = vld [vmem:[#allocation106_spill] sm:$0xff] }
 0xe43   : > { %v11230_v55 = vpop.eup %11229  ;;  %1075 = vadd.xlane.f32.xlu0 %v17241_v45 }
 0xe44   : > { %v1884_v24 = vmul.f32 %v11230_v55, %v17242_v29  ;;  %v5353_v37 = vmul.f32 1.442695, %v5327_v18  ;;  %v5312_v28 = vpop.xlane.xlu0 %5311  ;;  %1647 = vadd.xlane.f32.xlu1 %v17243_v59 }
 0xe45   : > { %v5330_v48 = vsub.f32 %v14428_v62, %v5312_v28  ;;  %v4740_v6 = vpop.xlane.xlu1 %4739 }
 0xe46   : > { %11241 = vpow2.f32 %v5353_v37  ;;  %v1900_v16 = vadd.f32 %v1884_v24, %v14528_v26 }
 0xe47   : > { %v11232_v52 = vpop.eup %11231  ;;  %11243 = vrcp.f32 %v4740_v6  ;;  %2919 = vadd.xlane.f32.xlu0 %v17244_v3  ;;  %v5359_v62 = vmul.f32 1.442695, %v5330_v48  ;;  %v17251_v48 = vld [vmem:[#allocation130_spill] sm:$0xff] }
 0xe48   : > { %v14569_v2 = vpop.eup %11233  ;;  %v1054_v42 = vpop.xlane.xlu0 %1053  ;;  %4115 = vadd.xlane.f32.xlu1 %v17245_v51  ;;  %v4354_v0 = vmul.f32 %v11232_v52, %v17246_v32  ;;  %v14573_v8 = vadd.f32 %v2510_v40, %v1900_v16  ;;  %v17249_v40 = vld [vmem:[#allocation159_spill] sm:$0xff]  ;;  %v17252_v3 = vld [vmem:[#allocation62_spill] sm:$0xff] }
 0xe49   : > { %v14575_v13 = vpop.eup %11235  ;;  %9575 = vmatprep.mubr.f32.mxu1 %v14569_v2  ;;  %v5310_v7 = vpop.xlane.xlu1 %5309  ;;  %11245 = vrcp.f32 %v1054_v42  ;;  %v17253_v42 = vld [vmem:[#allocation68_spill] sm:$0xff] }
 0xe4a   : > { %v5329_v26 = vsub.f32 %v14433_v21, %v5310_v7  ;;  %9576 = vmatmul.mubr.f32.gmra.mrb[152].mxu1 %v14575_v13  ;;  %v4370_v44 = vadd.f32 %v4354_v0, %v3728_v43  ;;  %11247 = vpow2.f32 %v5359_v62  ;;  %v17250_v43 = vld [vmem:[#allocation59_spill] sm:$0xff]  ;;  %v17254_v0 = vld [vmem:[#allocation157_spill] sm:$0xff]  ;;  %v17255_v7 = vld [vmem:[#allocation20_spill] sm:$0xff] }
 0xe4b   : > { %v11238_v47 = vpop.eup %11237  ;;  %3545 = vadd.xlane.f32.xlu0 %v17247_v60 }
 0xe4c   : > { %v5357_v5 = vmul.f32 1.442695, %v5329_v26  ;;  %v5316_v25 = vpop.xlane.xlu0 %5315  ;;  %2289 = vadd.xlane.f32.xlu1 %v17248_v36  ;;  %v3713_v41 = vmul.f32 %v11238_v47, %v17249_v40  ;;  %v14587_v21 = vpop.eup %11239  ;;  %v17256_v47 = vld [vmem:[#allocation84_spill] sm:$0xff]  ;;  %v17258_v40 = vld [vmem:[#allocation107_spill] sm:$0xff] }
 0xe4d   : > { %v5332_v18 = vsub.f32 %v14438_v54, %v5316_v25  ;;  %v1632_v55 = vpop.xlane.xlu1 %1631 }
 0xe4e   : > { %11249 = vpow2.f32 %v5357_v5  ;;  %v14585_v45 = vadd.f32 %v3713_v41, %v14547_v50  ;;  %v17257_v5 = vld [vmem:[#allocation131_spill] sm:$0xff] }
 0xe4f   : > { %11251 = vrcp.f32 %v1632_v55  ;;  %1077 = vadd.xlane.f32.xlu0 %v17250_v43  ;;  %v5363_v24 = vmul.f32 1.442695, %v5332_v18  ;;  %v17259_v55 = vld [vmem:[#allocation135_spill] sm:$0xff] }
 0xe50   : > { %v14590_v29 = vpop.eup %11241  ;;  %v2898_v37 = vpop.xlane.xlu0 %2897  ;;  %4757 = vadd.xlane.f32.xlu1 %v14297_v31 }
 0xe51   : > { %v11244_v28 = vpop.eup %11243  ;;  %9578 = vmatprep.mubr.f32.mxu1 %v14590_v29  ;;  %v5314_v54 = vpop.xlane.xlu1 %5313  ;;  %11253 = vrcp.f32 %v2898_v37 }
 0xe52   : > { %v5331_v59 = vsub.f32 %v14443_v1, %v5314_v54  ;;  %9579 = vmatmul.mubr.f32.gmra.mrb[154].mxu1 %v14587_v21  ;;  %v4980_v50 = vmul.f32 %v11244_v28, %v14337_v14  ;;  %11255 = vpow2.f32 %v5363_v24 }
 0xe53   : > { %2921 = vadd.xlane.f32.xlu0 %v17251_v48  ;;  %v11246_v6 = vpop.eup %11245 }
 0xe54   : > { %v5361_v16 = vmul.f32 1.442695, %v5331_v59  ;;  %v3524_v52 = vpop.xlane.xlu0 %3523  ;;  %1649 = vadd.xlane.f32.xlu1 %v17252_v3  ;;  %v14599_v31 = vadd.f32 %v4980_v50, %v4370_v44  ;;  %v1243_v51 = vmul.f32 %v11246_v6, %v17253_v42  ;;  %v14602_v1 = vpop.eup %11247  ;;  %v17260_v50 = vld [vmem:[#allocation162_spill] sm:$0xff] }
 0xe55   : > { %11257 = vrcp.f32 %v3524_v52  ;;  %v4100_v32 = vpop.xlane.xlu1 %4099  ;;  %v17261_v52 = vld [vmem:[#allocation175_spill] sm:$0xff] }
 0xe56   : > { %11259 = vpow2.f32 %v5361_v16 }
 0xe57   : > { %11261 = vrcp.f32 %v4100_v32  ;;  %3547 = vadd.xlane.f32.xlu0 %v17254_v0 }
 0xe58   : > { %v14605_v14 = vpop.eup %11249  ;;  %v1056_v62 = vpop.xlane.xlu0 %1055  ;;  %4117 = vadd.xlane.f32.xlu1 %v17255_v7 }
 0xe59   : > { %v11252_v26 = vpop.eup %11251  ;;  %11263 = vrcp.f32 %v1056_v62  ;;  %9581 = vmatprep.mubr.f32.mxu1 %v14605_v14  ;;  %v2274_v44 = vpop.xlane.xlu1 %2273  ;;  %v17264_v62 = vld [vmem:[#allocation63_spill] sm:$0xff] }
 0xe5a   : > { %v1885_v60 = vmul.f32 %v11252_v26, %v17256_v47  ;;  %11265 = vrcp.f32 %v2274_v44  ;;  %9582 = vmatmul.mubr.f32.gmra.mrb[156].mxu1 %v14602_v1  ;;  %v17265_v26 = vld [vmem:[#allocation39_spill] sm:$0xff] }
 0xe5b   : > { %2923 = vadd.xlane.f32.xlu0 %v17257_v5  ;;  %v11254_v25 = vpop.eup %11253 }
 0xe5c   : > { %v2900_v36 = vpop.xlane.xlu0 %2899  ;;  %2291 = vadd.xlane.f32.xlu1 %v17258_v40  ;;  %v1901_v41 = vadd.f32 %v1885_v60, %v1243_v51  ;;  %v3136_v43 = vmul.f32 %v11254_v25, %v17259_v55  ;;  %v14614_v24 = vpop.eup %11255  ;;  %v17267_v40 = vld [vmem:[#allocation134_spill] sm:$0xff] }
 0xe5d   : > { %11267 = vrcp.f32 %v2900_v36  ;;  %v4742_v18 = vpop.xlane.xlu1 %4741  ;;  %v17266_v36 = vld [vmem:[#allocation25_spill] sm:$0xff] }
 0xe5e   : > { %11269 = vrcp.f32 %v4742_v18  ;;  %v3152_v28 = vadd.f32 %v3136_v43, %v14573_v8  ;;  %v17262_v8 = vmov 0.0  }
 0xe5f   : > { %v11258_v37 = vpop.eup %11257  ;;  %5367 = vadd.xlane.f32.xlu0 %v14498_v30 }
 0xe60   : > { %v14618_v54 = vpop.eup %11259  ;;  %v3526_v59 = vpop.xlane.xlu0 %3525  ;;  %4759 = vadd.xlane.f32.xlu1 %v14301_v49  ;;  %v3714_v48 = vmul.f32 %v11258_v37, %v17260_v50  ;;  %v17263_v49 = vld [vmem:[#allocation71_spill] sm:$0xff]  ;;  %v17269_v50 = vld [vmem:[#allocation161_spill] sm:$0xff] }
 0xe61   : > { %v11262_v6 = vpop.eup %11261  ;;  %11271 = vrcp.f32 %v3526_v59  ;;  %9584 = vmatprep.mubr.f32.mxu1 %v14618_v54  ;;  %v1634_v16 = vpop.xlane.xlu1 %1633 }
 0xe62   : > { %11273 = vrcp.f32 %v1634_v16  ;;  %9585 = vmatmul.mubr.f32.gmra.mrb[158].mxu1 %v14614_v24  ;;  %v4355_v3 = vmul.f32 %v11262_v6, %v17261_v52  ;;  %v3730_v30 = vadd.f32 %v3714_v48, %v3152_v28  ;;  %v17270_v6 = vld [vmem:[#allocation87_spill] sm:$0xff] }
 0xe63   : > { %v11264_v42 = vpop.eup %11263  ;;  %5365 = vadd.xlane.f32.xlu0 %v14501_v35  ;;  %6046 = vmatprep.mubr.f32.mxu1 %v17262_v8 }
 0xe64   : > { %v11266_v51 = vpop.eup %11265  ;;  %v1244_v32 = vmul.f32 %v11264_v42, %v17263_v49  ;;  %v1058_v0 = vpop.xlane.xlu0 %1057  ;;  %1651 = vadd.xlane.f32.xlu1 %v17264_v62  ;;  %v4371_v7 = vadd.f32 %v4355_v3, %v14585_v45 }
 0xe65   : > { %v2511_v44 = vmul.f32 %v11266_v51, %v17265_v26  ;;  %11275 = vrcp.f32 %v1058_v0  ;;  %v4102_v47 = vpop.xlane.xlu1 %4101 }
 0xe66   : > { %11277 = vrcp.f32 %v4102_v47 }
 0xe67   : > { %v11268_v60 = vpop.eup %11267  ;;  %5371 = vadd.xlane.f32.xlu0 %v14512_v57  ;;  %v2527_v5 = vadd.f32 %v2511_v44, %v1901_v41  ;;  %v17268_v41 = vld [vmem:[#allocation108_spill] sm:$0xff] }
 0xe68   : > { %v11270_v35 = vpop.eup %11269  ;;  %v2902_v25 = vpop.xlane.xlu0 %2901  ;;  %4119 = vadd.xlane.f32.xlu1 %v17266_v36  ;;  %v3137_v18 = vmul.f32 %v11268_v60, %v17267_v40 }
 0xe69   : > { %11279 = vrcp.f32 %v2902_v25  ;;  %v2276_v55 = vpop.xlane.xlu1 %2275  ;;  %v4981_v43 = vmul.f32 %v11270_v35, %v14335_v56  ;;  %v17273_v35 = vld [vmem:[#allocation64_spill] sm:$0xff]  ;;  %v17275_v25 = vld [vmem:[#allocation42_spill] sm:$0xff] }
 0xe6a   : > { %11281 = vrcp.f32 %v2276_v55  ;;  %v3153_v45 = vadd.f32 %v3137_v18, %v2527_v5 }
 0xe6b   : > { %v11272_v37 = vpop.eup %11271  ;;  %5369 = vadd.xlane.f32.xlu0 %v14517_v4  ;;  %v14636_v28 = vadd.f32 %v4981_v43, %v4371_v7  ;;  %v17271_v4 = vld [vmem:[#allocation70_spill] sm:$0xff] }
 0xe6c   : > { %v11274_v59 = vpop.eup %11273  ;;  %v3528_v57 = vpop.xlane.xlu0 %3527  ;;  %2293 = vadd.xlane.f32.xlu1 %v17268_v41  ;;  %v3715_v48 = vmul.f32 %v11272_v37, %v17269_v50  ;;  %v17272_v7 = vld [vmem:[#allocation178_spill] sm:$0xff] }
 0xe6d   : > { %v1886_v16 = vmul.f32 %v11274_v59, %v17270_v6  ;;  %11283 = vrcp.f32 %v3528_v57  ;;  %v4744_v52 = vpop.xlane.xlu1 %4743  ;;  %v17278_v6 = vld [vmem:[#allocation109_spill] sm:$0xff] }
 0xe6e   : > { %11285 = vrcp.f32 %v4744_v52  ;;  %v3731_v3 = vadd.f32 %v3715_v48, %v3153_v45  ;;  %v17276_v45 = vld [vmem:[#allocation12_spill] sm:$0xff] }
 0xe6f   : > { %v11276_v56 = vpop.eup %11275  ;;  %5375 = vadd.xlane.f32.xlu0 %v14530_v63  ;;  %v1902_v42 = vadd.f32 %v1886_v16, %v1244_v32  ;;  %v17274_v63 = vld [vmem:[#allocation137_spill] sm:$0xff]  ;;  %v17279_v16 = vld [vmem:[#allocation86_spill] sm:$0xff] }
 0xe70   : > { %v11278_v51 = vpop.eup %11277  ;;  %v1245_v49 = vmul.f32 %v11276_v56, %v17271_v4  ;;  %v1060_v0 = vpop.xlane.xlu0 %1059  ;;  %4761 = vadd.xlane.f32.xlu1 %v14303_v33  ;;  %v17280_v4 = vld [vmem:[#allocation177_spill] sm:$0xff] }
 0xe71   : > { %v1636_v62 = vpop.xlane.xlu1 %1635  ;;  %v4356_v26 = vmul.f32 %v11278_v51, %v17272_v7 }
 0xe72   : > { %11287 = vrcp.f32 %v1636_v62 }
 0xe73   : > { %v11280_v44 = vpop.eup %11279  ;;  %5373 = vadd.xlane.f32.xlu0 %v14533_v46  ;;  %v4372_v47 = vadd.f32 %v4356_v26, %v3730_v30  ;;  %v17277_v46 = vld [vmem:[#allocation164_spill] sm:$0xff] }
 0xe74   : > { %v11282_v60 = vpop.eup %11281  ;;  %v2904_v5 = vpop.xlane.xlu0 %2903  ;;  %1653 = vadd.xlane.f32.xlu1 %v17273_v35  ;;  %v3138_v32 = vmul.f32 %v11280_v44, %v17274_v63 }
 0xe75   : > { %v2512_v36 = vmul.f32 %v11282_v60, %v17275_v25  ;;  %v4104_v40 = vpop.xlane.xlu1 %4103  ;;  %v17281_v60 = vld [vmem:[#allocation65_spill] sm:$0xff] }
 0xe76   : > { %11289 = vrcp.f32 %v4104_v40 }
 0xe77   : > { %v11284_v18 = vpop.eup %11283  ;;  %5379 = vadd.xlane.f32.xlu0 %v14558_v9  ;;  %v2528_v33 = vadd.f32 %v2512_v36, %v1902_v42  ;;  %11291 = vrcp.f32 %v2904_v5  ;;  %v17282_v5 = vld [vmem:[#allocation41_spill] sm:$0xff]  ;;  %v17284_v36 = vld [vmem:[#allocation31_spill] sm:$0xff] }
 0xe78   : > { %v11286_v55 = vpop.eup %11285  ;;  %v3530_v43 = vpop.xlane.xlu0 %3529  ;;  %4121 = vadd.xlane.f32.xlu1 %v17276_v45  ;;  %v3716_v30 = vmul.f32 %v11284_v18, %v17277_v46  ;;  %v17285_v18 = vld [vmem:[#allocation163_spill] sm:$0xff] }
 0xe79   : > { %v2278_v37 = vpop.xlane.xlu1 %2277  ;;  %v4982_v59 = vmul.f32 %v11286_v55, %v14341_v23  ;;  %v3154_v57 = vadd.f32 %v3138_v32, %v2528_v33 }
 0xe7a   : > { %11293 = vrcp.f32 %v2278_v37  ;;  %v17287_v37 = vld [vmem:[#allocation73_spill] sm:$0xff] }
 0xe7b   : > { %5377 = vadd.xlane.f32.xlu0 %v14554_v19  ;;  %v14654_v41 = vadd.f32 %v4982_v59, %v4372_v47  ;;  %v3732_v50 = vadd.f32 %v3716_v30, %v3154_v57  ;;  %11295 = vrcp.f32 %v3530_v43  ;;  %v17286_v30 = vld [vmem:[#allocation110_spill] sm:$0xff]  ;;  %v17288_v57 = vld [vmem:[#allocation89_spill] sm:$0xff] }
 0xe7c   : > { %v11288_v48 = vpop.eup %11287  ;;  %v1062_v9 = vpop.xlane.xlu0 %1061  ;;  %2295 = vadd.xlane.f32.xlu1 %v17278_v6 }
 0xe7d   : > { %v1887_v52 = vmul.f32 %v11288_v48, %v17279_v16  ;;  %v4746_v56 = vpop.xlane.xlu1 %4745 }
 0xe7e   : > { %11297 = vrcp.f32 %v4746_v56  ;;  %v17289_v56 = vld [vmem:[#allocation180_spill] sm:$0xff] }
 0xe7f   : > { %5383 = vadd.xlane.f32.xlu0 %v14575_v13  ;;  %v1903_v42 = vadd.f32 %v1887_v52, %v1245_v49  ;;  %11299 = vrcp.f32 %v1060_v0  ;;  %v17283_v0 = vld [vmem:[#allocation136_spill] sm:$0xff] }
 0xe80   : > { %v11290_v23 = vpop.eup %11289  ;;  %v2906_v51 = vpop.xlane.xlu0 %2905  ;;  %4763 = vadd.xlane.f32.xlu1 %v14307_v58 }
 0xe81   : > { %v1638_v19 = vpop.xlane.xlu1 %1637  ;;  %v4357_v62 = vmul.f32 %v11290_v23, %v17280_v4  ;;  %v11292_v7 = vpop.eup %11291 }
 0xe82   : > { %11301 = vrcp.f32 %v1638_v19  ;;  %v3139_v63 = vmul.f32 %v11292_v7, %v17283_v0 }
 0xe83   : > { %5381 = vadd.xlane.f32.xlu0 %v14569_v2  ;;  %v4373_v26 = vadd.f32 %v4357_v62, %v3731_v3  ;;  %v17290_v62 = vld [vmem:[#allocation13_spill] sm:$0xff] }
 0xe84   : > { %v11294_v44 = vpop.eup %11293  ;;  %v3532_v47 = vpop.xlane.xlu0 %3531  ;;  %1655 = vadd.xlane.f32.xlu1 %v17281_v60 }
 0xe85   : > { %v2513_v13 = vmul.f32 %v11294_v44, %v17282_v5  ;;  %v4106_v49 = vpop.xlane.xlu1 %4105  ;;  %v11296_v35 = vpop.eup %11295  ;;  %v17292_v44 = vld [vmem:[#allocation139_spill] sm:$0xff] }
 0xe86   : > { %11303 = vrcp.f32 %v4106_v49  ;;  %v3717_v33 = vmul.f32 %v11296_v35, %v17285_v18  ;;  %v17294_v35 = vld [vmem:[#allocation166_spill] sm:$0xff]  ;;  %v17297_v18 = vld [vmem:[#allocation88_spill] sm:$0xff] }
 0xe87   : > { %5387 = vadd.xlane.f32.xlu0 %v14587_v21  ;;  %v2529_v58 = vadd.f32 %v2513_v13, %v1903_v42  ;;  %11305 = vrcp.f32 %v2906_v51  ;;  %v17293_v13 = vld [vmem:[#allocation158_spill] sm:$0xff] }
 0xe88   : > { %v11298_v32 = vpop.eup %11297  ;;  %v14666_v25 = vpop.xlane.xlu0 %1063  ;;  %4123 = vadd.xlane.f32.xlu1 %v17284_v36 }
 0xe89   : > { %v2280_v2 = vpop.xlane.xlu1 %2279  ;;  %v4983_v3 = vmul.f32 %v11298_v32, %v14339_v39  ;;  %v3155_v40 = vadd.f32 %v3139_v63, %v2529_v58  ;;  %v11300_v55 = vpop.eup %11299 }
 0xe8a   : > { %11307 = vrcp.f32 %v2280_v2  ;;  %v1246_v59 = vmul.f32 %v11300_v55, %v17287_v37  ;;  %v17295_v2 = vld [vmem:[#allocation16_spill] sm:$0xff] }
 0xe8b   : > { %5385 = vadd.xlane.f32.xlu0 %v14590_v29  ;;  %v14672_v21 = vadd.f32 %v4983_v3, %v4373_v26  ;;  %v3733_v43 = vadd.f32 %v3717_v33, %v3155_v40  ;;  %11309 = vrcp.f32 %v3532_v47  ;;  %v17296_v3 = vld [vmem:[#allocation72_spill] sm:$0xff] }
 0xe8c   : > { %v11302_v45 = vpop.eup %11301  ;;  %v2908_v46 = vpop.xlane.xlu0 %2907  ;;  %2297 = vadd.xlane.f32.xlu1 %v17286_v30  ;;  %v17298_v30 = vld [vmem:[#allocation179_spill] sm:$0xff] }
 0xe8d   : > { %v1888_v48 = vmul.f32 %v11302_v45, %v17288_v57  ;;  %v4748_v39 = vpop.xlane.xlu1 %4747 }
 0xe8e   : > { %11311 = vrcp.f32 %v4748_v39 }
 0xe8f   : > { %5391 = vadd.xlane.f32.xlu0 %v14602_v1  ;;  %v1904_v6 = vadd.f32 %v1888_v48, %v1246_v59  ;;  %11313 = vrcp.f32 %v1062_v9  ;;  %v17291_v1 = vld [vmem:[#allocation111_spill] sm:$0xff] }
 0xe90   : > { %v11304_v16 = vpop.eup %11303  ;;  %v3534_v29 = vpop.xlane.xlu0 %3533  ;;  %4765 = vadd.xlane.f32.xlu1 %v14309_v61 }
 0xe91   : > { %v1640_v52 = vpop.xlane.xlu1 %1639  ;;  %v4358_v42 = vmul.f32 %v11304_v16, %v17289_v56  ;;  %v11306_v23 = vpop.eup %11305  ;;  %v17300_v56 = vld [vmem:[#allocation138_spill] sm:$0xff] }
 0xe92   : > { %11315 = vrcp.f32 %v1640_v52  ;;  %v3140_v47 = vmul.f32 %v11306_v23, %v17292_v44  ;;  %v17302_v44 = vld [vmem:[#allocation75_spill] sm:$0xff] }
 0xe93   : > { %5389 = vadd.xlane.f32.xlu0 %v14605_v14  ;;  %v4374_v51 = vadd.f32 %v4358_v42, %v3732_v50 }
 0xe94   : > { %v11308_v19 = vpop.eup %11307  ;;  %v14681_v4 = vpop.xlane.xlu0 %1065  ;;  %4125 = vadd.xlane.f32.xlu1 %v17290_v62  ;;  %v17301_v62 = vld [vmem:[#allocation165_spill] sm:$0xff] }
 0xe95   : > { %v2514_v7 = vmul.f32 %v11308_v19, %v17291_v1  ;;  %v4108_v26 = vpop.xlane.xlu1 %4107  ;;  %v11310_v9 = vpop.eup %11309 }
 0xe96   : > { %11317 = vrcp.f32 %v4108_v26  ;;  %v3718_v58 = vmul.f32 %v11310_v9, %v17294_v35  ;;  %v17304_v35 = vld [vmem:[#allocation182_spill] sm:$0xff] }
 0xe97   : > { %4767 = vadd.xlane.f32.xlu0 %v14312_v17  ;;  %v2530_v61 = vadd.f32 %v2514_v7, %v1904_v6  ;;  %11319 = vrcp.f32 %v2908_v46  ;;  %v17299_v6 = vld [vmem:[#allocation43_spill] sm:$0xff] }
 0xe98   : > { %v11312_v60 = vpop.eup %11311  ;;  %v2910_v5 = vpop.xlane.xlu0 %2909  ;;  %3549 = vadd.xlane.f32.xlu1 %v17293_v13 }
 0xe99   : > { %v2282_v14 = vpop.xlane.xlu1 %2281  ;;  %v4984_v50 = vmul.f32 %v11312_v60, %v14345_v20  ;;  %v3156_v49 = vadd.f32 %v3140_v47, %v2530_v61  ;;  %v11314_v0 = vpop.eup %11313  ;;  %v17303_v60 = vld [vmem:[#allocation91_spill] sm:$0xff] }
 0xe9a   : > { %11321 = vrcp.f32 %v2282_v14  ;;  %v1247_v40 = vmul.f32 %v11314_v0, %v17296_v3  ;;  %v17305_v3 = vld [vmem:[#allocation113_spill] sm:$0xff] }
 0xe9b   : > { %5393 = vadd.xlane.f32.xlu0 %v14618_v54  ;;  %v14691_v63 = vadd.f32 %v4984_v50, %v4374_v51  ;;  %v3734_v17 = vadd.f32 %v3718_v58, %v3156_v49  ;;  %11323 = vrcp.f32 %v3534_v29 }
 0xe9c   : > { %v11316_v32 = vpop.eup %11315  ;;  %v3536_v36 = vpop.xlane.xlu0 %3535  ;;  %4127 = vadd.xlane.f32.xlu1 %v17295_v2 }
 0xe9d   : > { %v1889_v33 = vmul.f32 %v11316_v32, %v17297_v18  ;;  %v4750_v20 = vpop.xlane.xlu1 %4749 }
 0xe9e   : > { %11325 = vrcp.f32 %v4750_v20 }
 0xe9f   : > { %5395 = vadd.xlane.f32.xlu0 %v14614_v24  ;;  %v1905_v55 = vadd.f32 %v1889_v33, %v1247_v40  ;;  %11327 = vrcp.f32 %v14666_v25 }
 0xea0   : > { %v11318_v45 = vpop.eup %11317  ;;  %v14698_v54 = vpop.xlane.xlu0 %1067  ;;  %4769 = vadd.xlane.f32.xlu1 %v14316_v34 }
 0xea1   : > { %v1642_v46 = vpop.xlane.xlu1 %1641  ;;  %v4359_v37 = vmul.f32 %v11318_v45, %v17298_v30  ;;  %v11320_v59 = vpop.eup %11319 }
 0xea2   : > { %11329 = vrcp.f32 %v1642_v46  ;;  %v3141_v25 = vmul.f32 %v11320_v59, %v17300_v56 }
 0xea3   : > { %v4375_v57 = vadd.f32 %v4359_v37, %v3733_v43 }
 0xea4   : > { %v11322_v48 = vpop.eup %11321  ;;  %v2912_v39 = vpop.xlane.xlu0 %2911 }
 0xea5   : > { %v2515_v16 = vmul.f32 %v11322_v48, %v17299_v6  ;;  %v4110_v29 = vpop.xlane.xlu1 %4109  ;;  %v11324_v24 = vpop.eup %11323 }
 0xea6   : > { %11331 = vrcp.f32 %v4110_v29  ;;  %v3719_v1 = vmul.f32 %v11324_v24, %v17301_v62  ;;  %v17310_v62 = vld [vmem:[#allocation181_spill] sm:$0xff] }
 0xea7   : > { %v2531_v52 = vadd.f32 %v2515_v16, %v1905_v55  ;;  %11333 = vrcp.f32 %v2910_v5  ;;  %v17306_v55 = vld [vmem:[#allocation141_spill] sm:$0xff] }
 0xea8   : > { %v11326_v42 = vpop.eup %11325  ;;  %v3538_v23 = vpop.xlane.xlu0 %3537 }
 0xea9   : > { %v2284_v34 = vpop.xlane.xlu1 %2283  ;;  %v4985_v51 = vmul.f32 %v11326_v42, %v14343_v38  ;;  %v3157_v19 = vadd.f32 %v3141_v25, %v2531_v52  ;;  %v11328_v43 = vpop.eup %11327  ;;  %v17308_v52 = vld [vmem:[#allocation74_spill] sm:$0xff] }
 0xeaa   : > { %11335 = vrcp.f32 %v2284_v34  ;;  %v1248_v47 = vmul.f32 %v11328_v43, %v17302_v44  ;;  %v17309_v25 = vld [vmem:[#allocation90_spill] sm:$0xff] }
 0xeab   : > { %v14706_v7 = vadd.f32 %v4985_v51, %v4375_v57  ;;  %v3735_v26 = vadd.f32 %v3719_v1, %v3157_v19  ;;  %11337 = vrcp.f32 %v3536_v36  ;;  %v17307_v57 = vld [vmem:[#allocation168_spill] sm:$0xff] }
 0xeac   : > { %v11330_v9 = vpop.eup %11329  ;;  %v14708_v61 = vpop.xlane.xlu0 %1069 }
 0xead   : > { %v1890_v13 = vmul.f32 %v11330_v9, %v17303_v60  ;;  %v4752_v5 = vpop.xlane.xlu1 %4751 }
 0xeae   : > { %11339 = vrcp.f32 %v4752_v5 }
 0xeaf   : > { %v1906_v14 = vadd.f32 %v1890_v13, %v1248_v47  ;;  %11341 = vrcp.f32 %v14681_v4  ;;  %v17311_v47 = vld [vmem:[#allocation112_spill] sm:$0xff] }
 0xeb0   : > { %v11332_v38 = vpop.eup %11331  ;;  %v2914_v50 = vpop.xlane.xlu0 %2913 }
 0xeb1   : > { %v1644_v49 = vpop.xlane.xlu1 %1643  ;;  %v4360_v58 = vmul.f32 %v11332_v38, %v17304_v35  ;;  %v11334_v0 = vpop.eup %11333  ;;  %v17312_v38 = vld [vmem:[#allocation140_spill] sm:$0xff] }
 0xeb2   : > { %11343 = vrcp.f32 %v1644_v49  ;;  %v3142_v45 = vmul.f32 %v11334_v0, %v17306_v55  ;;  %v17314_v55 = vld [vmem:[#allocation77_spill] sm:$0xff] }
 0xeb3   : > { %v4376_v32 = vadd.f32 %v4360_v58, %v3734_v17 }
 0xeb4   : > { %v11336_v36 = vpop.eup %11335  ;;  %v3540_v2 = vpop.xlane.xlu0 %3539 }
 0xeb5   : > { %v2516_v40 = vmul.f32 %v11336_v36, %v17305_v3  ;;  %v4112_v18 = vpop.xlane.xlu1 %4111  ;;  %v11338_v33 = vpop.eup %11337 }
 0xeb6   : > { %11345 = vrcp.f32 %v4112_v18  ;;  %v3720_v17 = vmul.f32 %v11338_v33, %v17307_v57 }
 0xeb7   : > { %v2532_v20 = vadd.f32 %v2516_v40, %v1906_v14  ;;  %11347 = vrcp.f32 %v2912_v39 }
 0xeb8   : > { %v11340_v46 = vpop.eup %11339  ;;  %v14716_v30 = vpop.xlane.xlu0 %1071 }
 0xeb9   : > { %v2286_v4 = vpop.xlane.xlu1 %2285  ;;  %v4986_v37 = vmul.f32 %v11340_v46, %v14349_v11  ;;  %v3158_v59 = vadd.f32 %v3142_v45, %v2532_v20  ;;  %v11342_v48 = vpop.eup %11341  ;;  %v17315_v46 = vld [vmem:[#allocation93_spill] sm:$0xff] }
 0xeba   : > { %11349 = vrcp.f32 %v2286_v4  ;;  %v1249_v56 = vmul.f32 %v11342_v48, %v17308_v52 }
 0xebb   : > { %v14720_v6 = vadd.f32 %v4986_v37, %v4376_v32  ;;  %v3736_v16 = vadd.f32 %v3720_v17, %v3158_v59  ;;  %11351 = vrcp.f32 %v3538_v23  ;;  %v17316_v17 = vld [vmem:[#allocation184_spill] sm:$0xff] }
 0xebc   : > { %v11344_v29 = vpop.eup %11343  ;;  %v2916_v24 = vpop.xlane.xlu0 %2915 }
 0xebd   : > { %v1891_v42 = vmul.f32 %v11344_v29, %v17309_v25  ;;  %v4754_v34 = vpop.xlane.xlu1 %4753  ;;  %v17317_v25 = vld [vmem:[#allocation115_spill] sm:$0xff] }
 0xebe   : > { %11353 = vrcp.f32 %v4754_v34 }
 0xebf   : > { %v1907_v39 = vadd.f32 %v1891_v42, %v1249_v56  ;;  %11355 = vrcp.f32 %v14698_v54 }
 0xec0   : > { %v11346_v51 = vpop.eup %11345  ;;  %v3542_v11 = vpop.xlane.xlu0 %3541 }
 0xec1   : > { %v1646_v19 = vpop.xlane.xlu1 %1645  ;;  %v4361_v1 = vmul.f32 %v11346_v51, %v17310_v62  ;;  %v11348_v43 = vpop.eup %11347 }
 0xec2   : > { %11357 = vrcp.f32 %v1646_v19  ;;  %v3143_v49 = vmul.f32 %v11348_v43, %v17312_v38  ;;  %v17318_v19 = vld [vmem:[#allocation143_spill] sm:$0xff] }
 0xec3   : > { %v4377_v9 = vadd.f32 %v4361_v1, %v3735_v26  ;;  %v17313_v26 = vld [vmem:[#allocation167_spill] sm:$0xff] }
 0xec4   : > { %v11350_v44 = vpop.eup %11349  ;;  %v14726_v23 = vpop.xlane.xlu0 %1073 }
 0xec5   : > { %v2517_v60 = vmul.f32 %v11350_v44, %v17311_v47  ;;  %v4114_v13 = vpop.xlane.xlu1 %4113  ;;  %v11352_v5 = vpop.eup %11351 }
 0xec6   : > { %11359 = vrcp.f32 %v4114_v13  ;;  %v3721_v36 = vmul.f32 %v11352_v5, %v17313_v26 }
 0xec7   : > { %v2533_v14 = vadd.f32 %v2517_v60, %v1907_v39  ;;  %11361 = vrcp.f32 %v2914_v50 }
 0xec8   : > { %v11354_v35 = vpop.eup %11353  ;;  %v14730_v54 = vpop.xlane.xlu0 %2917 }
 0xec9   : > { %v2288_v58 = vpop.xlane.xlu1 %2287  ;;  %v4987_v0 = vmul.f32 %v11354_v35, %v14347_v27  ;;  %v3159_v32 = vadd.f32 %v3143_v49, %v2533_v14  ;;  %v11356_v3 = vpop.eup %11355  ;;  %v17320_v49 = vld [vmem:[#allocation76_spill] sm:$0xff] }
 0xeca   : > { %11363 = vrcp.f32 %v2288_v58  ;;  %v1250_v45 = vmul.f32 %v11356_v3, %v17314_v55  ;;  %v17321_v58 = vld [vmem:[#allocation92_spill] sm:$0xff]  ;;  %v17322_v3 = vld [vmem:[#allocation183_spill] sm:$0xff] }
 0xecb   : > { %v14734_v40 = vadd.f32 %v4987_v0, %v4377_v9  ;;  %v3737_v18 = vadd.f32 %v3721_v36, %v3159_v32  ;;  %11365 = vrcp.f32 %v3540_v2 }
 0xecc   : > { %v11358_v33 = vpop.eup %11357  ;;  %v14736_v20 = vpop.xlane.xlu0 %3543 }
 0xecd   : > { %v1892_v4 = vmul.f32 %v11358_v33, %v17315_v46  ;;  %v4756_v50 = vpop.xlane.xlu1 %4755 }
 0xece   : > { %11367 = vrcp.f32 %v4756_v50 }
 0xecf   : > { %v1908_v37 = vadd.f32 %v1892_v4, %v1250_v45  ;;  %11369 = vrcp.f32 %v14708_v61  ;;  %v17323_v4 = vld [vmem:[#allocation114_spill] sm:$0xff] }
 0xed0   : > { %v11360_v27 = vpop.eup %11359  ;;  %v14741_v59 = vpop.xlane.xlu0 %1075 }
 0xed1   : > { %v1648_v57 = vpop.xlane.xlu1 %1647  ;;  %v4362_v48 = vmul.f32 %v11360_v27, %v17316_v17  ;;  %v11362_v29 = vpop.eup %11361  ;;  %v17324_v17 = vld [vmem:[#allocation142_spill] sm:$0xff] }
 0xed2   : > { %11371 = vrcp.f32 %v1648_v57  ;;  %v3144_v62 = vmul.f32 %v11362_v29, %v17318_v19 }
 0xed3   : > { %v4378_v2 = vadd.f32 %v4362_v48, %v3736_v16  ;;  %v17319_v16 = vld [vmem:[#allocation170_spill] sm:$0xff] }
 0xed4   : > { %v11364_v52 = vpop.eup %11363  ;;  %v14744_v56 = vpop.xlane.xlu0 %2919 }
 0xed5   : > { %v2518_v42 = vmul.f32 %v11364_v52, %v17317_v25  ;;  %v4116_v34 = vpop.xlane.xlu1 %4115  ;;  %v11366_v39 = vpop.eup %11365  ;;  %v17325_v25 = vld [vmem:[#allocation169_spill] sm:$0xff] }
 0xed6   : > { %11373 = vrcp.f32 %v4116_v34  ;;  %v3722_v47 = vmul.f32 %v11366_v39, %v17319_v16 }
 0xed7   : > { %v2534_v51 = vadd.f32 %v2518_v42, %v1908_v37  ;;  %11375 = vrcp.f32 %v2916_v24 }
 0xed8   : > { %v11368_v61 = vpop.eup %11367  ;;  %v14748_v1 = vpop.xlane.xlu0 %3545 }
 0xed9   : > { %v2290_v43 = vpop.xlane.xlu1 %2289  ;;  %v4988_v9 = vmul.f32 %v11368_v61, %v14353_v15  ;;  %v3160_v44 = vadd.f32 %v3144_v62, %v2534_v51  ;;  %v11370_v60 = vpop.eup %11369  ;;  %v17326_v61 = vld [vmem:[#allocation79_spill] sm:$0xff] }
 0xeda   : > { %11377 = vrcp.f32 %v2290_v43  ;;  %v1251_v35 = vmul.f32 %v11370_v60, %v17320_v49 }
 0xedb   : > { %v14752_v13 = vadd.f32 %v4988_v9, %v4378_v2  ;;  %v3738_v5 = vadd.f32 %v3722_v47, %v3160_v44  ;;  %11379 = vrcp.f32 %v3542_v11  ;;  %v17327_v9 = vld [vmem:[#allocation95_spill] sm:$0xff] }
 0xedc   : > { %v11372_v14 = vpop.eup %11371  ;;  %v14754_v38 = vpop.xlane.xlu0 %1077 }
 0xedd   : > { %v1893_v0 = vmul.f32 %v11372_v14, %v17321_v58  ;;  %v4758_v24 = vpop.xlane.xlu1 %4757  ;;  %v17328_v14 = vld [vmem:[#allocation186_spill] sm:$0xff] }
 0xede   : > { %11381 = vrcp.f32 %v4758_v24  ;;  %v17329_v24 = vld [vmem:[#allocation117_spill] sm:$0xff] }
 0xedf   : > { %v1909_v32 = vadd.f32 %v1893_v0, %v1251_v35  ;;  %11383 = vrcp.f32 %v14716_v30 }
 0xee0   : > { %v11374_v15 = vpop.eup %11373  ;;  %v14759_v26 = vpop.xlane.xlu0 %2921 }
 0xee1   : > { %v1650_v36 = vpop.xlane.xlu1 %1649  ;;  %v4363_v33 = vmul.f32 %v11374_v15, %v17322_v3  ;;  %v11376_v55 = vpop.eup %11375 }
 0xee2   : > { %11385 = vrcp.f32 %v1650_v36  ;;  %v3145_v48 = vmul.f32 %v11376_v55, %v17324_v17 }
 0xee3   : > { %v4379_v11 = vadd.f32 %v4363_v33, %v3737_v18  ;;  %v17330_v33 = vld [vmem:[#allocation145_spill] sm:$0xff] }
 0xee4   : > { %v11378_v45 = vpop.eup %11377  ;;  %v14762_v46 = vpop.xlane.xlu0 %3547 }
 0xee5   : > { %v2519_v50 = vmul.f32 %v11378_v45, %v17323_v4  ;;  %v4118_v37 = vpop.xlane.xlu1 %4117  ;;  %v11380_v27 = vpop.eup %11379 }
 0xee6   : > { %11387 = vrcp.f32 %v4118_v37  ;;  %v3723_v42 = vmul.f32 %v11380_v27, %v17325_v25  ;;  %v17331_v27 = vld [vmem:[#allocation172_spill] sm:$0xff] }
 0xee7   : > { %v2535_v57 = vadd.f32 %v2519_v50, %v1909_v32  ;;  %11389 = vrcp.f32 %v14730_v54 }
 0xee8   : > { %v11382_v30 = vpop.eup %11381  ;;  %v14766_v29 = vpop.xlane.xlu0 %2923 }
 0xee9   : > { %v2292_v2 = vpop.xlane.xlu1 %2291  ;;  %v4989_v52 = vmul.f32 %v11382_v30, %v14351_v22  ;;  %v3161_v18 = vadd.f32 %v3145_v48, %v2535_v57  ;;  %v11384_v34 = vpop.eup %11383 }
 0xeea   : > { %11391 = vrcp.f32 %v2292_v2  ;;  %v1252_v43 = vmul.f32 %v11384_v34, %v17326_v61 }
 0xeeb   : > { %v14771_v39 = vadd.f32 %v4989_v52, %v4379_v11  ;;  %v14773_v51 = vadd.f32 %v3723_v42, %v3161_v18  ;;  %11393 = vrcp.f32 %v14736_v20  ;;  %v14788_v52 = vld [vmem:[%s16645_s7 + $0x2] ss:$0 sm:$0xff] }
 0xeec   : > { %v11386_v19 = vpop.eup %11385  ;;  %v5368_v62 = vpop.xlane.xlu0 %5367 }
 0xeed   : > { %v1894_v54 = vmul.f32 %v11386_v19, %v17327_v9  ;;  %v4760_v44 = vpop.xlane.xlu1 %4759 }
 0xeee   : > { %11395 = vrcp.f32 %v4760_v44 }
 0xeef   : > { %11397 = vrcp.f32 %v5368_v62  ;;  %v1910_v22 = vadd.f32 %v1894_v54, %v1252_v43  ;;  %v17332_v62 = vld [vmem:[#allocation78_spill] sm:$0xff] }
 0xef0   : > { %v11388_v16 = vpop.eup %11387  ;;  %11399 = vrcp.f32 %v14726_v23  ;;  %v5366_v47 = vpop.xlane.xlu0 %5365 }
 0xef1   : > { %11401 = vrcp.f32 %v5366_v47  ;;  %v1652_v60 = vpop.xlane.xlu1 %1651  ;;  %v4364_v49 = vmul.f32 %v11388_v16, %v17328_v14  ;;  %v11390_v35 = vpop.eup %11389  ;;  %v11655_v14 = vld [vmem:[%s11796_s15 + $0x8] sm:$0xff] }
 0xef2   : > { %11403 = vrcp.f32 %v1652_v60  ;;  %v3146_v55 = vmul.f32 %v11390_v35, %v17330_v33 }
 0xef3   : > { %v4380_v20 = vadd.f32 %v4364_v49, %v3738_v5 }
 0xef4   : > { %v11392_v58 = vpop.eup %11391  ;;  %v5372_v0 = vpop.xlane.xlu0 %5371 }
 0xef5   : > { %v2520_v32 = vmul.f32 %v11392_v58, %v17329_v24  ;;  %11405 = vrcp.f32 %v5372_v0  ;;  %v4120_v15 = vpop.xlane.xlu1 %4119  ;;  %v11394_v36 = vpop.eup %11393  ;;  %v17334_v0 = vld [vmem:[#allocation185_spill] sm:$0xff] }
 0xef6   : > { %11407 = vrcp.f32 %v4120_v15  ;;  %v3724_v57 = vmul.f32 %v11394_v36, %v17331_v27 }
 0xef7   : > { %v2536_v3 = vadd.f32 %v2520_v32, %v1910_v22  ;;  %v11656_v32 = vld [vmem:[%s11796_s15] sm:$0xff] }
 0xef8   : > { %v11396_v23 = vpop.eup %11395  ;;  %v5370_v11 = vpop.xlane.xlu0 %5369 }
 0xef9   : > { %v11398_v45 = vpop.eup %11397  ;;  %11409 = vrcp.f32 %v5370_v11  ;;  %v9565_v4 = vpop.f32.mrb[144].mxu1  ;;  %v4990_v37 = vmul.f32 %v11396_v23, %v14357_v10  ;;  %v3162_v5 = vadd.f32 %v3146_v55, %v2536_v3 }
 0xefa   : > { %v2294_v50 = vpop.xlane.xlu1 %2293  ;;  %v11400_v17 = vpop.eup %11399  ;;  %v5607_v48 = vmul.f32 %v11398_v45, %v9565_v4  ;;  %v17335_v4 = vld [vmem:[#allocation116_spill] sm:$0xff] }
 0xefb   : > { %11411 = vrcp.f32 %v2294_v50  ;;  %v5511_v30 = vpop.f32.mrb[145].mxu1  ;;  %v11402_v2 = vpop.eup %11401  ;;  %v14790_v18 = vadd.f32 %v4990_v37, %v4380_v20  ;;  %v14792_v25 = vadd.f32 %v3724_v57, %v3162_v5  ;;  %v1253_v61 = vmul.f32 %v11400_v17, %v17332_v62  ;;  %v11657_v17 = vld [vmem:[%s11796_s15 + $0x18] sm:$0xff] }
 0xefc   : > { %11413 = vrcp.f32 %v14744_v56  ;;  %v11404_v10 = vpop.eup %11403  ;;  %v5623_v42 = vadd.f32 %v5607_v48, %v14636_v28  ;;  %v5606_v34 = vmul.f32 %v11402_v2, %v5511_v30  ;;  %v5376_v19 = vpop.xlane.xlu0 %5375  ;;  %v17333_v56 = vld [vmem:[#allocation94_spill] sm:$0xff] }
 0xefd   : > { %11415 = vrcp.f32 %v14748_v1  ;;  %v1895_v43 = vmul.f32 %v11404_v10, %v17333_v56 }
 0xefe   : > { %11417 = vrcp.f32 %v5376_v19  ;;  %v4762_v9 = vpop.xlane.xlu1 %4761  ;;  %v5640_v54 = vadd.f32 %v14788_v52, %v5623_v42  ;;  %v5622_v44 = vadd.f32 %v5606_v34, %v14599_v31  ;;  %v17336_v34 = vld [vmem:[#allocation144_spill] sm:$0xff] }
 0xeff   : > { %11419 = vrcp.f32 %v4762_v9  ;;  %v11406_v22 = vpop.eup %11405  ;;  %v1911_v16 = vadd.f32 %v1895_v43, %v1253_v61 }
 0xf00   : > { %v11408_v1 = vpop.eup %11407  ;;  %11421 = vrcp.f32 %v14741_v59  ;;  %v5639_v28 = vadd.f32 %v14788_v52, %v5622_v44  ;;  %v5374_v47 = vpop.xlane.xlu0 %5373  ;;  %v14803_v49 = vadd.f32 %v11655_v14, %v5640_v54 }
 0xf01   : > { %v9568_v60 = vpop.f32.mrb[146].mxu1  ;;  %11423 = vrcp.f32 %v5374_v47  ;;  %v4365_v31 = vmul.f32 %v11408_v1, %v17334_v0  ;;  %v17339_v0 = vld [vmem:[#allocation97_spill] sm:$0xff] }
 0xf02   : > { %v5609_v35 = vmul.f32 %v11406_v22, %v9568_v60  ;;  %v5521_v20 = vpop.f32.mrb[147].mxu1  ;;  %v1654_v58 = vpop.xlane.xlu1 %1653  ;;  %v5674_v24 = vsel %vm16841_vm0, %v14803_v49, 0.0  ;;  %v14809_v15 = vadd.f32 %v11656_v32, %v5639_v28  ;;  %v17337_v22 = vld [vmem:[#allocation171_spill] sm:$0xff] }
 0xf03   : > { %11425 = vrcp.f32 %v1654_v58  ;;  %v11410_v59 = vpop.eup %11409  ;;  %5675 = vadd.xlane.f32.xlu0 %v5674_v24  ;;  %v4381_v3 = vadd.f32 %v4365_v31, %v14773_v51 }
 0xf04   : > { %v5625_v36 = vadd.f32 %v5609_v35, %v14672_v21  ;;  %v5608_v55 = vmul.f32 %v11410_v59, %v5521_v20  ;;  %v5380_v23 = vpop.xlane.xlu0 %5379  ;;  %v5671_v11 = vsel %vm16841_vm0, %v14809_v15, 0.0  ;;  %v17338_v20 = vld [vmem:[#allocation81_spill] sm:$0xff]  ;;  %v11659_v59 = vld [vmem:[%s11796_s15 + $0x28] sm:$0xff] }
 0xf05   : > { %v11412_v33 = vpop.eup %11411  ;;  %5672 = vadd.xlane.f32.xlu1 %v5671_v11 }
 0xf06   : > { %v11414_v45 = vpop.eup %11413  ;;  %v2521_v50 = vmul.f32 %v11412_v33, %v17335_v4  ;;  %v5642_v37 = vadd.f32 %v14788_v52, %v5625_v36  ;;  %v4122_v5 = vpop.xlane.xlu1 %4121  ;;  %v5624_v21 = vadd.f32 %v5608_v55, %v14654_v41  ;;  %v17340_v4 = vld [vmem:[#allocation188_spill] sm:$0xff] }
 0xf07   : > { %v11416_v27 = vpop.eup %11415  ;;  %11427 = vrcp.f32 %v4122_v5  ;;  %v3147_v19 = vmul.f32 %v11414_v45, %v17336_v34 }
 0xf08   : > { %v11418_v57 = vpop.eup %11417  ;;  %v14819_v51 = vadd.f32 %v11657_v17, %v5642_v37  ;;  %v2537_v48 = vadd.f32 %v2521_v50, %v1911_v16  ;;  %11429 = vrcp.f32 %v14759_v26  ;;  %v5641_v2 = vadd.f32 %v14788_v52, %v5624_v21  ;;  %v9571_v10 = vpop.f32.mrb[148].mxu1  ;;  %v11658_v26 = vld [vmem:[%s11796_s15 + $0x10] sm:$0xff] }
 0xf09   : > { %v11420_v30 = vpop.eup %11419  ;;  %v5378_v42 = vpop.xlane.xlu0 %5377  ;;  %11431 = vrcp.f32 %v14762_v46  ;;  %v5611_v62 = vmul.f32 %v11418_v57, %v9571_v10  ;;  %v3725_v16 = vmul.f32 %v11416_v27, %v17337_v22 }
 0xf0a   : > { %v5531_v41 = vpop.f32.mrb[149].mxu1  ;;  %v2296_v61 = vpop.xlane.xlu1 %2295  ;;  %v5680_v56 = vsel %vm16841_vm0, %v14819_v51, 0.0  ;;  %v4991_v43 = vmul.f32 %v11420_v30, %v14355_v12  ;;  %v14829_v54 = vadd.f32 %v11658_v26, %v5641_v2  ;;  %v3163_v44 = vadd.f32 %v3147_v19, %v2537_v48  ;;  %v17341_v30 = vld [vmem:[#allocation119_spill] sm:$0xff] }
 0xf0b   : > { %v11422_v9 = vpop.eup %11421  ;;  %11433 = vrcp.f32 %v2296_v61  ;;  %5681 = vadd.xlane.f32.xlu0 %v5680_v56  ;;  %v5627_v46 = vadd.f32 %v5611_v62, %v14706_v7  ;;  %v17342_v56 = vld [vmem:[#allocation147_spill] sm:$0xff] }
 0xf0c   : > { %v11424_v1 = vpop.eup %11423  ;;  %11435 = vrcp.f32 %v5380_v23  ;;  %v14833_v28 = vadd.f32 %v4991_v43, %v4381_v3  ;;  %v5677_v14 = vsel %vm16841_vm0, %v14829_v54, 0.0  ;;  %v14837_v35 = vadd.f32 %v3725_v16, %v3163_v44 }
 0xf0d   : > { %v11426_v47 = vpop.eup %11425  ;;  %11437 = vrcp.f32 %v5378_v42  ;;  %v5610_v60 = vmul.f32 %v11424_v1, %v5531_v41  ;;  %v5384_v12 = vpop.xlane.xlu0 %5383  ;;  %v1254_v58 = vmul.f32 %v11422_v9, %v17338_v20  ;;  %v5644_v24 = vadd.f32 %v14788_v52, %v5627_v46  ;;  %5678 = vadd.xlane.f32.xlu1 %v5677_v14  ;;  %v17343_v46 = vld [vmem:[#allocation174_spill] sm:$0xff] }
 0xf0e   : > { %v1896_v31 = vmul.f32 %v11426_v47, %v17339_v0  ;;  %v4764_v32 = vpop.xlane.xlu1 %4763 }
 0xf0f   : > { %v5626_v7 = vadd.f32 %v5610_v60, %v14691_v63  ;;  %11439 = vrcp.f32 %v4764_v32  ;;  %v14844_v36 = vadd.f32 %v11659_v59, %v5644_v24  ;;  %v11660_v63 = vld [vmem:[%s11796_s15 + $0x20] sm:$0xff]  ;;  %v17345_v32 = vld [vmem:[#allocation96_spill] sm:$0xff] }
 0xf10   : > { %v1912_v3 = vadd.f32 %v1896_v31, %v1254_v58  ;;  %11441 = vrcp.f32 %v14754_v38  ;;  %v11661_v58 = vld [vmem:[%s11796_s15 + $0x38] sm:$0xff]  ;;  %v17344_v31 = vld [vmem:[#allocation80_spill] sm:$0xff] }
 0xf11   : > { %v11428_v33 = vpop.eup %11427  ;;  %v5643_v55 = vadd.f32 %v14788_v52, %v5626_v7  ;;  %v5382_v23 = vpop.xlane.xlu0 %5381  ;;  %v5686_v45 = vsel %vm16841_vm0, %v14844_v36, 0.0 }
 0xf12   : > { %v1656_v11 = vpop.xlane.xlu1 %1655  ;;  %v4366_v50 = vmul.f32 %v11428_v33, %v17340_v4  ;;  %v11430_v37 = vpop.eup %11429  ;;  %5687 = vadd.xlane.f32.xlu0 %v5686_v45  ;;  %v11662_v33 = vld [vmem:[%s11796_s15 + $0x30] sm:$0xff] }
 0xf13   : > { %11443 = vrcp.f32 %v1656_v11  ;;  %v14852_v5 = vadd.f32 %v11660_v63, %v5643_v55  ;;  %v11432_v27 = vpop.eup %11431 }
 0xf14   : > { %11445 = vrcp.f32 %v5384_v12  ;;  %v4382_v21 = vadd.f32 %v4366_v50, %v14792_v25  ;;  %v3148_v25 = vmul.f32 %v11430_v37, %v17342_v56  ;;  %v3726_v47 = vmul.f32 %v11432_v27, %v17343_v46 }
 0xf15   : > { %v11434_v38 = vpop.eup %11433  ;;  %11447 = vrcp.f32 %v5382_v23  ;;  %v5388_v57 = vpop.xlane.xlu0 %5387  ;;  %v5683_v17 = vsel %vm16841_vm0, %v14852_v5, 0.0 }
 0xf16   : > { %v11436_v48 = vpop.eup %11435  ;;  %v2522_v2 = vmul.f32 %v11434_v38, %v17341_v30  ;;  %v9574_v10 = vpop.f32.mrb[150].mxu1  ;;  %5684 = vadd.xlane.f32.xlu1 %v5683_v17 }
 0xf17   : > { %v4124_v42 = vpop.xlane.xlu1 %4123  ;;  %v11438_v34 = vpop.eup %11437  ;;  %v5613_v19 = vmul.f32 %v11436_v48, %v9574_v10  ;;  %v17346_v48 = vld [vmem:[#allocation187_spill] sm:$0xff] }
 0xf18   : > { %11449 = vrcp.f32 %v4124_v42  ;;  %v5541_v62 = vpop.f32.mrb[151].mxu1  ;;  %v2538_v61 = vadd.f32 %v2522_v2, %v1912_v3 }
 0xf19   : > { %v5612_v41 = vmul.f32 %v11438_v34, %v5541_v62  ;;  %v11440_v43 = vpop.eup %11439  ;;  %11451 = vrcp.f32 %v14766_v29  ;;  %v5629_v9 = vadd.f32 %v5613_v19, %v14734_v40  ;;  %v5386_v26 = vpop.xlane.xlu0 %5385  ;;  %v11663_v62 = vld [vmem:[%s11796_s15 + $0x48] sm:$0xff] }
 0xf1a   : > { %v4992_v16 = vmul.f32 %v11440_v43, %v14361_v53  ;;  %v3164_v1 = vadd.f32 %v3148_v25, %v2538_v61  ;;  %v11442_v60 = vpop.eup %11441  ;;  %v17347_v61 = vld [vmem:[#allocation118_spill] sm:$0xff] }
 0xf1b   : > { %v5628_v44 = vadd.f32 %v5612_v41, %v14720_v6  ;;  %v2298_v22 = vpop.xlane.xlu1 %2297  ;;  %v5646_v12 = vadd.f32 %v14788_v52, %v5629_v9  ;;  %v1255_v24 = vmul.f32 %v11442_v60, %v17344_v31  ;;  %v11664_v9 = vld [vmem:[%s11796_s15 + $0x40] sm:$0xff]  ;;  %v17349_v31 = vld [vmem:[#allocation48_spill] sm:$0xff] }
 0xf1c   : > { %11453 = vrcp.f32 %v2298_v22  ;;  %v14866_v14 = vadd.f32 %v4992_v16, %v4382_v21  ;;  %v14868_v40 = vadd.f32 %v3726_v47, %v3164_v1  ;;  %v17348_v60 = vld [vmem:[#allocation146_spill] sm:$0xff] }
 0xf1d   : > { %11455 = vrcp.f32 %v5388_v57  ;;  %v5645_v29 = vadd.f32 %v14788_v52, %v5628_v44  ;;  %v11444_v20 = vpop.eup %11443  ;;  %v5392_v6 = vpop.xlane.xlu0 %5391  ;;  %v14871_v53 = vadd.f32 %v11661_v58, %v5646_v12 }
 0xf1e   : > { %11457 = vrcp.f32 %v5386_v26  ;;  %v11446_v0 = vpop.eup %11445  ;;  %v1897_v7 = vmul.f32 %v11444_v20, %v17345_v32  ;;  %v9577_v59 = vpop.f32.mrb[152].mxu1 }
 0xf1f   : > { %v4766_v3 = vpop.xlane.xlu1 %4765  ;;  %v14876_v55 = vadd.f32 %v11662_v33, %v5645_v29  ;;  %v11448_v23 = vpop.eup %11447  ;;  %v5615_v11 = vmul.f32 %v11446_v0, %v9577_v59  ;;  %v5692_v4 = vsel %vm16841_vm0, %v14871_v53, 0.0 }
 0xf20   : > { %11459 = vrcp.f32 %v4766_v3  ;;  %v5551_v45 = vpop.f32.mrb[153].mxu1  ;;  %5693 = vadd.xlane.f32.xlu0 %v5692_v4  ;;  %v1913_v63 = vadd.f32 %v1897_v7, %v1255_v24 }
 0xf21   : > { %v5614_v50 = vmul.f32 %v11448_v23, %v5551_v45  ;;  %v5689_v37 = vsel %vm16841_vm0, %v14876_v55, 0.0  ;;  %v5631_v21 = vadd.f32 %v5615_v11, %v14771_v39  ;;  %v5390_v38 = vpop.xlane.xlu0 %5389  ;;  %v11665_v11 = vld [vmem:[%s11796_s15 + $0x58] sm:$0xff] }
 0xf22   : > { %v11450_v27 = vpop.eup %11449  ;;  %5690 = vadd.xlane.f32.xlu1 %v5689_v37 }
 0xf23   : > { %v5630_v57 = vadd.f32 %v5614_v50, %v14752_v13  ;;  %v4126_v17 = vpop.xlane.xlu1 %4125  ;;  %v4367_v30 = vmul.f32 %v11450_v27, %v17346_v48  ;;  %v11452_v2 = vpop.eup %11451  ;;  %v5648_v10 = vadd.f32 %v14788_v52, %v5631_v21  ;;  %v11666_v50 = vld [vmem:[%s11796_s15 + $0x50] sm:$0xff] }
 0xf24   : > { %11461 = vrcp.f32 %v4126_v17  ;;  %v3149_v12 = vmul.f32 %v11452_v2, %v17348_v60 }
 0xf25   : > { %11463 = vrcp.f32 %v5392_v6  ;;  %v5647_v42 = vadd.f32 %v14788_v52, %v5630_v57  ;;  %v4383_v34 = vadd.f32 %v4367_v30, %v14837_v35  ;;  %v4768_v39 = vpop.xlane.xlu0 %4767  ;;  %v14889_v41 = vadd.f32 %v11663_v62, %v5648_v10  ;;  %v9580_v25 = vpop.f32.mrb[154].mxu1 }
 0xf26   : > { %v11454_v19 = vpop.eup %11453  ;;  %11465 = vrcp.f32 %v5390_v38  ;;  %v5561_v16 = vpop.f32.mrb[155].mxu1 }
 0xf27   : > { %v11456_v13 = vpop.eup %11455  ;;  %v2523_v56 = vmul.f32 %v11454_v19, %v17347_v61  ;;  %11467 = vrcp.f32 %v4768_v39  ;;  %v3550_v43 = vpop.xlane.xlu1 %3549  ;;  %v14893_v26 = vadd.f32 %v11664_v9, %v5647_v42  ;;  %v5698_v35 = vsel %vm16841_vm0, %v14889_v41, 0.0  ;;  %v17351_v19 = vld [vmem:[#allocation191_spill] sm:$0xff] }
 0xf28   : > { %v11458_v44 = vpop.eup %11457  ;;  %v5617_v22 = vmul.f32 %v11456_v13, %v9580_v25  ;;  %11469 = vrcp.f32 %v3550_v43  ;;  %5699 = vadd.xlane.f32.xlu0 %v5698_v35  ;;  %v17352_v13 = vld [vmem:[#allocation173_spill] sm:$0xff] }
 0xf29   : > { %v5616_v1 = vmul.f32 %v11458_v44, %v5561_v16  ;;  %v5695_v46 = vsel %vm16841_vm0, %v14893_v26, 0.0  ;;  %v2539_v47 = vadd.f32 %v2523_v56, %v1913_v63  ;;  %v5394_v6 = vpop.xlane.xlu0 %5393  ;;  %v17350_v63 = vld [vmem:[#allocation190_spill] sm:$0xff] }
 0xf2a   : > { %v11460_v29 = vpop.eup %11459  ;;  %v5633_v20 = vadd.f32 %v5617_v22, %v14833_v28  ;;  %5696 = vadd.xlane.f32.xlu1 %v5695_v46  ;;  %v11667_v22 = vld [vmem:[%s11796_s15 + $0x68] sm:$0xff]  ;;  %v11668_v46 = vld [vmem:[%s11796_s15 + $0x60] sm:$0xff] }
 0xf2b   : > { %v5632_v58 = vadd.f32 %v5616_v1, %v14790_v18  ;;  %v4128_v0 = vpop.xlane.xlu1 %4127  ;;  %v4993_v24 = vmul.f32 %v11460_v29, %v17349_v31  ;;  %v3165_v32 = vadd.f32 %v3149_v12, %v2539_v47  ;;  %v17354_v31 = vld [vmem:[#allocation24_spill] sm:$0xff] }
 0xf2c   : > { %v5650_v7 = vadd.f32 %v14788_v52, %v5633_v20  ;;  %11471 = vrcp.f32 %v4128_v0 }
 0xf2d   : > { %v5649_v59 = vadd.f32 %v14788_v52, %v5632_v58  ;;  %v5009_v3 = vadd.f32 %v4993_v24, %v4383_v34  ;;  %11473 = vrcp.f32 %v5394_v6  ;;  %v5396_v23 = vpop.xlane.xlu0 %5395  ;;  %v9583_v18 = vpop.f32.mrb[156].mxu1 }
 0xf2e   : > { %v11462_v33 = vpop.eup %11461  ;;  %v14906_v28 = vadd.f32 %v11665_v11, %v5650_v7  ;;  %11475 = vrcp.f32 %v5396_v23  ;;  %v5571_v57 = vpop.f32.mrb[157].mxu1  ;;  %v11669_v23 = vld [vmem:[%s11796_s15 + $0x70] sm:$0xff] }
 0xf2f   : > { %v11464_v45 = vpop.eup %11463  ;;  %v4770_v4 = vpop.xlane.xlu1 %4769  ;;  %v14909_v37 = vadd.f32 %v11666_v50, %v5649_v59  ;;  %v4368_v27 = vmul.f32 %v11462_v33, %v17350_v63 }
 0xf30   : > { %v11466_v21 = vpop.eup %11465  ;;  %v5619_v38 = vmul.f32 %v11464_v45, %v9583_v18  ;;  %11477 = vrcp.f32 %v4770_v4  ;;  %v5704_v17 = vsel %vm16841_vm0, %v14906_v28, 0.0  ;;  %v11670_v4 = vld [vmem:[%s11796_s15 + $0x78] sm:$0xff] }
 0xf31   : > { %v11468_v48 = vpop.eup %11467  ;;  %v5618_v30 = vmul.f32 %v11466_v21, %v5571_v57  ;;  %5705 = vadd.xlane.f32.xlu0 %v5704_v17  ;;  %v5701_v2 = vsel %vm16841_vm0, %v14909_v37, 0.0  ;;  %v4384_v10 = vadd.f32 %v4368_v27, %v14868_v40  ;;  %v17353_v40 = vld [vmem:[#allocation189_spill] sm:$0xff]  ;;  %v5915_v27 = vld [vmem:[%s16641_s3 + $0x8] sm:$0xff]  ;;  %v5916_v57 = vld [vmem:[%s16641_s3 + $0x10] sm:$0xff] }
 0xf32   : > { %v11470_v42 = vpop.eup %11469  ;;  %v5635_v34 = vadd.f32 %v5619_v38, %v5009_v3  ;;  %5702 = vadd.xlane.f32.xlu1 %v5701_v2  ;;  %v4994_v39 = vmul.f32 %v11468_v48, %v17351_v19  ;;  %v5917_v21 = vld [vmem:[%s16641_s3 + $0x18] sm:$0xff] }
 0xf33   : > { %v5634_v62 = vadd.f32 %v5618_v30, %v14866_v14  ;;  %v3727_v61 = vmul.f32 %v11470_v42, %v17352_v13  ;;  %v10325_v38 = vpack.c.bf16 %v5917_v21, %v5915_v27 }
 0xf34   : > { %v5652_v56 = vadd.f32 %v14788_v52, %v5635_v34  ;;  %v5010_v25 = vadd.f32 %v4994_v39, %v4384_v10 }
 0xf35   : > { %v5651_v43 = vadd.f32 %v14788_v52, %v5634_v62  ;;  %v3743_v9 = vadd.f32 %v3727_v61, %v3165_v32  ;;  %v9586_v1 = vpop.f32.mrb[158].mxu1  ;;  %10326 = vmatprep.subr.bf16.mxu1 %v10325_v38 }
 0xf36   : > { %v11472_v44 = vpop.eup %11471  ;;  %v14923_v16 = vadd.f32 %v11667_v22, %v5652_v56  ;;  %v5581_v14 = vpop.f32.mrb[159].mxu1 }
 0xf37   : > { %v4369_v35 = vmul.f32 %v11472_v44, %v17353_v40  ;;  %v14927_v47 = vadd.f32 %v11668_v46, %v5651_v43  ;;  %v11474_v60 = vpop.eup %11473 }
 0xf38   : > { %v5710_v12 = vsel %vm16841_vm0, %v14923_v16, 0.0  ;;  %v11476_v29 = vpop.eup %11475  ;;  %v5620_v6 = vmul.f32 %v11474_v60, %v5581_v14 }
 0xf39   : > { %v4385_v20 = vadd.f32 %v4369_v35, %v3743_v9  ;;  %5711 = vadd.xlane.f32.xlu0 %v5710_v12  ;;  %v5707_v58 = vsel %vm16841_vm0, %v14927_v47, 0.0  ;;  %v5621_v59 = vmul.f32 %v11476_v29, %v9586_v1 }
 0xf3a   : > { %v11478_v0 = vpop.eup %11477  ;;  %5708 = vadd.xlane.f32.xlu1 %v5707_v58  ;;  %v5636_v32 = vadd.f32 %v5620_v6, %v5010_v25 }
 0xf3b   : > { %v4995_v24 = vmul.f32 %v11478_v0, %v17354_v31 }
 0xf3c   : > { %v5653_v3 = vadd.f32 %v14788_v52, %v5636_v32 }
 0xf3d   : > { %v5011_v7 = vadd.f32 %v4995_v24, %v4385_v20 }
 0xf3e   : > { %v14936_v11 = vadd.f32 %v11669_v23, %v5653_v3 }
 0xf3f   : > { %v5637_v33 = vadd.f32 %v5621_v59, %v5011_v7 }
 0xf40   : > { %v5713_v18 = vsel %vm16841_vm0, %v14936_v11, 0.0 }
 0xf41   : > { %v5654_v45 = vadd.f32 %v14788_v52, %v5637_v33  ;;  %5714 = vadd.xlane.f32.xlu1 %v5713_v18  ;;  %v5914_v52 = vld [vmem:[%s16641_s3] sm:$0xff]  ;;  %v5919_v18 = vld [vmem:[%s16641_s3 + $0x28] sm:$0xff] }
 0xf42   : > { %v10327_v17 = vpack.c.bf16 %v5916_v57, %v5914_v52 }
 0xf43   : > { %v14942_v50 = vadd.f32 %v11670_v4, %v5654_v45  ;;  %v5921_v4 = vld [vmem:[%s16641_s3 + $0x38] sm:$0xff] }
 0xf44   : > { %10328 = vmatpush1.bf16.msra.mxu1 %v10327_v17  ;;  %v10329_v27 = vpack.c.bf16 %v5921_v4, %v5919_v18 }
 0xf45   : > { %v5716_v63 = vsel %vm16841_vm0, %v14942_v50, 0.0 }
 0xf46   : > { %5717 = vadd.xlane.f32.xlu0 %v5716_v63  ;;  %10330 = vmatprep.subr.bf16.mxu1 %v10329_v27 }
 0xf90   : > { %v5676_v48 = vpop.xlane.xlu0 %5675 }
 0xf91   : > { %v5721_v30 = vmul.f32 0.03125, %v5676_v48 }
 0xf92   : > { %v5673_v2 = vpop.xlane.xlu1 %5672 }
 0xf93   : > { %v14959_v10 = vsub.f32 %v14803_v49, %v5721_v30  ;;  %v5720_v42 = vmul.f32 0.03125, %v5673_v2 }
 0xf95   : > { %v14962_v34 = vsub.f32 %v14809_v15, %v5720_v42  ;;  %v5753_v19 = vmul.f32 %v14959_v10, %v14959_v10 }
 0xf97   : > { %v5771_v62 = vsel %vm16841_vm0, %v5753_v19, 0.0  ;;  %v5752_v13 = vmul.f32 %v14962_v34, %v14962_v34 }
 0xf98   : > { %v5682_v39 = vpop.xlane.xlu0 %5681  ;;  %5772 = vadd.xlane.f32.xlu0 %v5771_v62 }
 0xf99   : > { %v5723_v61 = vmul.f32 0.03125, %v5682_v39  ;;  %v5768_v56 = vsel %vm16841_vm0, %v5752_v13, 0.0 }
 0xf9a   : > { %5769 = vadd.xlane.f32.xlu1 %v5768_v56  ;;  %v5679_v25 = vpop.xlane.xlu1 %5678 }
 0xf9b   : > { %v14971_v49 = vsub.f32 %v14819_v51, %v5723_v61  ;;  %v5722_v15 = vmul.f32 0.03125, %v5679_v25 }
 0xf9d   : > { %v5755_v43 = vmul.f32 %v14971_v49, %v14971_v49  ;;  %v14976_v9 = vsub.f32 %v14829_v54, %v5722_v15 }
 0xf9f   : > { %v5777_v44 = vsel %vm16841_vm0, %v5755_v43, 0.0  ;;  %v5688_v22 = vpop.xlane.xlu0 %5687  ;;  %v5754_v40 = vmul.f32 %v14976_v9, %v14976_v9 }
 0xfa0   : > { %5778 = vadd.xlane.f32.xlu0 %v5777_v44  ;;  %v5725_v35 = vmul.f32 0.03125, %v5688_v22 }
 0xfa1   : > { %v5774_v51 = vsel %vm16841_vm0, %v5754_v40, 0.0 }
 0xfa2   : > { %v14983_v1 = vsub.f32 %v14844_v36, %v5725_v35  ;;  %5775 = vadd.xlane.f32.xlu1 %v5774_v51 }
 0xfa3   : > { %v5685_v46 = vpop.xlane.xlu1 %5684 }
 0xfa4   : > { %v5724_v60 = vmul.f32 0.03125, %v5685_v46  ;;  %v5757_v54 = vmul.f32 %v14983_v1, %v14983_v1 }
 0xfa6   : > { %v14988_v14 = vsub.f32 %v14852_v5, %v5724_v60  ;;  %v5783_v12 = vsel %vm16841_vm0, %v5757_v54, 0.0 }
 0xfa7   : > { %5784 = vadd.xlane.f32.xlu0 %v5783_v12 }
 0xfa8   : > { %v5756_v29 = vmul.f32 %v14988_v14, %v14988_v14 }
 0xfaa   : > { %v5780_v20 = vsel %vm16841_vm0, %v5756_v29, 0.0 }
 0xfab   : > { %5781 = vadd.xlane.f32.xlu1 %v5780_v20 }
 0xfad   : > { %v5694_v36 = vpop.xlane.xlu0 %5693 }
 0xfae   : > { %v5727_v6 = vmul.f32 0.03125, %v5694_v36 }
 0xfaf   : > { %v5691_v58 = vpop.xlane.xlu1 %5690 }
 0xfb0   : > { %v5726_v0 = vmul.f32 0.03125, %v5691_v58  ;;  %v14995_v31 = vsub.f32 %v14871_v53, %v5727_v6 }
 0xfb2   : > { %v14998_v24 = vsub.f32 %v14876_v55, %v5726_v0  ;;  %v5759_v5 = vmul.f32 %v14995_v31, %v14995_v31 }
 0xfb4   : > { %v5758_v32 = vmul.f32 %v14998_v24, %v14998_v24  ;;  %v5789_v7 = vsel %vm16841_vm0, %v5759_v5, 0.0 }
 0xfb5   : > { %v5700_v59 = vpop.xlane.xlu0 %5699  ;;  %5790 = vadd.xlane.f32.xlu0 %v5789_v7 }
 0xfb6   : > { %v5786_v3 = vsel %vm16841_vm0, %v5758_v32, 0.0  ;;  %v5729_v33 = vmul.f32 0.03125, %v5700_v59 }
 0xfb7   : > { %5787 = vadd.xlane.f32.xlu1 %v5786_v3  ;;  %v5697_v23 = vpop.xlane.xlu1 %5696 }
 0xfb8   : > { %v5728_v53 = vmul.f32 0.03125, %v5697_v23  ;;  %v15007_v45 = vsub.f32 %v14889_v41, %v5729_v33  ;;  %v5918_v41 = vld [vmem:[%s16641_s3 + $0x20] sm:$0xff] }
 0xfba   : > { %v15010_v55 = vsub.f32 %v14893_v26, %v5728_v53  ;;  %v5761_v63 = vmul.f32 %v15007_v45, %v15007_v45  ;;  %v5920_v26 = vld [vmem:[%s16641_s3 + $0x30] sm:$0xff] }
 0xfbb   : > { %v10331_v52 = vpack.c.bf16 %v5920_v26, %v5918_v41 }
 0xfbc   : > { %v5760_v21 = vmul.f32 %v15010_v55, %v15010_v55  ;;  %v5795_v38 = vsel %vm16841_vm0, %v5761_v63, 0.0 }
 0xfbd   : > { %5796 = vadd.xlane.f32.xlu0 %v5795_v38  ;;  %10332 = vmatpush1.bf16.msra.mxu1 %v10331_v52  ;;  %v15071_v52 = vld [vmem:[%s16645_s7 + $0x3] ss:$0 sm:$0xff] }
 0xfbe   : > { %v5706_v57 = vpop.xlane.xlu0 %5705  ;;  %v5792_v17 = vsel %vm16841_vm0, %v5760_v21, 0.0 }
 0xfbf   : > { %v5731_v48 = vmul.f32 0.03125, %v5706_v57  ;;  %5793 = vadd.xlane.f32.xlu1 %v5792_v17  ;;  %v5703_v30 = vpop.xlane.xlu1 %5702 }
 0xfc0   : > { %v5730_v2 = vmul.f32 0.03125, %v5703_v30 }
 0xfc1   : > { %v15031_v42 = vsub.f32 %v14906_v28, %v5731_v48  ;;  %v15077_v48 = vld [vmem:[%s16645_s7 + $0x4] ss:$0 sm:$0xff] }
 0xfc2   : > { %v15034_v19 = vsub.f32 %v14909_v37, %v5730_v2 }
 0xfc3   : > { %v5763_v39 = vmul.f32 %v15031_v42, %v15031_v42 }
 0xfc4   : > { %v5762_v62 = vmul.f32 %v15034_v19, %v15034_v19 }
 0xfc5   : > { %v5801_v13 = vsel %vm16841_vm0, %v5763_v39, 0.0 }
 0xfc6   : > { %v5712_v61 = vpop.xlane.xlu0 %5711  ;;  %5802 = vadd.xlane.f32.xlu0 %v5801_v13  ;;  %v5798_v56 = vsel %vm16841_vm0, %v5762_v62, 0.0 }
 0xfc7   : > { %v5733_v25 = vmul.f32 0.03125, %v5712_v61  ;;  %5799 = vadd.xlane.f32.xlu1 %v5798_v56  ;;  %v5709_v15 = vpop.xlane.xlu1 %5708 }
 0xfc8   : > { %v5732_v28 = vmul.f32 0.03125, %v5709_v15 }
 0xfc9   : > { %v15043_v43 = vsub.f32 %v14923_v16, %v5733_v25 }
 0xfca   : > { %v15046_v37 = vsub.f32 %v14927_v47, %v5732_v28 }
 0xfcb   : > { %v5765_v44 = vmul.f32 %v15043_v43, %v15043_v43 }
 0xfcc   : > { %v5764_v22 = vmul.f32 %v15046_v37, %v15046_v37 }
 0xfcd   : > { %v5807_v40 = vsel %vm16841_vm0, %v5765_v44, 0.0 }
 0xfce   : > { %5808 = vadd.xlane.f32.xlu0 %v5807_v40  ;;  %v5804_v35 = vsel %vm16841_vm0, %v5764_v22, 0.0  ;;  %v5715_v51 = vpop.xlane.xlu1 %5714 }
 0xfcf   : > { %5805 = vadd.xlane.f32.xlu1 %v5804_v35  ;;  %v5734_v46 = vmul.f32 0.03125, %v5715_v51 }
 0xfd1   : > { %v15055_v16 = vsub.f32 %v14936_v11, %v5734_v46 }
 0xfd3   : > { %v5718_v60 = vpop.xlane.xlu0 %5717  ;;  %v5766_v54 = vmul.f32 %v15055_v16, %v15055_v16 }
 0xfd4   : > { %v5735_v47 = vmul.f32 0.03125, %v5718_v60 }
 0xfd5   : > { %v5810_v29 = vsel %vm16841_vm0, %v5766_v54, 0.0 }
 0xfd6   : > { %v15060_v12 = vsub.f32 %v14942_v50, %v5735_v47  ;;  %5811 = vadd.xlane.f32.xlu1 %v5810_v29 }
 0xfd8   : > { %v5767_v20 = vmul.f32 %v15060_v12, %v15060_v12 }
 0xfda   : > { %v5813_v36 = vsel %vm16841_vm0, %v5767_v20, 0.0 }
 0xfdb   : > { %5814 = vadd.xlane.f32.xlu0 %v5813_v36 }
0x1025   : > { %v5773_v6 = vpop.xlane.xlu0 %5772 }
0x1026   : > { %v5817_v11 = vmul.f32 0.03125, %v5773_v6 }
0x1027   : > { %v5770_v58 = vpop.xlane.xlu1 %5769 }
0x1028   : > { %v5833_v0 = vadd.f32 1e-05, %v5817_v11  ;;  %v5816_v5 = vmul.f32 0.03125, %v5770_v58 }
0x102a   : > { %11479 = vrsqrt.f32 %v5833_v0  ;;  %v5832_v32 = vadd.f32 1e-05, %v5816_v5 }
0x102c   : > { %11481 = vrsqrt.f32 %v5832_v32 }
0x102d   : > { %v5779_v7 = vpop.xlane.xlu0 %5778 }
0x102e   : > { %v5819_v50 = vmul.f32 0.03125, %v5779_v7 }
0x102f   : > { %v5776_v3 = vpop.xlane.xlu1 %5775 }
0x1030   : > { %v5835_v59 = vadd.f32 1e-05, %v5819_v50  ;;  %v5818_v33 = vmul.f32 0.03125, %v5776_v3 }
0x1032   : > { %11483 = vrsqrt.f32 %v5835_v59  ;;  %v5834_v23 = vadd.f32 1e-05, %v5818_v33 }
0x1034   : > { %v11480_v53 = vpop.eup %11479  ;;  %11485 = vrsqrt.f32 %v5834_v23  ;;  %v5785_v18 = vpop.xlane.xlu0 %5784 }
0x1035   : > { %v5821_v4 = vmul.f32 0.03125, %v5785_v18  ;;  %v5865_v21 = vmul.f32 %v11480_v53, %v14959_v10 }
0x1036   : > { %v11482_v63 = vpop.eup %11481 }
0x1037   : > { %v5864_v27 = vmul.f32 %v11482_v63, %v14962_v34  ;;  %v5837_v41 = vadd.f32 1e-05, %v5821_v4  ;;  %v5882_v10 = vmul.f32 %v15071_v52, %v5865_v21 }
0x1038   : > { %v5782_v26 = vpop.xlane.xlu1 %5781 }
0x1039   : > { %v5820_v38 = vmul.f32 0.03125, %v5782_v26  ;;  %v5881_v57 = vmul.f32 %v15071_v52, %v5864_v27  ;;  %11487 = vrsqrt.f32 %v5837_v41  ;;  %v15087_v39 = vadd.f32 %v15077_v48, %v5882_v10 }
0x103b   : > { %v5836_v17 = vadd.f32 1e-05, %v5820_v38  ;;  %v15080_v34 = vadd.f32 %v15077_v48, %v5881_v57  ;;  %17356 = vst [vmem:[#allocation19_spill] sm:$0xff] %v15087_v39 }
0x103c   : > { %v11484_v30 = vpop.eup %11483 }
0x103d   : > { %17355 = vst [vmem:[#allocation5_spill] sm:$0xff] %v15080_v34  ;;  %11489 = vrsqrt.f32 %v5836_v17  ;;  %8043 = vmatmul.mubr.msk.f32.vlgmr.msra.gmra.mrb[160].mxu1 %vm16841_vm0, %v15080_v34  ;;  %v5867_v13 = vmul.f32 %v11484_v30, %v14971_v49 }
0x103e   : > { %v11486_v2 = vpop.eup %11485  ;;  %6052 = vmatprep.mubr.f32.mxu1 %v17262_v8 }
0x103f   : > { %v5866_v62 = vmul.f32 %v11486_v2, %v14976_v9  ;;  %v5884_v22 = vmul.f32 %v15071_v52, %v5867_v13 }
0x1041   : > { %8044 = vmatmul.mubr.msk.f32.gmra.mrb[162].mxu1 %vm16841_vm0, %v15087_v39  ;;  %v5883_v56 = vmul.f32 %v15071_v52, %v5866_v62  ;;  %v15103_v51 = vadd.f32 %v15077_v48, %v5884_v22 }
0x1042   : > { %v5791_v61 = vpop.xlane.xlu0 %5790  ;;  %6058 = vmatprep.mubr.f32.mxu1 %v17262_v8 }
0x1043   : > { %v5823_v25 = vmul.f32 0.03125, %v5791_v61  ;;  %v15096_v44 = vadd.f32 %v15077_v48, %v5883_v56  ;;  %v11488_v40 = vpop.eup %11487  ;;  %17358 = vst [vmem:[#allocation50_spill] sm:$0xff] %v15103_v51 }
0x1044   : > { %v5788_v15 = vpop.xlane.xlu1 %5787  ;;  %v5869_v60 = vmul.f32 %v11488_v40, %v14983_v1 }
0x1045   : > { %v5822_v28 = vmul.f32 0.03125, %v5788_v15  ;;  %17357 = vst [vmem:[#allocation4_spill] sm:$0xff] %v15096_v44  ;;  %v5839_v9 = vadd.f32 1e-05, %v5823_v25  ;;  %8045 = vmatmul.mubr.msk.f32.gmra.mrb[164].mxu1 %vm16841_vm0, %v15096_v44 }
0x1046   : > { %6064 = vmatprep.mubr.f32.mxu1 %v17262_v8  ;;  %v5886_v11 = vmul.f32 %v15071_v52, %v5869_v60 }
0x1047   : > { %v5838_v35 = vadd.f32 1e-05, %v5822_v28  ;;  %v11490_v49 = vpop.eup %11489  ;;  %11491 = vrsqrt.f32 %v5839_v9 }
0x1048   : > { %v5868_v46 = vmul.f32 %v11490_v49, %v14988_v14  ;;  %v15119_v1 = vadd.f32 %v15077_v48, %v5886_v11 }
0x1049   : > { %11493 = vrsqrt.f32 %v5838_v35  ;;  %8046 = vmatmul.mubr.msk.f32.gmra.mrb[166].mxu1 %vm16841_vm0, %v15103_v51 }
0x104a   : > { %v5797_v47 = vpop.xlane.xlu0 %5796  ;;  %v5885_v54 = vmul.f32 %v15071_v52, %v5868_v46  ;;  %6070 = vmatprep.mubr.f32.mxu1 %v17262_v8  ;;  %17360 = vst [vmem:[#allocation28_spill] sm:$0xff] %v15119_v1 }
0x104b   : > { %v5825_v29 = vmul.f32 0.03125, %v5797_v47 }
0x104c   : > { %v5794_v20 = vpop.xlane.xlu1 %5793  ;;  %v15112_v6 = vadd.f32 %v15077_v48, %v5885_v54 }
0x104d   : > { %v5824_v36 = vmul.f32 0.03125, %v5794_v20  ;;  %v5841_v58 = vadd.f32 1e-05, %v5825_v29 }
0x104e   : > { %17359 = vst [vmem:[#allocation49_spill] sm:$0xff] %v15112_v6  ;;  %8047 = vmatmul.mubr.msk.f32.gmra.mrb[168].mxu1 %vm16841_vm0, %v15112_v6 }
0x104f   : > { %v5840_v14 = vadd.f32 1e-05, %v5824_v36  ;;  %11495 = vrsqrt.f32 %v5841_v58  ;;  %6076 = vmatprep.mubr.f32.mxu1 %v17262_v8 }
0x1051   : > { %11497 = vrsqrt.f32 %v5840_v14  ;;  %v11492_v0 = vpop.eup %11491 }
0x1052   : > { %8048 = vmatmul.mubr.msk.f32.gmra.mrb[170].mxu1 %vm16841_vm0, %v15119_v1  ;;  %v5871_v3 = vmul.f32 %v11492_v0, %v14995_v31 }
0x1053   : > { %v11494_v5 = vpop.eup %11493  ;;  %v5803_v32 = vpop.xlane.xlu0 %5802  ;;  %6082 = vmatprep.mubr.f32.mxu1 %v17262_v8 }
0x1054   : > { %v5827_v7 = vmul.f32 0.03125, %v5803_v32  ;;  %v5800_v50 = vpop.xlane.xlu1 %5799  ;;  %v5870_v59 = vmul.f32 %v11494_v5, %v14998_v24  ;;  %v5888_v63 = vmul.f32 %v15071_v52, %v5871_v3 }
0x1055   : > { %v5826_v33 = vmul.f32 0.03125, %v5800_v50  ;;  %v5924_v50 = vlaneseq }
0x1056   : > { %v5843_v23 = vadd.f32 1e-05, %v5827_v7  ;;  %v5887_v53 = vmul.f32 %v15071_v52, %v5870_v59  ;;  %v15135_v21 = vadd.f32 %v15077_v48, %v5888_v63 }
0x1057   : > { %v5842_v18 = vadd.f32 1e-05, %v5826_v33  ;;  %v15204_v59 = vshrl.u32 %v5924_v50, 7 }
0x1058   : > { %11499 = vrsqrt.f32 %v5843_v23  ;;  %v15128_v4 = vadd.f32 %v15077_v48, %v5887_v53  ;;  %17362 = vst [vmem:[#allocation21_spill] sm:$0xff] %v15135_v21 }
0x1059   : > { %11501 = vrsqrt.f32 %v5842_v18  ;;  %v11496_v27 = vpop.eup %11495  ;;  %17371 = vst [vmem:[#allocation8_spill] sm:$0xff] %v15204_v59  ;;  %v5930_v3 = vsub.s32 1, %v15204_v59 }
0x105a   : > { %17361 = vst [vmem:[#allocation98_spill] sm:$0xff] %v15128_v4  ;;  %8049 = vmatmul.mubr.msk.f32.gmra.mrb[172].mxu1 %vm16841_vm0, %v15128_v4  ;;  %v5873_v57 = vmul.f32 %v11496_v27, %v15007_v45 }
0x105b   : > { %v11498_v41 = vpop.eup %11497  ;;  %v5809_v24 = vpop.xlane.xlu0 %5808  ;;  %6088 = vmatprep.mubr.f32.mxu1 %v17262_v8 }
0x105c   : > { %v5829_v31 = vmul.f32 0.03125, %v5809_v24  ;;  %v5806_v26 = vpop.xlane.xlu1 %5805  ;;  %v5872_v38 = vmul.f32 %v11498_v41, %v15010_v55  ;;  %v5890_v13 = vmul.f32 %v15071_v52, %v5873_v57 }
0x105d   : > { %v5828_v17 = vmul.f32 0.03125, %v5806_v26 }
0x105e   : > { %v5845_v10 = vadd.f32 1e-05, %v5829_v31  ;;  %8050 = vmatmul.mubr.msk.f32.gmra.mrb[174].mxu1 %vm16841_vm0, %v15135_v21  ;;  %v5889_v30 = vmul.f32 %v15071_v52, %v5872_v38  ;;  %v15151_v56 = vadd.f32 %v15077_v48, %v5890_v13 }
0x105f   : > { %v5844_v2 = vadd.f32 1e-05, %v5828_v17  ;;  %6094 = vmatprep.mubr.f32.mxu1 %v17262_v8 }
0x1060   : > { %11503 = vrsqrt.f32 %v5845_v10  ;;  %v15144_v62 = vadd.f32 %v15077_v48, %v5889_v30  ;;  %17364 = vst [vmem:[#allocation27_spill] sm:$0xff] %v15151_v56 }
0x1061   : > { %11505 = vrsqrt.f32 %v5844_v2 }
0x1062   : > { %17363 = vst [vmem:[#allocation32_spill] sm:$0xff] %v15144_v62  ;;  %v11500_v55 = vpop.eup %11499  ;;  %8051 = vmatmul.mubr.msk.f32.gmra.mrb[176].mxu1 %vm16841_vm0, %v15144_v62 }
0x1063   : > { %v11502_v45 = vpop.eup %11501  ;;  %6100 = vmatprep.mubr.f32.mxu1 %v17262_v8  ;;  %v5812_v61 = vpop.xlane.xlu1 %5811  ;;  %v5875_v15 = vmul.f32 %v11500_v55, %v15031_v42 }
0x1064   : > { %v5874_v25 = vmul.f32 %v11502_v45, %v15034_v19  ;;  %v5830_v28 = vmul.f32 0.03125, %v5812_v61 }
0x1065   : > { %v5892_v49 = vmul.f32 %v15071_v52, %v5875_v15 }
0x1066   : > { %8052 = vmatmul.mubr.msk.f32.gmra.mrb[178].mxu1 %vm16841_vm0, %v15151_v56  ;;  %v5891_v22 = vmul.f32 %v15071_v52, %v5874_v25  ;;  %v5846_v40 = vadd.f32 1e-05, %v5830_v28 }
0x1067   : > { %6106 = vmatprep.mubr.f32.mxu1 %v17262_v8  ;;  %v15167_v47 = vadd.f32 %v15077_v48, %v5892_v49 }
0x1068   : > { %v5815_v9 = vpop.xlane.xlu0 %5814  ;;  %v15160_v35 = vadd.f32 %v15077_v48, %v5891_v22  ;;  %11507 = vrsqrt.f32 %v5846_v40 }
0x1069   : > { %v5831_v46 = vmul.f32 0.03125, %v5815_v9  ;;  %17366 = vst [vmem:[#allocation51_spill] sm:$0xff] %v15167_v47 }
0x106a   : > { %17365 = vst [vmem:[#allocation30_spill] sm:$0xff] %v15160_v35  ;;  %v11504_v19 = vpop.eup %11503  ;;  %8053 = vmatmul.mubr.msk.f32.gmra.mrb[180].mxu1 %vm16841_vm0, %v15160_v35 }
0x106b   : > { %v11506_v42 = vpop.eup %11505  ;;  %v5847_v60 = vadd.f32 1e-05, %v5831_v46  ;;  %6112 = vmatprep.mubr.f32.mxu1 %v17262_v8  ;;  %v5877_v29 = vmul.f32 %v11504_v19, %v15043_v43 }
0x106c   : > { %v5876_v54 = vmul.f32 %v11506_v42, %v15046_v37 }
0x106d   : > { %11509 = vrsqrt.f32 %v5847_v60  ;;  %v5894_v11 = vmul.f32 %v15071_v52, %v5877_v29 }
0x106e   : > { %8054 = vmatmul.mubr.msk.f32.gmra.mrb[182].mxu1 %vm16841_vm0, %v15167_v47  ;;  %v5893_v20 = vmul.f32 %v15071_v52, %v5876_v54 }
0x106f   : > { %6118 = vmatprep.mubr.f32.mxu1 %v17262_v8  ;;  %v15183_v43 = vadd.f32 %v15077_v48, %v5894_v11 }
0x1070   : > { %v15176_v36 = vadd.f32 %v15077_v48, %v5893_v20 }
0x1071   : > { %17368 = vst [vmem:[#allocation2_spill] sm:$0xff] %v15183_v43 }
0x1072   : > { %17367 = vst [vmem:[#allocation45_spill] sm:$0xff] %v15176_v36  ;;  %8055 = vmatmul.mubr.msk.f32.gmra.mrb[184].mxu1 %vm16841_vm0, %v15176_v36  ;;  %v11508_v58 = vpop.eup %11507 }
0x1073   : > { %6124 = vmatprep.mubr.f32.mxu1 %v17262_v8  ;;  %v5878_v37 = vmul.f32 %v11508_v58, %v15055_v16 }
0x1075   : > { %v5895_v14 = vmul.f32 %v15071_v52, %v5878_v37 }
0x1076   : > { %8056 = vmatmul.mubr.msk.f32.gmra.mrb[186].mxu1 %vm16841_vm0, %v15183_v43 }
0x1077   : > { %v11510_v0 = vpop.eup %11509  ;;  %6130 = vmatprep.mubr.f32.mxu1 %v17262_v8  ;;  %v15191_v5 = vadd.f32 %v15077_v48, %v5895_v14 }
0x1078   : > { %v5879_v32 = vmul.f32 %v11510_v0, %v15060_v12  ;;  %v5922_v12 = vld [vmem:[%s16645_s7] ss:$8 sm:$0x3] }
0x1079   : > { %17369 = vst [vmem:[#allocation52_spill] sm:$0xff] %v15191_v5  ;;  %v15210_v33 = vrot.slane %v5922_v12, %v5930_v3 }
0x107a   : > { %8057 = vmatmul.mubr.msk.f32.gmra.mrb[188].mxu1 %vm16841_vm0, %v15191_v5  ;;  %v5896_v7 = vmul.f32 %v15071_v52, %v5879_v32 }
0x107b   : > { %6136 = vmatprep.mubr.f32.mxu1 %v17262_v8 }
0x107c   : > { %v15199_v16 = vadd.f32 %v15077_v48, %v5896_v7 }
0x107e   : > { %17370 = vst [vmem:[#allocation99_spill] sm:$0xff] %v15199_v16  ;;  %8058 = vmatmul.mubr.msk.f32.gmra.mrb[190].mxu1 %vm16841_vm0, %v15199_v16 }
0x1110   : > { %v15212_v52 = vpop.f32.mrb[160].mxu1 }
0x1111   : > { %17372 = vst [vmem:[#allocation35_spill] sm:$0xff] %v15212_v52  ;;  %v6050_v8 = vpop.f32.mrb[161].mxu1 }
0x1112   : > { %v15215_v48 = vadd.f32 %v6050_v8, %v15210_v33 }
0x1114   : > { %v15217_v23 = vpop.f32.mrb[162].mxu1  ;;  %v6143_v53 = vsel %vm757_vm1, %v15215_v48, -inf }
0x1115   : > { %17373 = vst [vmem:[#allocation33_spill] sm:$0xff] %v15217_v23  ;;  %v6056_v18 = vpop.f32.mrb[163].mxu1  ;;  %6144 = vmax.xlane.f32.xlu1 %v6143_v53 }
0x1116   : > { %v15222_v63 = vadd.f32 %v6056_v18, %v15210_v33 }
0x1118   : > { %v15224_v27 = vpop.f32.mrb[164].mxu1  ;;  %v6146_v41 = vsel %vm757_vm1, %v15222_v63, -inf }
0x1119   : > { %17374 = vst [vmem:[#allocation53_spill] sm:$0xff] %v15224_v27  ;;  %6147 = vmax.xlane.f32.xlu0 %v6146_v41  ;;  %v6062_v24 = vpop.f32.mrb[165].mxu1 }
0x111a   : > { %v15229_v31 = vadd.f32 %v6062_v24, %v15210_v33 }
0x111c   : > { %v15231_v26 = vpop.f32.mrb[166].mxu1  ;;  %v6149_v38 = vsel %vm757_vm1, %v15229_v31, -inf }
0x111d   : > { %17375 = vst [vmem:[#allocation18_spill] sm:$0xff] %v15231_v26  ;;  %v6068_v57 = vpop.f32.mrb[167].mxu1  ;;  %6150 = vmax.xlane.f32.xlu1 %v6149_v38 }
0x111e   : > { %v15236_v17 = vadd.f32 %v6068_v57, %v15210_v33 }
0x1120   : > { %v6152_v30 = vsel %vm757_vm1, %v15236_v17, -inf }
0x1121   : > { %v15238_v10 = vpop.f32.mrb[168].mxu1  ;;  %6153 = vmax.xlane.f32.xlu0 %v6152_v30 }
0x1122   : > { %17376 = vst [vmem:[#allocation120_spill] sm:$0xff] %v15238_v10  ;;  %v6074_v2 = vpop.f32.mrb[169].mxu1 }
0x1123   : > { %v15243_v13 = vadd.f32 %v6074_v2, %v15210_v33 }
0x1125   : > { %v15245_v55 = vpop.f32.mrb[170].mxu1  ;;  %v6155_v45 = vsel %vm757_vm1, %v15243_v13, -inf }
0x1126   : > { %17377 = vst [vmem:[#allocation100_spill] sm:$0xff] %v15245_v55  ;;  %v6080_v61 = vpop.f32.mrb[171].mxu1  ;;  %6156 = vmax.xlane.f32.xlu1 %v6155_v45 }
0x1127   : > { %v15250_v25 = vadd.f32 %v6080_v61, %v15210_v33 }
0x1129   : > { %v6158_v15 = vsel %vm757_vm1, %v15250_v25, -inf }
0x112a   : > { %6159 = vmax.xlane.f32.xlu0 %v6158_v15 }
0x112d   : > { %v15254_v28 = vpop.f32.mrb[172].mxu1 }
0x112e   : > { %17378 = vst [vmem:[#allocation34_spill] sm:$0xff] %v15254_v28  ;;  %v6086_v22 = vpop.f32.mrb[173].mxu1 }
0x112f   : > { %v15257_v40 = vadd.f32 %v6086_v22, %v15210_v33 }
0x1131   : > { %v15259_v9 = vpop.f32.mrb[174].mxu1  ;;  %v6161_v49 = vsel %vm757_vm1, %v15257_v40, -inf }
0x1132   : > { %17379 = vst [vmem:[#allocation54_spill] sm:$0xff] %v15259_v9  ;;  %v6092_v46 = vpop.f32.mrb[175].mxu1  ;;  %6162 = vmax.xlane.f32.xlu1 %v6161_v49 }
0x1133   : > { %v15264_v19 = vadd.f32 %v6092_v46, %v15210_v33 }
0x1135   : > { %v15266_v42 = vpop.f32.mrb[176].mxu1  ;;  %v6164_v60 = vsel %vm757_vm1, %v15264_v19, -inf }
0x1136   : > { %17380 = vst [vmem:[#allocation46_spill] sm:$0xff] %v15266_v42  ;;  %6165 = vmax.xlane.f32.xlu0 %v6164_v60  ;;  %v6098_v54 = vpop.f32.mrb[177].mxu1 }
0x1137   : > { %v15271_v29 = vadd.f32 %v6098_v54, %v15210_v33 }
0x1139   : > { %v15273_v20 = vpop.f32.mrb[178].mxu1  ;;  %v6167_v11 = vsel %vm757_vm1, %v15271_v29, -inf }
0x113a   : > { %17381 = vst [vmem:[#allocation121_spill] sm:$0xff] %v15273_v20  ;;  %v6104_v58 = vpop.f32.mrb[179].mxu1  ;;  %6168 = vmax.xlane.f32.xlu1 %v6167_v11 }
0x113b   : > { %v15278_v37 = vadd.f32 %v6104_v58, %v15210_v33 }
0x113d   : > { %v15280_v14 = vpop.f32.mrb[180].mxu1  ;;  %v6170_v0 = vsel %vm757_vm1, %v15278_v37, -inf }
0x113e   : > { %17382 = vst [vmem:[#allocation10_spill] sm:$0xff] %v15280_v14  ;;  %6171 = vmax.xlane.f32.xlu0 %v6170_v0  ;;  %v6110_v32 = vpop.f32.mrb[181].mxu1 }
0x113f   : > { %v15285_v7 = vadd.f32 %v6110_v32, %v15210_v33 }
0x1141   : > { %v15287_v3 = vpop.f32.mrb[182].mxu1  ;;  %v6173_v12 = vsel %vm757_vm1, %v15285_v7, -inf }
0x1142   : > { %17383 = vst [vmem:[#allocation148_spill] sm:$0xff] %v15287_v3  ;;  %v6116_v8 = vpop.f32.mrb[183].mxu1  ;;  %6174 = vmax.xlane.f32.xlu1 %v6173_v12 }
0x1143   : > { %v15292_v53 = vadd.f32 %v6116_v8, %v15210_v33 }
0x1145   : > { %v15294_v18 = vpop.f32.mrb[184].mxu1  ;;  %v6176_v41 = vsel %vm757_vm1, %v15292_v53, -inf }
0x1146   : > { %17384 = vst [vmem:[#allocation101_spill] sm:$0xff] %v15294_v18  ;;  %6177 = vmax.xlane.f32.xlu0 %v6176_v41  ;;  %v6122_v24 = vpop.f32.mrb[185].mxu1 }
0x1147   : > { %v15299_v38 = vadd.f32 %v6122_v24, %v15210_v33 }
0x1149   : > { %v15301_v57 = vpop.f32.mrb[186].mxu1  ;;  %v6179_v30 = vsel %vm757_vm1, %v15299_v38, -inf }
0x114a   : > { %17385 = vst [vmem:[#allocation55_spill] sm:$0xff] %v15301_v57  ;;  %v6128_v2 = vpop.f32.mrb[187].mxu1  ;;  %6180 = vmax.xlane.f32.xlu1 %v6179_v30 }
0x114b   : > { %v15306_v45 = vadd.f32 %v6128_v2, %v15210_v33 }
0x114d   : > { %v15308_v61 = vpop.f32.mrb[188].mxu1  ;;  %v6182_v15 = vsel %vm757_vm1, %v15306_v45, -inf }
0x114e   : > { %17386 = vst [vmem:[#allocation122_spill] sm:$0xff] %v15308_v61  ;;  %6183 = vmax.xlane.f32.xlu0 %v6182_v15  ;;  %v6134_v22 = vpop.f32.mrb[189].mxu1 }
0x114f   : > { %v15313_v49 = vadd.f32 %v6134_v22, %v15210_v33 }
0x1151   : > { %v15315_v46 = vpop.f32.mrb[190].mxu1  ;;  %v6185_v60 = vsel %vm757_vm1, %v15313_v49, -inf }
0x1152   : > { %17387 = vst [vmem:[#allocation3_spill] sm:$0xff] %v15315_v46  ;;  %v6140_v54 = vpop.f32.mrb[191].mxu1  ;;  %6186 = vmax.xlane.f32.xlu1 %v6185_v60 }
0x1153   : > { %v15320_v11 = vadd.f32 %v6140_v54, %v15210_v33 }
0x1155   : > { %v6188_v58 = vsel %vm757_vm1, %v15320_v11, -inf }
0x1156   : > { %6189 = vmax.xlane.f32.xlu0 %v6188_v58 }
0x11a2   : > { %v6145_v0 = vpop.xlane.xlu1 %6144 }
0x11a3   : > { %v6191_v32 = vsub.f32 %v15215_v48, %v6145_v0 }
0x11a5   : > { %v6207_v12 = vmul.f32 1.442695, %v6191_v32 }
0x11a6   : > { %v6148_v8 = vpop.xlane.xlu0 %6147 }
0x11a7   : > { %11511 = vpow2.f32 %v6207_v12  ;;  %v6192_v41 = vsub.f32 %v15222_v63, %v6148_v8 }
0x11a9   : > { %v6209_v24 = vmul.f32 1.442695, %v6192_v41 }
0x11aa   : > { %v6151_v30 = vpop.xlane.xlu1 %6150 }
0x11ab   : > { %11513 = vpow2.f32 %v6209_v24  ;;  %v6193_v2 = vsub.f32 %v15229_v31, %v6151_v30 }
0x11ad   : > { %v6211_v15 = vmul.f32 1.442695, %v6193_v2 }
0x11ae   : > { %v6154_v33 = vpop.xlane.xlu0 %6153 }
0x11af   : > { %11515 = vpow2.f32 %v6211_v15  ;;  %v6194_v22 = vsub.f32 %v15236_v17, %v6154_v33 }
0x11b1   : > { %v15328_v60 = vpop.eup %11511  ;;  %v6213_v54 = vmul.f32 1.442695, %v6194_v22 }
0x11b2   : > { %v6239_v48 = vsel %vm757_vm1, %v15328_v60, 0.0 }
0x11b3   : > { %v6157_v58 = vpop.xlane.xlu1 %6156  ;;  %11517 = vpow2.f32 %v6213_v54  ;;  %6240 = vadd.xlane.f32.xlu1 %v6239_v48 }
0x11b4   : > { %v6195_v63 = vsub.f32 %v15243_v13, %v6157_v58 }
0x11b5   : > { %v15333_v0 = vpop.eup %11513 }
0x11b6   : > { %v6215_v32 = vmul.f32 1.442695, %v6195_v63  ;;  %v6242_v12 = vsel %vm757_vm1, %v15333_v0, 0.0 }
0x11b7   : > { %v6160_v31 = vpop.xlane.xlu0 %6159  ;;  %6243 = vadd.xlane.f32.xlu0 %v6242_v12 }
0x11b8   : > { %11519 = vpow2.f32 %v6215_v32  ;;  %v6196_v17 = vsub.f32 %v15250_v25, %v6160_v31 }
0x11b9   : > { %v15338_v8 = vpop.eup %11515 }
0x11ba   : > { %v6217_v41 = vmul.f32 1.442695, %v6196_v17  ;;  %v6245_v24 = vsel %vm757_vm1, %v15338_v8, 0.0 }
0x11bb   : > { %6246 = vadd.xlane.f32.xlu1 %v6245_v24 }
0x11bc   : > { %11521 = vpow2.f32 %v6217_v41 }
0x11bd   : > { %v15342_v13 = vpop.eup %11517 }
0x11be   : > { %v6248_v15 = vsel %vm757_vm1, %v15342_v13, 0.0 }
0x11bf   : > { %v6163_v30 = vpop.xlane.xlu1 %6162  ;;  %6249 = vadd.xlane.f32.xlu0 %v6248_v15 }
0x11c0   : > { %v6197_v2 = vsub.f32 %v15257_v40, %v6163_v30 }
0x11c2   : > { %v6219_v33 = vmul.f32 1.442695, %v6197_v2  ;;  %v15347_v25 = vpop.eup %11519 }
0x11c3   : > { %v6166_v22 = vpop.xlane.xlu0 %6165  ;;  %v6251_v58 = vsel %vm757_vm1, %v15347_v25, 0.0 }
0x11c4   : > { %11523 = vpow2.f32 %v6219_v33  ;;  %v6198_v54 = vsub.f32 %v15264_v19, %v6166_v22  ;;  %6252 = vadd.xlane.f32.xlu1 %v6251_v58 }
0x11c6   : > { %v6221_v48 = vmul.f32 1.442695, %v6198_v54  ;;  %v15352_v63 = vpop.eup %11521 }
0x11c7   : > { %v6169_v32 = vpop.xlane.xlu1 %6168  ;;  %v6254_v31 = vsel %vm757_vm1, %v15352_v63, 0.0 }
0x11c8   : > { %11525 = vpow2.f32 %v6221_v48  ;;  %v6199_v40 = vsub.f32 %v15271_v29, %v6169_v32  ;;  %6255 = vadd.xlane.f32.xlu0 %v6254_v31 }
0x11ca   : > { %v6223_v12 = vmul.f32 1.442695, %v6199_v40 }
0x11cb   : > { %v6172_v17 = vpop.xlane.xlu0 %6171 }
0x11cc   : > { %11527 = vpow2.f32 %v6223_v12  ;;  %v6200_v19 = vsub.f32 %v15278_v37, %v6172_v17 }
0x11ce   : > { %v15358_v41 = vpop.eup %11523  ;;  %v6225_v24 = vmul.f32 1.442695, %v6200_v19 }
0x11cf   : > { %v6175_v30 = vpop.xlane.xlu1 %6174  ;;  %v6257_v2 = vsel %vm757_vm1, %v15358_v41, 0.0 }
0x11d0   : > { %11529 = vpow2.f32 %v6225_v24  ;;  %v6201_v15 = vsub.f32 %v15285_v7, %v6175_v30  ;;  %6258 = vadd.xlane.f32.xlu1 %v6257_v2 }
0x11d2   : > { %v15363_v29 = vpop.eup %11525  ;;  %v6227_v33 = vmul.f32 1.442695, %v6201_v15 }
0x11d3   : > { %v6178_v22 = vpop.xlane.xlu0 %6177  ;;  %v6260_v54 = vsel %vm757_vm1, %v15363_v29, 0.0 }
0x11d4   : > { %11531 = vpow2.f32 %v6227_v33  ;;  %v6202_v37 = vsub.f32 %v15292_v53, %v6178_v22  ;;  %6261 = vadd.xlane.f32.xlu0 %v6260_v54 }
0x11d6   : > { %v15368_v58 = vpop.eup %11527  ;;  %v6229_v48 = vmul.f32 1.442695, %v6202_v37 }
0x11d7   : > { %v6181_v32 = vpop.xlane.xlu1 %6180  ;;  %v6263_v40 = vsel %vm757_vm1, %v15368_v58, 0.0 }
0x11d8   : > { %11533 = vpow2.f32 %v6229_v48  ;;  %v6203_v7 = vsub.f32 %v15299_v38, %v6181_v32  ;;  %6264 = vadd.xlane.f32.xlu1 %v6263_v40 }
0x11da   : > { %v15373_v31 = vpop.eup %11529  ;;  %v6231_v12 = vmul.f32 1.442695, %v6203_v7 }
0x11db   : > { %v6184_v17 = vpop.xlane.xlu0 %6183  ;;  %v6266_v19 = vsel %vm757_vm1, %v15373_v31, 0.0 }
0x11dc   : > { %11535 = vpow2.f32 %v6231_v12  ;;  %v6204_v53 = vsub.f32 %v15306_v45, %v6184_v17  ;;  %6267 = vadd.xlane.f32.xlu0 %v6266_v19 }
0x11de   : > { %v15378_v24 = vpop.eup %11531  ;;  %v6233_v30 = vmul.f32 1.442695, %v6204_v53 }
0x11df   : > { %v6187_v2 = vpop.xlane.xlu1 %6186  ;;  %v6269_v15 = vsel %vm757_vm1, %v15378_v24, 0.0 }
0x11e0   : > { %11537 = vpow2.f32 %v6233_v30  ;;  %v6205_v38 = vsub.f32 %v15313_v49, %v6187_v2  ;;  %6270 = vadd.xlane.f32.xlu1 %v6269_v15 }
0x11e2   : > { %v15383_v33 = vpop.eup %11533  ;;  %v6235_v22 = vmul.f32 1.442695, %v6205_v38 }
0x11e3   : > { %v6190_v54 = vpop.xlane.xlu0 %6189  ;;  %v6272_v37 = vsel %vm757_vm1, %v15383_v33, 0.0 }
0x11e4   : > { %11539 = vpow2.f32 %v6235_v22  ;;  %v6206_v45 = vsub.f32 %v15320_v11, %v6190_v54  ;;  %6273 = vadd.xlane.f32.xlu0 %v6272_v37 }
0x11e6   : > { %v15388_v48 = vpop.eup %11535  ;;  %v6237_v32 = vmul.f32 1.442695, %v6206_v45 }
0x11e7   : > { %v6275_v40 = vsel %vm757_vm1, %v15388_v48, 0.0 }
0x11e8   : > { %11541 = vpow2.f32 %v6237_v32  ;;  %6276 = vadd.xlane.f32.xlu1 %v6275_v40 }
0x11ea   : > { %v15392_v49 = vpop.eup %11537 }
0x11eb   : > { %v6278_v7 = vsel %vm757_vm1, %v15392_v49, 0.0 }
0x11ec   : > { %6279 = vadd.xlane.f32.xlu0 %v6278_v7 }
0x11ee   : > { %v15396_v12 = vpop.eup %11539 }
0x11ef   : > { %v6281_v11 = vsel %vm757_vm1, %v15396_v12, 0.0 }
0x11f0   : > { %6282 = vadd.xlane.f32.xlu1 %v6281_v11 }
0x11f2   : > { %v15400_v17 = vpop.eup %11541 }
0x11f3   : > { %v6284_v19 = vsel %vm757_vm1, %v15400_v17, 0.0 }
0x11f4   : > { %6285 = vadd.xlane.f32.xlu0 %v6284_v19 }
0x1240   : > { %v6241_v53 = vpop.xlane.xlu1 %6240 }
0x1241   : > { %11543 = vrcp.f32 %v6241_v53 }
0x1244   : > { %v6244_v30 = vpop.xlane.xlu0 %6243 }
0x1245   : > { %11545 = vrcp.f32 %v6244_v30 }
0x1248   : > { %v6247_v2 = vpop.xlane.xlu1 %6246 }
0x1249   : > { %11547 = vrcp.f32 %v6247_v2 }
0x124b   : > { %v11544_v15 = vpop.eup %11543 }
0x124c   : > { %v6250_v38 = vpop.xlane.xlu0 %6249  ;;  %v15405_v22 = vmul.f32 %v11544_v15, %v15328_v60 }
0x124d   : > { %11549 = vrcp.f32 %v6250_v38 }
0x124e   : > { %v6321_v54 = vsel %vm757_vm1, %v15405_v22, -inf }
0x124f   : > { %v11546_v37 = vpop.eup %11545  ;;  %6322 = vmax.xlane.f32.xlu1 %v6321_v54 }
0x1250   : > { %v15410_v32 = vmul.f32 %v11546_v37, %v15333_v0 }
0x1251   : > { %v6253_v45 = vpop.xlane.xlu1 %6252 }
0x1252   : > { %11551 = vrcp.f32 %v6253_v45  ;;  %v6324_v40 = vsel %vm757_vm1, %v15410_v32, -inf }
0x1253   : > { %v11548_v7 = vpop.eup %11547  ;;  %6325 = vmax.xlane.f32.xlu0 %v6324_v40 }
0x1254   : > { %v15415_v60 = vmul.f32 %v11548_v7, %v15338_v8 }
0x1255   : > { %v6256_v11 = vpop.xlane.xlu0 %6255 }
0x1256   : > { %11553 = vrcp.f32 %v6256_v11  ;;  %v6327_v19 = vsel %vm757_vm1, %v15415_v60, -inf }
0x1257   : > { %v11550_v53 = vpop.eup %11549  ;;  %6328 = vmax.xlane.f32.xlu1 %v6327_v19 }
0x1258   : > { %v15420_v30 = vmul.f32 %v11550_v53, %v15342_v13 }
0x125a   : > { %v6330_v0 = vsel %vm757_vm1, %v15420_v30, -inf }
0x125b   : > { %6331 = vmax.xlane.f32.xlu0 %v6330_v0 }
0x125c   : > { %v11552_v2 = vpop.eup %11551 }
0x125d   : > { %v6259_v15 = vpop.xlane.xlu1 %6258  ;;  %v15425_v38 = vmul.f32 %v11552_v2, %v15347_v25 }
0x125e   : > { %11555 = vrcp.f32 %v6259_v15 }
0x125f   : > { %v6333_v8 = vsel %vm757_vm1, %v15425_v38, -inf }
0x1260   : > { %v11554_v54 = vpop.eup %11553  ;;  %6334 = vmax.xlane.f32.xlu1 %v6333_v8 }
0x1261   : > { %v6262_v37 = vpop.xlane.xlu0 %6261  ;;  %v15430_v13 = vmul.f32 %v11554_v54, %v15352_v63 }
0x1262   : > { %11557 = vrcp.f32 %v6262_v37 }
0x1263   : > { %v6336_v45 = vsel %vm757_vm1, %v15430_v13, -inf }
0x1264   : > { %6337 = vmax.xlane.f32.xlu0 %v6336_v45 }
0x1265   : > { %v6265_v40 = vpop.xlane.xlu1 %6264 }
0x1266   : > { %11559 = vrcp.f32 %v6265_v40 }
0x1268   : > { %v11556_v7 = vpop.eup %11555 }
0x1269   : > { %v6268_v11 = vpop.xlane.xlu0 %6267  ;;  %v15435_v25 = vmul.f32 %v11556_v7, %v15358_v41 }
0x126a   : > { %11561 = vrcp.f32 %v6268_v11 }
0x126b   : > { %v6339_v19 = vsel %vm757_vm1, %v15435_v25, -inf }
0x126c   : > { %v11558_v53 = vpop.eup %11557  ;;  %6340 = vmax.xlane.f32.xlu1 %v6339_v19 }
0x126d   : > { %v6271_v0 = vpop.xlane.xlu1 %6270  ;;  %v15440_v63 = vmul.f32 %v11558_v53, %v15363_v29 }
0x126e   : > { %11563 = vrcp.f32 %v6271_v0 }
0x126f   : > { %v6342_v2 = vsel %vm757_vm1, %v15440_v63, -inf }
0x1270   : > { %v11560_v15 = vpop.eup %11559  ;;  %6343 = vmax.xlane.f32.xlu0 %v6342_v2 }
0x1271   : > { %v6274_v8 = vpop.xlane.xlu0 %6273  ;;  %v15445_v41 = vmul.f32 %v11560_v15, %v15368_v58 }
0x1272   : > { %11565 = vrcp.f32 %v6274_v8 }
0x1273   : > { %v6345_v54 = vsel %vm757_vm1, %v15445_v41, -inf }
0x1274   : > { %v11562_v37 = vpop.eup %11561  ;;  %6346 = vmax.xlane.f32.xlu1 %v6345_v54 }
0x1275   : > { %v6277_v45 = vpop.xlane.xlu1 %6276  ;;  %v15450_v29 = vmul.f32 %v11562_v37, %v15373_v31 }
0x1276   : > { %11567 = vrcp.f32 %v6277_v45 }
0x1277   : > { %v6348_v40 = vsel %vm757_vm1, %v15450_v29, -inf }
0x1278   : > { %v11564_v7 = vpop.eup %11563  ;;  %6349 = vmax.xlane.f32.xlu0 %v6348_v40 }
0x1279   : > { %v6280_v11 = vpop.xlane.xlu0 %6279  ;;  %v15455_v58 = vmul.f32 %v11564_v7, %v15378_v24 }
0x127a   : > { %11569 = vrcp.f32 %v6280_v11 }
0x127b   : > { %v6351_v19 = vsel %vm757_vm1, %v15455_v58, -inf }
0x127c   : > { %v11566_v53 = vpop.eup %11565  ;;  %6352 = vmax.xlane.f32.xlu1 %v6351_v19 }
0x127d   : > { %v6283_v0 = vpop.xlane.xlu1 %6282  ;;  %v15460_v31 = vmul.f32 %v11566_v53, %v15383_v33  ;;  %v15485_v53 = vand.u32 127, %v5924_v50 }
0x127e   : > { %11571 = vrcp.f32 %v6283_v0 }
0x127f   : > { %17388 = vst [vmem:[#allocation149_spill] sm:$0xff] %v15460_v31  ;;  %v6354_v2 = vsel %vm757_vm1, %v15460_v31, -inf }
0x1280   : > { %v11568_v15 = vpop.eup %11567  ;;  %6355 = vmax.xlane.f32.xlu0 %v6354_v2 }
0x1281   : > { %v6286_v8 = vpop.xlane.xlu0 %6285  ;;  %v15465_v24 = vmul.f32 %v11568_v15, %v15388_v48 }
0x1282   : > { %11573 = vrcp.f32 %v6286_v8 }
0x1283   : > { %17389 = vst [vmem:[#allocation23_spill] sm:$0xff] %v15465_v24  ;;  %v6357_v54 = vsel %vm757_vm1, %v15465_v24, -inf }
0x1284   : > { %v11570_v37 = vpop.eup %11569  ;;  %6358 = vmax.xlane.f32.xlu1 %v6357_v54 }
0x1285   : > { %v15470_v45 = vmul.f32 %v11570_v37, %v15392_v49 }
0x1287   : > { %17390 = vst [vmem:[#allocation56_spill] sm:$0xff] %v15470_v45  ;;  %v6360_v33 = vsel %vm757_vm1, %v15470_v45, -inf }
0x1288   : > { %v11572_v40 = vpop.eup %11571  ;;  %6361 = vmax.xlane.f32.xlu0 %v6360_v33 }
0x1289   : > { %v15475_v7 = vmul.f32 %v11572_v40, %v15396_v12 }
0x128b   : > { %17391 = vst [vmem:[#allocation36_spill] sm:$0xff] %v15475_v7  ;;  %v6363_v48 = vsel %vm757_vm1, %v15475_v7, -inf }
0x128c   : > { %v11574_v11 = vpop.eup %11573  ;;  %6364 = vmax.xlane.f32.xlu1 %v6363_v48 }
0x128d   : > { %v15480_v19 = vmul.f32 %v11574_v11, %v15400_v17 }
0x128f   : > { %17392 = vst [vmem:[#allocation123_spill] sm:$0xff] %v15480_v19  ;;  %v6366_v49 = vsel %vm757_vm1, %v15480_v19, -inf }
0x1290   : > { %6367 = vmax.xlane.f32.xlu0 %v6366_v49 }
0x12dc   : > { %v6323_v0 = vpop.xlane.xlu1 %6322 }
0x12dd   : > { %vm6369_vm3 = vcmp.eq.f32.partialorder %v15405_v22, %v6323_v0 }
0x12de   : > { %v6385_v12 = vsel %vm6369_vm3, %v15485_v53, 4 }
0x12df   : > { %v15490_v2 = vsel %vm757_vm1, %v6385_v12, 2147483647 }
0x12e0   : > { %v6326_v15 = vpop.xlane.xlu0 %6325  ;;  %v6403_v8 = vshra.s32 %v15490_v2, 16  ;;  %v6402_v42 = vand.u32 65535, %v15490_v2 }
0x12e1   : > { %vm6370_vm4 = vcmp.eq.f32.partialorder %v15410_v32, %v6326_v15 }
0x12e2   : > { %v6386_v17 = vsel %vm6370_vm4, %v15485_v53, 4  ;;  %v15495_v54 = vcvt.s32.f32 %v6403_v8 }
0x12e3   : > { %v15498_v50 = vsel %vm757_vm1, %v6386_v17, 2147483647 }
0x12e4   : > { %6406 = vmin.xlane.f32.xlu1 %v15495_v54  ;;  %v6329_v37 = vpop.xlane.xlu1 %6328  ;;  %v6418_v33 = vshra.s32 %v15498_v50, 16  ;;  %v6417_v28 = vand.u32 65535, %v15498_v50 }
0x12e5   : > { %vm6371_vm5 = vcmp.eq.f32.partialorder %v15415_v60, %v6329_v37 }
0x12e6   : > { %v6387_v40 = vsel %vm6371_vm5, %v15485_v53, 4  ;;  %v15504_v48 = vcvt.s32.f32 %v6418_v33  ;;  %v6419_v9 = vcvt.s32.f32 %v6417_v28 }
0x12e7   : > { %v15507_v11 = vsel %vm757_vm1, %v6387_v40, 2147483647 }
0x12e8   : > { %6421 = vmin.xlane.f32.xlu0 %v15504_v48  ;;  %v6332_v49 = vpop.xlane.xlu0 %6331  ;;  %v6433_v0 = vshra.s32 %v15507_v11, 16 }
0x12e9   : > { %vm6372_vm6 = vcmp.eq.f32.partialorder %v15420_v30, %v6332_v49 }
0x12ea   : > { %v6388_v12 = vsel %vm6372_vm6, %v15485_v53, 4  ;;  %v15513_v15 = vcvt.s32.f32 %v6433_v0 }
0x12eb   : > { %v15516_v8 = vsel %vm757_vm1, %v6388_v12, 2147483647 }
0x12ec   : > { %6436 = vmin.xlane.f32.xlu1 %v15513_v15  ;;  %v6448_v37 = vshra.s32 %v15516_v8, 16  ;;  %v6447_v50 = vand.u32 65535, %v15516_v8 }
0x12ed   : > { %v6335_v17 = vpop.xlane.xlu1 %6334 }
0x12ee   : > { %vm6373_vm7 = vcmp.eq.f32.partialorder %v15425_v38, %v6335_v17  ;;  %v15522_v40 = vcvt.s32.f32 %v6448_v37  ;;  %v6449_v28 = vcvt.s32.f32 %v6447_v50 }
0x12ef   : > { %v6389_v33 = vsel %vm6373_vm7, %v15485_v53, 4 }
0x12f0   : > { %v15525_v49 = vsel %vm757_vm1, %v6389_v33, 2147483647  ;;  %6451 = vmin.xlane.f32.xlu0 %v15522_v40 }
0x12f1   : > { %v6338_v0 = vpop.xlane.xlu0 %6337  ;;  %v6463_v12 = vshra.s32 %v15525_v49, 16 }
0x12f2   : > { %vm6374_vm8 = vcmp.eq.f32.partialorder %v15430_v13, %v6338_v0 }
0x12f3   : > { %v6390_v5 = vsel %vm6374_vm8, %v15485_v53, 4  ;;  %v15531_v16 = vcvt.s32.f32 %v6463_v12 }
0x12f4   : > { %v15534_v17 = vsel %vm757_vm1, %v6390_v5, 2147483647 }
0x12f5   : > { %6466 = vmin.xlane.f32.xlu1 %v15531_v16  ;;  %v6478_v37 = vshra.s32 %v15534_v17, 16  ;;  %v6477_v8 = vand.u32 65535, %v15534_v17 }
0x12f7   : > { %v15538_v33 = vcvt.s32.f32 %v6478_v37 }
0x12f9   : > { %v6341_v36 = vpop.xlane.xlu1 %6340  ;;  %6481 = vmin.xlane.f32.xlu0 %v15538_v33 }
0x12fa   : > { %vm6375_vm9 = vcmp.eq.f32.partialorder %v15435_v25, %v6341_v36 }
0x12fb   : > { %v6391_v0 = vsel %vm6375_vm9, %v15485_v53, 4 }
0x12fc   : > { %v15544_v43 = vsel %vm757_vm1, %v6391_v0, 2147483647 }
0x12fd   : > { %v6344_v12 = vpop.xlane.xlu0 %6343  ;;  %v6493_v5 = vshra.s32 %v15544_v43, 16 }
0x12fe   : > { %vm6376_vm10 = vcmp.eq.f32.partialorder %v15440_v63, %v6344_v12 }
0x12ff   : > { %v6392_v35 = vsel %vm6376_vm10, %v15485_v53, 4  ;;  %v15549_v47 = vcvt.s32.f32 %v6493_v5 }
0x1300   : > { %v15552_v37 = vsel %vm757_vm1, %v6392_v35, 2147483647 }
0x1301   : > { %6496 = vmin.xlane.f32.xlu1 %v15549_v47  ;;  %v6347_v36 = vpop.xlane.xlu1 %6346  ;;  %v6508_v62 = vshra.s32 %v15552_v37, 16  ;;  %v6507_v17 = vand.u32 65535, %v15552_v37 }
0x1302   : > { %vm6377_vm11 = vcmp.eq.f32.partialorder %v15445_v41, %v6347_v36 }
0x1303   : > { %v6393_v0 = vsel %vm6377_vm11, %v15485_v53, 4  ;;  %v15558_v56 = vcvt.s32.f32 %v6508_v62 }
0x1304   : > { %v15561_v12 = vsel %vm757_vm1, %v6393_v0, 2147483647 }
0x1305   : > { %6511 = vmin.xlane.f32.xlu0 %v15558_v56  ;;  %v6350_v5 = vpop.xlane.xlu0 %6349  ;;  %v6523_v35 = vshra.s32 %v15561_v12, 16 }
0x1306   : > { %vm6378_vm12 = vcmp.eq.f32.partialorder %v15450_v29, %v6350_v5 }
0x1307   : > { %v6394_v4 = vsel %vm6378_vm12, %v15485_v53, 4  ;;  %v15567_v21 = vcvt.s32.f32 %v6523_v35 }
0x1308   : > { %v15570_v36 = vsel %vm757_vm1, %v6394_v4, 2147483647 }
0x1309   : > { %6526 = vmin.xlane.f32.xlu1 %v15567_v21  ;;  %v6353_v62 = vpop.xlane.xlu1 %6352  ;;  %v6538_v0 = vshra.s32 %v15570_v36, 16  ;;  %v6537_v37 = vand.u32 65535, %v15570_v36 }
0x130a   : > { %vm6379_vm13 = vcmp.eq.f32.partialorder %v15455_v58, %v6353_v62 }
0x130b   : > { %v6395_v6 = vsel %vm6379_vm13, %v15485_v53, 4  ;;  %v15576_v1 = vcvt.s32.f32 %v6538_v0 }
0x130c   : > { %v15579_v5 = vsel %vm757_vm1, %v6395_v6, 2147483647 }
0x130d   : > { %6541 = vmin.xlane.f32.xlu0 %v15576_v1  ;;  %v6356_v35 = vpop.xlane.xlu0 %6355  ;;  %v6553_v4 = vshra.s32 %v15579_v5, 16 }
0x130e   : > { %vm6380_vm14 = vcmp.eq.f32.partialorder %v15460_v31, %v6356_v35 }
0x130f   : > { %v6396_v44 = vsel %vm6380_vm14, %v15485_v53, 4  ;;  %v15585_v51 = vcvt.s32.f32 %v6553_v4 }
0x1310   : > { %v15588_v62 = vsel %vm757_vm1, %v6396_v44, 2147483647 }
0x1311   : > { %6556 = vmin.xlane.f32.xlu1 %v15585_v51  ;;  %v6359_v0 = vpop.xlane.xlu1 %6358  ;;  %v6568_v6 = vshra.s32 %v15588_v62, 16  ;;  %v6567_v36 = vand.u32 65535, %v15588_v62 }
0x1312   : > { %vm6381_vm15 = vcmp.eq.f32.partialorder %v15465_v24, %v6359_v0 }
0x1313   : > { %v6397_v34 = vsel %vm6381_vm15, %v15485_v53, 4  ;;  %v15594_v39 = vcvt.s32.f32 %v6568_v6 }
0x1314   : > { %v15597_v35 = vsel %vm757_vm1, %v6397_v34, 2147483647 }
0x1315   : > { %6571 = vmin.xlane.f32.xlu0 %v15594_v39  ;;  %v6362_v4 = vpop.xlane.xlu0 %6361  ;;  %v6583_v44 = vshra.s32 %v15597_v35, 16 }
0x1316   : > { %vm6382_vm2 = vcmp.eq.f32.partialorder %v15470_v45, %v6362_v4 }
0x1317   : > { %v6398_v61 = vsel %vm6382_vm2, %v15485_v53, 4  ;;  %v15603_v46 = vcvt.s32.f32 %v6583_v44 }
0x1318   : > { %v15606_v0 = vsel %vm757_vm1, %v6398_v61, 2147483647 }
0x1319   : > { %6586 = vmin.xlane.f32.xlu1 %v15603_v46  ;;  %v6365_v6 = vpop.xlane.xlu1 %6364  ;;  %v6598_v34 = vshra.s32 %v15606_v0, 16  ;;  %v6597_v62 = vand.u32 65535, %v15606_v0 }
0x131a   : > { %vm6383_vm3 = vcmp.eq.f32.partialorder %v15475_v7, %v6365_v6 }
0x131b   : > { %v6399_v18 = vsel %vm6383_vm3, %v15485_v53, 4  ;;  %v15612_v57 = vcvt.s32.f32 %v6598_v34 }
0x131c   : > { %v15615_v4 = vsel %vm757_vm1, %v6399_v18, 2147483647 }
0x131d   : > { %6601 = vmin.xlane.f32.xlu0 %v15612_v57  ;;  %v6368_v44 = vpop.xlane.xlu0 %6367  ;;  %v6613_v61 = vshra.s32 %v15615_v4, 16 }
0x131e   : > { %vm6384_vm4 = vcmp.eq.f32.partialorder %v15480_v19, %v6368_v44  ;;  %v6404_v44 = vcvt.s32.f32 %v6402_v42 }
0x131f   : > { %v6400_v14 = vsel %vm6384_vm4, %v15485_v53, 4  ;;  %v15621_v3 = vcvt.s32.f32 %v6613_v61 }
0x1320   : > { %v15624_v6 = vsel %vm757_vm1, %v6400_v14, 2147483647 }
0x1321   : > { %6616 = vmin.xlane.f32.xlu1 %v15621_v3  ;;  %v6628_v34 = vshra.s32 %v15624_v6, 16  ;;  %v6627_v0 = vand.u32 65535, %v15624_v6 }
0x1323   : > { %v15628_v18 = vcvt.s32.f32 %v6628_v34  ;;  %v6432_v34 = vand.u32 65535, %v15507_v11  ;;  %v6462_v11 = vand.u32 65535, %v15525_v49 }
0x1325   : > { %6631 = vmin.xlane.f32.xlu0 %v15628_v18  ;;  %v6434_v42 = vcvt.s32.f32 %v6432_v34  ;;  %v6479_v34 = vcvt.s32.f32 %v6477_v8  ;;  %v6539_v8 = vcvt.s32.f32 %v6537_v37  ;;  %v6629_v37 = vcvt.s32.f32 %v6627_v0 }
0x1371   : > { %v15632_v20 = vpop.xlane.xlu1 %6406 }
0x1372   : > { %vm6408_vm5 = vcmp.eq.f32.partialorder %v15495_v54, %v15632_v20 }
0x1373   : > { %v6409_v14 = vsel %vm6408_vm5, %v6404_v44, inf }
0x1374   : > { %6410 = vmin.xlane.f32.xlu1 %v6409_v14 }
0x1375   : > { %v15637_v61 = vpop.xlane.xlu0 %6421 }
0x1376   : > { %vm6423_vm6 = vcmp.eq.f32.partialorder %v15504_v48, %v15637_v61  ;;  %v6464_v48 = vcvt.s32.f32 %v6462_v11  ;;  %v6522_v11 = vand.u32 65535, %v15561_v12  ;;  %v6552_v12 = vand.u32 65535, %v15579_v5 }
0x1377   : > { %v6424_v10 = vsel %vm6423_vm6, %v6419_v9, inf  ;;  %v6582_v5 = vand.u32 65535, %v15597_v35  ;;  %v6612_v35 = vand.u32 65535, %v15615_v4 }
0x1378   : > { %6425 = vmin.xlane.f32.xlu0 %v6424_v10 }
0x1379   : > { %v15642_v2 = vpop.xlane.xlu1 %6436 }
0x137a   : > { %vm6438_vm7 = vcmp.eq.f32.partialorder %v15513_v15, %v15642_v2 }
0x137b   : > { %v6439_v54 = vsel %vm6438_vm7, %v6434_v42, inf }
0x137c   : > { %6440 = vmin.xlane.f32.xlu1 %v6439_v54 }
0x137d   : > { %v15647_v44 = vpop.xlane.xlu0 %6451 }
0x137e   : > { %vm6453_vm8 = vcmp.eq.f32.partialorder %v15522_v40, %v15647_v44  ;;  %v6492_v40 = vand.u32 65535, %v15544_v43 }
0x137f   : > { %v6454_v9 = vsel %vm6453_vm8, %v6449_v28, inf  ;;  %v6509_v28 = vcvt.s32.f32 %v6507_v17  ;;  %v6584_v17 = vcvt.s32.f32 %v6582_v5 }
0x1380   : > { %6455 = vmin.xlane.f32.xlu0 %v6454_v9  ;;  %v6494_v50 = vcvt.s32.f32 %v6492_v40  ;;  %v6524_v9 = vcvt.s32.f32 %v6522_v11  ;;  %v6569_v40 = vcvt.s32.f32 %v6567_v36  ;;  %v6443_v36 = vcvt.f32.s32 %v15642_v2 }
0x1381   : > { %v6458_v2 = vcvt.f32.s32 %v15647_v44 }
0x1382   : > { %v15652_v10 = vpop.xlane.xlu1 %6466  ;;  %v6444_v5 = vshll.u32 %v6443_v36, 16 }
0x1383   : > { %vm6468_vm9 = vcmp.eq.f32.partialorder %v15531_v16, %v15652_v10  ;;  %v6473_v44 = vcvt.f32.s32 %v15652_v10 }
0x1384   : > { %v6469_v15 = vsel %vm6468_vm9, %v6464_v48, inf }
0x1385   : > { %6470 = vmin.xlane.f32.xlu1 %v6469_v15 }
0x1386   : > { %v15657_v14 = vpop.xlane.xlu0 %6481 }
0x1387   : > { %vm6483_vm10 = vcmp.eq.f32.partialorder %v15538_v33, %v15657_v14  ;;  %v6488_v10 = vcvt.f32.s32 %v15657_v14 }
0x1388   : > { %v6484_v49 = vsel %vm6483_vm10, %v6479_v34, inf  ;;  %v6554_v34 = vcvt.s32.f32 %v6552_v12  ;;  %v6428_v12 = vcvt.f32.s32 %v15637_v61 }
0x1389   : > { %6485 = vmin.xlane.f32.xlu0 %v6484_v49 }
0x138e   : > { %v15662_v42 = vpop.xlane.xlu1 %6496 }
0x138f   : > { %vm6498_vm11 = vcmp.eq.f32.partialorder %v15549_v47, %v15662_v42 }
0x1390   : > { %v6499_v16 = vsel %vm6498_vm11, %v6494_v50, inf }
0x1391   : > { %6500 = vmin.xlane.f32.xlu1 %v6499_v16 }
0x1392   : > { %v15667_v54 = vpop.xlane.xlu0 %6511 }
0x1393   : > { %vm6513_vm12 = vcmp.eq.f32.partialorder %v15558_v56, %v15667_v54 }
0x1394   : > { %v6514_v33 = vsel %vm6513_vm12, %v6509_v28, inf  ;;  %v6599_v28 = vcvt.s32.f32 %v6597_v62 }
0x1395   : > { %6515 = vmin.xlane.f32.xlu0 %v6514_v33  ;;  %v6614_v33 = vcvt.s32.f32 %v6612_v35  ;;  %v6459_v35 = vshll.u32 %v6458_v2, 16 }
0x1396   : > { %v15672_v43 = vpop.xlane.xlu1 %6526 }
0x1397   : > { %vm6528_vm13 = vcmp.eq.f32.partialorder %v15567_v21, %v15672_v43 }
0x1398   : > { %v6529_v47 = vsel %vm6528_vm13, %v6524_v9, inf }
0x1399   : > { %6530 = vmin.xlane.f32.xlu1 %v6529_v47 }
0x139a   : > { %v15677_v48 = vpop.xlane.xlu0 %6541 }
0x139b   : > { %vm6543_vm14 = vcmp.eq.f32.partialorder %v15576_v1, %v15677_v48 }
0x139c   : > { %v6544_v56 = vsel %vm6543_vm14, %v6539_v8, inf }
0x139d   : > { %6545 = vmin.xlane.f32.xlu0 %v6544_v56 }
0x139e   : > { %v15682_v15 = vpop.xlane.xlu1 %6556 }
0x139f   : > { %vm6558_vm15 = vcmp.eq.f32.partialorder %v15585_v51, %v15682_v15 }
0x13a0   : > { %v6559_v21 = vsel %vm6558_vm15, %v6554_v34, inf  ;;  %v6429_v34 = vshll.u32 %v6428_v12, 16 }
0x13a1   : > { %6560 = vmin.xlane.f32.xlu1 %v6559_v21 }
0x13a2   : > { %v15687_v49 = vpop.xlane.xlu0 %6571 }
0x13a3   : > { %vm6573_vm2 = vcmp.eq.f32.partialorder %v15594_v39, %v15687_v49 }
0x13a4   : > { %v6574_v1 = vsel %vm6573_vm2, %v6569_v40, inf }
0x13a5   : > { %6575 = vmin.xlane.f32.xlu0 %v6574_v1 }
0x13a6   : > { %v15692_v50 = vpop.xlane.xlu1 %6586 }
0x13a7   : > { %vm6588_vm3 = vcmp.eq.f32.partialorder %v15603_v46, %v15692_v50 }
0x13a8   : > { %v6589_v51 = vsel %vm6588_vm3, %v6584_v17, inf }
0x13a9   : > { %6590 = vmin.xlane.f32.xlu1 %v6589_v51 }
0x13aa   : > { %v15697_v16 = vpop.xlane.xlu0 %6601 }
0x13ab   : > { %vm6603_vm4 = vcmp.eq.f32.partialorder %v15612_v57, %v15697_v16  ;;  %v6413_v57 = vcvt.f32.s32 %v15632_v20 }
0x13ac   : > { %v6604_v39 = vsel %vm6603_vm4, %v6599_v28, inf }
0x13ad   : > { %6605 = vmin.xlane.f32.xlu0 %v6604_v39  ;;  %v6414_v8 = vshll.u32 %v6413_v57, 16 }
0x13ae   : > { %v15702_v11 = vpop.xlane.xlu1 %6616 }
0x13af   : > { %vm6618_vm5 = vcmp.eq.f32.partialorder %v15621_v3, %v15702_v11 }
0x13b0   : > { %v6619_v46 = vsel %vm6618_vm5, %v6614_v33, inf }
0x13b1   : > { %6620 = vmin.xlane.f32.xlu1 %v6619_v46 }
0x13b2   : > { %v15707_v9 = vpop.xlane.xlu0 %6631 }
0x13b3   : > { %vm6633_vm6 = vcmp.eq.f32.partialorder %v15628_v18, %v15707_v9 }
0x13b4   : > { %v6634_v4 = vsel %vm6633_vm6, %v6629_v37, inf }
0x13b5   : > { %6635 = vmin.xlane.f32.xlu0 %v6634_v4  ;;  %v6474_v4 = vshll.u32 %v6473_v44, 16 }
0x1401   : > { %v6411_v47 = vpop.xlane.xlu1 %6410 }
0x1402   : > { %v6412_v6 = vcvt.f32.s32 %v6411_v47 }
0x1404   : > { %v15713_v56 = vadd.s32 %v6414_v8, %v6412_v6 }
0x1405   : > { %v6426_v3 = vpop.xlane.xlu0 %6425 }
0x1406   : > { %v6427_v21 = vcvt.f32.s32 %v6426_v3  ;;  %vm6641_vm7 = vcmp.eq.s32.totalorder %v15485_v53, %v15713_v56  ;;  %v6489_v3 = vshll.u32 %v6488_v10, 16 }
0x1407   : > { %v15722_v20 = vsel %vm6641_vm7, -1.0, %v15405_v22 }
0x1408   : > { %v15724_v18 = vadd.s32 %v6429_v34, %v6427_v21  ;;  %v6673_v61 = vsel %vm757_vm1, %v15722_v20, -inf }
0x1409   : > { %6674 = vmax.xlane.f32.xlu1 %v6673_v61  ;;  %v6441_v40 = vpop.xlane.xlu1 %6440  ;;  %v6503_v61 = vcvt.f32.s32 %v15662_v42 }
0x140a   : > { %v6442_v1 = vcvt.f32.s32 %v6441_v40  ;;  %vm6642_vm8 = vcmp.eq.s32.totalorder %v15485_v53, %v15724_v18 }
0x140b   : > { %v15735_v17 = vsel %vm6642_vm8, -1.0, %v15410_v32 }
0x140c   : > { %v15737_v62 = vadd.s32 %v6444_v5, %v6442_v1  ;;  %v6676_v51 = vsel %vm757_vm1, %v15735_v17, -inf  ;;  %v6504_v1 = vshll.u32 %v6503_v61, 16 }
0x140d   : > { %6677 = vmax.xlane.f32.xlu0 %v6676_v51  ;;  %v6456_v28 = vpop.xlane.xlu0 %6455  ;;  %v6518_v51 = vcvt.f32.s32 %v15667_v54 }
0x140e   : > { %v6457_v39 = vcvt.f32.s32 %v6456_v28  ;;  %vm6643_vm9 = vcmp.eq.s32.totalorder %v15485_v53, %v15737_v62 }
0x140f   : > { %v15748_v33 = vsel %vm6643_vm9, -1.0, %v15415_v60  ;;  %v6519_v44 = vshll.u32 %v6518_v51, 16 }
0x1410   : > { %v15750_v0 = vadd.s32 %v6459_v35, %v6457_v39  ;;  %v6679_v46 = vsel %vm757_vm1, %v15748_v33, -inf  ;;  %v6533_v39 = vcvt.f32.s32 %v15672_v43  ;;  %v6548_v43 = vcvt.f32.s32 %v15677_v48 }
0x1411   : > { %6680 = vmax.xlane.f32.xlu1 %v6679_v46  ;;  %v6563_v48 = vcvt.f32.s32 %v15682_v15  ;;  %v6578_v15 = vcvt.f32.s32 %v15687_v49  ;;  %v6593_v49 = vcvt.f32.s32 %v15692_v50  ;;  %v6608_v50 = vcvt.f32.s32 %v15697_v16 }
0x1412   : > { %v6471_v37 = vpop.xlane.xlu1 %6470  ;;  %vm6644_vm10 = vcmp.eq.s32.totalorder %v15485_v53, %v15750_v0  ;;  %v6549_v61 = vshll.u32 %v6548_v43, 16  ;;  %v6623_v16 = vcvt.f32.s32 %v15702_v11  ;;  %v6638_v11 = vcvt.f32.s32 %v15707_v9 }
0x1413   : > { %v6472_v57 = vcvt.f32.s32 %v6471_v37  ;;  %v15761_v47 = vsel %vm6644_vm10, -1.0, %v15420_v30 }
0x1414   : > { %v6682_v12 = vsel %vm757_vm1, %v15761_v47, -inf }
0x1415   : > { %v15763_v8 = vadd.s32 %v6474_v4, %v6472_v57  ;;  %6683 = vmax.xlane.f32.xlu0 %v6682_v12  ;;  %v6534_v57 = vshll.u32 %v6533_v39, 16 }
0x1416   : > { %v6486_v6 = vpop.xlane.xlu0 %6485 }
0x1417   : > { %v6487_v34 = vcvt.f32.s32 %v6486_v6  ;;  %vm6645_vm11 = vcmp.eq.s32.totalorder %v15485_v53, %v15763_v8 }
0x1418   : > { %v15773_v14 = vsel %vm6645_vm11, -1.0, %v15425_v38 }
0x1419   : > { %v15775_v36 = vadd.s32 %v6489_v3, %v6487_v34  ;;  %v6685_v21 = vsel %vm757_vm1, %v15773_v14, -inf }
0x141a   : > { %6686 = vmax.xlane.f32.xlu1 %v6685_v21 }
0x141b   : > { %vm6646_vm12 = vcmp.eq.s32.totalorder %v15485_v53, %v15775_v36 }
0x141c   : > { %v15786_v40 = vsel %vm6646_vm12, -1.0, %v15430_v13 }
0x141d   : > { %v6688_v2 = vsel %vm757_vm1, %v15786_v40, -inf }
0x141e   : > { %v6501_v5 = vpop.xlane.xlu1 %6500  ;;  %6689 = vmax.xlane.f32.xlu0 %v6688_v2 }
0x141f   : > { %v6502_v28 = vcvt.f32.s32 %v6501_v5 }
0x1421   : > { %v15791_v42 = vadd.s32 %v6504_v1, %v6502_v28 }
0x1422   : > { %v6516_v35 = vpop.xlane.xlu0 %6515 }
0x1423   : > { %v6517_v46 = vcvt.f32.s32 %v6516_v35  ;;  %vm6647_vm13 = vcmp.eq.s32.totalorder %v15485_v53, %v15791_v42  ;;  %v6564_v35 = vshll.u32 %v6563_v48, 16  ;;  %v6594_v48 = vshll.u32 %v6593_v49, 16 }
0x1424   : > { %v15800_v37 = vsel %vm6647_vm13, -1.0, %v15435_v25 }
0x1425   : > { %v15802_v4 = vadd.s32 %v6519_v44, %v6517_v46  ;;  %v6691_v54 = vsel %vm757_vm1, %v15800_v37, -inf }
0x1426   : > { %6692 = vmax.xlane.f32.xlu1 %v6691_v54  ;;  %v6531_v10 = vpop.xlane.xlu1 %6530 }
0x1427   : > { %v6532_v12 = vcvt.f32.s32 %v6531_v10  ;;  %vm6648_vm14 = vcmp.eq.s32.totalorder %v15485_v53, %v15802_v4 }
0x1428   : > { %v15813_v6 = vsel %vm6648_vm14, -1.0, %v15440_v63 }
0x1429   : > { %v15815_v3 = vadd.s32 %v6534_v57, %v6532_v12  ;;  %v6694_v34 = vsel %vm757_vm1, %v15813_v6, -inf  ;;  %v6579_v57 = vshll.u32 %v6578_v15, 16 }
0x142a   : > { %6695 = vmax.xlane.f32.xlu0 %v6694_v34  ;;  %v6546_v21 = vpop.xlane.xlu0 %6545 }
0x142b   : > { %v6547_v5 = vcvt.f32.s32 %v6546_v21  ;;  %vm6649_vm15 = vcmp.eq.s32.totalorder %v15485_v53, %v15815_v3 }
0x142c   : > { %v15826_v2 = vsel %vm6649_vm15, -1.0, %v15445_v41 }
0x142d   : > { %v15828_v1 = vadd.s32 %v6549_v61, %v6547_v5  ;;  %v6697_v51 = vsel %vm757_vm1, %v15826_v2, -inf }
0x142e   : > { %6698 = vmax.xlane.f32.xlu1 %v6697_v51  ;;  %v6561_v28 = vpop.xlane.xlu1 %6560 }
0x142f   : > { %v6562_v44 = vcvt.f32.s32 %v6561_v28  ;;  %vm6650_vm2 = vcmp.eq.s32.totalorder %v15485_v53, %v15828_v1 }
0x1430   : > { %v15839_v39 = vsel %vm6650_vm2, -1.0, %v15450_v29 }
0x1431   : > { %v15841_v46 = vadd.s32 %v6564_v35, %v6562_v44  ;;  %v6700_v54 = vsel %vm757_vm1, %v15839_v39, -inf  ;;  %v6609_v44 = vshll.u32 %v6608_v50, 16 }
0x1432   : > { %6701 = vmax.xlane.f32.xlu0 %v6700_v54  ;;  %v6576_v10 = vpop.xlane.xlu0 %6575 }
0x1433   : > { %v6577_v43 = vcvt.f32.s32 %v6576_v10  ;;  %vm6651_vm3 = vcmp.eq.s32.totalorder %v15485_v53, %v15841_v46 }
0x1434   : > { %v15852_v12 = vsel %vm6651_vm3, -1.0, %v15455_v58 }
0x1435   : > { %v15854_v34 = vadd.s32 %v6579_v57, %v6577_v43  ;;  %v6703_v21 = vsel %vm757_vm1, %v15852_v12, -inf }
0x1436   : > { %6704 = vmax.xlane.f32.xlu1 %v6703_v21  ;;  %v6591_v61 = vpop.xlane.xlu1 %6590  ;;  %v6624_v21 = vshll.u32 %v6623_v16, 16 }
0x1437   : > { %17393 = vst [vmem:[#allocation150_spill] sm:$0xff] %v15854_v34  ;;  %v6592_v5 = vcvt.f32.s32 %v6591_v61  ;;  %vm16857_vm4 = vcmp.eq.s32.totalorder %v15485_v53, %v15854_v34 }
0x1438   : > { %v15865_v51 = vsel %vm16857_vm4, -1.0, %v15460_v31 }
0x1439   : > { %v15867_v28 = vadd.s32 %v6594_v48, %v6592_v5  ;;  %v6706_v35 = vsel %vm757_vm1, %v15865_v51, -inf }
0x143a   : > { %6707 = vmax.xlane.f32.xlu0 %v6706_v35  ;;  %v6606_v15 = vpop.xlane.xlu0 %6605 }
0x143b   : > { %17394 = vst [vmem:[#allocation7_spill] sm:$0xff] %v15867_v28  ;;  %v6607_v54 = vcvt.f32.s32 %v6606_v15  ;;  %vm16844_vm5 = vcmp.eq.s32.totalorder %v15485_v53, %v15867_v28  ;;  %v6639_v15 = vshll.u32 %v6638_v11, 16 }
0x143c   : > { %v15878_v10 = vsel %vm16844_vm5, -1.0, %v15465_v24 }
0x143d   : > { %v15880_v57 = vadd.s32 %v6609_v44, %v6607_v54  ;;  %v6709_v49 = vsel %vm757_vm1, %v15878_v10, -inf }
0x143e   : > { %6710 = vmax.xlane.f32.xlu1 %v6709_v49  ;;  %v6621_v43 = vpop.xlane.xlu1 %6620 }
0x143f   : > { %17395 = vst [vmem:[#allocation11_spill] sm:$0xff] %v15880_v57  ;;  %v6622_v61 = vcvt.f32.s32 %v6621_v43  ;;  %vm16842_vm6 = vcmp.eq.s32.totalorder %v15485_v53, %v15880_v57 }
0x1440   : > { %v15891_v48 = vsel %vm16842_vm6, -1.0, %v15470_v45 }
0x1441   : > { %v15893_v50 = vadd.s32 %v6624_v21, %v6622_v61  ;;  %v6712_v5 = vsel %vm757_vm1, %v15891_v48, -inf }
0x1442   : > { %6713 = vmax.xlane.f32.xlu0 %v6712_v5  ;;  %v6636_v35 = vpop.xlane.xlu0 %6635 }
0x1443   : > { %17396 = vst [vmem:[#allocation14_spill] sm:$0xff] %v15893_v50  ;;  %v6637_v44 = vcvt.f32.s32 %v6636_v35  ;;  %vm16843_vm0 = vcmp.eq.s32.totalorder %v15485_v53, %v15893_v50 }
0x1444   : > { %v15903_v9 = vsel %vm16843_vm0, -1.0, %v15475_v7 }
0x1445   : > { %v15905_v16 = vadd.s32 %v6639_v15, %v6637_v44  ;;  %v6715_v54 = vsel %vm757_vm1, %v15903_v9, -inf }
0x1446   : > { %6716 = vmax.xlane.f32.xlu1 %v6715_v54 }
0x1447   : > { %17397 = vst [vmem:[#allocation124_spill] sm:$0xff] %v15905_v16  ;;  %vm16856_vm6 = vcmp.eq.s32.totalorder %v15485_v53, %v15905_v16 }
0x1448   : > { %v15915_v49 = vsel %vm16856_vm6, -1.0, %v15480_v19 }
0x1449   : > { %v6718_v43 = vsel %vm757_vm1, %v15915_v49, -inf }
0x144a   : > { %6719 = vmax.xlane.f32.xlu0 %v6718_v43 }
0x1496   : > { %v6675_v21 = vpop.xlane.xlu1 %6674 }
0x1497   : > { %vm6721_vm0 = vcmp.eq.f32.partialorder %v15722_v20, %v6675_v21 }
0x1498   : > { %v6737_v11 = vsel %vm6721_vm0, %v15485_v53, 4 }
0x1499   : > { %v15922_v61 = vsel %vm757_vm1, %v6737_v11, 2147483647 }
0x149a   : > { %v6755_v5 = vshra.s32 %v15922_v61, 16  ;;  %v6678_v35 = vpop.xlane.xlu0 %6677 }
0x149b   : > { %vm6722_vm5 = vcmp.eq.f32.partialorder %v15735_v17, %v6678_v35 }
0x149c   : > { %v6738_v15 = vsel %vm6722_vm5, %v15485_v53, 4  ;;  %v15927_v44 = vcvt.s32.f32 %v6755_v5 }
0x149d   : > { %v15930_v54 = vsel %vm757_vm1, %v6738_v15, 2147483647 }
0x149e   : > { %v6770_v43 = vshra.s32 %v15930_v54, 16  ;;  %6758 = vmin.xlane.f32.xlu1 %v15927_v44  ;;  %v6681_v20 = vpop.xlane.xlu1 %6680  ;;  %v6769_v28 = vand.u32 65535, %v15930_v54 }
0x149f   : > { %vm6723_vm0 = vcmp.eq.f32.partialorder %v15748_v33, %v6681_v20 }
0x14a0   : > { %v6739_v21 = vsel %vm6723_vm0, %v15485_v53, 4  ;;  %v15936_v11 = vcvt.s32.f32 %v6770_v43 }
0x14a1   : > { %v15939_v17 = vsel %vm757_vm1, %v6739_v21, 2147483647 }
0x14a2   : > { %v6785_v5 = vshra.s32 %v15939_v17, 16  ;;  %6773 = vmin.xlane.f32.xlu0 %v15936_v11  ;;  %v6684_v35 = vpop.xlane.xlu0 %6683 }
0x14a3   : > { %vm6724_vm5 = vcmp.eq.f32.partialorder %v15761_v47, %v6684_v35 }
0x14a4   : > { %v6740_v15 = vsel %vm6724_vm5, %v15485_v53, 4  ;;  %v15945_v55 = vcvt.s32.f32 %v6785_v5 }
0x14a5   : > { %v15948_v33 = vsel %vm757_vm1, %v6740_v15, 2147483647 }
0x14a6   : > { %v6800_v43 = vshra.s32 %v15948_v33, 16  ;;  %6788 = vmin.xlane.f32.xlu1 %v15945_v55 }
0x14a7   : > { %v6687_v20 = vpop.xlane.xlu1 %6686 }
0x14a8   : > { %vm6725_vm0 = vcmp.eq.f32.partialorder %v15773_v14, %v6687_v20  ;;  %v15954_v27 = vcvt.s32.f32 %v6800_v43 }
0x14a9   : > { %v6741_v21 = vsel %vm6725_vm0, %v15485_v53, 4 }
0x14aa   : > { %v15957_v47 = vsel %vm757_vm1, %v6741_v21, 2147483647  ;;  %6803 = vmin.xlane.f32.xlu0 %v15954_v27 }
0x14ab   : > { %v6815_v5 = vshra.s32 %v15957_v47, 16  ;;  %v6690_v35 = vpop.xlane.xlu0 %6689 }
0x14ac   : > { %vm6726_vm5 = vcmp.eq.f32.partialorder %v15786_v40, %v6690_v35 }
0x14ad   : > { %v6742_v15 = vsel %vm6726_vm5, %v15485_v53, 4  ;;  %v15963_v26 = vcvt.s32.f32 %v6815_v5 }
0x14ae   : > { %v15966_v14 = vsel %vm757_vm1, %v6742_v15, 2147483647 }
0x14af   : > { %v6830_v43 = vshra.s32 %v15966_v14, 16  ;;  %6818 = vmin.xlane.f32.xlu1 %v15963_v26 }
0x14b1   : > { %v15970_v20 = vcvt.s32.f32 %v6830_v43 }
0x14b3   : > { %v6693_v21 = vpop.xlane.xlu1 %6692  ;;  %6833 = vmin.xlane.f32.xlu0 %v15970_v20 }
0x14b4   : > { %vm6727_vm0 = vcmp.eq.f32.partialorder %v15800_v37, %v6693_v21 }
0x14b5   : > { %v6743_v40 = vsel %vm6727_vm0, %v15485_v53, 4 }
0x14b6   : > { %v15976_v35 = vsel %vm757_vm1, %v6743_v40, 2147483647 }
0x14b7   : > { %v6845_v5 = vshra.s32 %v15976_v35, 16  ;;  %v6696_v15 = vpop.xlane.xlu0 %6695 }
0x14b8   : > { %vm6728_vm5 = vcmp.eq.f32.partialorder %v15813_v6, %v6696_v15 }
0x14b9   : > { %v6744_v52 = vsel %vm6728_vm5, %v15485_v53, 4  ;;  %v15981_v23 = vcvt.s32.f32 %v6845_v5 }
0x14ba   : > { %v15984_v43 = vsel %vm757_vm1, %v6744_v52, 2147483647 }
0x14bb   : > { %v6860_v37 = vshra.s32 %v15984_v43, 16  ;;  %6848 = vmin.xlane.f32.xlu1 %v15981_v23  ;;  %v6699_v21 = vpop.xlane.xlu1 %6698 }
0x14bc   : > { %vm6729_vm0 = vcmp.eq.f32.partialorder %v15826_v2, %v6699_v21 }
0x14bd   : > { %v6745_v40 = vsel %vm6729_vm0, %v15485_v53, 4  ;;  %v15990_v59 = vcvt.s32.f32 %v6860_v37 }
0x14be   : > { %v15993_v6 = vsel %vm757_vm1, %v6745_v40, 2147483647 }
0x14bf   : > { %v6875_v5 = vshra.s32 %v15993_v6, 16  ;;  %6863 = vmin.xlane.f32.xlu0 %v15990_v59  ;;  %v6702_v52 = vpop.xlane.xlu0 %6701 }
0x14c0   : > { %vm6730_vm5 = vcmp.eq.f32.partialorder %v15839_v39, %v6702_v52 }
0x14c1   : > { %v6746_v15 = vsel %vm6730_vm5, %v15485_v53, 4  ;;  %v15999_v19 = vcvt.s32.f32 %v6875_v5 }
0x14c2   : > { %v16002_v2 = vsel %vm757_vm1, %v6746_v15, 2147483647 }
0x14c3   : > { %v6890_v37 = vshra.s32 %v16002_v2, 16  ;;  %6878 = vmin.xlane.f32.xlu1 %v15999_v19  ;;  %v6705_v21 = vpop.xlane.xlu1 %6704 }
0x14c4   : > { %vm6731_vm0 = vcmp.eq.f32.partialorder %v15852_v12, %v6705_v21 }
0x14c5   : > { %v6747_v40 = vsel %vm6731_vm0, %v15485_v53, 4  ;;  %v16008_v16 = vcvt.s32.f32 %v6890_v37 }
0x14c6   : > { %v16011_v39 = vsel %vm757_vm1, %v6747_v40, 2147483647 }
0x14c7   : > { %v6905_v5 = vshra.s32 %v16011_v39, 16  ;;  %6893 = vmin.xlane.f32.xlu0 %v16008_v16  ;;  %v6708_v52 = vpop.xlane.xlu0 %6707 }
0x14c8   : > { %vm6732_vm5 = vcmp.eq.f32.partialorder %v15865_v51, %v6708_v52 }
0x14c9   : > { %v6748_v15 = vsel %vm6732_vm5, %v15485_v53, 4  ;;  %v16017_v7 = vcvt.s32.f32 %v6905_v5 }
0x14ca   : > { %v16020_v12 = vsel %vm757_vm1, %v6748_v15, 2147483647 }
0x14cb   : > { %v6920_v37 = vshra.s32 %v16020_v12, 16  ;;  %6908 = vmin.xlane.f32.xlu1 %v16017_v7  ;;  %v6711_v21 = vpop.xlane.xlu1 %6710 }
0x14cc   : > { %vm6733_vm0 = vcmp.eq.f32.partialorder %v15878_v10, %v6711_v21 }
0x14cd   : > { %v6749_v40 = vsel %vm6733_vm0, %v15485_v53, 4  ;;  %v16026_v50 = vcvt.s32.f32 %v6920_v37 }
0x14ce   : > { %v16029_v51 = vsel %vm757_vm1, %v6749_v40, 2147483647 }
0x14cf   : > { %v6935_v5 = vshra.s32 %v16029_v51, 16  ;;  %6923 = vmin.xlane.f32.xlu0 %v16026_v50  ;;  %v6714_v52 = vpop.xlane.xlu0 %6713 }
0x14d0   : > { %vm6734_vm5 = vcmp.eq.f32.partialorder %v15891_v48, %v6714_v52 }
0x14d1   : > { %v6750_v15 = vsel %vm6734_vm5, %v15485_v53, 4  ;;  %v16035_v45 = vcvt.s32.f32 %v6935_v5 }
0x14d2   : > { %v16038_v10 = vsel %vm757_vm1, %v6750_v15, 2147483647 }
0x14d3   : > { %v6950_v37 = vshra.s32 %v16038_v10, 16  ;;  %6938 = vmin.xlane.f32.xlu1 %v16035_v45  ;;  %v6717_v21 = vpop.xlane.xlu1 %6716 }
0x14d4   : > { %vm6735_vm0 = vcmp.eq.f32.partialorder %v15903_v9, %v6717_v21 }
0x14d5   : > { %v6751_v40 = vsel %vm6735_vm0, %v15485_v53, 4  ;;  %v16044_v57 = vcvt.s32.f32 %v6950_v37 }
0x14d6   : > { %v16047_v48 = vsel %vm757_vm1, %v6751_v40, 2147483647  ;;  %v6754_v40 = vand.u32 65535, %v15922_v61  ;;  %v6799_v61 = vand.u32 65535, %v15948_v33 }
0x14d7   : > { %v6965_v5 = vshra.s32 %v16047_v48, 16  ;;  %6953 = vmin.xlane.f32.xlu0 %v16044_v57  ;;  %v6720_v52 = vpop.xlane.xlu0 %6719 }
0x14d8   : > { %vm6736_vm5 = vcmp.eq.f32.partialorder %v15915_v49, %v6720_v52  ;;  %v6756_v52 = vcvt.s32.f32 %v6754_v40 }
0x14d9   : > { %v6752_v15 = vsel %vm6736_vm5, %v15485_v53, 4  ;;  %v16053_v24 = vcvt.s32.f32 %v6965_v5 }
0x14da   : > { %v16056_v9 = vsel %vm757_vm1, %v6752_v15, 2147483647  ;;  %v6784_v15 = vand.u32 65535, %v15939_v17  ;;  %v6814_v17 = vand.u32 65535, %v15957_v47 }
0x14db   : > { %v6980_v37 = vshra.s32 %v16056_v9, 16  ;;  %6968 = vmin.xlane.f32.xlu1 %v16053_v24 }
0x14dc   : > { %v6786_v40 = vcvt.s32.f32 %v6784_v15 }
0x14dd   : > { %v16060_v21 = vcvt.s32.f32 %v6980_v37  ;;  %v6771_v37 = vcvt.s32.f32 %v6769_v28  ;;  %v6801_v28 = vcvt.s32.f32 %v6799_v61 }
0x14df   : > { %6983 = vmin.xlane.f32.xlu0 %v16060_v21 }
0x152b   : > { %v16065_v49 = vpop.xlane.xlu1 %6758 }
0x152c   : > { %vm6760_vm0 = vcmp.eq.f32.partialorder %v15927_v44, %v16065_v49 }
0x152d   : > { %v6761_v5 = vsel %vm6760_vm0, %v6756_v52, inf }
0x152e   : > { %6762 = vmin.xlane.f32.xlu1 %v6761_v5  ;;  %v6816_v5 = vcvt.s32.f32 %v6814_v17 }
0x152f   : > { %v16070_v31 = vpop.xlane.xlu0 %6773 }
0x1530   : > { %vm6775_vm5 = vcmp.eq.f32.partialorder %v15936_v11, %v16070_v31 }
0x1531   : > { %v6776_v34 = vsel %vm6775_vm5, %v6771_v37, inf }
0x1532   : > { %6777 = vmin.xlane.f32.xlu0 %v6776_v34  ;;  %v6829_v34 = vand.u32 65535, %v15966_v14  ;;  %v6859_v14 = vand.u32 65535, %v15984_v43 }
0x1533   : > { %v16075_v54 = vpop.xlane.xlu1 %6788 }
0x1534   : > { %vm6790_vm6 = vcmp.eq.f32.partialorder %v15945_v55, %v16075_v54  ;;  %v6831_v47 = vcvt.s32.f32 %v6829_v34  ;;  %v6861_v43 = vcvt.s32.f32 %v6859_v14 }
0x1535   : > { %v6791_v44 = vsel %vm6790_vm6, %v6786_v40, inf }
0x1536   : > { %6792 = vmin.xlane.f32.xlu1 %v6791_v44 }
0x1537   : > { %v16080_v52 = vpop.xlane.xlu0 %6803 }
0x1538   : > { %vm6805_vm0 = vcmp.eq.f32.partialorder %v15954_v27, %v16080_v52  ;;  %v6844_v27 = vand.u32 65535, %v15976_v35 }
0x1539   : > { %v6806_v11 = vsel %vm6805_vm0, %v6801_v28, inf  ;;  %vm7090_vm0 = vcmask 1043456   ;;  %v6889_v28 = vand.u32 65535, %v16002_v2  ;;  %v6919_v2 = vand.u32 65535, %v16020_v12 }
0x153a   : > { %6807 = vmin.xlane.f32.xlu0 %v6806_v11  ;;  %v6846_v40 = vcvt.s32.f32 %v6844_v27  ;;  %v6949_v12 = vand.u32 65535, %v16038_v10  ;;  %v6979_v10 = vand.u32 65535, %v16056_v9  ;;  %v7256_v9 = vld [vmem:[%s16644_s6 + $0x8] sm:$0xff] }
0x153b   : > { %v6921_v14 = vcvt.s32.f32 %v6919_v2 }
0x153c   : > { %v16085_v33 = vpop.xlane.xlu1 %6818 }
0x153d   : > { %vm6820_vm5 = vcmp.eq.f32.partialorder %v15963_v26, %v16085_v33  ;;  %v7041_v26 = vld [vmem:[%s16643_s5] sm:$0xf] }
0x153e   : > { %v6821_v55 = vsel %vm6820_vm5, %v6816_v5, inf  ;;  %9587 = vmatprep.subr.msk.mxu0 %vm7090_vm0, %v7041_v26 }
0x153f   : > { %6822 = vmin.xlane.f32.xlu1 %v6821_v55  ;;  %9588 = vmatpush3.msk.msra.mxu0 %vm7090_vm0, %v7041_v26  ;;  %v6891_v55 = vcvt.s32.f32 %v6889_v28 }
0x1540   : > { %v16089_v15 = vpop.xlane.xlu0 %6833 }
0x1541   : > { %vm6835_vm6 = vcmp.eq.f32.partialorder %v15970_v20, %v16089_v15  ;;  %v6874_v20 = vand.u32 65535, %v15993_v6  ;;  %v6904_v6 = vand.u32 65535, %v16011_v39  ;;  %v6934_v39 = vand.u32 65535, %v16029_v51 }
0x1542   : > { %v6836_v37 = vsel %vm6835_vm6, %v6831_v47, inf  ;;  %v6964_v51 = vand.u32 65535, %v16047_v48  ;;  %v6981_v48 = vcvt.s32.f32 %v6979_v10 }
0x1543   : > { %6837 = vmin.xlane.f32.xlu0 %v6836_v37  ;;  %v6876_v34 = vcvt.s32.f32 %v6874_v20  ;;  %v6906_v37 = vcvt.s32.f32 %v6904_v6  ;;  %v6936_v26 = vcvt.s32.f32 %v6934_v39  ;;  %v6951_v20 = vcvt.s32.f32 %v6949_v12  ;;  %v7258_v6 = vld [vmem:[%s16644_s6 + $0x18] sm:$0xff] }
0x1548   : > { %v16095_v61 = vpop.xlane.xlu1 %6848 }
0x1549   : > { %vm6850_vm5 = vcmp.eq.f32.partialorder %v15981_v23, %v16095_v61 }
0x154a   : > { %v6851_v44 = vsel %vm6850_vm5, %v6846_v40, inf }
0x154b   : > { %6852 = vmin.xlane.f32.xlu1 %v6851_v44 }
0x154c   : > { %v16103_v35 = vpop.xlane.xlu0 %6863 }
0x154d   : > { %vm6865_vm6 = vcmp.eq.f32.partialorder %v15990_v59, %v16103_v35 }
0x154e   : > { %v6866_v17 = vsel %vm6865_vm6, %v6861_v43, inf }
0x154f   : > { %6867 = vmin.xlane.f32.xlu0 %v6866_v17  ;;  %v6966_v17 = vcvt.s32.f32 %v6964_v51 }
0x1550   : > { %v16108_v11 = vpop.xlane.xlu1 %6878 }
0x1551   : > { %vm6880_vm5 = vcmp.eq.f32.partialorder %v15999_v19, %v16108_v11  ;;  %v6885_v36 = vcvt.f32.s32 %v16108_v11 }
0x1552   : > { %v6881_v23 = vsel %vm6880_vm5, %v6876_v34, inf }
0x1553   : > { %6882 = vmin.xlane.f32.xlu1 %v6881_v23 }
0x1554   : > { %v16113_v5 = vpop.xlane.xlu0 %6893 }
0x1555   : > { %vm6895_vm0 = vcmp.eq.f32.partialorder %v16008_v16, %v16113_v5  ;;  %v6900_v11 = vcvt.f32.s32 %v16113_v5 }
0x1556   : > { %v6896_v59 = vsel %vm6895_vm0, %v6891_v55, inf  ;;  %v7259_v55 = vld [vmem:[%s16644_s6 + $0x20] sm:$0xff] }
0x1557   : > { %6897 = vmin.xlane.f32.xlu0 %v6896_v59  ;;  %v7260_v59 = vld [vmem:[%s16644_s6 + $0x28] sm:$0xff] }
0x1558   : > { %v16118_v47 = vpop.xlane.xlu1 %6908  ;;  %v16167_v2 = vpack.c.bf16 %v7260_v59, %v7259_v55  ;;  %v6795_v55 = vcvt.f32.s32 %v16075_v54 }
0x1559   : > { %vm6910_vm6 = vcmp.eq.f32.partialorder %v16017_v7, %v16118_v47 }
0x155a   : > { %v6911_v19 = vsel %vm6910_vm6, %v6906_v37, inf  ;;  %v7261_v37 = vld [vmem:[%s16644_s6 + $0x30] sm:$0xff] }
0x155b   : > { %6912 = vmin.xlane.f32.xlu1 %v6911_v19  ;;  %v7262_v19 = vld [vmem:[%s16644_s6 + $0x38] sm:$0xff] }
0x155c   : > { %v16123_v27 = vpop.xlane.xlu0 %6923  ;;  %v16177_v39 = vpack.c.bf16 %v7262_v19, %v7261_v37 }
0x155d   : > { %vm6925_vm5 = vcmp.eq.f32.partialorder %v16026_v50, %v16123_v27 }
0x155e   : > { %v6926_v16 = vsel %vm6925_vm5, %v6921_v14, inf  ;;  %v7263_v14 = vld [vmem:[%s16644_s6 + $0x40] sm:$0xff] }
0x155f   : > { %6927 = vmin.xlane.f32.xlu0 %v6926_v16  ;;  %v7264_v16 = vld [vmem:[%s16644_s6 + $0x48] sm:$0xff] }
0x1560   : > { %v16128_v40 = vpop.xlane.xlu1 %6938  ;;  %v16187_v12 = vpack.c.bf16 %v7264_v16, %v7263_v14  ;;  %v6810_v14 = vcvt.f32.s32 %v16080_v52 }
0x1561   : > { %vm6940_vm0 = vcmp.eq.f32.partialorder %v16035_v45, %v16128_v40 }
0x1562   : > { %v6941_v7 = vsel %vm6940_vm0, %v6936_v26, inf  ;;  %v7265_v26 = vld [vmem:[%s16644_s6 + $0x50] sm:$0xff] }
0x1563   : > { %6942 = vmin.xlane.f32.xlu1 %v6941_v7  ;;  %v7266_v7 = vld [vmem:[%s16644_s6 + $0x58] sm:$0xff] }
0x1564   : > { %v16133_v44 = vpop.xlane.xlu0 %6953  ;;  %v16197_v51 = vpack.c.bf16 %v7266_v7, %v7265_v26  ;;  %v6825_v7 = vcvt.f32.s32 %v16085_v33 }
0x1565   : > { %vm6955_vm6 = vcmp.eq.f32.partialorder %v16044_v57, %v16133_v44  ;;  %v7255_v57 = vld [vmem:[%s16644_s6] sm:$0xff] }
0x1566   : > { %v6956_v50 = vsel %vm6955_vm6, %v6951_v20, inf  ;;  %v10333_v23 = vpack.c.bf16 %v7256_v9, %v7255_v57  ;;  %v7267_v20 = vld [vmem:[%s16644_s6 + $0x60] sm:$0xff] }
0x1567   : > { %6957 = vmin.xlane.f32.xlu0 %v6956_v50  ;;  %v7268_v50 = vld [vmem:[%s16644_s6 + $0x68] sm:$0xff] }
0x1568   : > { %v16138_v43 = vpop.xlane.xlu1 %6968  ;;  %10334 = vmatprep.subr.bf16.mxu0 %v10333_v23  ;;  %10365 = vmatprep.subr.bf16.mxu1 %v10333_v23  ;;  %v16207_v10 = vpack.c.bf16 %v7268_v50, %v7267_v20  ;;  %v6826_v50 = vshll.u32 %v6825_v7, 16  ;;  %v17400_v7 = vld [vmem:[#allocation149_spill] sm:$0xff] }
0x1569   : > { %vm6970_vm5 = vcmp.eq.f32.partialorder %v16053_v24, %v16138_v43  ;;  %v7257_v24 = vld [vmem:[%s16644_s6 + $0x10] sm:$0xff]  ;;  %10373 = vmatpush3.bf16.msra.mxu1 %v10333_v23 }
0x156a   : > { %v6971_v45 = vsel %vm6970_vm5, %v6966_v17, inf  ;;  %v6765_v17 = vcvt.f32.s32 %v16065_v49 }
0x156b   : > { %6972 = vmin.xlane.f32.xlu1 %v6971_v45 }
0x156c   : > { %v16142_v28 = vpop.xlane.xlu0 %6983 }
0x156d   : > { %vm6985_vm0 = vcmp.eq.f32.partialorder %v16060_v21, %v16142_v28  ;;  %v16158_v21 = vpack.c.bf16 %v7258_v6, %v7257_v24 }
0x156e   : > { %v6986_v34 = vsel %vm6985_vm0, %v6981_v48, inf  ;;  %v6766_v48 = vshll.u32 %v6765_v17, 16  ;;  %v6840_v17 = vcvt.f32.s32 %v16089_v15 }
0x156f   : > { %6987 = vmin.xlane.f32.xlu0 %v6986_v34  ;;  %10366 = vmatprep.subr.bf16.mxu1 %v16158_v21  ;;  %v6780_v34 = vcvt.f32.s32 %v16070_v31  ;;  %v6796_v31 = vshll.u32 %v6795_v55, 16  ;;  %v6901_v55 = vshll.u32 %v6900_v11, 16 }
0x1570   : > { %10374 = vmatpush3.bf16.msra.mxu1 %v16158_v21 }
0x1571   : > { %10367 = vmatprep.subr.bf16.mxu1 %v16167_v2  ;;  %v6781_v6 = vshll.u32 %v6780_v34, 16 }
0x1574   : > { %10375 = vmatpush3.bf16.msra.mxu1 %v16167_v2 }
0x1575   : > { %10368 = vmatprep.subr.bf16.mxu1 %v16177_v39 }
0x1578   : > { %10376 = vmatpush3.bf16.msra.mxu1 %v16177_v39 }
0x1579   : > { %10369 = vmatprep.subr.bf16.mxu1 %v16187_v12 }
0x157c   : > { %10377 = vmatpush3.bf16.msra.mxu1 %v16187_v12 }
0x157d   : > { %10370 = vmatprep.subr.bf16.mxu1 %v16197_v51 }
0x1580   : > { %10378 = vmatpush3.bf16.msra.mxu1 %v16197_v51 }
0x1581   : > { %10371 = vmatprep.subr.bf16.mxu1 %v16207_v10 }
0x1584   : > { %10379 = vmatpush3.bf16.msra.mxu1 %v16207_v10 }
0x15bb   : > { %v6763_v45 = vpop.xlane.xlu1 %6762 }
0x15bc   : > { %v6764_v57 = vcvt.f32.s32 %v6763_v45  ;;  %v6841_v45 = vshll.u32 %v6840_v17, 16 }
0x15be   : > { %v6767_v9 = vadd.s32 %v6766_v48, %v6764_v57 }
0x15bf   : > { %v6778_v24 = vpop.xlane.xlu0 %6777 }
0x15c0   : > { %vm6993_vm6 = vcmp.eq.s32.totalorder %v15485_v53, %v6767_v9  ;;  %v6779_v59 = vcvt.f32.s32 %v6778_v24  ;;  %v6886_v24 = vshll.u32 %v6885_v36, 16  ;;  %v7270_v36 = vld [vmem:[%s16644_s6 + $0x78] sm:$0xff] }
0x15c1   : > { %vm7009_vm5 = vmor %vm6641_vm7, %vm6993_vm6 }
0x15c2   : > { %v6782_v37 = vadd.s32 %v6781_v6, %v6779_v59  ;;  %v7025_v49 = vsel %vm7009_vm5, %v15405_v22, 0.0  ;;  %v6811_v22 = vshll.u32 %v6810_v14, 16  ;;  %v6915_v59 = vcvt.f32.s32 %v16118_v47 }
0x15c3   : > { %9589 = vmatprep.mubr.msk.f32.mxu0 %vm757_vm1, %v7025_v49  ;;  %v6793_v19 = vpop.xlane.xlu1 %6792  ;;  %v6930_v49 = vcvt.f32.s32 %v16123_v27  ;;  %v6945_v14 = vcvt.f32.s32 %v16128_v40  ;;  %v17398_v40 = vld [vmem:[#allocation150_spill] sm:$0xff] }
0x15c4   : > { %vm6994_vm0 = vcmp.eq.s32.totalorder %v15485_v53, %v6782_v37  ;;  %v6794_v16 = vcvt.f32.s32 %v6793_v19 }
0x15c5   : > { %vm7010_vm4 = vmor %vm6642_vm8, %vm6994_vm0 }
0x15c6   : > { %v7026_v54 = vsel %vm7010_vm4, %v15410_v32, 0.0  ;;  %v6797_v56 = vadd.s32 %v6796_v31, %v6794_v16 }
0x15c7   : > { %v6808_v26 = vpop.xlane.xlu0 %6807  ;;  %9590 = vmatmul.mubr.msk.f32.vlgmr.msra.gmra.mrb[144].mxu0 %vm757_vm1, %v7026_v54 }
0x15c8   : > { %vm6995_vm7 = vcmp.eq.s32.totalorder %v15485_v53, %v6797_v56  ;;  %v6809_v20 = vcvt.f32.s32 %v6808_v26  ;;  %10336 = vmatpush3.bf16.msra.mxu0 %v10333_v23  ;;  %v6960_v56 = vcvt.f32.s32 %v16133_v44  ;;  %v17401_v44 = vld [vmem:[#allocation7_spill] sm:$0xff] }
0x15c9   : > { %vm7011_vm6 = vmor %vm6643_vm9, %vm6995_vm7  ;;  %10338 = vmatprep.subr.bf16.mxu0 %v16158_v21 }
0x15ca   : > { %v6812_v18 = vadd.s32 %v6811_v22, %v6809_v20  ;;  %v7027_v32 = vsel %vm7011_vm6, %v15415_v60, 0.0 }
0x15cb   : > { %9592 = vmatprep.mubr.msk.f32.mxu0 %vm757_vm1, %v7027_v32 }
0x15cc   : > { %v6823_v52 = vpop.xlane.xlu1 %6822  ;;  %vm6996_vm8 = vcmp.eq.s32.totalorder %v15485_v53, %v6812_v18  ;;  %10340 = vmatpush3.bf16.msra.mxu0 %v16158_v21  ;;  %v6975_v18 = vcvt.f32.s32 %v16138_v43  ;;  %v17404_v43 = vld [vmem:[#allocation11_spill] sm:$0xff] }
0x15cd   : > { %v6824_v33 = vcvt.f32.s32 %v6823_v52  ;;  %vm7012_vm9 = vmor %vm6644_vm10, %vm6996_vm8  ;;  %10342 = vmatprep.subr.bf16.mxu0 %v16167_v2 }
0x15ce   : > { %v7028_v60 = vsel %vm7012_vm9, %v15420_v30, 0.0  ;;  %v6855_v30 = vcvt.f32.s32 %v16095_v61 }
0x15cf   : > { %v6827_v62 = vadd.s32 %v6826_v50, %v6824_v33  ;;  %9593 = vmatmul.mubr.msk.f32.gmra.mrb[146].mxu0 %vm757_vm1, %v7028_v60  ;;  %v17403_v50 = vld [vmem:[#allocation23_spill] sm:$0xff]  ;;  %v6990_v60 = vcvt.f32.s32 %v16142_v28 }
0x15d0   : > { %v6838_v23 = vpop.xlane.xlu0 %6837  ;;  %10344 = vmatpush3.bf16.msra.mxu0 %v16167_v2  ;;  %v6856_v48 = vshll.u32 %v6855_v30, 16 }
0x15d1   : > { %vm6997_vm4 = vcmp.eq.s32.totalorder %v15485_v53, %v6827_v62  ;;  %v6839_v15 = vcvt.f32.s32 %v6838_v23  ;;  %10346 = vmatprep.subr.bf16.mxu0 %v16177_v39  ;;  %v6976_v62 = vshll.u32 %v6975_v18, 16  ;;  %v6991_v30 = vshll.u32 %v6990_v60, 16 }
0x15d2   : > { %vm7013_vm5 = vmor %vm6645_vm11, %vm6997_vm4 }
0x15d3   : > { %v6842_v0 = vadd.s32 %v6841_v45, %v6839_v15  ;;  %v7029_v21 = vsel %vm7013_vm5, %v15425_v38, 0.0  ;;  %v6870_v38 = vcvt.f32.s32 %v16103_v35  ;;  %vm17399_vm5 = vcmp.eq.s32.totalorder %v15485_v53, %v17398_v40  ;;  %v17406_v15 = vld [vmem:[#allocation56_spill] sm:$0xff] }
0x15d4   : > { %9595 = vmatprep.mubr.msk.f32.mxu0 %vm757_vm1, %v7029_v21  ;;  %10348 = vmatpush3.bf16.msra.mxu0 %v16177_v39 }
0x15d5   : > { %vm6998_vm10 = vcmp.eq.s32.totalorder %v15485_v53, %v6842_v0  ;;  %10350 = vmatprep.subr.bf16.mxu0 %v16187_v12  ;;  %v6871_v57 = vshll.u32 %v6870_v38, 16 }
0x15d6   : > { %vm7014_vm0 = vmor %vm6646_vm12, %vm6998_vm10 }
0x15d7   : > { %v7030_v2 = vsel %vm7014_vm0, %v15430_v13, 0.0  ;;  %vm17402_vm0 = vcmp.eq.s32.totalorder %v15485_v53, %v17401_v44 }
0x15d8   : > { %v6853_v8 = vpop.xlane.xlu1 %6852  ;;  %9596 = vmatmul.mubr.msk.f32.gmra.mrb[148].mxu0 %vm757_vm1, %v7030_v2  ;;  %v17407_v2 = vld [vmem:[#allocation14_spill] sm:$0xff] }
0x15d9   : > { %v6854_v34 = vcvt.f32.s32 %v6853_v8  ;;  %10352 = vmatpush3.bf16.msra.mxu0 %v16187_v12 }
0x15da   : > { %10354 = vmatprep.subr.bf16.mxu0 %v16197_v51 }
0x15db   : > { %v6857_v61 = vadd.s32 %v6856_v48, %v6854_v34  ;;  %v17409_v48 = vld [vmem:[#allocation36_spill] sm:$0xff] }
0x15dc   : > { %v6868_v39 = vpop.xlane.xlu0 %6867  ;;  %v17410_v34 = vld [vmem:[#allocation124_spill] sm:$0xff] }
0x15dd   : > { %vm6999_vm11 = vcmp.eq.s32.totalorder %v15485_v53, %v6857_v61  ;;  %v6869_v9 = vcvt.f32.s32 %v6868_v39  ;;  %10356 = vmatpush3.bf16.msra.mxu0 %v16197_v51  ;;  %v17412_v61 = vld [vmem:[#allocation123_spill] sm:$0xff] }
0x15de   : > { %vm7015_vm12 = vmor %vm6647_vm13, %vm6999_vm11  ;;  %10358 = vmatprep.subr.bf16.mxu0 %v16207_v10 }
0x15df   : > { %v6872_v13 = vadd.s32 %v6871_v57, %v6869_v9  ;;  %v7031_v35 = vsel %vm7015_vm12, %v15435_v25, 0.0  ;;  %v7269_v57 = vld [vmem:[%s16644_s6 + $0x70] sm:$0xff] }
0x15e0   : > { %9598 = vmatprep.mubr.msk.f32.mxu0 %vm757_vm1, %v7031_v35  ;;  %v6883_v12 = vpop.xlane.xlu1 %6882  ;;  %v10361_v9 = vpack.c.bf16 %v7270_v36, %v7269_v57  ;;  %v11671_v35 = vld [vmem:[%s16645_s7] ss:$8 sm:$0x3] }
0x15e1   : > { %vm7000_vm7 = vcmp.eq.s32.totalorder %v15485_v53, %v6872_v13  ;;  %v6884_v6 = vcvt.f32.s32 %v6883_v12  ;;  %10360 = vmatpush3.bf16.msra.mxu0 %v16207_v10  ;;  %v17413_v13 = vld [vmem:[#allocation8_spill] sm:$0xff]  ;;  %v17429_v36 = vld [vmem:[#allocation122_spill] sm:$0xff] }
0x15e2   : > { %vm7016_vm13 = vmor %vm6648_vm14, %vm7000_vm7  ;;  %vm17405_vm7 = vcmp.eq.s32.totalorder %v15485_v53, %v17404_v43  ;;  %10362 = vmatprep.subr.bf16.mxu0 %v10361_v9  ;;  %10372 = vmatprep.subr.bf16.mxu1 %v10361_v9 }
0x15e3   : > { %v6887_v42 = vadd.s32 %v6886_v24, %v6884_v6  ;;  %v7032_v25 = vsel %vm7016_vm13, %v15440_v63, 0.0  ;;  %v6916_v63 = vshll.u32 %v6915_v59, 16  ;;  %10380 = vmatpush3.bf16.msra.mxu1 %v10361_v9  ;;  %v17414_v24 = vld [vmem:[#allocation33_spill] sm:$0xff]  ;;  %v17415_v6 = vld [vmem:[#allocation35_spill] sm:$0xff] }
0x15e4   : > { %v6898_v51 = vpop.xlane.xlu0 %6897  ;;  %9599 = vmatmul.mubr.msk.f32.gmra.mrb[150].mxu0 %vm757_vm1, %v7032_v25 }
0x15e5   : > { %vm7001_vm6 = vcmp.eq.s32.totalorder %v15485_v53, %v6887_v42  ;;  %v6899_v5 = vcvt.f32.s32 %v6898_v51  ;;  %10364 = vmatpush3.bf16.msra.mxu0 %v10361_v9 }
0x15e6   : > { %vm7017_vm8 = vmor %vm6649_vm15, %vm7001_vm6 }
0x15e7   : > { %v6902_v4 = vadd.s32 %v6901_v55, %v6899_v5  ;;  %v7033_v37 = vsel %vm7017_vm8, %v15445_v41, 0.0  ;;  %v6931_v41 = vshll.u32 %v6930_v49, 16  ;;  %vm17408_vm8 = vcmp.eq.s32.totalorder %v15485_v53, %v17407_v2  ;;  %v17416_v5 = vld [vmem:[#allocation18_spill] sm:$0xff]  ;;  %v17427_v2 = vld [vmem:[#allocation101_spill] sm:$0xff] }
0x15e8   : > { %9601 = vmatprep.mubr.msk.f32.mxu0 %vm757_vm1, %v7033_v37  ;;  %v6913_v10 = vpop.xlane.xlu1 %6912  ;;  %v17417_v37 = vld [vmem:[#allocation53_spill] sm:$0xff] }
0x15e9   : > { %vm7002_vm14 = vcmp.eq.s32.totalorder %v15485_v53, %v6902_v4  ;;  %v6914_v19 = vcvt.f32.s32 %v6913_v10 }
0x15ea   : > { %vm7018_vm9 = vmor %vm6650_vm2, %vm7002_vm14 }
0x15eb   : > { %v6917_v47 = vadd.s32 %v6916_v63, %v6914_v19  ;;  %v7034_v3 = vsel %vm7018_vm9, %v15450_v29, 0.0  ;;  %v6946_v29 = vshll.u32 %v6945_v14, 16 }
0x15ec   : > { %v6928_v31 = vpop.xlane.xlu0 %6927  ;;  %9602 = vmatmul.mubr.msk.f32.gmra.mrb[152].mxu0 %vm757_vm1, %v7034_v3  ;;  %v17418_v3 = vld [vmem:[#allocation100_spill] sm:$0xff] }
0x15ed   : > { %vm7003_vm15 = vcmp.eq.s32.totalorder %v15485_v53, %v6917_v47  ;;  %v6929_v16 = vcvt.f32.s32 %v6928_v31 }
0x15ee   : > { %vm7019_vm4 = vmor %vm6651_vm3, %vm7003_vm15  ;;  %vm17411_vm15 = vcmp.eq.s32.totalorder %v15485_v53, %v17410_v34 }
0x15ef   : > { %v6932_v27 = vadd.s32 %v6931_v41, %v6929_v16  ;;  %v7035_v1 = vsel %vm7019_vm4, %v15455_v58, 0.0  ;;  %v6961_v58 = vshll.u32 %v6960_v56, 16  ;;  %v17419_v41 = vld [vmem:[#allocation120_spill] sm:$0xff] }
0x15f0   : > { %9604 = vmatprep.mubr.msk.f32.mxu0 %vm757_vm1, %v7035_v1  ;;  %v6943_v54 = vpop.xlane.xlu1 %6942 }
0x15f1   : > { %vm7004_vm2 = vcmp.eq.s32.totalorder %v15485_v53, %v6932_v27  ;;  %v6944_v26 = vcvt.f32.s32 %v6943_v54 }
0x15f2   : > { %vm7020_vm10 = vmor %vm17399_vm5, %vm7004_vm2 }
0x15f3   : > { %v6947_v22 = vadd.s32 %v6946_v29, %v6944_v26  ;;  %v7036_v46 = vsel %vm7020_vm10, %v17400_v7, 0.0  ;;  %v17420_v29 = vld [vmem:[#allocation54_spill] sm:$0xff] }
0x15f4   : > { %v6958_v20 = vpop.xlane.xlu0 %6957  ;;  %9605 = vmatmul.mubr.msk.f32.gmra.mrb[154].mxu0 %vm757_vm1, %v7036_v46  ;;  %v17421_v26 = vld [vmem:[#allocation34_spill] sm:$0xff] }
0x15f5   : > { %vm7005_vm3 = vcmp.eq.s32.totalorder %v15485_v53, %v6947_v22  ;;  %v6959_v32 = vcvt.f32.s32 %v6958_v20 }
0x15f6   : > { %vm7021_vm11 = vmor %vm17402_vm0, %vm7005_vm3 }
0x15f7   : > { %v6962_v52 = vadd.s32 %v6961_v58, %v6959_v32  ;;  %v7037_v17 = vsel %vm7021_vm11, %v17403_v50, 0.0  ;;  %v17422_v58 = vld [vmem:[#allocation121_spill] sm:$0xff]  ;;  %v17423_v32 = vld [vmem:[#allocation46_spill] sm:$0xff] }
0x15f8   : > { %9607 = vmatprep.mubr.msk.f32.mxu0 %vm757_vm1, %v7037_v17  ;;  %v6973_v33 = vpop.xlane.xlu1 %6972 }
0x15f9   : > { %vm7006_vm12 = vcmp.eq.s32.totalorder %v15485_v53, %v6962_v52  ;;  %v6974_v23 = vcvt.f32.s32 %v6973_v33 }
0x15fa   : > { %vm7022_vm13 = vmor %vm17405_vm7, %vm7006_vm12 }
0x15fb   : > { %v6977_v45 = vadd.s32 %v6976_v62, %v6974_v23  ;;  %v7038_v0 = vsel %vm7022_vm13, %v17406_v15, 0.0  ;;  %v17424_v62 = vld [vmem:[#allocation148_spill] sm:$0xff]  ;;  %v17425_v23 = vld [vmem:[#allocation10_spill] sm:$0xff] }
0x15fc   : > { %v6988_v21 = vpop.xlane.xlu0 %6987  ;;  %9608 = vmatmul.mubr.msk.f32.gmra.mrb[156].mxu0 %vm757_vm1, %v7038_v0 }
0x15fd   : > { %vm7007_vm6 = vcmp.eq.s32.totalorder %v15485_v53, %v6977_v45  ;;  %v6989_v8 = vcvt.f32.s32 %v6988_v21 }
0x15fe   : > { %vm7023_vm14 = vmor %vm17408_vm8, %vm7007_vm6 }
0x15ff   : > { %v6992_v28 = vadd.s32 %v6991_v30, %v6989_v8  ;;  %v7039_v38 = vsel %vm7023_vm14, %v17409_v48, 0.0  ;;  %v17426_v30 = vld [vmem:[#allocation55_spill] sm:$0xff] }
0x1600   : > { %9610 = vmatprep.mubr.msk.f32.mxu0 %vm757_vm1, %v7039_v38 }
0x1601   : > { %vm7008_vm9 = vcmp.eq.s32.totalorder %v15485_v53, %v6992_v28  ;;  %v5926_v53 = vsub.s32 0, %v17413_v13 }
0x1602   : > { %vm7024_vm4 = vmor %vm17411_vm15, %vm7008_vm9 }
0x1603   : > { %v7040_v39 = vsel %vm7024_vm4, %v17412_v61, 0.0  ;;  %v5927_v12 = vrot.slane %v11671_v35, %v5926_v53 }
0x1604   : > { %9611 = vmatmul.mubr.msk.f32.gmra.mrb[158].mxu0 %vm757_vm1, %v7040_v39  ;;  %v17428_v39 = vld [vmem:[#allocation3_spill] sm:$0xff]  ;;  %vm17432_vm1 = vcmask 261120  }
0x1605   : > { %v6055_v11 = vadd.f32 %v17414_v24, %v5927_v12  ;;  %v6049_v42 = vadd.f32 %v17415_v6, %v5927_v12  ;;  %v6067_v4 = vadd.f32 %v17416_v5, %v5927_v12  ;;  %v6061_v10 = vadd.f32 %v17417_v37, %v5927_v12  ;;  %v17430_v6 = vld [vmem:[#allocation19_spill] sm:$0xff]  ;;  %vm17433_vm2 = vmmov %vm17432_vm1 }
0x1606   : > { %v6079_v31 = vadd.f32 %v17418_v3, %v5927_v12  ;;  %v6073_v14 = vadd.f32 %v17419_v41, %v5927_v12  ;;  %v6091_v56 = vadd.f32 %v17420_v29, %v5927_v12  ;;  %v6085_v40 = vadd.f32 %v17421_v26, %v5927_v12  ;;  %vm17436_vm5 = vmmov %vm17432_vm1 }
0x1607   : > { %v6103_v18 = vadd.f32 %v17422_v58, %v5927_v12  ;;  %v6097_v44 = vadd.f32 %v17423_v32, %v5927_v12  ;;  %v6115_v60 = vadd.f32 %v17424_v62, %v5927_v12  ;;  %v6109_v43 = vadd.f32 %v17425_v23, %v5927_v12  ;;  %vm17437_vm10 = vmmov %vm17432_vm1 }
0x1608   : > { %v6127_v8 = vadd.f32 %v17426_v30, %v5927_v12  ;;  %v6121_v28 = vadd.f32 %v17427_v2, %v5927_v12  ;;  %v6139_v57 = vadd.f32 %v17428_v39, %v5927_v12  ;;  %v6133_v9 = vadd.f32 %v17429_v36, %v5927_v12  ;;  %vm17440_vm3 = vmmov %vm17432_vm1 }
0x1609   : > { %vm17441_vm0 = vmmov %vm17432_vm1 }
0x160a   : > { %vm17444_vm11 = vmmov %vm17441_vm0 }
0x160b   : > { %vm17445_vm12 = vmmov %vm17441_vm0 }
0x160c   : > { %vm17448_vm7 = vmmov %vm17441_vm0 }
0x160d   : > { %vm17449_vm13 = vmmov %vm17441_vm0 }
0x160e   : > { %vm17452_vm6 = vmmov %vm17441_vm0 }
0x160f   : > { %vm17453_vm8 = vmmov %vm17441_vm0 }
0x1610   : > { %vm17456_vm14 = vmmov %vm17441_vm0 }
0x1611   : > { %vm17457_vm9 = vmmov %vm17441_vm0 }
0x1612   : > { %vm17460_vm15 = vmmov %vm17441_vm0 }
0x1613   : > { %vm17461_vm4 = vmmov %vm17441_vm0 }
0x169a   : > { %v9591_v25 = vpop.f32.mrb[144].mxu0 }
0x169b   : > { %v7240_v51 = vmul.f32 %v9591_v25, %v6055_v11  ;;  %v7160_v55 = vpop.f32.mrb[145].mxu0 }
0x169c   : > { %v7239_v59 = vmul.f32 %v7160_v55, %v6049_v42 }
0x169e   : > { %9645 = vmatprep.mubr.f32.mxu0 %v7239_v59 }
0x169f   : > { %9646 = vmatmul.mubr.f32.vlgmr.msra.gmra.mrb[160].mxu0 %v7240_v51  ;;  %v17431_v51 = vld [vmem:[#allocation5_spill] sm:$0xff] }
0x16a2   : > { %v9594_v63 = vpop.f32.mrb[146].mxu0 }
0x16a3   : > { %v7242_v49 = vmul.f32 %v9594_v63, %v6067_v4  ;;  %v7170_v19 = vpop.f32.mrb[147].mxu0  ;;  %v17434_v4 = vld [vmem:[#allocation50_spill] sm:$0xff]  ;;  %v17435_v63 = vld [vmem:[#allocation4_spill] sm:$0xff] }
0x16a4   : > { %v7241_v47 = vmul.f32 %v7170_v19, %v6061_v10 }
0x16a6   : > { %9648 = vmatprep.mubr.f32.mxu0 %v7241_v47 }
0x16a7   : > { %9649 = vmatmul.mubr.f32.gmra.mrb[162].mxu0 %v7242_v49 }
0x16ab   : > { %v9597_v16 = vpop.f32.mrb[148].mxu0 }
0x16ac   : > { %v7244_v27 = vmul.f32 %v9597_v16, %v6079_v31  ;;  %v7180_v1 = vpop.f32.mrb[149].mxu0  ;;  %v17438_v31 = vld [vmem:[#allocation28_spill] sm:$0xff]  ;;  %v17439_v16 = vld [vmem:[#allocation49_spill] sm:$0xff] }
0x16ad   : > { %v7243_v54 = vmul.f32 %v7180_v1, %v6073_v14 }
0x16af   : > { %9651 = vmatprep.mubr.f32.mxu0 %v7243_v54 }
0x16b0   : > { %9652 = vmatmul.mubr.f32.gmra.mrb[164].mxu0 %v7244_v27 }
0x16b7   : > { %v9600_v22 = vpop.f32.mrb[150].mxu0 }
0x16b8   : > { %v7246_v7 = vmul.f32 %v9600_v22, %v6091_v56  ;;  %v7190_v46 = vpop.f32.mrb[151].mxu0  ;;  %v17442_v56 = vld [vmem:[#allocation21_spill] sm:$0xff]  ;;  %v17443_v22 = vld [vmem:[#allocation98_spill] sm:$0xff] }
0x16b9   : > { %v7245_v20 = vmul.f32 %v7190_v46, %v6085_v40 }
0x16bb   : > { %9654 = vmatprep.mubr.f32.mxu0 %v7245_v20 }
0x16bc   : > { %9655 = vmatmul.mubr.f32.gmra.mrb[166].mxu0 %v7246_v7 }
0x16bf   : > { %v9603_v52 = vpop.f32.mrb[152].mxu0 }
0x16c0   : > { %v7248_v50 = vmul.f32 %v9603_v52, %v6103_v18  ;;  %v7200_v17 = vpop.f32.mrb[153].mxu0  ;;  %v17446_v18 = vld [vmem:[#allocation27_spill] sm:$0xff]  ;;  %v17447_v52 = vld [vmem:[#allocation32_spill] sm:$0xff] }
0x16c1   : > { %v7247_v33 = vmul.f32 %v7200_v17, %v6097_v44 }
0x16c3   : > { %9657 = vmatprep.mubr.f32.mxu1 %v7247_v33 }
0x16c4   : > { %9658 = vmatmul.mubr.f32.vlgmr.msra.gmra.mrb[192].mxu1 %v7248_v50 }
0x16c7   : > { %v9606_v45 = vpop.f32.mrb[154].mxu0 }
0x16c8   : > { %v7250_v15 = vmul.f32 %v9606_v45, %v6115_v60  ;;  %v7210_v0 = vpop.f32.mrb[155].mxu0  ;;  %v17450_v60 = vld [vmem:[#allocation51_spill] sm:$0xff]  ;;  %v17451_v45 = vld [vmem:[#allocation30_spill] sm:$0xff] }
0x16c9   : > { %v7249_v21 = vmul.f32 %v7210_v0, %v6109_v43 }
0x16cb   : > { %9660 = vmatprep.mubr.f32.mxu1 %v7249_v21 }
0x16cc   : > { %9661 = vmatmul.mubr.f32.gmra.mrb[194].mxu1 %v7250_v15 }
0x16cf   : > { %v9609_v48 = vpop.f32.mrb[156].mxu0 }
0x16d0   : > { %v7252_v38 = vmul.f32 %v9609_v48, %v6127_v8  ;;  %v7220_v34 = vpop.f32.mrb[157].mxu0  ;;  %v17454_v8 = vld [vmem:[#allocation2_spill] sm:$0xff]  ;;  %v17455_v48 = vld [vmem:[#allocation45_spill] sm:$0xff] }
0x16d1   : > { %v7251_v61 = vmul.f32 %v7220_v34, %v6121_v28 }
0x16d3   : > { %9663 = vmatprep.mubr.f32.mxu1 %v7251_v61 }
0x16d4   : > { %9664 = vmatmul.mubr.f32.gmra.mrb[196].mxu1 %v7252_v38 }
0x16d7   : > { %v9612_v13 = vpop.f32.mrb[158].mxu0 }
0x16d8   : > { %v7254_v53 = vmul.f32 %v9612_v13, %v6139_v57  ;;  %v7230_v35 = vpop.f32.mrb[159].mxu0  ;;  %v17458_v57 = vld [vmem:[#allocation99_spill] sm:$0xff]  ;;  %v17459_v13 = vld [vmem:[#allocation52_spill] sm:$0xff] }
0x16d9   : > { %v7253_v24 = vmul.f32 %v7230_v35, %v6133_v9 }
0x16db   : > { %9666 = vmatprep.mubr.f32.mxu1 %v7253_v24 }
0x16dc   : > { %9667 = vmatmul.mubr.f32.gmra.mrb[198].mxu1 %v7254_v53 }
0x1772   : > { %v9647_v11 = vpop.f32.mrb[160].mxu0 }
0x1773   : > { %v16363_v42 = vadd.f32 %v9647_v11, %v17430_v6  ;;  %v7337_v25 = vpop.f32.mrb[161].mxu0 }
0x1774   : > { %v16366_v55 = vadd.f32 %v7337_v25, %v17431_v51 }
0x1775   : > { %v7435_v59 = vsel %vm17432_vm1, %v16363_v42, 0.0  ;;  %vm17462_vm1 = vmmov %vm17441_vm0 }
0x1776   : > { %7436 = vadd.xlane.f32.xlu0 %v7435_v59  ;;  %v7432_v12 = vsel %vm17433_vm2, %v16366_v55, 0.0  ;;  %vm17463_vm2 = vmmov %vm17441_vm0 }
0x1777   : > { %7433 = vadd.xlane.f32.xlu1 %v7432_v12 }
0x177a   : > { %v9650_v5 = vpop.f32.mrb[162].mxu0 }
0x177b   : > { %v16373_v37 = vadd.f32 %v9650_v5, %v17434_v4  ;;  %v7347_v10 = vpop.f32.mrb[163].mxu0 }
0x177c   : > { %v16376_v49 = vadd.f32 %v7347_v10, %v17435_v63 }
0x177d   : > { %v7441_v19 = vsel %vm17436_vm5, %v16373_v37, 0.0  ;;  %vm17464_vm5 = vmmov %vm17441_vm0 }
0x177e   : > { %7442 = vadd.xlane.f32.xlu0 %v7441_v19  ;;  %v7438_v47 = vsel %vm17437_vm10, %v16376_v49, 0.0  ;;  %vm17465_vm10 = vmmov %vm17441_vm0 }
0x177f   : > { %7439 = vadd.xlane.f32.xlu1 %v7438_v47 }
0x1783   : > { %v9653_v3 = vpop.f32.mrb[164].mxu0 }
0x1784   : > { %v16383_v41 = vadd.f32 %v9653_v3, %v17438_v31  ;;  %v7357_v14 = vpop.f32.mrb[165].mxu0 }
0x1785   : > { %v16386_v27 = vadd.f32 %v7357_v14, %v17439_v16 }
0x1786   : > { %v7447_v1 = vsel %vm17440_vm3, %v16383_v41, 0.0  ;;  %vm17466_vm3 = vmmov %vm17441_vm0 }
0x1787   : > { %7448 = vadd.xlane.f32.xlu0 %v7447_v1  ;;  %v7444_v54 = vsel %vm17441_vm0, %v16386_v27, 0.0 }
0x1788   : > { %7445 = vadd.xlane.f32.xlu1 %v7444_v54 }
0x178f   : > { %v9656_v29 = vpop.f32.mrb[166].mxu0 }
0x1790   : > { %v16393_v26 = vadd.f32 %v9656_v29, %v17442_v56  ;;  %v7367_v40 = vpop.f32.mrb[167].mxu0 }
0x1791   : > { %v16396_v7 = vadd.f32 %v7367_v40, %v17443_v22 }
0x1792   : > { %v7453_v46 = vsel %vm17444_vm11, %v16393_v26, 0.0  ;;  %vm17467_vm11 = vmmov %vm17441_vm0 }
0x1793   : > { %7454 = vadd.xlane.f32.xlu0 %v7453_v46  ;;  %v7450_v20 = vsel %vm17445_vm12, %v16396_v7, 0.0  ;;  %vm17468_vm12 = vmmov %vm17441_vm0 }
0x1794   : > { %7451 = vadd.xlane.f32.xlu1 %v7450_v20 }
0x1797   : > { %v9659_v58 = vpop.f32.mrb[192].mxu1 }
0x1798   : > { %v16403_v32 = vadd.f32 %v9659_v58, %v17446_v18  ;;  %v7377_v44 = vpop.f32.mrb[193].mxu1 }
0x1799   : > { %v16406_v50 = vadd.f32 %v7377_v44, %v17447_v52 }
0x179a   : > { %v7459_v17 = vsel %vm17448_vm7, %v16403_v32, 0.0  ;;  %vm17469_vm7 = vmmov %vm17441_vm0 }
0x179b   : > { %7460 = vadd.xlane.f32.xlu0 %v7459_v17  ;;  %v7456_v33 = vsel %vm17449_vm13, %v16406_v50, 0.0  ;;  %vm17470_vm13 = vmmov %vm17441_vm0 }
0x179c   : > { %7457 = vadd.xlane.f32.xlu1 %v7456_v33 }
0x179f   : > { %v9662_v62 = vpop.f32.mrb[194].mxu1 }
0x17a0   : > { %v16413_v23 = vadd.f32 %v9662_v62, %v17450_v60  ;;  %v7387_v43 = vpop.f32.mrb[195].mxu1 }
0x17a1   : > { %v16416_v15 = vadd.f32 %v7387_v43, %v17451_v45 }
0x17a2   : > { %v7465_v0 = vsel %vm17452_vm6, %v16413_v23, 0.0  ;;  %vm17471_vm6 = vmmov %vm17441_vm0 }
0x17a3   : > { %7466 = vadd.xlane.f32.xlu0 %v7465_v0  ;;  %v7462_v21 = vsel %vm17453_vm8, %v16416_v15, 0.0  ;;  %vm17472_vm8 = vmmov %vm17441_vm0 }
0x17a4   : > { %7463 = vadd.xlane.f32.xlu1 %v7462_v21 }
0x17a7   : > { %v9665_v30 = vpop.f32.mrb[196].mxu1 }
0x17a8   : > { %v16423_v2 = vadd.f32 %v9665_v30, %v17454_v8  ;;  %v7397_v28 = vpop.f32.mrb[197].mxu1 }
0x17a9   : > { %v16426_v38 = vadd.f32 %v7397_v28, %v17455_v48 }
0x17aa   : > { %v7471_v34 = vsel %vm17456_vm14, %v16423_v2, 0.0  ;;  %vm17473_vm14 = vmmov %vm17441_vm0 }
0x17ab   : > { %7472 = vadd.xlane.f32.xlu0 %v7471_v34  ;;  %v7468_v61 = vsel %vm17457_vm9, %v16426_v38, 0.0  ;;  %vm17474_vm9 = vmmov %vm17441_vm0 }
0x17ac   : > { %7469 = vadd.xlane.f32.xlu1 %v7468_v61 }
0x17af   : > { %v9668_v39 = vpop.f32.mrb[198].mxu1 }
0x17b0   : > { %v16433_v36 = vadd.f32 %v9668_v39, %v17458_v57  ;;  %v7407_v9 = vpop.f32.mrb[199].mxu1 }
0x17b1   : > { %v16436_v53 = vadd.f32 %v7407_v9, %v17459_v13 }
0x17b2   : > { %v7477_v35 = vsel %vm17460_vm15, %v16433_v36, 0.0  ;;  %vm17475_vm15 = vmmov %vm17441_vm0 }
0x17b3   : > { %7478 = vadd.xlane.f32.xlu0 %v7477_v35  ;;  %v7474_v24 = vsel %vm17461_vm4, %v16436_v53, 0.0  ;;  %vm17476_vm4 = vmmov %vm17441_vm0 }
0x17b4   : > { %7475 = vadd.xlane.f32.xlu1 %v7474_v24 }
0x1803   : > { %v7437_v11 = vpop.xlane.xlu0 %7436 }
0x1804   : > { %v7481_v6 = vmul.f32 0.03125, %v7437_v11  ;;  %v7434_v25 = vpop.xlane.xlu1 %7433 }
0x1805   : > { %v7480_v51 = vmul.f32 0.03125, %v7434_v25 }
0x1806   : > { %v16443_v59 = vsub.f32 %v16363_v42, %v7481_v6 }
0x1807   : > { %v16446_v12 = vsub.f32 %v16366_v55, %v7480_v51 }
0x1808   : > { %v7513_v5 = vmul.f32 %v16443_v59, %v16443_v59 }
0x1809   : > { %v7512_v4 = vmul.f32 %v16446_v12, %v16446_v12 }
0x180a   : > { %v7531_v10 = vsel %vm17462_vm1, %v7513_v5, 0.0  ;;  %vm17477_vm1 = vmmov %vm17441_vm0 }
0x180b   : > { %v7443_v63 = vpop.xlane.xlu0 %7442  ;;  %7532 = vadd.xlane.f32.xlu0 %v7531_v10  ;;  %v7528_v19 = vsel %vm17463_vm2, %v7512_v4, 0.0  ;;  %vm17478_vm2 = vmmov %vm17441_vm0 }
0x180c   : > { %v7483_v47 = vmul.f32 0.03125, %v7443_v63  ;;  %v7440_v3 = vpop.xlane.xlu1 %7439  ;;  %7529 = vadd.xlane.f32.xlu1 %v7528_v19 }
0x180d   : > { %v7482_v42 = vmul.f32 0.03125, %v7440_v3 }
0x180e   : > { %v16455_v31 = vsub.f32 %v16373_v37, %v7483_v47 }
0x180f   : > { %v16458_v55 = vsub.f32 %v16376_v49, %v7482_v42 }
0x1810   : > { %v7515_v14 = vmul.f32 %v16455_v31, %v16455_v31 }
0x1811   : > { %v7514_v16 = vmul.f32 %v16458_v55, %v16458_v55 }
0x1812   : > { %v7537_v1 = vsel %vm17464_vm5, %v7515_v14, 0.0  ;;  %vm17479_vm5 = vmmov %vm17441_vm0 }
0x1813   : > { %7538 = vadd.xlane.f32.xlu0 %v7537_v1  ;;  %v7534_v29 = vsel %vm17465_vm10, %v7514_v16, 0.0  ;;  %vm17480_vm10 = vmmov %vm17441_vm0 }
0x1814   : > { %v7449_v54 = vpop.xlane.xlu0 %7448  ;;  %7535 = vadd.xlane.f32.xlu1 %v7534_v29 }
0x1815   : > { %v7485_v56 = vmul.f32 0.03125, %v7449_v54  ;;  %v7446_v40 = vpop.xlane.xlu1 %7445 }
0x1816   : > { %v7484_v37 = vmul.f32 0.03125, %v7446_v40 }
0x1817   : > { %v16467_v22 = vsub.f32 %v16383_v41, %v7485_v56 }
0x1818   : > { %v16470_v49 = vsub.f32 %v16386_v27, %v7484_v37 }
0x1819   : > { %v7517_v46 = vmul.f32 %v16467_v22, %v16467_v22 }
0x181a   : > { %v7516_v20 = vmul.f32 %v16470_v49, %v16470_v49 }
0x181b   : > { %v7543_v58 = vsel %vm17466_vm3, %v7517_v46, 0.0  ;;  %vm17481_vm3 = vmmov %vm17441_vm0 }
0x181c   : > { %7544 = vadd.xlane.f32.xlu0 %v7543_v58  ;;  %v7540_v18 = vsel %vm17441_vm0, %v7516_v20, 0.0 }
0x181d   : > { %7541 = vadd.xlane.f32.xlu1 %v7540_v18 }
0x1820   : > { %v7455_v44 = vpop.xlane.xlu0 %7454 }
0x1821   : > { %v7487_v52 = vmul.f32 0.03125, %v7455_v44  ;;  %v7452_v17 = vpop.xlane.xlu1 %7451 }
0x1822   : > { %v7486_v41 = vmul.f32 0.03125, %v7452_v17 }
0x1823   : > { %v16479_v33 = vsub.f32 %v16393_v26, %v7487_v52 }
0x1824   : > { %v16482_v27 = vsub.f32 %v16396_v7, %v7486_v41 }
0x1825   : > { %v7519_v62 = vmul.f32 %v16479_v33, %v16479_v33 }
0x1826   : > { %v7518_v60 = vmul.f32 %v16482_v27, %v16482_v27 }
0x1827   : > { %v7549_v43 = vsel %vm17467_vm11, %v7519_v62, 0.0  ;;  %vm17482_vm11 = vmmov %vm17441_vm0 }
0x1828   : > { %v7461_v45 = vpop.xlane.xlu0 %7460  ;;  %7550 = vadd.xlane.f32.xlu0 %v7549_v43  ;;  %v7546_v0 = vsel %vm17468_vm12, %v7518_v60, 0.0  ;;  %v16541_v60 = vld [vmem:[%s16645_s7 + $0x5] ss:$0 sm:$0xff]  ;;  %vm17483_vm12 = vmmov %vm17441_vm0 }
0x1829   : > { %v7489_v21 = vmul.f32 0.03125, %v7461_v45  ;;  %v7458_v30 = vpop.xlane.xlu1 %7457  ;;  %7547 = vadd.xlane.f32.xlu1 %v7546_v0 }
0x182a   : > { %v7488_v26 = vmul.f32 0.03125, %v7458_v30 }
0x182b   : > { %v16491_v8 = vsub.f32 %v16403_v32, %v7489_v21  ;;  %v16547_v21 = vld [vmem:[%s16645_s7 + $0x6] ss:$0 sm:$0xff] }
0x182c   : > { %v16494_v7 = vsub.f32 %v16406_v50, %v7488_v26 }
0x182d   : > { %v7521_v28 = vmul.f32 %v16491_v8, %v16491_v8 }
0x182e   : > { %v7520_v48 = vmul.f32 %v16494_v7, %v16494_v7 }
0x182f   : > { %v7555_v34 = vsel %vm17469_vm7, %v7521_v28, 0.0  ;;  %vm17484_vm7 = vmmov %vm17441_vm0 }
0x1830   : > { %v7467_v61 = vpop.xlane.xlu0 %7466  ;;  %7556 = vadd.xlane.f32.xlu0 %v7555_v34  ;;  %v7552_v39 = vsel %vm17470_vm13, %v7520_v48, 0.0  ;;  %vm17485_vm13 = vmmov %vm17441_vm0 }
0x1831   : > { %v7491_v57 = vmul.f32 0.03125, %v7467_v61  ;;  %v7464_v9 = vpop.xlane.xlu1 %7463  ;;  %7553 = vadd.xlane.f32.xlu1 %v7552_v39 }
0x1832   : > { %v7490_v32 = vmul.f32 0.03125, %v7464_v9 }
0x1833   : > { %v16503_v13 = vsub.f32 %v16413_v23, %v7491_v57 }
0x1834   : > { %v16506_v50 = vsub.f32 %v16416_v15, %v7490_v32 }
0x1835   : > { %v7523_v35 = vmul.f32 %v16503_v13, %v16503_v13 }
0x1836   : > { %v7522_v24 = vmul.f32 %v16506_v50, %v16506_v50 }
0x1837   : > { %v7561_v11 = vsel %vm17471_vm6, %v7523_v35, 0.0  ;;  %vm17486_vm6 = vmmov %vm17441_vm0 }
0x1838   : > { %v7473_v6 = vpop.xlane.xlu0 %7472  ;;  %7562 = vadd.xlane.f32.xlu0 %v7561_v11  ;;  %v7558_v25 = vsel %vm17472_vm8, %v7522_v24, 0.0  ;;  %vm17487_vm8 = vmmov %vm17441_vm0 }
0x1839   : > { %v7493_v51 = vmul.f32 0.03125, %v7473_v6  ;;  %v7470_v5 = vpop.xlane.xlu1 %7469  ;;  %7559 = vadd.xlane.f32.xlu1 %v7558_v25 }
0x183a   : > { %v7492_v23 = vmul.f32 0.03125, %v7470_v5 }
0x183b   : > { %v16515_v4 = vsub.f32 %v16423_v2, %v7493_v51 }
0x183c   : > { %v16518_v15 = vsub.f32 %v16426_v38, %v7492_v23 }
0x183d   : > { %v7525_v10 = vmul.f32 %v16515_v4, %v16515_v4 }
0x183e   : > { %v7524_v63 = vmul.f32 %v16518_v15, %v16518_v15 }
0x183f   : > { %v7567_v19 = vsel %vm17473_vm14, %v7525_v10, 0.0  ;;  %vm17488_vm14 = vmmov %vm17441_vm0 }
0x1840   : > { %7568 = vadd.xlane.f32.xlu0 %v7567_v19  ;;  %v7479_v47 = vpop.xlane.xlu0 %7478  ;;  %v7564_v3 = vsel %vm17474_vm9, %v7524_v63, 0.0  ;;  %vm17489_vm9 = vmmov %vm17441_vm0 }
0x1841   : > { %v7495_v42 = vmul.f32 0.03125, %v7479_v47  ;;  %7565 = vadd.xlane.f32.xlu1 %v7564_v3  ;;  %v7476_v14 = vpop.xlane.xlu1 %7475 }
0x1842   : > { %v7494_v2 = vmul.f32 0.03125, %v7476_v14 }
0x1843   : > { %v16527_v16 = vsub.f32 %v16433_v36, %v7495_v42 }
0x1844   : > { %v16530_v38 = vsub.f32 %v16436_v53, %v7494_v2 }
0x1845   : > { %v7527_v1 = vmul.f32 %v16527_v16, %v16527_v16 }
0x1846   : > { %v7526_v54 = vmul.f32 %v16530_v38, %v16530_v38 }
0x1847   : > { %v7573_v29 = vsel %vm17475_vm15, %v7527_v1, 0.0  ;;  %vm17490_vm15 = vmmov %vm17441_vm0 }
0x1848   : > { %7574 = vadd.xlane.f32.xlu0 %v7573_v29  ;;  %v7570_v56 = vsel %vm17476_vm4, %v7526_v54, 0.0  ;;  %vm17491_vm4 = vmmov %vm17441_vm0 }
0x1849   : > { %7571 = vadd.xlane.f32.xlu1 %v7570_v56 }
0x1898   : > { %v7533_v40 = vpop.xlane.xlu0 %7532 }
0x1899   : > { %v7577_v37 = vmul.f32 0.03125, %v7533_v40  ;;  %v7530_v46 = vpop.xlane.xlu1 %7529 }
0x189a   : > { %v7576_v36 = vmul.f32 0.03125, %v7530_v46 }
0x189b   : > { %v7593_v20 = vadd.f32 1e-05, %v7577_v37 }
0x189c   : > { %v7592_v58 = vadd.f32 1e-05, %v7576_v36 }
0x189d   : > { %11575 = vrsqrt.f32 %v7593_v20 }
0x189e   : > { %11577 = vrsqrt.f32 %v7592_v58 }
0x18a0   : > { %v7539_v53 = vpop.xlane.xlu0 %7538 }
0x18a1   : > { %v7579_v18 = vmul.f32 0.03125, %v7539_v53  ;;  %v7536_v44 = vpop.xlane.xlu1 %7535 }
0x18a2   : > { %v7578_v52 = vmul.f32 0.03125, %v7536_v44 }
0x18a3   : > { %v7595_v17 = vadd.f32 1e-05, %v7579_v18 }
0x18a4   : > { %v7594_v41 = vadd.f32 1e-05, %v7578_v52 }
0x18a5   : > { %11579 = vrsqrt.f32 %v7595_v17 }
0x18a6   : > { %11581 = vrsqrt.f32 %v7594_v41 }
0x18a7   : > { %v11576_v62 = vpop.eup %11575 }
0x18a8   : > { %v11578_v43 = vpop.eup %11577  ;;  %v7625_v45 = vmul.f32 %v11576_v62, %v16443_v59 }
0x18a9   : > { %v7545_v0 = vpop.xlane.xlu0 %7544  ;;  %v7624_v30 = vmul.f32 %v11578_v43, %v16446_v12 }
0x18aa   : > { %v7581_v26 = vmul.f32 0.03125, %v7545_v0  ;;  %v7542_v28 = vpop.xlane.xlu1 %7541  ;;  %v7642_v48 = vmul.f32 %v16541_v60, %v7625_v45 }
0x18ab   : > { %v7580_v34 = vmul.f32 0.03125, %v7542_v28  ;;  %v7641_v59 = vmul.f32 %v16541_v60, %v7624_v30 }
0x18ac   : > { %v7597_v61 = vadd.f32 1e-05, %v7581_v26  ;;  %v7659_v39 = vadd.f32 %v16547_v21, %v7642_v48 }
0x18ad   : > { %v7596_v57 = vadd.f32 1e-05, %v7580_v34  ;;  %v7658_v12 = vadd.f32 %v16547_v21, %v7641_v59 }
0x18ae   : > { %11583 = vrsqrt.f32 %v7597_v61  ;;  %7675 = vst.msk [vmem:[%s16556_s28 + $0x8] sm:$0xff] %vm17477_vm1, %v7659_v39 }
0x18af   : > { %11585 = vrsqrt.f32 %v7596_v57  ;;  %v11580_v9 = vpop.eup %11579  ;;  %7674 = vst.msk [vmem:[%s16556_s28] sm:$0xff] %vm17478_vm2, %v7658_v12 }
0x18b0   : > { %v11582_v32 = vpop.eup %11581  ;;  %v7627_v35 = vmul.f32 %v11580_v9, %v16455_v31 }
0x18b1   : > { %v7626_v24 = vmul.f32 %v11582_v32, %v16458_v55 }
0x18b2   : > { %v7644_v11 = vmul.f32 %v16541_v60, %v7627_v35 }
0x18b3   : > { %v7643_v6 = vmul.f32 %v16541_v60, %v7626_v24 }
0x18b4   : > { %v7661_v51 = vadd.f32 %v16547_v21, %v7644_v11 }
0x18b5   : > { %v7551_v25 = vpop.xlane.xlu0 %7550  ;;  %v7660_v10 = vadd.f32 %v16547_v21, %v7643_v6 }
0x18b6   : > { %v7583_v5 = vmul.f32 0.03125, %v7551_v25  ;;  %v7548_v23 = vpop.xlane.xlu1 %7547  ;;  %7677 = vst.msk [vmem:[%s16556_s28 + $0x18] sm:$0xff] %vm17479_vm5, %v7661_v51 }
0x18b7   : > { %v7582_v63 = vmul.f32 0.03125, %v7548_v23  ;;  %7676 = vst.msk [vmem:[%s16556_s28 + $0x10] sm:$0xff] %vm17480_vm10, %v7660_v10 }
0x18b8   : > { %v7599_v19 = vadd.f32 1e-05, %v7583_v5  ;;  %v11584_v47 = vpop.eup %11583 }
0x18b9   : > { %v7598_v31 = vadd.f32 1e-05, %v7582_v63  ;;  %v11586_v55 = vpop.eup %11585  ;;  %v7629_v3 = vmul.f32 %v11584_v47, %v16467_v22 }
0x18ba   : > { %11587 = vrsqrt.f32 %v7599_v19  ;;  %v7628_v42 = vmul.f32 %v11586_v55, %v16470_v49 }
0x18bb   : > { %11589 = vrsqrt.f32 %v7598_v31  ;;  %v7646_v14 = vmul.f32 %v16541_v60, %v7629_v3 }
0x18bc   : > { %v7645_v2 = vmul.f32 %v16541_v60, %v7628_v42 }
0x18bd   : > { %v7557_v1 = vpop.xlane.xlu0 %7556  ;;  %v7663_v54 = vadd.f32 %v16547_v21, %v7646_v14 }
0x18be   : > { %v7585_v29 = vmul.f32 0.03125, %v7557_v1  ;;  %v7554_v56 = vpop.xlane.xlu1 %7553  ;;  %v7662_v40 = vadd.f32 %v16547_v21, %v7645_v2 }
0x18bf   : > { %v7584_v37 = vmul.f32 0.03125, %v7554_v56  ;;  %7679 = vst.msk [vmem:[%s16556_s28 + $0x28] sm:$0xff] %vm17481_vm3, %v7663_v54 }
0x18c0   : > { %v7601_v46 = vadd.f32 1e-05, %v7585_v29  ;;  %7678 = vst.msk [vmem:[%s16556_s28 + $0x20] sm:$0xff] %vm17441_vm0, %v7662_v40 }
0x18c1   : > { %v7600_v22 = vadd.f32 1e-05, %v7584_v37 }
0x18c2   : > { %11591 = vrsqrt.f32 %v7601_v46 }
0x18c3   : > { %11593 = vrsqrt.f32 %v7600_v22 }
0x18c4   : > { %v11588_v49 = vpop.eup %11587 }
0x18c5   : > { %v11590_v36 = vpop.eup %11589  ;;  %v7631_v20 = vmul.f32 %v11588_v49, %v16479_v33  ;;  %v7563_v58 = vpop.xlane.xlu0 %7562 }
0x18c6   : > { %v7630_v53 = vmul.f32 %v11590_v36, %v16482_v27  ;;  %v7587_v18 = vmul.f32 0.03125, %v7563_v58  ;;  %v7560_v44 = vpop.xlane.xlu1 %7559 }
0x18c7   : > { %v7648_v52 = vmul.f32 %v16541_v60, %v7631_v20  ;;  %v7586_v17 = vmul.f32 0.03125, %v7560_v44 }
0x18c8   : > { %v7647_v41 = vmul.f32 %v16541_v60, %v7630_v53  ;;  %v7603_v62 = vadd.f32 1e-05, %v7587_v18 }
0x18c9   : > { %v7665_v43 = vadd.f32 %v16547_v21, %v7648_v52  ;;  %v7602_v45 = vadd.f32 1e-05, %v7586_v17 }
0x18ca   : > { %v7664_v0 = vadd.f32 %v16547_v21, %v7647_v41  ;;  %11595 = vrsqrt.f32 %v7603_v62 }
0x18cb   : > { %7681 = vst.msk [vmem:[%s16556_s28 + $0x38] sm:$0xff] %vm17482_vm11, %v7665_v43  ;;  %11597 = vrsqrt.f32 %v7602_v45 }
0x18cc   : > { %v11592_v33 = vpop.eup %11591  ;;  %7680 = vst.msk [vmem:[%s16556_s28 + $0x30] sm:$0xff] %vm17483_vm12, %v7664_v0 }
0x18cd   : > { %v11594_v27 = vpop.eup %11593  ;;  %v7633_v30 = vmul.f32 %v11592_v33, %v16491_v8  ;;  %v7569_v26 = vpop.xlane.xlu0 %7568 }
0x18ce   : > { %v7632_v28 = vmul.f32 %v11594_v27, %v16494_v7  ;;  %v7589_v48 = vmul.f32 0.03125, %v7569_v26  ;;  %v7566_v34 = vpop.xlane.xlu1 %7565 }
0x18cf   : > { %v7650_v59 = vmul.f32 %v16541_v60, %v7633_v30  ;;  %v7588_v61 = vmul.f32 0.03125, %v7566_v34 }
0x18d0   : > { %v7649_v39 = vmul.f32 %v16541_v60, %v7632_v28  ;;  %v7605_v57 = vadd.f32 1e-05, %v7589_v48 }
0x18d1   : > { %v7667_v12 = vadd.f32 %v16547_v21, %v7650_v59  ;;  %v7604_v9 = vadd.f32 1e-05, %v7588_v61 }
0x18d2   : > { %v7666_v32 = vadd.f32 %v16547_v21, %v7649_v39  ;;  %11599 = vrsqrt.f32 %v7605_v57 }
0x18d3   : > { %7683 = vst.msk [vmem:[%s16556_s28 + $0x48] sm:$0xff] %vm17484_vm7, %v7667_v12  ;;  %11601 = vrsqrt.f32 %v7604_v9 }
0x18d4   : > { %v11596_v8 = vpop.eup %11595  ;;  %7682 = vst.msk [vmem:[%s16556_s28 + $0x40] sm:$0xff] %vm17485_vm13, %v7666_v32 }
0x18d5   : > { %v11598_v7 = vpop.eup %11597  ;;  %v7635_v35 = vmul.f32 %v11596_v8, %v16503_v13  ;;  %v7575_v24 = vpop.xlane.xlu0 %7574 }
0x18d6   : > { %v7634_v11 = vmul.f32 %v11598_v7, %v16506_v50  ;;  %v7591_v6 = vmul.f32 0.03125, %v7575_v24  ;;  %v7572_v25 = vpop.xlane.xlu1 %7571 }
0x18d7   : > { %v7652_v51 = vmul.f32 %v16541_v60, %v7635_v35  ;;  %v7590_v5 = vmul.f32 0.03125, %v7572_v25 }
0x18d8   : > { %v7651_v23 = vmul.f32 %v16541_v60, %v7634_v11  ;;  %v7607_v10 = vadd.f32 1e-05, %v7591_v6 }
0x18d9   : > { %v7669_v63 = vadd.f32 %v16547_v21, %v7652_v51  ;;  %v7606_v19 = vadd.f32 1e-05, %v7590_v5 }
0x18da   : > { %v7668_v47 = vadd.f32 %v16547_v21, %v7651_v23  ;;  %11603 = vrsqrt.f32 %v7607_v10 }
0x18db   : > { %7685 = vst.msk [vmem:[%s16556_s28 + $0x58] sm:$0xff] %vm17486_vm6, %v7669_v63  ;;  %11605 = vrsqrt.f32 %v7606_v19 }
0x18dc   : > { %v11600_v13 = vpop.eup %11599  ;;  %7684 = vst.msk [vmem:[%s16556_s28 + $0x50] sm:$0xff] %vm17487_vm8, %v7668_v47 }
0x18dd   : > { %v11602_v50 = vpop.eup %11601  ;;  %v7637_v31 = vmul.f32 %v11600_v13, %v16515_v4 }
0x18de   : > { %v7636_v55 = vmul.f32 %v11602_v50, %v16518_v15 }
0x18df   : > { %v7654_v3 = vmul.f32 %v16541_v60, %v7637_v31 }
0x18e0   : > { %v7653_v42 = vmul.f32 %v16541_v60, %v7636_v55 }
0x18e1   : > { %v7671_v14 = vadd.f32 %v16547_v21, %v7654_v3 }
0x18e2   : > { %v7670_v2 = vadd.f32 %v16547_v21, %v7653_v42 }
0x18e3   : > { %7687 = vst.msk [vmem:[%s16556_s28 + $0x68] sm:$0xff] %vm17488_vm14, %v7671_v14 }
0x18e4   : > { %v11604_v1 = vpop.eup %11603  ;;  %7686 = vst.msk [vmem:[%s16556_s28 + $0x60] sm:$0xff] %vm17489_vm9, %v7670_v2 }
0x18e5   : > { %v11606_v54 = vpop.eup %11605  ;;  %v7639_v4 = vmul.f32 %v11604_v1, %v16527_v16 }
0x18e6   : > { %v7638_v29 = vmul.f32 %v11606_v54, %v16530_v38 }
0x18e7   : > { %v7656_v15 = vmul.f32 %v16541_v60, %v7639_v4 }
0x18e8   : > { %v7655_v56 = vmul.f32 %v16541_v60, %v7638_v29 }
0x18e9   : > { %v7673_v40 = vadd.f32 %v16547_v21, %v7656_v15 }
0x18ea   : > { %v7672_v37 = vadd.f32 %v16547_v21, %v7655_v56 }
0x18eb   : > { %7689 = vst.msk [vmem:[%s16556_s28 + $0x78] sm:$0xff] %vm17490_vm15, %v7673_v40 }
0x18ec   : > { %7688 = vst.msk [vmem:[%s16556_s28 + $0x70] sm:$0xff] %vm17491_vm4, %v7672_v37 }
0x18ed PF: > { %s18_s27 = sadd.s32 1, %s11678_s27  }
0x18ee   : > { %p15_p4 = scmp.ge.s32.totalorder %s18_s27, 4  }
0x18f0   :  { %17 = sbr.rel (!%p15_p4) target bundleno = 1 (0x1), region = 82 }

</bundles_post_ra>
